<compile_context>
chip_gen: v6e
topology: v6e:2x2x1
jax: 0.10.0
libtpu: 0.0.40
codegen_flags: <defaults>
</compile_context>

<pallas_src>
import functools

import jax
import jax.numpy as jnp
import numpy as np
from jax.experimental import pallas as pl
from jax.experimental.pallas import tpu as pltpu


# ----------------------------- model constants ------------------------------
CIN = 3            # input image channels
HIN = WIN = 32     # input spatial size
C1 = 16            # stem / layer1 channel width (width-reduced ResNet-18)
HP = WP = 19       # parity-packed padded input spatial size ((32 + 2*3) / 2)
CQ = 16            # parity-packed channels (4 parities * 3 ch, zero-padded to 16)
HO1 = WO1 = 16     # conv1 output spatial size
HB = WB = 8        # layer1 activation spatial size
K1 = 4 * 4 * CQ    # conv1 im2col contraction depth  (256)
K3 = 3 * 3 * C1    # 3x3 conv im2col contraction depth (144)


# -----------------------------------------------------------------------------
# Pallas kernel (whole ResBottom forward, per image)
# -----------------------------------------------------------------------------
def _conv3x3_bn(pad_ref, col_ref, w_bf16, scale, bias):
    """3x3 / stride-1 conv over the zero-padded (10,10,C1) activation held in
    `pad_ref`, fused with folded BatchNorm.

    Builds the (64, 144) im2col matrix once into a VMEM scratch and issues a
    single MXU matmul (bf16 operands, f32 accumulation). Returns (64, C1) f32.
    """
    for kh in range(3):
        for kw in range(3):
            t = kh * 3 + kw
            patch = pad_ref[kh:kh + HB, kw:kw + WB, :].reshape(HB * WB, C1)
            col_ref[:, t * C1:(t + 1) * C1] = patch
    y = jnp.dot(col_ref[...].astype(jnp.bfloat16), w_bf16,
                preferred_element_type=jnp.float32)           # (64, C1)
    return y * scale + bias


def _maxpool3_s2_p1_axis0(a):
    """3-wide / stride-2 / pad-1 max pool along the leading axis (static slices)."""
    n = a.shape[0]
    pieces = []
    for o in range(n // 2):
        lo, hi = max(2 * o - 1, 0), min(2 * o + 2, n)
        m = a[lo:lo + 1]
        for j in range(lo + 1, hi):
            m = jnp.maximum(m, a[j:j + 1])
        pieces.append(m)
    return jnp.concatenate(pieces, axis=0)


def resbottom_kernel(xq_ref, w1_ref, wb_ref, sc_ref, bi_ref, o_ref,
                     col1_ref, col2_ref, pad_ref):
    # ---- stem: conv1(7x7, s2, p3) + BN + ReLU -------------------------------
    # The stride-2 7x7x3 conv was re-expressed (wrapper-side, on the tiny input
    # only) as a stride-1 4x4xCQ conv over a parity-packed input, so no strided
    # access is needed here and no output is computed then thrown away.
    for a in range(4):
        for b in range(4):
            t = a * 4 + b
            patch = xq_ref[a:a + HO1, b:b + WO1, :].reshape(HO1 * WO1, CQ)
            col1_ref[:, t * CQ:(t + 1) * CQ] = patch
    y = jnp.dot(col1_ref[...].astype(jnp.bfloat16), w1_ref[...],
                preferred_element_type=jnp.float32)           # (256, 16)
    y = y * sc_ref[0:1, :] + bi_ref[0:1, :]                   # folded BN
    y = jnp.maximum(y, 0.0).reshape(HO1, WO1, C1)             # (16, 16, 16)

    # ---- maxpool 3x3, s2, p1 -> (8, 8, 16), written straight into the
    # ---- zero-padded (10, 10, 16) scratch used by the layer1 convolutions ---
    vh = _maxpool3_s2_p1_axis0(y)                             # (8, 16, 16)
    pad_ref[...] = jnp.zeros(pad_ref.shape, jnp.float32)      # zero border
    for ow in range(WB):
        lo, hi = max(2 * ow - 1, 0), min(2 * ow + 2, WO1)
        m = vh[:, lo:lo + 1, :]
        for j in range(lo + 1, hi):
            m = jnp.maximum(m, vh[:, j:j + 1, :])
        pad_ref[1:1 + HB, 1 + ow:2 + ow, :] = m               # (8, 1, 16)

    # ---- layer1: two BasicBlocks, fully VMEM-resident -----------------------
    # invariant: pad_ref[1:9, 1:9, :] holds the current activation, border = 0
    for blk in range(2):
        idt = pad_ref[1:1 + HB, 1:1 + WB, :]                  # residual (8,8,16)
        h = _conv3x3_bn(pad_ref, col2_ref, wb_ref[2 * blk],
                        sc_ref[1 + 2 * blk:2 + 2 * blk, :],
                        bi_ref[1 + 2 * blk:2 + 2 * blk, :])
        h = jnp.maximum(h, 0.0)                               # (64, 16)
        pad_ref[1:1 + HB, 1:1 + WB, :] = h.reshape(HB, WB, C1)
        z = _conv3x3_bn(pad_ref, col2_ref, wb_ref[2 * blk + 1],
                        sc_ref[2 + 2 * blk:3 + 2 * blk, :],
                        bi_ref[2 + 2 * blk:3 + 2 * blk, :])
        y_new = jnp.maximum(z.reshape(HB, WB, C1) + idt, 0.0)
        pad_ref[1:1 + HB, 1:1 + WB, :] = y_new

    # ---- lane-dense output store: (8, 8, 16) -> (8, 128) ---------------------
    for ww in range(WB):
        o_ref[:, ww * C1:(ww + 1) * C1] = pad_ref[1:1 + HB, 1 + ww, :]


# -----------------------------------------------------------------------------
# Wrapper: layout plumbing + one fused pallas_call
# -----------------------------------------------------------------------------
def res_bottom_forward(x_nchw, KP):
    """ResBottom forward. Input/output are NCHW (PyTorch convention)."""
    N = x_nchw.shape[0]
    x = jnp.transpose(x_nchw, (0, 2, 3, 1)).astype(jnp.float32)   # NHWC

    # Layout plumbing on the ~12 KiB input: zero-pad (pad=3) and parity-pack
    # H/W so that the stride-2 conv1 becomes a stride-1 conv inside the kernel.
    xp = jnp.pad(x, ((0, 0), (3, 3), (3, 3), (0, 0)))             # (N, 38, 38, 3)
    xq = xp.reshape(N, HP, 2, WP, 2, CIN)
    xq = jnp.transpose(xq, (0, 1, 3, 2, 4, 5)).reshape(N, HP, WP, 4 * CIN)
    xq = jnp.pad(xq, ((0, 0), (0, 0), (0, 0), (0, CQ - 4 * CIN)))  # (N,19,19,16)

    out = pl.pallas_call(
        resbottom_kernel,
        out_shape=jax.ShapeDtypeStruct((N, HB, WB * C1), jnp.float32),
        grid=(N,),
        in_specs=[
            pl.BlockSpec((None, HP, WP, CQ), lambda n: (n, 0, 0, 0)),
            pl.BlockSpec((K1, C1), lambda n: (0, 0)),
            pl.BlockSpec((4, K3, C1), lambda n: (0, 0, 0)),
            pl.BlockSpec((5, C1), lambda n: (0, 0)),
            pl.BlockSpec((5, C1), lambda n: (0, 0)),
        ],
        out_specs=pl.BlockSpec((None, HB, WB * C1), lambda n: (n, 0, 0)),
        scratch_shapes=[
            pltpu.VMEM((HO1 * WO1, K1), jnp.float32),          # conv1 im2col (256,256)
            pltpu.VMEM((HB * WB, K3), jnp.float32),            # 3x3 im2col   (64,144)
            pltpu.VMEM((HB + 2, WB + 2, C1), jnp.float32),     # padded act   (10,10,16)
        ],
        compiler_params=pltpu.CompilerParams(
            dimension_semantics=("parallel",)),                # feed both v7x TCs
    )(xq, KP['w1'], KP['wb'], KP['scale'], KP['bias'])

    y = out.reshape(N, HB, WB, C1)                              # NHWC
    return jnp.transpose(y, (0, 3, 1, 2))                       # NCHW


# -----------------------------------------------------------------------------
# Deterministic synthetic parameters + kernel-side packing
# -----------------------------------------------------------------------------
def _conv_w(key, kh, kw, cin, cout):
    fan_in = kh * kw * cin
    return jax.random.normal(key, (kh, kw, cin, cout), jnp.float32) / np.sqrt(fan_in)


def _bn_raw(key, c):
    k1, k2, k3, k4 = jax.random.split(key, 4)
    gamma = 1.0 + 0.1 * jax.random.normal(k1, (c,), jnp.float32)
    beta = 0.1 * jax.random.normal(k2, (c,), jnp.float32)
    mean = 0.1 * jax.random.normal(k3, (c,), jnp.float32)
    var = jax.random.uniform(k4, (c,), jnp.float32, 0.5, 1.5)
    return (gamma, beta, mean, var)


def _fold_bn(raw, eps=1e-5):
    g, b, m, v = raw
    scale = g / jnp.sqrt(v + eps)
    return scale, b - m * scale


def init_params(key, cin, c1):
    ks = jax.random.split(key, 10)
    P = {'conv1_w': _conv_w(ks[0], 7, 7, cin, c1),
         'bn1_raw': _bn_raw(ks[1], c1)}
    blocks, i = [], 2
    for _ in range(2):                       # ResNet-18 layer1 = 2 BasicBlocks
        blocks.append({'conv1_w': _conv_w(ks[i], 3, 3, c1, c1),
                       'bn1_raw': _bn_raw(ks[i + 1], c1),
                       'conv2_w': _conv_w(ks[i + 2], 3, 3, c1, c1),
                       'bn2_raw': _bn_raw(ks[i + 3], c1)})
        i += 4
    P['layer1'] = blocks
    return P


def prepare_kernel_params(P):
    """Host-side packing of parameters into the kernel layouts (done once)."""
    # conv1 (7,7,3,16) -> parity-packed stride-1 weight (4,4,16,16) -> (256,16)
    w1 = np.asarray(P['conv1_w'], np.float32)
    w1q = np.zeros((4, 4, CQ, C1), np.float32)
    for a in range(4):
        for p in range(2):
            kh = 2 * a + p
            if kh > 6:
                continue
            for b in range(4):
                for q in range(2):
                    kw = 2 * b + q
                    if kw > 6:
                        continue
                    ch = (2 * p + q) * CIN
                    w1q[a, b, ch:ch + CIN, :] = w1[kh, kw, :, :]
    w1q = jnp.asarray(w1q.reshape(K1, C1), jnp.bfloat16)

    wb, scales, biases = [], [], []
    s0, b0 = _fold_bn(P['bn1_raw'])
    scales.append(s0)
    biases.append(b0)
    for blk in P['layer1']:
        for wkey, bnkey in (('conv1_w', 'bn1_raw'), ('conv2_w', 'bn2_raw')):
            wb.append(np.asarray(blk[wkey], np.float32).reshape(K3, C1))
            s, bb = _fold_bn(blk[bnkey])
            scales.append(s)
            biases.append(bb)
    return {
        'w1': w1q,                                               # (256, 16) bf16
        'wb': jnp.asarray(np.stack(wb), jnp.bfloat16),           # (4, 144, 16) bf16
        'scale': jnp.stack(scales).astype(jnp.float32),          # (5, 16) f32
        'bias': jnp.stack(biases).astype(jnp.float32),           # (5, 16) f32
    }


# -----------------------------------------------------------------------------
# Pure-JAX reference (mirrors the PyTorch forward semantics, NCHW)
# -----------------------------------------------------------------------------
def reference_forward(x_nchw, P):
    def conv(x, w_hwio, stride, pad):
        w = jnp.transpose(w_hwio, (3, 2, 0, 1))   # OIHW
        return jax.lax.conv_general_dilated(
            x, w, (stride, stride), [(pad, pad), (pad, pad)],
            dimension_numbers=('NCHW', 'OIHW', 'NCHW'),
            precision=jax.lax.Precision.HIGHEST)

    def bn(x, raw, eps=1e-5):
        g, b, m, v = [t.reshape(1, -1, 1, 1) for t in raw]
        return (x - m) / jnp.sqrt(v + eps) * g + b

    def maxpool(x):
        return jax.lax.reduce_window(
            x, -jnp.inf, jax.lax.max, (1, 1, 3, 3), (1, 1, 2, 2),
            [(0, 0), (0, 0), (1, 1), (1, 1)])

    y = jax.nn.relu(bn(conv(x_nchw, P['conv1_w'], 2, 3), P['bn1_raw']))
    y = maxpool(y)
    for blk in P['layer1']:
        idt = y
        h = jax.nn.relu(bn(conv(y, blk['conv1_w'], 1, 1), blk['bn1_raw']))
        h = bn(conv(h, blk['conv2_w'], 1, 1), blk['bn2_raw'])
        y = jax.nn.relu(h + idt)
    return y


# -----------------------------------------------------------------------------
if __name__ == "__main__":
    key = jax.random.PRNGKey(0)
    N = 2

    kx, kp = jax.random.split(key)
    x = jax.random.normal(kx, (N, CIN, HIN, WIN), jnp.float32)   # NCHW input
    P = init_params(kp, CIN, C1)
    KP = prepare_kernel_params(P)

    fwd = jax.jit(functools.partial(res_bottom_forward, KP=KP))
    out = jax.block_until_ready(fwd(x))

    ref = reference_forward(x, P)
    assert out.shape == ref.shape == (N, C1, 8, 8), (out.shape, ref.shape)
    np.testing.assert_allclose(np.asarray(out), np.asarray(ref),
                               rtol=2e-2, atol=2e-2)
    print("KERNEL_OK")
</pallas_src>

<mosaic_0001>
module attributes {stable_mosaic.version = 11 : i64} {
  func.func @resbottom_kernel(%arg0: i32, %arg1: memref<1x19x19x16xf32, #tpu.memory_space<vmem>>, %arg2: memref<256x16xbf16, #tpu.memory_space<vmem>>, %arg3: memref<4x144x16xbf16, #tpu.memory_space<vmem>>, %arg4: memref<5x16xf32, #tpu.memory_space<vmem>>, %arg5: memref<5x16xf32, #tpu.memory_space<vmem>>, %arg6: memref<1x8x128xf32, #tpu.memory_space<vmem>>, %arg7: memref<256x256xf32, #tpu.memory_space<vmem>>, %arg8: memref<64x144xf32, #tpu.memory_space<vmem>>, %arg9: memref<10x10x16xf32, #tpu.memory_space<vmem>>) attributes {dimension_semantics = [#tpu.dimension_semantics<parallel>], iteration_bounds = array<i64: 2>, scalar_prefetch = 0 : i64, scratch_operands = 3 : i64, tpu.core_type = #tpu.core_type<tc>, window_params = [{transform_indices = @transform_0, window_bounds = array<i64: 1, 19, 19, 16>}, {pipeline_mode = #tpu.pipeline_mode<synchronous>, transform_indices = @transform_1, window_bounds = array<i64: 256, 16>}, {pipeline_mode = #tpu.pipeline_mode<synchronous>, transform_indices = @transform_2, window_bounds = array<i64: 4, 144, 16>}, {pipeline_mode = #tpu.pipeline_mode<synchronous>, transform_indices = @transform_3, window_bounds = array<i64: 5, 16>}, {pipeline_mode = #tpu.pipeline_mode<synchronous>, transform_indices = @transform_4, window_bounds = array<i64: 5, 16>}, {transform_indices = @transform_5, window_bounds = array<i64: 1, 8, 128>}]} {
    %c0 = arith.constant 0 : index
    %c0_0 = arith.constant 0 : index
    %c0_1 = arith.constant 0 : index
    %c0_2 = arith.constant 0 : index
    %0 = vector.load %arg1[%c0, %c0_0, %c0_1, %c0_2] : memref<1x19x19x16xf32, #tpu.memory_space<vmem>>, vector<1x16x16x16xf32>
    %1 = vector.shape_cast %0 : vector<1x16x16x16xf32> to vector<16x16x16xf32>
    %2 = vector.shape_cast %1 : vector<16x16x16xf32> to vector<256x16xf32>
    %c0_3 = arith.constant 0 : index
    %c0_4 = arith.constant 0 : index
    %3 = vector.load %arg7[%c0_3, %c0_4] : memref<256x256xf32, #tpu.memory_space<vmem>>, vector<256x16xf32>
    tpu.vector_store %arg7[%c0_3, %c0_4], %2 {strides = array<i32>} : memref<256x256xf32, #tpu.memory_space<vmem>>, vector<256x16xf32>,
    %c0_5 = arith.constant 0 : index
    %c0_6 = arith.constant 0 : index
    %c1 = arith.constant 1 : index
    %c0_7 = arith.constant 0 : index
    %4 = vector.load %arg1[%c0_5, %c0_6, %c1, %c0_7] : memref<1x19x19x16xf32, #tpu.memory_space<vmem>>, vector<1x16x16x16xf32>
    %5 = vector.shape_cast %4 : vector<1x16x16x16xf32> to vector<16x16x16xf32>
    %6 = vector.shape_cast %5 : vector<16x16x16xf32> to vector<256x16xf32>
    %c0_8 = arith.constant 0 : index
    %c16 = arith.constant 16 : index
    %7 = vector.load %arg7[%c0_8, %c16] : memref<256x256xf32, #tpu.memory_space<vmem>>, vector<256x16xf32>
    tpu.vector_store %arg7[%c0_8, %c16], %6 {strides = array<i32>} : memref<256x256xf32, #tpu.memory_space<vmem>>, vector<256x16xf32>,
    %c0_9 = arith.constant 0 : index
    %c0_10 = arith.constant 0 : index
    %c2 = arith.constant 2 : index
    %c0_11 = arith.constant 0 : index
    %8 = vector.load %arg1[%c0_9, %c0_10, %c2, %c0_11] : memref<1x19x19x16xf32, #tpu.memory_space<vmem>>, vector<1x16x16x16xf32>
    %9 = vector.shape_cast %8 : vector<1x16x16x16xf32> to vector<16x16x16xf32>
    %10 = vector.shape_cast %9 : vector<16x16x16xf32> to vector<256x16xf32>
    %c0_12 = arith.constant 0 : index
    %c32 = arith.constant 32 : index
    %11 = vector.load %arg7[%c0_12, %c32] : memref<256x256xf32, #tpu.memory_space<vmem>>, vector<256x16xf32>
    tpu.vector_store %arg7[%c0_12, %c32], %10 {strides = array<i32>} : memref<256x256xf32, #tpu.memory_space<vmem>>, vector<256x16xf32>,
    %c0_13 = arith.constant 0 : index
    %c0_14 = arith.constant 0 : index
    %c3 = arith.constant 3 : index
    %c0_15 = arith.constant 0 : index
    %12 = vector.load %arg1[%c0_13, %c0_14, %c3, %c0_15] : memref<1x19x19x16xf32, #tpu.memory_space<vmem>>, vector<1x16x16x16xf32>
    %13 = vector.shape_cast %12 : vector<1x16x16x16xf32> to vector<16x16x16xf32>
    %14 = vector.shape_cast %13 : vector<16x16x16xf32> to vector<256x16xf32>
    %c0_16 = arith.constant 0 : index
    %c48 = arith.constant 48 : index
    %15 = vector.load %arg7[%c0_16, %c48] : memref<256x256xf32, #tpu.memory_space<vmem>>, vector<256x16xf32>
    tpu.vector_store %arg7[%c0_16, %c48], %14 {strides = array<i32>} : memref<256x256xf32, #tpu.memory_space<vmem>>, vector<256x16xf32>,
    %c0_17 = arith.constant 0 : index
    %c1_18 = arith.constant 1 : index
    %c0_19 = arith.constant 0 : index
    %c0_20 = arith.constant 0 : index
    %16 = vector.load %arg1[%c0_17, %c1_18, %c0_19, %c0_20] : memref<1x19x19x16xf32, #tpu.memory_space<vmem>>, vector<1x16x16x16xf32>
    %17 = vector.shape_cast %16 : vector<1x16x16x16xf32> to vector<16x16x16xf32>
    %18 = vector.shape_cast %17 : vector<16x16x16xf32> to vector<256x16xf32>
    %c0_21 = arith.constant 0 : index
    %c64 = arith.constant 64 : index
    %19 = vector.load %arg7[%c0_21, %c64] : memref<256x256xf32, #tpu.memory_space<vmem>>, vector<256x16xf32>
    tpu.vector_store %arg7[%c0_21, %c64], %18 {strides = array<i32>} : memref<256x256xf32, #tpu.memory_space<vmem>>, vector<256x16xf32>,
    %c0_22 = arith.constant 0 : index
    %c1_23 = arith.constant 1 : index
    %c1_24 = arith.constant 1 : index
    %c0_25 = arith.constant 0 : index
    %20 = vector.load %arg1[%c0_22, %c1_23, %c1_24, %c0_25] : memref<1x19x19x16xf32, #tpu.memory_space<vmem>>, vector<1x16x16x16xf32>
    %21 = vector.shape_cast %20 : vector<1x16x16x16xf32> to vector<16x16x16xf32>
    %22 = vector.shape_cast %21 : vector<16x16x16xf32> to vector<256x16xf32>
    %c0_26 = arith.constant 0 : index
    %c80 = arith.constant 80 : index
    %23 = vector.load %arg7[%c0_26, %c80] : memref<256x256xf32, #tpu.memory_space<vmem>>, vector<256x16xf32>
    tpu.vector_store %arg7[%c0_26, %c80], %22 {strides = array<i32>} : memref<256x256xf32, #tpu.memory_space<vmem>>, vector<256x16xf32>,
    %c0_27 = arith.constant 0 : index
    %c1_28 = arith.constant 1 : index
    %c2_29 = arith.constant 2 : index
    %c0_30 = arith.constant 0 : index
    %24 = vector.load %arg1[%c0_27, %c1_28, %c2_29, %c0_30] : memref<1x19x19x16xf32, #tpu.memory_space<vmem>>, vector<1x16x16x16xf32>
    %25 = vector.shape_cast %24 : vector<1x16x16x16xf32> to vector<16x16x16xf32>
    %26 = vector.shape_cast %25 : vector<16x16x16xf32> to vector<256x16xf32>
    %c0_31 = arith.constant 0 : index
    %c96 = arith.constant 96 : index
    %27 = vector.load %arg7[%c0_31, %c96] : memref<256x256xf32, #tpu.memory_space<vmem>>, vector<256x16xf32>
    tpu.vector_store %arg7[%c0_31, %c96], %26 {strides = array<i32>} : memref<256x256xf32, #tpu.memory_space<vmem>>, vector<256x16xf32>,
    %c0_32 = arith.constant 0 : index
    %c1_33 = arith.constant 1 : index
    %c3_34 = arith.constant 3 : index
    %c0_35 = arith.constant 0 : index
    %28 = vector.load %arg1[%c0_32, %c1_33, %c3_34, %c0_35] : memref<1x19x19x16xf32, #tpu.memory_space<vmem>>, vector<1x16x16x16xf32>
    %29 = vector.shape_cast %28 : vector<1x16x16x16xf32> to vector<16x16x16xf32>
    %30 = vector.shape_cast %29 : vector<16x16x16xf32> to vector<256x16xf32>
    %c0_36 = arith.constant 0 : index
    %c112 = arith.constant 112 : index
    %31 = vector.load %arg7[%c0_36, %c112] : memref<256x256xf32, #tpu.memory_space<vmem>>, vector<256x16xf32>
    tpu.vector_store %arg7[%c0_36, %c112], %30 {strides = array<i32>} : memref<256x256xf32, #tpu.memory_space<vmem>>, vector<256x16xf32>,
    %c0_37 = arith.constant 0 : index
    %c2_38 = arith.constant 2 : index
    %c0_39 = arith.constant 0 : index
    %c0_40 = arith.constant 0 : index
    %32 = vector.load %arg1[%c0_37, %c2_38, %c0_39, %c0_40] : memref<1x19x19x16xf32, #tpu.memory_space<vmem>>, vector<1x16x16x16xf32>
    %33 = vector.shape_cast %32 : vector<1x16x16x16xf32> to vector<16x16x16xf32>
    %34 = vector.shape_cast %33 : vector<16x16x16xf32> to vector<256x16xf32>
    %c0_41 = arith.constant 0 : index
    %c128 = arith.constant 128 : index
    %35 = vector.load %arg7[%c0_41, %c128] : memref<256x256xf32, #tpu.memory_space<vmem>>, vector<256x16xf32>
    tpu.vector_store %arg7[%c0_41, %c128], %34 {strides = array<i32>} : memref<256x256xf32, #tpu.memory_space<vmem>>, vector<256x16xf32>,
    %c0_42 = arith.constant 0 : index
    %c2_43 = arith.constant 2 : index
    %c1_44 = arith.constant 1 : index
    %c0_45 = arith.constant 0 : index
    %36 = vector.load %arg1[%c0_42, %c2_43, %c1_44, %c0_45] : memref<1x19x19x16xf32, #tpu.memory_space<vmem>>, vector<1x16x16x16xf32>
    %37 = vector.shape_cast %36 : vector<1x16x16x16xf32> to vector<16x16x16xf32>
    %38 = vector.shape_cast %37 : vector<16x16x16xf32> to vector<256x16xf32>
    %c0_46 = arith.constant 0 : index
    %c144 = arith.constant 144 : index
    %39 = vector.load %arg7[%c0_46, %c144] : memref<256x256xf32, #tpu.memory_space<vmem>>, vector<256x16xf32>
    tpu.vector_store %arg7[%c0_46, %c144], %38 {strides = array<i32>} : memref<256x256xf32, #tpu.memory_space<vmem>>, vector<256x16xf32>,
    %c0_47 = arith.constant 0 : index
    %c2_48 = arith.constant 2 : index
    %c2_49 = arith.constant 2 : index
    %c0_50 = arith.constant 0 : index
    %40 = vector.load %arg1[%c0_47, %c2_48, %c2_49, %c0_50] : memref<1x19x19x16xf32, #tpu.memory_space<vmem>>, vector<1x16x16x16xf32>
    %41 = vector.shape_cast %40 : vector<1x16x16x16xf32> to vector<16x16x16xf32>
    %42 = vector.shape_cast %41 : vector<16x16x16xf32> to vector<256x16xf32>
    %c0_51 = arith.constant 0 : index
    %c160 = arith.constant 160 : index
    %43 = vector.load %arg7[%c0_51, %c160] : memref<256x256xf32, #tpu.memory_space<vmem>>, vector<256x16xf32>
    tpu.vector_store %arg7[%c0_51, %c160], %42 {strides = array<i32>} : memref<256x256xf32, #tpu.memory_space<vmem>>, vector<256x16xf32>,
    %c0_52 = arith.constant 0 : index
    %c2_53 = arith.constant 2 : index
    %c3_54 = arith.constant 3 : index
    %c0_55 = arith.constant 0 : index
    %44 = vector.load %arg1[%c0_52, %c2_53, %c3_54, %c0_55] : memref<1x19x19x16xf32, #tpu.memory_space<vmem>>, vector<1x16x16x16xf32>
    %45 = vector.shape_cast %44 : vector<1x16x16x16xf32> to vector<16x16x16xf32>
    %46 = vector.shape_cast %45 : vector<16x16x16xf32> to vector<256x16xf32>
    %c0_56 = arith.constant 0 : index
    %c176 = arith.constant 176 : index
    %47 = vector.load %arg7[%c0_56, %c176] : memref<256x256xf32, #tpu.memory_space<vmem>>, vector<256x16xf32>
    tpu.vector_store %arg7[%c0_56, %c176], %46 {strides = array<i32>} : memref<256x256xf32, #tpu.memory_space<vmem>>, vector<256x16xf32>,
    %c0_57 = arith.constant 0 : index
    %c3_58 = arith.constant 3 : index
    %c0_59 = arith.constant 0 : index
    %c0_60 = arith.constant 0 : index
    %48 = vector.load %arg1[%c0_57, %c3_58, %c0_59, %c0_60] : memref<1x19x19x16xf32, #tpu.memory_space<vmem>>, vector<1x16x16x16xf32>
    %49 = vector.shape_cast %48 : vector<1x16x16x16xf32> to vector<16x16x16xf32>
    %50 = vector.shape_cast %49 : vector<16x16x16xf32> to vector<256x16xf32>
    %c0_61 = arith.constant 0 : index
    %c192 = arith.constant 192 : index
    %51 = vector.load %arg7[%c0_61, %c192] : memref<256x256xf32, #tpu.memory_space<vmem>>, vector<256x16xf32>
    tpu.vector_store %arg7[%c0_61, %c192], %50 {strides = array<i32>} : memref<256x256xf32, #tpu.memory_space<vmem>>, vector<256x16xf32>,
    %c0_62 = arith.constant 0 : index
    %c3_63 = arith.constant 3 : index
    %c1_64 = arith.constant 1 : index
    %c0_65 = arith.constant 0 : index
    %52 = vector.load %arg1[%c0_62, %c3_63, %c1_64, %c0_65] : memref<1x19x19x16xf32, #tpu.memory_space<vmem>>, vector<1x16x16x16xf32>
    %53 = vector.shape_cast %52 : vector<1x16x16x16xf32> to vector<16x16x16xf32>
    %54 = vector.shape_cast %53 : vector<16x16x16xf32> to vector<256x16xf32>
    %c0_66 = arith.constant 0 : index
    %c208 = arith.constant 208 : index
    %55 = vector.load %arg7[%c0_66, %c208] : memref<256x256xf32, #tpu.memory_space<vmem>>, vector<256x16xf32>
    tpu.vector_store %arg7[%c0_66, %c208], %54 {strides = array<i32>} : memref<256x256xf32, #tpu.memory_space<vmem>>, vector<256x16xf32>,
    %c0_67 = arith.constant 0 : index
    %c3_68 = arith.constant 3 : index
    %c2_69 = arith.constant 2 : index
    %c0_70 = arith.constant 0 : index
    %56 = vector.load %arg1[%c0_67, %c3_68, %c2_69, %c0_70] : memref<1x19x19x16xf32, #tpu.memory_space<vmem>>, vector<1x16x16x16xf32>
    %57 = vector.shape_cast %56 : vector<1x16x16x16xf32> to vector<16x16x16xf32>
    %58 = vector.shape_cast %57 : vector<16x16x16xf32> to vector<256x16xf32>
    %c0_71 = arith.constant 0 : index
    %c224 = arith.constant 224 : index
    %59 = vector.load %arg7[%c0_71, %c224] : memref<256x256xf32, #tpu.memory_space<vmem>>, vector<256x16xf32>
    tpu.vector_store %arg7[%c0_71, %c224], %58 {strides = array<i32>} : memref<256x256xf32, #tpu.memory_space<vmem>>, vector<256x16xf32>,
    %c0_72 = arith.constant 0 : index
    %c3_73 = arith.constant 3 : index
    %c3_74 = arith.constant 3 : index
    %c0_75 = arith.constant 0 : index
    %60 = vector.load %arg1[%c0_72, %c3_73, %c3_74, %c0_75] : memref<1x19x19x16xf32, #tpu.memory_space<vmem>>, vector<1x16x16x16xf32>
    %61 = vector.shape_cast %60 : vector<1x16x16x16xf32> to vector<16x16x16xf32>
    %62 = vector.shape_cast %61 : vector<16x16x16xf32> to vector<256x16xf32>
    %c0_76 = arith.constant 0 : index
    %c240 = arith.constant 240 : index
    %63 = vector.load %arg7[%c0_76, %c240] : memref<256x256xf32, #tpu.memory_space<vmem>>, vector<256x16xf32>
    tpu.vector_store %arg7[%c0_76, %c240], %62 {strides = array<i32>} : memref<256x256xf32, #tpu.memory_space<vmem>>, vector<256x16xf32>,
    %c0_77 = arith.constant 0 : index
    %c0_78 = arith.constant 0 : index
    %64 = vector.load %arg7[%c0_77, %c0_78] : memref<256x256xf32, #tpu.memory_space<vmem>>, vector<256x256xf32>
    %65 = arith.truncf %64 : vector<256x256xf32> to vector<256x256xbf16>
    %c0_79 = arith.constant 0 : index
    %c0_80 = arith.constant 0 : index
    %66 = vector.load %arg2[%c0_79, %c0_80] : memref<256x16xbf16, #tpu.memory_space<vmem>>, vector<256x16xbf16>
    %cst = arith.constant dense<0.000000e+00> : vector<256x16xf32>
    %67 = tpu.matmul %65, %66, %cst {dimension_numbers = #tpu.dot_dimension_numbers<[1], [0], [0], [1], [0, 0, 1, 1], [], []>} : vector<256x256xbf16>, vector<256x16xbf16>, vector<256x16xf32> -> vector<256x16xf32>
    %c0_81 = arith.constant 0 : index
    %c0_82 = arith.constant 0 : index
    %68 = vector.load %arg4[%c0_81, %c0_82] : memref<5x16xf32, #tpu.memory_space<vmem>>, vector<1x16xf32>
    %69 = vector.broadcast %68 : vector<1x16xf32> to vector<256x16xf32>
    %70 = arith.mulf %67, %69 : vector<256x16xf32>
    %c0_83 = arith.constant 0 : index
    %c0_84 = arith.constant 0 : index
    %71 = vector.load %arg5[%c0_83, %c0_84] : memref<5x16xf32, #tpu.memory_space<vmem>>, vector<1x16xf32>
    %72 = vector.broadcast %71 : vector<1x16xf32> to vector<256x16xf32>
    %73 = arith.addf %70, %72 : vector<256x16xf32>
    %cst_85 = arith.constant 0.000000e+00 : f32
    %74 = vector.broadcast %cst_85 : f32 to vector<256x16xf32>
    %75 = arith.maximumf %73, %74 : vector<256x16xf32>
    %76 = vector.shape_cast %75 : vector<256x16xf32> to vector<16x16x16xf32>
    %77 = vector.extract_strided_slice %76 {offsets = [0, 0, 0], sizes = [1, 16, 16], strides = [1, 1, 1]} : vector<16x16x16xf32> to vector<1x16x16xf32>
    %78 = vector.extract_strided_slice %76 {offsets = [1, 0, 0], sizes = [1, 16, 16], strides = [1, 1, 1]} : vector<16x16x16xf32> to vector<1x16x16xf32>
    %79 = arith.maximumf %77, %78 : vector<1x16x16xf32>
    %80 = vector.extract_strided_slice %76 {offsets = [1, 0, 0], sizes = [1, 16, 16], strides = [1, 1, 1]} : vector<16x16x16xf32> to vector<1x16x16xf32>
    %81 = vector.extract_strided_slice %76 {offsets = [2, 0, 0], sizes = [1, 16, 16], strides = [1, 1, 1]} : vector<16x16x16xf32> to vector<1x16x16xf32>
    %82 = arith.maximumf %80, %81 : vector<1x16x16xf32>
    %83 = vector.extract_strided_slice %76 {offsets = [3, 0, 0], sizes = [1, 16, 16], strides = [1, 1, 1]} : vector<16x16x16xf32> to vector<1x16x16xf32>
    %84 = arith.maximumf %82, %83 : vector<1x16x16xf32>
    %85 = vector.extract_strided_slice %76 {offsets = [3, 0, 0], sizes = [1, 16, 16], strides = [1, 1, 1]} : vector<16x16x16xf32> to vector<1x16x16xf32>
    %86 = vector.extract_strided_slice %76 {offsets = [4, 0, 0], sizes = [1, 16, 16], strides = [1, 1, 1]} : vector<16x16x16xf32> to vector<1x16x16xf32>
    %87 = arith.maximumf %85, %86 : vector<1x16x16xf32>
    %88 = vector.extract_strided_slice %76 {offsets = [5, 0, 0], sizes = [1, 16, 16], strides = [1, 1, 1]} : vector<16x16x16xf32> to vector<1x16x16xf32>
    %89 = arith.maximumf %87, %88 : vector<1x16x16xf32>
    %90 = vector.extract_strided_slice %76 {offsets = [5, 0, 0], sizes = [1, 16, 16], strides = [1, 1, 1]} : vector<16x16x16xf32> to vector<1x16x16xf32>
    %91 = vector.extract_strided_slice %76 {offsets = [6, 0, 0], sizes = [1, 16, 16], strides = [1, 1, 1]} : vector<16x16x16xf32> to vector<1x16x16xf32>
    %92 = arith.maximumf %90, %91 : vector<1x16x16xf32>
    %93 = vector.extract_strided_slice %76 {offsets = [7, 0, 0], sizes = [1, 16, 16], strides = [1, 1, 1]} : vector<16x16x16xf32> to vector<1x16x16xf32>
    %94 = arith.maximumf %92, %93 : vector<1x16x16xf32>
    %95 = vector.extract_strided_slice %76 {offsets = [7, 0, 0], sizes = [1, 16, 16], strides = [1, 1, 1]} : vector<16x16x16xf32> to vector<1x16x16xf32>
    %96 = vector.extract_strided_slice %76 {offsets = [8, 0, 0], sizes = [1, 16, 16], strides = [1, 1, 1]} : vector<16x16x16xf32> to vector<1x16x16xf32>
    %97 = arith.maximumf %95, %96 : vector<1x16x16xf32>
    %98 = vector.extract_strided_slice %76 {offsets = [9, 0, 0], sizes = [1, 16, 16], strides = [1, 1, 1]} : vector<16x16x16xf32> to vector<1x16x16xf32>
    %99 = arith.maximumf %97, %98 : vector<1x16x16xf32>
    %100 = vector.extract_strided_slice %76 {offsets = [9, 0, 0], sizes = [1, 16, 16], strides = [1, 1, 1]} : vector<16x16x16xf32> to vector<1x16x16xf32>
    %101 = vector.extract_strided_slice %76 {offsets = [10, 0, 0], sizes = [1, 16, 16], strides = [1, 1, 1]} : vector<16x16x16xf32> to vector<1x16x16xf32>
    %102 = arith.maximumf %100, %101 : vector<1x16x16xf32>
    %103 = vector.extract_strided_slice %76 {offsets = [11, 0, 0], sizes = [1, 16, 16], strides = [1, 1, 1]} : vector<16x16x16xf32> to vector<1x16x16xf32>
    %104 = arith.maximumf %102, %103 : vector<1x16x16xf32>
    %105 = vector.extract_strided_slice %76 {offsets = [11, 0, 0], sizes = [1, 16, 16], strides = [1, 1, 1]} : vector<16x16x16xf32> to vector<1x16x16xf32>
    %106 = vector.extract_strided_slice %76 {offsets = [12, 0, 0], sizes = [1, 16, 16], strides = [1, 1, 1]} : vector<16x16x16xf32> to vector<1x16x16xf32>
    %107 = arith.maximumf %105, %106 : vector<1x16x16xf32>
    %108 = vector.extract_strided_slice %76 {offsets = [13, 0, 0], sizes = [1, 16, 16], strides = [1, 1, 1]} : vector<16x16x16xf32> to vector<1x16x16xf32>
    %109 = arith.maximumf %107, %108 : vector<1x16x16xf32>
    %110 = vector.extract_strided_slice %76 {offsets = [13, 0, 0], sizes = [1, 16, 16], strides = [1, 1, 1]} : vector<16x16x16xf32> to vector<1x16x16xf32>
    %111 = vector.extract_strided_slice %76 {offsets = [14, 0, 0], sizes = [1, 16, 16], strides = [1, 1, 1]} : vector<16x16x16xf32> to vector<1x16x16xf32>
    %112 = arith.maximumf %110, %111 : vector<1x16x16xf32>
    %113 = vector.extract_strided_slice %76 {offsets = [15, 0, 0], sizes = [1, 16, 16], strides = [1, 1, 1]} : vector<16x16x16xf32> to vector<1x16x16xf32>
    %114 = arith.maximumf %112, %113 : vector<1x16x16xf32>
    %115 = tpu.concatenate %79, %84, %89, %94, %99, %104, %109, %114 in 0 : vector<1x16x16xf32>, vector<1x16x16xf32>, vector<1x16x16xf32>, vector<1x16x16xf32>, vector<1x16x16xf32>, vector<1x16x16xf32>, vector<1x16x16xf32>, vector<1x16x16xf32> -> vector<8x16x16xf32>
    %cst_86 = arith.constant 0.000000e+00 : f32
    %116 = vector.broadcast %cst_86 : f32 to vector<10x10x16xf32>
    %c0_87 = arith.constant 0 : index
    %c0_88 = arith.constant 0 : index
    %c0_89 = arith.constant 0 : index
    %117 = vector.load %arg9[%c0_87, %c0_88, %c0_89] : memref<10x10x16xf32, #tpu.memory_space<vmem>>, vector<10x10x16xf32>
    tpu.vector_store %arg9[%c0_87, %c0_88, %c0_89], %116 {strides = array<i32>} : memref<10x10x16xf32, #tpu.memory_space<vmem>>, vector<10x10x16xf32>,
    %118 = vector.extract_strided_slice %115 {offsets = [0, 0, 0], sizes = [8, 1, 16], strides = [1, 1, 1]} : vector<8x16x16xf32> to vector<8x1x16xf32>
    %119 = vector.extract_strided_slice %115 {offsets = [0, 1, 0], sizes = [8, 1, 16], strides = [1, 1, 1]} : vector<8x16x16xf32> to vector<8x1x16xf32>
    %120 = arith.maximumf %118, %119 : vector<8x1x16xf32>
    %c1_90 = arith.constant 1 : index
    %c1_91 = arith.constant 1 : index
    %c0_92 = arith.constant 0 : index
    %121 = vector.load %arg9[%c1_90, %c1_91, %c0_92] : memref<10x10x16xf32, #tpu.memory_space<vmem>>, vector<8x1x16xf32>
    tpu.vector_store %arg9[%c1_90, %c1_91, %c0_92], %120 {strides = array<i32>} : memref<10x10x16xf32, #tpu.memory_space<vmem>>, vector<8x1x16xf32>,
    %122 = vector.extract_strided_slice %115 {offsets = [0, 1, 0], sizes = [8, 1, 16], strides = [1, 1, 1]} : vector<8x16x16xf32> to vector<8x1x16xf32>
    %123 = vector.extract_strided_slice %115 {offsets = [0, 2, 0], sizes = [8, 1, 16], strides = [1, 1, 1]} : vector<8x16x16xf32> to vector<8x1x16xf32>
    %124 = arith.maximumf %122, %123 : vector<8x1x16xf32>
    %125 = vector.extract_strided_slice %115 {offsets = [0, 3, 0], sizes = [8, 1, 16], strides = [1, 1, 1]} : vector<8x16x16xf32> to vector<8x1x16xf32>
    %126 = arith.maximumf %124, %125 : vector<8x1x16xf32>
    %c1_93 = arith.constant 1 : index
    %c2_94 = arith.constant 2 : index
    %c0_95 = arith.constant 0 : index
    %127 = vector.load %arg9[%c1_93, %c2_94, %c0_95] : memref<10x10x16xf32, #tpu.memory_space<vmem>>, vector<8x1x16xf32>
    tpu.vector_store %arg9[%c1_93, %c2_94, %c0_95], %126 {strides = array<i32>} : memref<10x10x16xf32, #tpu.memory_space<vmem>>, vector<8x1x16xf32>,
    %128 = vector.extract_strided_slice %115 {offsets = [0, 3, 0], sizes = [8, 1, 16], strides = [1, 1, 1]} : vector<8x16x16xf32> to vector<8x1x16xf32>
    %129 = vector.extract_strided_slice %115 {offsets = [0, 4, 0], sizes = [8, 1, 16], strides = [1, 1, 1]} : vector<8x16x16xf32> to vector<8x1x16xf32>
    %130 = arith.maximumf %128, %129 : vector<8x1x16xf32>
    %131 = vector.extract_strided_slice %115 {offsets = [0, 5, 0], sizes = [8, 1, 16], strides = [1, 1, 1]} : vector<8x16x16xf32> to vector<8x1x16xf32>
    %132 = arith.maximumf %130, %131 : vector<8x1x16xf32>
    %c1_96 = arith.constant 1 : index
    %c3_97 = arith.constant 3 : index
    %c0_98 = arith.constant 0 : index
    %133 = vector.load %arg9[%c1_96, %c3_97, %c0_98] : memref<10x10x16xf32, #tpu.memory_space<vmem>>, vector<8x1x16xf32>
    tpu.vector_store %arg9[%c1_96, %c3_97, %c0_98], %132 {strides = array<i32>} : memref<10x10x16xf32, #tpu.memory_space<vmem>>, vector<8x1x16xf32>,
    %134 = vector.extract_strided_slice %115 {offsets = [0, 5, 0], sizes = [8, 1, 16], strides = [1, 1, 1]} : vector<8x16x16xf32> to vector<8x1x16xf32>
    %135 = vector.extract_strided_slice %115 {offsets = [0, 6, 0], sizes = [8, 1, 16], strides = [1, 1, 1]} : vector<8x16x16xf32> to vector<8x1x16xf32>
    %136 = arith.maximumf %134, %135 : vector<8x1x16xf32>
    %137 = vector.extract_strided_slice %115 {offsets = [0, 7, 0], sizes = [8, 1, 16], strides = [1, 1, 1]} : vector<8x16x16xf32> to vector<8x1x16xf32>
    %138 = arith.maximumf %136, %137 : vector<8x1x16xf32>
    %c1_99 = arith.constant 1 : index
    %c4 = arith.constant 4 : index
    %c0_100 = arith.constant 0 : index
    %139 = vector.load %arg9[%c1_99, %c4, %c0_100] : memref<10x10x16xf32, #tpu.memory_space<vmem>>, vector<8x1x16xf32>
    tpu.vector_store %arg9[%c1_99, %c4, %c0_100], %138 {strides = array<i32>} : memref<10x10x16xf32, #tpu.memory_space<vmem>>, vector<8x1x16xf32>,
    %140 = vector.extract_strided_slice %115 {offsets = [0, 7, 0], sizes = [8, 1, 16], strides = [1, 1, 1]} : vector<8x16x16xf32> to vector<8x1x16xf32>
    %141 = vector.extract_strided_slice %115 {offsets = [0, 8, 0], sizes = [8, 1, 16], strides = [1, 1, 1]} : vector<8x16x16xf32> to vector<8x1x16xf32>
    %142 = arith.maximumf %140, %141 : vector<8x1x16xf32>
    %143 = vector.extract_strided_slice %115 {offsets = [0, 9, 0], sizes = [8, 1, 16], strides = [1, 1, 1]} : vector<8x16x16xf32> to vector<8x1x16xf32>
    %144 = arith.maximumf %142, %143 : vector<8x1x16xf32>
    %c1_101 = arith.constant 1 : index
    %c5 = arith.constant 5 : index
    %c0_102 = arith.constant 0 : index
    %145 = vector.load %arg9[%c1_101, %c5, %c0_102] : memref<10x10x16xf32, #tpu.memory_space<vmem>>, vector<8x1x16xf32>
    tpu.vector_store %arg9[%c1_101, %c5, %c0_102], %144 {strides = array<i32>} : memref<10x10x16xf32, #tpu.memory_space<vmem>>, vector<8x1x16xf32>,
    %146 = vector.extract_strided_slice %115 {offsets = [0, 9, 0], sizes = [8, 1, 16], strides = [1, 1, 1]} : vector<8x16x16xf32> to vector<8x1x16xf32>
    %147 = vector.extract_strided_slice %115 {offsets = [0, 10, 0], sizes = [8, 1, 16], strides = [1, 1, 1]} : vector<8x16x16xf32> to vector<8x1x16xf32>
    %148 = arith.maximumf %146, %147 : vector<8x1x16xf32>
    %149 = vector.extract_strided_slice %115 {offsets = [0, 11, 0], sizes = [8, 1, 16], strides = [1, 1, 1]} : vector<8x16x16xf32> to vector<8x1x16xf32>
    %150 = arith.maximumf %148, %149 : vector<8x1x16xf32>
    %c1_103 = arith.constant 1 : index
    %c6 = arith.constant 6 : index
    %c0_104 = arith.constant 0 : index
    %151 = vector.load %arg9[%c1_103, %c6, %c0_104] : memref<10x10x16xf32, #tpu.memory_space<vmem>>, vector<8x1x16xf32>
    tpu.vector_store %arg9[%c1_103, %c6, %c0_104], %150 {strides = array<i32>} : memref<10x10x16xf32, #tpu.memory_space<vmem>>, vector<8x1x16xf32>,
    %152 = vector.extract_strided_slice %115 {offsets = [0, 11, 0], sizes = [8, 1, 16], strides = [1, 1, 1]} : vector<8x16x16xf32> to vector<8x1x16xf32>
    %153 = vector.extract_strided_slice %115 {offsets = [0, 12, 0], sizes = [8, 1, 16], strides = [1, 1, 1]} : vector<8x16x16xf32> to vector<8x1x16xf32>
    %154 = arith.maximumf %152, %153 : vector<8x1x16xf32>
    %155 = vector.extract_strided_slice %115 {offsets = [0, 13, 0], sizes = [8, 1, 16], strides = [1, 1, 1]} : vector<8x16x16xf32> to vector<8x1x16xf32>
    %156 = arith.maximumf %154, %155 : vector<8x1x16xf32>
    %c1_105 = arith.constant 1 : index
    %c7 = arith.constant 7 : index
    %c0_106 = arith.constant 0 : index
    %157 = vector.load %arg9[%c1_105, %c7, %c0_106] : memref<10x10x16xf32, #tpu.memory_space<vmem>>, vector<8x1x16xf32>
    tpu.vector_store %arg9[%c1_105, %c7, %c0_106], %156 {strides = array<i32>} : memref<10x10x16xf32, #tpu.memory_space<vmem>>, vector<8x1x16xf32>,
    %158 = vector.extract_strided_slice %115 {offsets = [0, 13, 0], sizes = [8, 1, 16], strides = [1, 1, 1]} : vector<8x16x16xf32> to vector<8x1x16xf32>
    %159 = vector.extract_strided_slice %115 {offsets = [0, 14, 0], sizes = [8, 1, 16], strides = [1, 1, 1]} : vector<8x16x16xf32> to vector<8x1x16xf32>
    %160 = arith.maximumf %158, %159 : vector<8x1x16xf32>
    %161 = vector.extract_strided_slice %115 {offsets = [0, 15, 0], sizes = [8, 1, 16], strides = [1, 1, 1]} : vector<8x16x16xf32> to vector<8x1x16xf32>
    %162 = arith.maximumf %160, %161 : vector<8x1x16xf32>
    %c1_107 = arith.constant 1 : index
    %c8 = arith.constant 8 : index
    %c0_108 = arith.constant 0 : index
    %163 = vector.load %arg9[%c1_107, %c8, %c0_108] : memref<10x10x16xf32, #tpu.memory_space<vmem>>, vector<8x1x16xf32>
    tpu.vector_store %arg9[%c1_107, %c8, %c0_108], %162 {strides = array<i32>} : memref<10x10x16xf32, #tpu.memory_space<vmem>>, vector<8x1x16xf32>,
    %c1_109 = arith.constant 1 : index
    %c1_110 = arith.constant 1 : index
    %c0_111 = arith.constant 0 : index
    %164 = vector.load %arg9[%c1_109, %c1_110, %c0_111] : memref<10x10x16xf32, #tpu.memory_space<vmem>>, vector<8x8x16xf32>
    %c0_112 = arith.constant 0 : index
    %c0_113 = arith.constant 0 : index
    %c0_114 = arith.constant 0 : index
    %165 = vector.load %arg3[%c0_112, %c0_113, %c0_114] : memref<4x144x16xbf16, #tpu.memory_space<vmem>>, vector<1x144x16xbf16>
    %166 = vector.shape_cast %165 : vector<1x144x16xbf16> to vector<144x16xbf16>
    %c1_115 = arith.constant 1 : index
    %c0_116 = arith.constant 0 : index
    %167 = vector.load %arg4[%c1_115, %c0_116] : memref<5x16xf32, #tpu.memory_space<vmem>>, vector<1x16xf32>
    %c1_117 = arith.constant 1 : index
    %c0_118 = arith.constant 0 : index
    %168 = vector.load %arg5[%c1_117, %c0_118] : memref<5x16xf32, #tpu.memory_space<vmem>>, vector<1x16xf32>
    %c0_119 = arith.constant 0 : index
    %c0_120 = arith.constant 0 : index
    %c0_121 = arith.constant 0 : index
    %169 = vector.load %arg9[%c0_119, %c0_120, %c0_121] : memref<10x10x16xf32, #tpu.memory_space<vmem>>, vector<8x8x16xf32>
    %170 = vector.shape_cast %169 : vector<8x8x16xf32> to vector<64x16xf32>
    %c0_122 = arith.constant 0 : index
    %c0_123 = arith.constant 0 : index
    %171 = vector.load %arg8[%c0_122, %c0_123] : memref<64x144xf32, #tpu.memory_space<vmem>>, vector<64x16xf32>
    tpu.vector_store %arg8[%c0_122, %c0_123], %170 {strides = array<i32>} : memref<64x144xf32, #tpu.memory_space<vmem>>, vector<64x16xf32>,
    %c0_124 = arith.constant 0 : index
    %c1_125 = arith.constant 1 : index
    %c0_126 = arith.constant 0 : index
    %172 = vector.load %arg9[%c0_124, %c1_125, %c0_126] : memref<10x10x16xf32, #tpu.memory_space<vmem>>, vector<8x8x16xf32>
    %173 = vector.shape_cast %172 : vector<8x8x16xf32> to vector<64x16xf32>
    %c0_127 = arith.constant 0 : index
    %c16_128 = arith.constant 16 : index
    %174 = vector.load %arg8[%c0_127, %c16_128] : memref<64x144xf32, #tpu.memory_space<vmem>>, vector<64x16xf32>
    tpu.vector_store %arg8[%c0_127, %c16_128], %173 {strides = array<i32>} : memref<64x144xf32, #tpu.memory_space<vmem>>, vector<64x16xf32>,
    %c0_129 = arith.constant 0 : index
    %c2_130 = arith.constant 2 : index
    %c0_131 = arith.constant 0 : index
    %175 = vector.load %arg9[%c0_129, %c2_130, %c0_131] : memref<10x10x16xf32, #tpu.memory_space<vmem>>, vector<8x8x16xf32>
    %176 = vector.shape_cast %175 : vector<8x8x16xf32> to vector<64x16xf32>
    %c0_132 = arith.constant 0 : index
    %c32_133 = arith.constant 32 : index
    %177 = vector.load %arg8[%c0_132, %c32_133] : memref<64x144xf32, #tpu.memory_space<vmem>>, vector<64x16xf32>
    tpu.vector_store %arg8[%c0_132, %c32_133], %176 {strides = array<i32>} : memref<64x144xf32, #tpu.memory_space<vmem>>, vector<64x16xf32>,
    %c1_134 = arith.constant 1 : index
    %c0_135 = arith.constant 0 : index
    %c0_136 = arith.constant 0 : index
    %178 = vector.load %arg9[%c1_134, %c0_135, %c0_136] : memref<10x10x16xf32, #tpu.memory_space<vmem>>, vector<8x8x16xf32>
    %179 = vector.shape_cast %178 : vector<8x8x16xf32> to vector<64x16xf32>
    %c0_137 = arith.constant 0 : index
    %c48_138 = arith.constant 48 : index
    %180 = vector.load %arg8[%c0_137, %c48_138] : memref<64x144xf32, #tpu.memory_space<vmem>>, vector<64x16xf32>
    tpu.vector_store %arg8[%c0_137, %c48_138], %179 {strides = array<i32>} : memref<64x144xf32, #tpu.memory_space<vmem>>, vector<64x16xf32>,
    %c1_139 = arith.constant 1 : index
    %c1_140 = arith.constant 1 : index
    %c0_141 = arith.constant 0 : index
    %181 = vector.load %arg9[%c1_139, %c1_140, %c0_141] : memref<10x10x16xf32, #tpu.memory_space<vmem>>, vector<8x8x16xf32>
    %182 = vector.shape_cast %181 : vector<8x8x16xf32> to vector<64x16xf32>
    %c0_142 = arith.constant 0 : index
    %c64_143 = arith.constant 64 : index
    %183 = vector.load %arg8[%c0_142, %c64_143] : memref<64x144xf32, #tpu.memory_space<vmem>>, vector<64x16xf32>
    tpu.vector_store %arg8[%c0_142, %c64_143], %182 {strides = array<i32>} : memref<64x144xf32, #tpu.memory_space<vmem>>, vector<64x16xf32>,
    %c1_144 = arith.constant 1 : index
    %c2_145 = arith.constant 2 : index
    %c0_146 = arith.constant 0 : index
    %184 = vector.load %arg9[%c1_144, %c2_145, %c0_146] : memref<10x10x16xf32, #tpu.memory_space<vmem>>, vector<8x8x16xf32>
    %185 = vector.shape_cast %184 : vector<8x8x16xf32> to vector<64x16xf32>
    %c0_147 = arith.constant 0 : index
    %c80_148 = arith.constant 80 : index
    %186 = vector.load %arg8[%c0_147, %c80_148] : memref<64x144xf32, #tpu.memory_space<vmem>>, vector<64x16xf32>
    tpu.vector_store %arg8[%c0_147, %c80_148], %185 {strides = array<i32>} : memref<64x144xf32, #tpu.memory_space<vmem>>, vector<64x16xf32>,
    %c2_149 = arith.constant 2 : index
    %c0_150 = arith.constant 0 : index
    %c0_151 = arith.constant 0 : index
    %187 = vector.load %arg9[%c2_149, %c0_150, %c0_151] : memref<10x10x16xf32, #tpu.memory_space<vmem>>, vector<8x8x16xf32>
    %188 = vector.shape_cast %187 : vector<8x8x16xf32> to vector<64x16xf32>
    %c0_152 = arith.constant 0 : index
    %c96_153 = arith.constant 96 : index
    %189 = vector.load %arg8[%c0_152, %c96_153] : memref<64x144xf32, #tpu.memory_space<vmem>>, vector<64x16xf32>
    tpu.vector_store %arg8[%c0_152, %c96_153], %188 {strides = array<i32>} : memref<64x144xf32, #tpu.memory_space<vmem>>, vector<64x16xf32>,
    %c2_154 = arith.constant 2 : index
    %c1_155 = arith.constant 1 : index
    %c0_156 = arith.constant 0 : index
    %190 = vector.load %arg9[%c2_154, %c1_155, %c0_156] : memref<10x10x16xf32, #tpu.memory_space<vmem>>, vector<8x8x16xf32>
    %191 = vector.shape_cast %190 : vector<8x8x16xf32> to vector<64x16xf32>
    %c0_157 = arith.constant 0 : index
    %c112_158 = arith.constant 112 : index
    %192 = vector.load %arg8[%c0_157, %c112_158] : memref<64x144xf32, #tpu.memory_space<vmem>>, vector<64x16xf32>
    tpu.vector_store %arg8[%c0_157, %c112_158], %191 {strides = array<i32>} : memref<64x144xf32, #tpu.memory_space<vmem>>, vector<64x16xf32>,
    %c2_159 = arith.constant 2 : index
    %c2_160 = arith.constant 2 : index
    %c0_161 = arith.constant 0 : index
    %193 = vector.load %arg9[%c2_159, %c2_160, %c0_161] : memref<10x10x16xf32, #tpu.memory_space<vmem>>, vector<8x8x16xf32>
    %194 = vector.shape_cast %193 : vector<8x8x16xf32> to vector<64x16xf32>
    %c0_162 = arith.constant 0 : index
    %c128_163 = arith.constant 128 : index
    %195 = vector.load %arg8[%c0_162, %c128_163] : memref<64x144xf32, #tpu.memory_space<vmem>>, vector<64x16xf32>
    tpu.vector_store %arg8[%c0_162, %c128_163], %194 {strides = array<i32>} : memref<64x144xf32, #tpu.memory_space<vmem>>, vector<64x16xf32>,
    %c0_164 = arith.constant 0 : index
    %c0_165 = arith.constant 0 : index
    %196 = vector.load %arg8[%c0_164, %c0_165] : memref<64x144xf32, #tpu.memory_space<vmem>>, vector<64x144xf32>
    %197 = arith.truncf %196 : vector<64x144xf32> to vector<64x144xbf16>
    %cst_166 = arith.constant dense<0.000000e+00> : vector<64x16xf32>
    %198 = tpu.matmul %197, %166, %cst_166 {dimension_numbers = #tpu.dot_dimension_numbers<[1], [0], [0], [1], [0, 0, 1, 1], [], []>} : vector<64x144xbf16>, vector<144x16xbf16>, vector<64x16xf32> -> vector<64x16xf32>
    %199 = vector.broadcast %167 : vector<1x16xf32> to vector<64x16xf32>
    %200 = arith.mulf %198, %199 : vector<64x16xf32>
    %201 = vector.broadcast %168 : vector<1x16xf32> to vector<64x16xf32>
    %202 = arith.addf %200, %201 : vector<64x16xf32>
    %cst_167 = arith.constant 0.000000e+00 : f32
    %203 = vector.broadcast %cst_167 : f32 to vector<64x16xf32>
    %204 = arith.maximumf %202, %203 : vector<64x16xf32>
    %205 = vector.shape_cast %204 : vector<64x16xf32> to vector<8x8x16xf32>
    %c1_168 = arith.constant 1 : index
    %c1_169 = arith.constant 1 : index
    %c0_170 = arith.constant 0 : index
    %206 = vector.load %arg9[%c1_168, %c1_169, %c0_170] : memref<10x10x16xf32, #tpu.memory_space<vmem>>, vector<8x8x16xf32>
    tpu.vector_store %arg9[%c1_168, %c1_169, %c0_170], %205 {strides = array<i32>} : memref<10x10x16xf32, #tpu.memory_space<vmem>>, vector<8x8x16xf32>,
    %c1_171 = arith.constant 1 : index
    %c0_172 = arith.constant 0 : index
    %c0_173 = arith.constant 0 : index
    %207 = vector.load %arg3[%c1_171, %c0_172, %c0_173] : memref<4x144x16xbf16, #tpu.memory_space<vmem>>, vector<1x144x16xbf16>
    %208 = vector.shape_cast %207 : vector<1x144x16xbf16> to vector<144x16xbf16>
    %c2_174 = arith.constant 2 : index
    %c0_175 = arith.constant 0 : index
    %209 = vector.load %arg4[%c2_174, %c0_175] : memref<5x16xf32, #tpu.memory_space<vmem>>, vector<1x16xf32>
    %c2_176 = arith.constant 2 : index
    %c0_177 = arith.constant 0 : index
    %210 = vector.load %arg5[%c2_176, %c0_177] : memref<5x16xf32, #tpu.memory_space<vmem>>, vector<1x16xf32>
    %c0_178 = arith.constant 0 : index
    %c0_179 = arith.constant 0 : index
    %c0_180 = arith.constant 0 : index
    %211 = vector.load %arg9[%c0_178, %c0_179, %c0_180] : memref<10x10x16xf32, #tpu.memory_space<vmem>>, vector<8x8x16xf32>
    %212 = vector.shape_cast %211 : vector<8x8x16xf32> to vector<64x16xf32>
    %c0_181 = arith.constant 0 : index
    %c0_182 = arith.constant 0 : index
    %213 = vector.load %arg8[%c0_181, %c0_182] : memref<64x144xf32, #tpu.memory_space<vmem>>, vector<64x16xf32>
    tpu.vector_store %arg8[%c0_181, %c0_182], %212 {strides = array<i32>} : memref<64x144xf32, #tpu.memory_space<vmem>>, vector<64x16xf32>,
    %c0_183 = arith.constant 0 : index
    %c1_184 = arith.constant 1 : index
    %c0_185 = arith.constant 0 : index
    %214 = vector.load %arg9[%c0_183, %c1_184, %c0_185] : memref<10x10x16xf32, #tpu.memory_space<vmem>>, vector<8x8x16xf32>
    %215 = vector.shape_cast %214 : vector<8x8x16xf32> to vector<64x16xf32>
    %c0_186 = arith.constant 0 : index
    %c16_187 = arith.constant 16 : index
    %216 = vector.load %arg8[%c0_186, %c16_187] : memref<64x144xf32, #tpu.memory_space<vmem>>, vector<64x16xf32>
    tpu.vector_store %arg8[%c0_186, %c16_187], %215 {strides = array<i32>} : memref<64x144xf32, #tpu.memory_space<vmem>>, vector<64x16xf32>,
    %c0_188 = arith.constant 0 : index
    %c2_189 = arith.constant 2 : index
    %c0_190 = arith.constant 0 : index
    %217 = vector.load %arg9[%c0_188, %c2_189, %c0_190] : memref<10x10x16xf32, #tpu.memory_space<vmem>>, vector<8x8x16xf32>
    %218 = vector.shape_cast %217 : vector<8x8x16xf32> to vector<64x16xf32>
    %c0_191 = arith.constant 0 : index
    %c32_192 = arith.constant 32 : index
    %219 = vector.load %arg8[%c0_191, %c32_192] : memref<64x144xf32, #tpu.memory_space<vmem>>, vector<64x16xf32>
    tpu.vector_store %arg8[%c0_191, %c32_192], %218 {strides = array<i32>} : memref<64x144xf32, #tpu.memory_space<vmem>>, vector<64x16xf32>,
    %c1_193 = arith.constant 1 : index
    %c0_194 = arith.constant 0 : index
    %c0_195 = arith.constant 0 : index
    %220 = vector.load %arg9[%c1_193, %c0_194, %c0_195] : memref<10x10x16xf32, #tpu.memory_space<vmem>>, vector<8x8x16xf32>
    %221 = vector.shape_cast %220 : vector<8x8x16xf32> to vector<64x16xf32>
    %c0_196 = arith.constant 0 : index
    %c48_197 = arith.constant 48 : index
    %222 = vector.load %arg8[%c0_196, %c48_197] : memref<64x144xf32, #tpu.memory_space<vmem>>, vector<64x16xf32>
    tpu.vector_store %arg8[%c0_196, %c48_197], %221 {strides = array<i32>} : memref<64x144xf32, #tpu.memory_space<vmem>>, vector<64x16xf32>,
    %c1_198 = arith.constant 1 : index
    %c1_199 = arith.constant 1 : index
    %c0_200 = arith.constant 0 : index
    %223 = vector.load %arg9[%c1_198, %c1_199, %c0_200] : memref<10x10x16xf32, #tpu.memory_space<vmem>>, vector<8x8x16xf32>
    %224 = vector.shape_cast %223 : vector<8x8x16xf32> to vector<64x16xf32>
    %c0_201 = arith.constant 0 : index
    %c64_202 = arith.constant 64 : index
    %225 = vector.load %arg8[%c0_201, %c64_202] : memref<64x144xf32, #tpu.memory_space<vmem>>, vector<64x16xf32>
    tpu.vector_store %arg8[%c0_201, %c64_202], %224 {strides = array<i32>} : memref<64x144xf32, #tpu.memory_space<vmem>>, vector<64x16xf32>,
    %c1_203 = arith.constant 1 : index
    %c2_204 = arith.constant 2 : index
    %c0_205 = arith.constant 0 : index
    %226 = vector.load %arg9[%c1_203, %c2_204, %c0_205] : memref<10x10x16xf32, #tpu.memory_space<vmem>>, vector<8x8x16xf32>
    %227 = vector.shape_cast %226 : vector<8x8x16xf32> to vector<64x16xf32>
    %c0_206 = arith.constant 0 : index
    %c80_207 = arith.constant 80 : index
    %228 = vector.load %arg8[%c0_206, %c80_207] : memref<64x144xf32, #tpu.memory_space<vmem>>, vector<64x16xf32>
    tpu.vector_store %arg8[%c0_206, %c80_207], %227 {strides = array<i32>} : memref<64x144xf32, #tpu.memory_space<vmem>>, vector<64x16xf32>,
    %c2_208 = arith.constant 2 : index
    %c0_209 = arith.constant 0 : index
    %c0_210 = arith.constant 0 : index
    %229 = vector.load %arg9[%c2_208, %c0_209, %c0_210] : memref<10x10x16xf32, #tpu.memory_space<vmem>>, vector<8x8x16xf32>
    %230 = vector.shape_cast %229 : vector<8x8x16xf32> to vector<64x16xf32>
    %c0_211 = arith.constant 0 : index
    %c96_212 = arith.constant 96 : index
    %231 = vector.load %arg8[%c0_211, %c96_212] : memref<64x144xf32, #tpu.memory_space<vmem>>, vector<64x16xf32>
    tpu.vector_store %arg8[%c0_211, %c96_212], %230 {strides = array<i32>} : memref<64x144xf32, #tpu.memory_space<vmem>>, vector<64x16xf32>,
    %c2_213 = arith.constant 2 : index
    %c1_214 = arith.constant 1 : index
    %c0_215 = arith.constant 0 : index
    %232 = vector.load %arg9[%c2_213, %c1_214, %c0_215] : memref<10x10x16xf32, #tpu.memory_space<vmem>>, vector<8x8x16xf32>
    %233 = vector.shape_cast %232 : vector<8x8x16xf32> to vector<64x16xf32>
    %c0_216 = arith.constant 0 : index
    %c112_217 = arith.constant 112 : index
    %234 = vector.load %arg8[%c0_216, %c112_217] : memref<64x144xf32, #tpu.memory_space<vmem>>, vector<64x16xf32>
    tpu.vector_store %arg8[%c0_216, %c112_217], %233 {strides = array<i32>} : memref<64x144xf32, #tpu.memory_space<vmem>>, vector<64x16xf32>,
    %c2_218 = arith.constant 2 : index
    %c2_219 = arith.constant 2 : index
    %c0_220 = arith.constant 0 : index
    %235 = vector.load %arg9[%c2_218, %c2_219, %c0_220] : memref<10x10x16xf32, #tpu.memory_space<vmem>>, vector<8x8x16xf32>
    %236 = vector.shape_cast %235 : vector<8x8x16xf32> to vector<64x16xf32>
    %c0_221 = arith.constant 0 : index
    %c128_222 = arith.constant 128 : index
    %237 = vector.load %arg8[%c0_221, %c128_222] : memref<64x144xf32, #tpu.memory_space<vmem>>, vector<64x16xf32>
    tpu.vector_store %arg8[%c0_221, %c128_222], %236 {strides = array<i32>} : memref<64x144xf32, #tpu.memory_space<vmem>>, vector<64x16xf32>,
    %c0_223 = arith.constant 0 : index
    %c0_224 = arith.constant 0 : index
    %238 = vector.load %arg8[%c0_223, %c0_224] : memref<64x144xf32, #tpu.memory_space<vmem>>, vector<64x144xf32>
    %239 = arith.truncf %238 : vector<64x144xf32> to vector<64x144xbf16>
    %cst_225 = arith.constant dense<0.000000e+00> : vector<64x16xf32>
    %240 = tpu.matmul %239, %208, %cst_225 {dimension_numbers = #tpu.dot_dimension_numbers<[1], [0], [0], [1], [0, 0, 1, 1], [], []>} : vector<64x144xbf16>, vector<144x16xbf16>, vector<64x16xf32> -> vector<64x16xf32>
    %241 = vector.broadcast %209 : vector<1x16xf32> to vector<64x16xf32>
    %242 = arith.mulf %240, %241 : vector<64x16xf32>
    %243 = vector.broadcast %210 : vector<1x16xf32> to vector<64x16xf32>
    %244 = arith.addf %242, %243 : vector<64x16xf32>
    %245 = vector.shape_cast %244 : vector<64x16xf32> to vector<8x8x16xf32>
    %246 = arith.addf %245, %164 : vector<8x8x16xf32>
    %cst_226 = arith.constant 0.000000e+00 : f32
    %247 = vector.broadcast %cst_226 : f32 to vector<8x8x16xf32>
    %248 = arith.maximumf %246, %247 : vector<8x8x16xf32>
    %c1_227 = arith.constant 1 : index
    %c1_228 = arith.constant 1 : index
    %c0_229 = arith.constant 0 : index
    %249 = vector.load %arg9[%c1_227, %c1_228, %c0_229] : memref<10x10x16xf32, #tpu.memory_space<vmem>>, vector<8x8x16xf32>
    tpu.vector_store %arg9[%c1_227, %c1_228, %c0_229], %248 {strides = array<i32>} : memref<10x10x16xf32, #tpu.memory_space<vmem>>, vector<8x8x16xf32>,
    %c1_230 = arith.constant 1 : index
    %c1_231 = arith.constant 1 : index
    %c0_232 = arith.constant 0 : index
    %250 = vector.load %arg9[%c1_230, %c1_231, %c0_232] : memref<10x10x16xf32, #tpu.memory_space<vmem>>, vector<8x8x16xf32>
    %c2_233 = arith.constant 2 : index
    %c0_234 = arith.constant 0 : index
    %c0_235 = arith.constant 0 : index
    %251 = vector.load %arg3[%c2_233, %c0_234, %c0_235] : memref<4x144x16xbf16, #tpu.memory_space<vmem>>, vector<1x144x16xbf16>
    %252 = vector.shape_cast %251 : vector<1x144x16xbf16> to vector<144x16xbf16>
    %c3_236 = arith.constant 3 : index
    %c0_237 = arith.constant 0 : index
    %253 = vector.load %arg4[%c3_236, %c0_237] : memref<5x16xf32, #tpu.memory_space<vmem>>, vector<1x16xf32>
    %c3_238 = arith.constant 3 : index
    %c0_239 = arith.constant 0 : index
    %254 = vector.load %arg5[%c3_238, %c0_239] : memref<5x16xf32, #tpu.memory_space<vmem>>, vector<1x16xf32>
    %c0_240 = arith.constant 0 : index
    %c0_241 = arith.constant 0 : index
    %c0_242 = arith.constant 0 : index
    %255 = vector.load %arg9[%c0_240, %c0_241, %c0_242] : memref<10x10x16xf32, #tpu.memory_space<vmem>>, vector<8x8x16xf32>
    %256 = vector.shape_cast %255 : vector<8x8x16xf32> to vector<64x16xf32>
    %c0_243 = arith.constant 0 : index
    %c0_244 = arith.constant 0 : index
    %257 = vector.load %arg8[%c0_243, %c0_244] : memref<64x144xf32, #tpu.memory_space<vmem>>, vector<64x16xf32>
    tpu.vector_store %arg8[%c0_243, %c0_244], %256 {strides = array<i32>} : memref<64x144xf32, #tpu.memory_space<vmem>>, vector<64x16xf32>,
    %c0_245 = arith.constant 0 : index
    %c1_246 = arith.constant 1 : index
    %c0_247 = arith.constant 0 : index
    %258 = vector.load %arg9[%c0_245, %c1_246, %c0_247] : memref<10x10x16xf32, #tpu.memory_space<vmem>>, vector<8x8x16xf32>
    %259 = vector.shape_cast %258 : vector<8x8x16xf32> to vector<64x16xf32>
    %c0_248 = arith.constant 0 : index
    %c16_249 = arith.constant 16 : index
    %260 = vector.load %arg8[%c0_248, %c16_249] : memref<64x144xf32, #tpu.memory_space<vmem>>, vector<64x16xf32>
    tpu.vector_store %arg8[%c0_248, %c16_249], %259 {strides = array<i32>} : memref<64x144xf32, #tpu.memory_space<vmem>>, vector<64x16xf32>,
    %c0_250 = arith.constant 0 : index
    %c2_251 = arith.constant 2 : index
    %c0_252 = arith.constant 0 : index
    %261 = vector.load %arg9[%c0_250, %c2_251, %c0_252] : memref<10x10x16xf32, #tpu.memory_space<vmem>>, vector<8x8x16xf32>
    %262 = vector.shape_cast %261 : vector<8x8x16xf32> to vector<64x16xf32>
    %c0_253 = arith.constant 0 : index
    %c32_254 = arith.constant 32 : index
    %263 = vector.load %arg8[%c0_253, %c32_254] : memref<64x144xf32, #tpu.memory_space<vmem>>, vector<64x16xf32>
    tpu.vector_store %arg8[%c0_253, %c32_254], %262 {strides = array<i32>} : memref<64x144xf32, #tpu.memory_space<vmem>>, vector<64x16xf32>,
    %c1_255 = arith.constant 1 : index
    %c0_256 = arith.constant 0 : index
    %c0_257 = arith.constant 0 : index
    %264 = vector.load %arg9[%c1_255, %c0_256, %c0_257] : memref<10x10x16xf32, #tpu.memory_space<vmem>>, vector<8x8x16xf32>
    %265 = vector.shape_cast %264 : vector<8x8x16xf32> to vector<64x16xf32>
    %c0_258 = arith.constant 0 : index
    %c48_259 = arith.constant 48 : index
    %266 = vector.load %arg8[%c0_258, %c48_259] : memref<64x144xf32, #tpu.memory_space<vmem>>, vector<64x16xf32>
    tpu.vector_store %arg8[%c0_258, %c48_259], %265 {strides = array<i32>} : memref<64x144xf32, #tpu.memory_space<vmem>>, vector<64x16xf32>,
    %c1_260 = arith.constant 1 : index
    %c1_261 = arith.constant 1 : index
    %c0_262 = arith.constant 0 : index
    %267 = vector.load %arg9[%c1_260, %c1_261, %c0_262] : memref<10x10x16xf32, #tpu.memory_space<vmem>>, vector<8x8x16xf32>
    %268 = vector.shape_cast %267 : vector<8x8x16xf32> to vector<64x16xf32>
    %c0_263 = arith.constant 0 : index
    %c64_264 = arith.constant 64 : index
    %269 = vector.load %arg8[%c0_263, %c64_264] : memref<64x144xf32, #tpu.memory_space<vmem>>, vector<64x16xf32>
    tpu.vector_store %arg8[%c0_263, %c64_264], %268 {strides = array<i32>} : memref<64x144xf32, #tpu.memory_space<vmem>>, vector<64x16xf32>,
    %c1_265 = arith.constant 1 : index
    %c2_266 = arith.constant 2 : index
    %c0_267 = arith.constant 0 : index
    %270 = vector.load %arg9[%c1_265, %c2_266, %c0_267] : memref<10x10x16xf32, #tpu.memory_space<vmem>>, vector<8x8x16xf32>
    %271 = vector.shape_cast %270 : vector<8x8x16xf32> to vector<64x16xf32>
    %c0_268 = arith.constant 0 : index
    %c80_269 = arith.constant 80 : index
    %272 = vector.load %arg8[%c0_268, %c80_269] : memref<64x144xf32, #tpu.memory_space<vmem>>, vector<64x16xf32>
    tpu.vector_store %arg8[%c0_268, %c80_269], %271 {strides = array<i32>} : memref<64x144xf32, #tpu.memory_space<vmem>>, vector<64x16xf32>,
    %c2_270 = arith.constant 2 : index
    %c0_271 = arith.constant 0 : index
    %c0_272 = arith.constant 0 : index
    %273 = vector.load %arg9[%c2_270, %c0_271, %c0_272] : memref<10x10x16xf32, #tpu.memory_space<vmem>>, vector<8x8x16xf32>
    %274 = vector.shape_cast %273 : vector<8x8x16xf32> to vector<64x16xf32>
    %c0_273 = arith.constant 0 : index
    %c96_274 = arith.constant 96 : index
    %275 = vector.load %arg8[%c0_273, %c96_274] : memref<64x144xf32, #tpu.memory_space<vmem>>, vector<64x16xf32>
    tpu.vector_store %arg8[%c0_273, %c96_274], %274 {strides = array<i32>} : memref<64x144xf32, #tpu.memory_space<vmem>>, vector<64x16xf32>,
    %c2_275 = arith.constant 2 : index
    %c1_276 = arith.constant 1 : index
    %c0_277 = arith.constant 0 : index
    %276 = vector.load %arg9[%c2_275, %c1_276, %c0_277] : memref<10x10x16xf32, #tpu.memory_space<vmem>>, vector<8x8x16xf32>
    %277 = vector.shape_cast %276 : vector<8x8x16xf32> to vector<64x16xf32>
    %c0_278 = arith.constant 0 : index
    %c112_279 = arith.constant 112 : index
    %278 = vector.load %arg8[%c0_278, %c112_279] : memref<64x144xf32, #tpu.memory_space<vmem>>, vector<64x16xf32>
    tpu.vector_store %arg8[%c0_278, %c112_279], %277 {strides = array<i32>} : memref<64x144xf32, #tpu.memory_space<vmem>>, vector<64x16xf32>,
    %c2_280 = arith.constant 2 : index
    %c2_281 = arith.constant 2 : index
    %c0_282 = arith.constant 0 : index
    %279 = vector.load %arg9[%c2_280, %c2_281, %c0_282] : memref<10x10x16xf32, #tpu.memory_space<vmem>>, vector<8x8x16xf32>
    %280 = vector.shape_cast %279 : vector<8x8x16xf32> to vector<64x16xf32>
    %c0_283 = arith.constant 0 : index
    %c128_284 = arith.constant 128 : index
    %281 = vector.load %arg8[%c0_283, %c128_284] : memref<64x144xf32, #tpu.memory_space<vmem>>, vector<64x16xf32>
    tpu.vector_store %arg8[%c0_283, %c128_284], %280 {strides = array<i32>} : memref<64x144xf32, #tpu.memory_space<vmem>>, vector<64x16xf32>,
    %c0_285 = arith.constant 0 : index
    %c0_286 = arith.constant 0 : index
    %282 = vector.load %arg8[%c0_285, %c0_286] : memref<64x144xf32, #tpu.memory_space<vmem>>, vector<64x144xf32>
    %283 = arith.truncf %282 : vector<64x144xf32> to vector<64x144xbf16>
    %cst_287 = arith.constant dense<0.000000e+00> : vector<64x16xf32>
    %284 = tpu.matmul %283, %252, %cst_287 {dimension_numbers = #tpu.dot_dimension_numbers<[1], [0], [0], [1], [0, 0, 1, 1], [], []>} : vector<64x144xbf16>, vector<144x16xbf16>, vector<64x16xf32> -> vector<64x16xf32>
    %285 = vector.broadcast %253 : vector<1x16xf32> to vector<64x16xf32>
    %286 = arith.mulf %284, %285 : vector<64x16xf32>
    %287 = vector.broadcast %254 : vector<1x16xf32> to vector<64x16xf32>
    %288 = arith.addf %286, %287 : vector<64x16xf32>
    %cst_288 = arith.constant 0.000000e+00 : f32
    %289 = vector.broadcast %cst_288 : f32 to vector<64x16xf32>
    %290 = arith.maximumf %288, %289 : vector<64x16xf32>
    %291 = vector.shape_cast %290 : vector<64x16xf32> to vector<8x8x16xf32>
    %c1_289 = arith.constant 1 : index
    %c1_290 = arith.constant 1 : index
    %c0_291 = arith.constant 0 : index
    %292 = vector.load %arg9[%c1_289, %c1_290, %c0_291] : memref<10x10x16xf32, #tpu.memory_space<vmem>>, vector<8x8x16xf32>
    tpu.vector_store %arg9[%c1_289, %c1_290, %c0_291], %291 {strides = array<i32>} : memref<10x10x16xf32, #tpu.memory_space<vmem>>, vector<8x8x16xf32>,
    %c3_292 = arith.constant 3 : index
    %c0_293 = arith.constant 0 : index
    %c0_294 = arith.constant 0 : index
    %293 = vector.load %arg3[%c3_292, %c0_293, %c0_294] : memref<4x144x16xbf16, #tpu.memory_space<vmem>>, vector<1x144x16xbf16>
    %294 = vector.shape_cast %293 : vector<1x144x16xbf16> to vector<144x16xbf16>
    %c4_295 = arith.constant 4 : index
    %c0_296 = arith.constant 0 : index
    %295 = vector.load %arg4[%c4_295, %c0_296] : memref<5x16xf32, #tpu.memory_space<vmem>>, vector<1x16xf32>
    %c4_297 = arith.constant 4 : index
    %c0_298 = arith.constant 0 : index
    %296 = vector.load %arg5[%c4_297, %c0_298] : memref<5x16xf32, #tpu.memory_space<vmem>>, vector<1x16xf32>
    %c0_299 = arith.constant 0 : index
    %c0_300 = arith.constant 0 : index
    %c0_301 = arith.constant 0 : index
    %297 = vector.load %arg9[%c0_299, %c0_300, %c0_301] : memref<10x10x16xf32, #tpu.memory_space<vmem>>, vector<8x8x16xf32>
    %298 = vector.shape_cast %297 : vector<8x8x16xf32> to vector<64x16xf32>
    %c0_302 = arith.constant 0 : index
    %c0_303 = arith.constant 0 : index
    %299 = vector.load %arg8[%c0_302, %c0_303] : memref<64x144xf32, #tpu.memory_space<vmem>>, vector<64x16xf32>
    tpu.vector_store %arg8[%c0_302, %c0_303], %298 {strides = array<i32>} : memref<64x144xf32, #tpu.memory_space<vmem>>, vector<64x16xf32>,
    %c0_304 = arith.constant 0 : index
    %c1_305 = arith.constant 1 : index
    %c0_306 = arith.constant 0 : index
    %300 = vector.load %arg9[%c0_304, %c1_305, %c0_306] : memref<10x10x16xf32, #tpu.memory_space<vmem>>, vector<8x8x16xf32>
    %301 = vector.shape_cast %300 : vector<8x8x16xf32> to vector<64x16xf32>
    %c0_307 = arith.constant 0 : index
    %c16_308 = arith.constant 16 : index
    %302 = vector.load %arg8[%c0_307, %c16_308] : memref<64x144xf32, #tpu.memory_space<vmem>>, vector<64x16xf32>
    tpu.vector_store %arg8[%c0_307, %c16_308], %301 {strides = array<i32>} : memref<64x144xf32, #tpu.memory_space<vmem>>, vector<64x16xf32>,
    %c0_309 = arith.constant 0 : index
    %c2_310 = arith.constant 2 : index
    %c0_311 = arith.constant 0 : index
    %303 = vector.load %arg9[%c0_309, %c2_310, %c0_311] : memref<10x10x16xf32, #tpu.memory_space<vmem>>, vector<8x8x16xf32>
    %304 = vector.shape_cast %303 : vector<8x8x16xf32> to vector<64x16xf32>
    %c0_312 = arith.constant 0 : index
    %c32_313 = arith.constant 32 : index
    %305 = vector.load %arg8[%c0_312, %c32_313] : memref<64x144xf32, #tpu.memory_space<vmem>>, vector<64x16xf32>
    tpu.vector_store %arg8[%c0_312, %c32_313], %304 {strides = array<i32>} : memref<64x144xf32, #tpu.memory_space<vmem>>, vector<64x16xf32>,
    %c1_314 = arith.constant 1 : index
    %c0_315 = arith.constant 0 : index
    %c0_316 = arith.constant 0 : index
    %306 = vector.load %arg9[%c1_314, %c0_315, %c0_316] : memref<10x10x16xf32, #tpu.memory_space<vmem>>, vector<8x8x16xf32>
    %307 = vector.shape_cast %306 : vector<8x8x16xf32> to vector<64x16xf32>
    %c0_317 = arith.constant 0 : index
    %c48_318 = arith.constant 48 : index
    %308 = vector.load %arg8[%c0_317, %c48_318] : memref<64x144xf32, #tpu.memory_space<vmem>>, vector<64x16xf32>
    tpu.vector_store %arg8[%c0_317, %c48_318], %307 {strides = array<i32>} : memref<64x144xf32, #tpu.memory_space<vmem>>, vector<64x16xf32>,
    %c1_319 = arith.constant 1 : index
    %c1_320 = arith.constant 1 : index
    %c0_321 = arith.constant 0 : index
    %309 = vector.load %arg9[%c1_319, %c1_320, %c0_321] : memref<10x10x16xf32, #tpu.memory_space<vmem>>, vector<8x8x16xf32>
    %310 = vector.shape_cast %309 : vector<8x8x16xf32> to vector<64x16xf32>
    %c0_322 = arith.constant 0 : index
    %c64_323 = arith.constant 64 : index
    %311 = vector.load %arg8[%c0_322, %c64_323] : memref<64x144xf32, #tpu.memory_space<vmem>>, vector<64x16xf32>
    tpu.vector_store %arg8[%c0_322, %c64_323], %310 {strides = array<i32>} : memref<64x144xf32, #tpu.memory_space<vmem>>, vector<64x16xf32>,
    %c1_324 = arith.constant 1 : index
    %c2_325 = arith.constant 2 : index
    %c0_326 = arith.constant 0 : index
    %312 = vector.load %arg9[%c1_324, %c2_325, %c0_326] : memref<10x10x16xf32, #tpu.memory_space<vmem>>, vector<8x8x16xf32>
    %313 = vector.shape_cast %312 : vector<8x8x16xf32> to vector<64x16xf32>
    %c0_327 = arith.constant 0 : index
    %c80_328 = arith.constant 80 : index
    %314 = vector.load %arg8[%c0_327, %c80_328] : memref<64x144xf32, #tpu.memory_space<vmem>>, vector<64x16xf32>
    tpu.vector_store %arg8[%c0_327, %c80_328], %313 {strides = array<i32>} : memref<64x144xf32, #tpu.memory_space<vmem>>, vector<64x16xf32>,
    %c2_329 = arith.constant 2 : index
    %c0_330 = arith.constant 0 : index
    %c0_331 = arith.constant 0 : index
    %315 = vector.load %arg9[%c2_329, %c0_330, %c0_331] : memref<10x10x16xf32, #tpu.memory_space<vmem>>, vector<8x8x16xf32>
    %316 = vector.shape_cast %315 : vector<8x8x16xf32> to vector<64x16xf32>
    %c0_332 = arith.constant 0 : index
    %c96_333 = arith.constant 96 : index
    %317 = vector.load %arg8[%c0_332, %c96_333] : memref<64x144xf32, #tpu.memory_space<vmem>>, vector<64x16xf32>
    tpu.vector_store %arg8[%c0_332, %c96_333], %316 {strides = array<i32>} : memref<64x144xf32, #tpu.memory_space<vmem>>, vector<64x16xf32>,
    %c2_334 = arith.constant 2 : index
    %c1_335 = arith.constant 1 : index
    %c0_336 = arith.constant 0 : index
    %318 = vector.load %arg9[%c2_334, %c1_335, %c0_336] : memref<10x10x16xf32, #tpu.memory_space<vmem>>, vector<8x8x16xf32>
    %319 = vector.shape_cast %318 : vector<8x8x16xf32> to vector<64x16xf32>
    %c0_337 = arith.constant 0 : index
    %c112_338 = arith.constant 112 : index
    %320 = vector.load %arg8[%c0_337, %c112_338] : memref<64x144xf32, #tpu.memory_space<vmem>>, vector<64x16xf32>
    tpu.vector_store %arg8[%c0_337, %c112_338], %319 {strides = array<i32>} : memref<64x144xf32, #tpu.memory_space<vmem>>, vector<64x16xf32>,
    %c2_339 = arith.constant 2 : index
    %c2_340 = arith.constant 2 : index
    %c0_341 = arith.constant 0 : index
    %321 = vector.load %arg9[%c2_339, %c2_340, %c0_341] : memref<10x10x16xf32, #tpu.memory_space<vmem>>, vector<8x8x16xf32>
    %322 = vector.shape_cast %321 : vector<8x8x16xf32> to vector<64x16xf32>
    %c0_342 = arith.constant 0 : index
    %c128_343 = arith.constant 128 : index
    %323 = vector.load %arg8[%c0_342, %c128_343] : memref<64x144xf32, #tpu.memory_space<vmem>>, vector<64x16xf32>
    tpu.vector_store %arg8[%c0_342, %c128_343], %322 {strides = array<i32>} : memref<64x144xf32, #tpu.memory_space<vmem>>, vector<64x16xf32>,
    %c0_344 = arith.constant 0 : index
    %c0_345 = arith.constant 0 : index
    %324 = vector.load %arg8[%c0_344, %c0_345] : memref<64x144xf32, #tpu.memory_space<vmem>>, vector<64x144xf32>
    %325 = arith.truncf %324 : vector<64x144xf32> to vector<64x144xbf16>
    %cst_346 = arith.constant dense<0.000000e+00> : vector<64x16xf32>
    %326 = tpu.matmul %325, %294, %cst_346 {dimension_numbers = #tpu.dot_dimension_numbers<[1], [0], [0], [1], [0, 0, 1, 1], [], []>} : vector<64x144xbf16>, vector<144x16xbf16>, vector<64x16xf32> -> vector<64x16xf32>
    %327 = vector.broadcast %295 : vector<1x16xf32> to vector<64x16xf32>
    %328 = arith.mulf %326, %327 : vector<64x16xf32>
    %329 = vector.broadcast %296 : vector<1x16xf32> to vector<64x16xf32>
    %330 = arith.addf %328, %329 : vector<64x16xf32>
    %331 = vector.shape_cast %330 : vector<64x16xf32> to vector<8x8x16xf32>
    %332 = arith.addf %331, %250 : vector<8x8x16xf32>
    %cst_347 = arith.constant 0.000000e+00 : f32
    %333 = vector.broadcast %cst_347 : f32 to vector<8x8x16xf32>
    %334 = arith.maximumf %332, %333 : vector<8x8x16xf32>
    %c1_348 = arith.constant 1 : index
    %c1_349 = arith.constant 1 : index
    %c0_350 = arith.constant 0 : index
    %335 = vector.load %arg9[%c1_348, %c1_349, %c0_350] : memref<10x10x16xf32, #tpu.memory_space<vmem>>, vector<8x8x16xf32>
    tpu.vector_store %arg9[%c1_348, %c1_349, %c0_350], %334 {strides = array<i32>} : memref<10x10x16xf32, #tpu.memory_space<vmem>>, vector<8x8x16xf32>,
    %c1_351 = arith.constant 1 : index
    %c1_352 = arith.constant 1 : index
    %c0_353 = arith.constant 0 : index
    %336 = vector.load %arg9[%c1_351, %c1_352, %c0_353] : memref<10x10x16xf32, #tpu.memory_space<vmem>>, vector<8x1x16xf32>
    %337 = vector.shape_cast %336 : vector<8x1x16xf32> to vector<8x16xf32>
    %c0_354 = arith.constant 0 : index
    %c0_355 = arith.constant 0 : index
    %c0_356 = arith.constant 0 : index
    %338 = vector.load %arg6[%c0_354, %c0_355, %c0_356] : memref<1x8x128xf32, #tpu.memory_space<vmem>>, vector<1x8x16xf32>
    %339 = vector.shape_cast %338 : vector<1x8x16xf32> to vector<8x16xf32>
    %340 = vector.shape_cast %337 : vector<8x16xf32> to vector<1x8x16xf32>
    tpu.vector_store %arg6[%c0_354, %c0_355, %c0_356], %340 {strides = array<i32>} : memref<1x8x128xf32, #tpu.memory_space<vmem>>, vector<1x8x16xf32>,
    %c1_357 = arith.constant 1 : index
    %c2_358 = arith.constant 2 : index
    %c0_359 = arith.constant 0 : index
    %341 = vector.load %arg9[%c1_357, %c2_358, %c0_359] : memref<10x10x16xf32, #tpu.memory_space<vmem>>, vector<8x1x16xf32>
    %342 = vector.shape_cast %341 : vector<8x1x16xf32> to vector<8x16xf32>
    %c0_360 = arith.constant 0 : index
    %c0_361 = arith.constant 0 : index
    %c16_362 = arith.constant 16 : index
    %343 = vector.load %arg6[%c0_360, %c0_361, %c16_362] : memref<1x8x128xf32, #tpu.memory_space<vmem>>, vector<1x8x16xf32>
    %344 = vector.shape_cast %343 : vector<1x8x16xf32> to vector<8x16xf32>
    %345 = vector.shape_cast %342 : vector<8x16xf32> to vector<1x8x16xf32>
    tpu.vector_store %arg6[%c0_360, %c0_361, %c16_362], %345 {strides = array<i32>} : memref<1x8x128xf32, #tpu.memory_space<vmem>>, vector<1x8x16xf32>,
    %c1_363 = arith.constant 1 : index
    %c3_364 = arith.constant 3 : index
    %c0_365 = arith.constant 0 : index
    %346 = vector.load %arg9[%c1_363, %c3_364, %c0_365] : memref<10x10x16xf32, #tpu.memory_space<vmem>>, vector<8x1x16xf32>
    %347 = vector.shape_cast %346 : vector<8x1x16xf32> to vector<8x16xf32>
    %c0_366 = arith.constant 0 : index
    %c0_367 = arith.constant 0 : index
    %c32_368 = arith.constant 32 : index
    %348 = vector.load %arg6[%c0_366, %c0_367, %c32_368] : memref<1x8x128xf32, #tpu.memory_space<vmem>>, vector<1x8x16xf32>
    %349 = vector.shape_cast %348 : vector<1x8x16xf32> to vector<8x16xf32>
    %350 = vector.shape_cast %347 : vector<8x16xf32> to vector<1x8x16xf32>
    tpu.vector_store %arg6[%c0_366, %c0_367, %c32_368], %350 {strides = array<i32>} : memref<1x8x128xf32, #tpu.memory_space<vmem>>, vector<1x8x16xf32>,
    %c1_369 = arith.constant 1 : index
    %c4_370 = arith.constant 4 : index
    %c0_371 = arith.constant 0 : index
    %351 = vector.load %arg9[%c1_369, %c4_370, %c0_371] : memref<10x10x16xf32, #tpu.memory_space<vmem>>, vector<8x1x16xf32>
    %352 = vector.shape_cast %351 : vector<8x1x16xf32> to vector<8x16xf32>
    %c0_372 = arith.constant 0 : index
    %c0_373 = arith.constant 0 : index
    %c48_374 = arith.constant 48 : index
    %353 = vector.load %arg6[%c0_372, %c0_373, %c48_374] : memref<1x8x128xf32, #tpu.memory_space<vmem>>, vector<1x8x16xf32>
    %354 = vector.shape_cast %353 : vector<1x8x16xf32> to vector<8x16xf32>
    %355 = vector.shape_cast %352 : vector<8x16xf32> to vector<1x8x16xf32>
    tpu.vector_store %arg6[%c0_372, %c0_373, %c48_374], %355 {strides = array<i32>} : memref<1x8x128xf32, #tpu.memory_space<vmem>>, vector<1x8x16xf32>,
    %c1_375 = arith.constant 1 : index
    %c5_376 = arith.constant 5 : index
    %c0_377 = arith.constant 0 : index
    %356 = vector.load %arg9[%c1_375, %c5_376, %c0_377] : memref<10x10x16xf32, #tpu.memory_space<vmem>>, vector<8x1x16xf32>
    %357 = vector.shape_cast %356 : vector<8x1x16xf32> to vector<8x16xf32>
    %c0_378 = arith.constant 0 : index
    %c0_379 = arith.constant 0 : index
    %c64_380 = arith.constant 64 : index
    %358 = vector.load %arg6[%c0_378, %c0_379, %c64_380] : memref<1x8x128xf32, #tpu.memory_space<vmem>>, vector<1x8x16xf32>
    %359 = vector.shape_cast %358 : vector<1x8x16xf32> to vector<8x16xf32>
    %360 = vector.shape_cast %357 : vector<8x16xf32> to vector<1x8x16xf32>
    tpu.vector_store %arg6[%c0_378, %c0_379, %c64_380], %360 {strides = array<i32>} : memref<1x8x128xf32, #tpu.memory_space<vmem>>, vector<1x8x16xf32>,
    %c1_381 = arith.constant 1 : index
    %c6_382 = arith.constant 6 : index
    %c0_383 = arith.constant 0 : index
    %361 = vector.load %arg9[%c1_381, %c6_382, %c0_383] : memref<10x10x16xf32, #tpu.memory_space<vmem>>, vector<8x1x16xf32>
    %362 = vector.shape_cast %361 : vector<8x1x16xf32> to vector<8x16xf32>
    %c0_384 = arith.constant 0 : index
    %c0_385 = arith.constant 0 : index
    %c80_386 = arith.constant 80 : index
    %363 = vector.load %arg6[%c0_384, %c0_385, %c80_386] : memref<1x8x128xf32, #tpu.memory_space<vmem>>, vector<1x8x16xf32>
    %364 = vector.shape_cast %363 : vector<1x8x16xf32> to vector<8x16xf32>
    %365 = vector.shape_cast %362 : vector<8x16xf32> to vector<1x8x16xf32>
    tpu.vector_store %arg6[%c0_384, %c0_385, %c80_386], %365 {strides = array<i32>} : memref<1x8x128xf32, #tpu.memory_space<vmem>>, vector<1x8x16xf32>,
    %c1_387 = arith.constant 1 : index
    %c7_388 = arith.constant 7 : index
    %c0_389 = arith.constant 0 : index
    %366 = vector.load %arg9[%c1_387, %c7_388, %c0_389] : memref<10x10x16xf32, #tpu.memory_space<vmem>>, vector<8x1x16xf32>
    %367 = vector.shape_cast %366 : vector<8x1x16xf32> to vector<8x16xf32>
    %c0_390 = arith.constant 0 : index
    %c0_391 = arith.constant 0 : index
    %c96_392 = arith.constant 96 : index
    %368 = vector.load %arg6[%c0_390, %c0_391, %c96_392] : memref<1x8x128xf32, #tpu.memory_space<vmem>>, vector<1x8x16xf32>
    %369 = vector.shape_cast %368 : vector<1x8x16xf32> to vector<8x16xf32>
    %370 = vector.shape_cast %367 : vector<8x16xf32> to vector<1x8x16xf32>
    tpu.vector_store %arg6[%c0_390, %c0_391, %c96_392], %370 {strides = array<i32>} : memref<1x8x128xf32, #tpu.memory_space<vmem>>, vector<1x8x16xf32>,
    %c1_393 = arith.constant 1 : index
    %c8_394 = arith.constant 8 : index
    %c0_395 = arith.constant 0 : index
    %371 = vector.load %arg9[%c1_393, %c8_394, %c0_395] : memref<10x10x16xf32, #tpu.memory_space<vmem>>, vector<8x1x16xf32>
    %372 = vector.shape_cast %371 : vector<8x1x16xf32> to vector<8x16xf32>
    %c0_396 = arith.constant 0 : index
    %c0_397 = arith.constant 0 : index
    %c112_398 = arith.constant 112 : index
    %373 = vector.load %arg6[%c0_396, %c0_397, %c112_398] : memref<1x8x128xf32, #tpu.memory_space<vmem>>, vector<1x8x16xf32>
    %374 = vector.shape_cast %373 : vector<1x8x16xf32> to vector<8x16xf32>
    %375 = vector.shape_cast %372 : vector<8x16xf32> to vector<1x8x16xf32>
    tpu.vector_store %arg6[%c0_396, %c0_397, %c112_398], %375 {strides = array<i32>} : memref<1x8x128xf32, #tpu.memory_space<vmem>>, vector<1x8x16xf32>,
    return
  }
  func.func @transform_0(%arg0: i32) -> (i32, i32, i32, i32) {
    %c0_i32 = arith.constant 0 : i32
    %c0_i32_0 = arith.constant 0 : i32
    %c0_i32_1 = arith.constant 0 : i32
    %c0_i32_2 = arith.constant 0 : i32
    return %arg0, %c0_i32, %c0_i32_0, %c0_i32_1 : i32, i32, i32, i32
  }
  func.func @transform_1(%arg0: i32) -> (i32, i32) {
    %c0_i32 = arith.constant 0 : i32
    %c0_i32_0 = arith.constant 0 : i32
    %c0_i32_1 = arith.constant 0 : i32
    return %c0_i32, %c0_i32_0 : i32, i32
  }
  func.func @transform_2(%arg0: i32) -> (i32, i32, i32) {
    %c0_i32 = arith.constant 0 : i32
    %c0_i32_0 = arith.constant 0 : i32
    %c0_i32_1 = arith.constant 0 : i32
    %c0_i32_2 = arith.constant 0 : i32
    return %c0_i32, %c0_i32_0, %c0_i32_1 : i32, i32, i32
  }
  func.func @transform_3(%arg0: i32) -> (i32, i32) {
    %c0_i32 = arith.constant 0 : i32
    %c0_i32_0 = arith.constant 0 : i32
    %c0_i32_1 = arith.constant 0 : i32
    return %c0_i32, %c0_i32_0 : i32, i32
  }
  func.func @transform_4(%arg0: i32) -> (i32, i32) {
    %c0_i32 = arith.constant 0 : i32
    %c0_i32_0 = arith.constant 0 : i32
    %c0_i32_1 = arith.constant 0 : i32
    return %c0_i32, %c0_i32_0 : i32, i32
  }
  func.func @transform_5(%arg0: i32) -> (i32, i32, i32) {
    %c0_i32 = arith.constant 0 : i32
    %c0_i32_0 = arith.constant 0 : i32
    %c0_i32_1 = arith.constant 0 : i32
    return %arg0, %c0_i32, %c0_i32_0 : i32, i32, i32
  }
}

</mosaic_0001>

<bundles_post_ra>
// kernel: res_bottom_forward.1
= control target key start
LH: loop header
LB: loop body
LE: loop exit
PB: predicated region body
PF: predicated region fallthrough
CT: control target
= control target key end

     0   :  { %s7267_s18 = smov 0   ;;  %s10562_s0 = inlined_call_operand.vmem [shape: f32[2,19,19,16], index: 0, kind: input, shape index: {}]   ;;  %s10563_s1 = inlined_call_operand.vmem [shape: bf16[256,16], index: 1, kind: input, shape index: {}]   ;;  %s10564_s2 = inlined_call_operand.vmem [shape: bf16[4,144,16], index: 2, kind: input, shape index: {}]   ;;  %s10565_s3 = inlined_call_operand.vmem [shape: f32[5,16], index: 3, kind: input, shape index: {}]   ;;  %s10566_s4 = inlined_call_operand.vmem [shape: f32[5,16], index: 4, kind: input, shape index: {}]   ;;  %s10567_s5 = inlined_call_operand.vmem [shape: f32[2,8,128], index: 5, kind: output, shape index: {}]  }
   0x1 LB: > { %s6489_s19 = sadd.s32 4294967295, %s7226_s18   ;;  %p6493_p0 = scmp.ge.s32.totalorder %s7226_s18, 1  ;;  %s7226_s18 = sphi %s7267_s18, %s15_s18  }
   0x2   : > { %p187_p1 = scmp.lt.s32.totalorder %s7226_s18, 3 }
   0x4   : > { %p188_p2 = pnand %p6493_p0, %p187_p1 }
   0x5   : > { %p214_p3 = scmp.lt.s32.totalorder (!%p188_p2), %s6489_s19, 1  ;;  %s7228_s24 = smov (!%p188_p2), 16  }
   0x6   : > { %191 = sbr.rel (%p188_p2) target bundleno = 2838 (0xb16), region = 40  ;;  %s7229_s25 = smov (!%p188_p2), 32  }
   0x7   : > { %s7230_s28 = smov (!%p188_p2), 48   ;;  %s7231_s12 = smov (!%p188_p2), 64  }
   0x8   : > { %s7232_s26 = smov (!%p188_p2), 80   ;;  %s7233_s11 = smov (!%p188_p2), 96  }
   0x9   : > { %s7234_s21 = smov (!%p188_p2), 112  }
   0xb   : > { %s10569_s19 = smov (!%p214_p3, %s6489_s19), 1  ;;  %vm256_vm0 = vcmask 130048   ;;  %v7162_v24 = vld [vmem:[%s10563_s1 + $0x78] sm:$0xff]   ;;  %v7164_v26 = vld [vmem:[%s10563_s1 + $0x70] sm:$0xff]   ;;  %v7166_v28 = vld [vmem:[%s10563_s1 + $0x68] sm:$0xff]   ;;  %vm449_vm1 = vcmask 261248  }
   0xc   : > { %s7144_s20 = smul.u32 456, %s10569_s19  ;;  %v7163_v25 = vld [vmem:[%s10563_s1 + $0x38] sm:$0xff]   ;;  %7014 = vmatprep.subr.bf16.mxu0 %v7162_v24  ;;  %v7165_v27 = vld [vmem:[%s10563_s1 + $0x30] sm:$0xff]   ;;  %v7167_v29 = vld [vmem:[%s10563_s1 + $0x28] sm:$0xff]   ;;  %vm642_vm2 = vcmask 392448   ;;  %vm835_vm3 = vcmask 523648  }
   0xd   : > { %7015 = vmatpush3.bf16.msra.mxu0 %v7163_v25  ;;  %v7168_v32 = vld [vmem:[%s10563_s1 + $0x60] sm:$0xff]   ;;  %v7170_v36 = vld [vmem:[%s10563_s1 + $0x58] sm:$0xff]   ;;  %v7172_v40 = vld [vmem:[%s10563_s1 + $0x50] sm:$0xff]   ;;  %vm1029_vm4 = vcmask 654848   ;;  %vm1222_vm5 = vcmask 786048   ;;  %vm1415_vm6 = vcmask 917248  }
   0xe   : > { %s7281_s23 = scalar_lea.vmem %s10562_s0, %s7144_s20  ;;  %7016 = vmatprep.subr.bf16.mxu0 %v7164_v26  ;;  %v7169_v33 = vld [vmem:[%s10563_s1 + $0x20] sm:$0xff]   ;;  %v7171_v37 = vld [vmem:[%s10563_s1 + $0x18] sm:$0xff]   ;;  %v7173_v41 = vld [vmem:[%s10563_s1 + $0x10] sm:$0xff]   ;;  %vm1608_vm7 = vcmask 1048448   ;;  %vm3573_vm8 = vcmask 123904   ;;  %vm3626_vm9 = vcmask 122880  }
   0xf   : > { %v7284_v0 = vld [vmem:[%s7281_s23 + $0x31] sm:$0xff]  ;;  %v289_v1 = vld [vmem:[%s7281_s23 + $0x1] sm:$0xff]  ;;  %v7291_v2 = vld [vmem:[%s7281_s23 + $0x39] sm:$0xff]  ;;  %vm3659_vm10 = vcmask 123905   ;;  %vm3668_vm11 = vcmask 125955   ;;  %vm3677_vm12 = vcmask 128005  }
  0x10   : > { %1770 = vrot.lane.b32.xlu0 %v7284_v0, %s7228_s24  ;;  %353 = vrot.lane.b32.xlu1 %v289_v1, %s7228_s24  ;;  %v290_v3 = vld [vmem:[%s7281_s23 + $0x9] sm:$0xff]  ;;  %v6496_v6 = vld [vmem:[%s7281_s23 + $0x18] sm:$0xff]  ;;  %vm3742_vm13 = vcmask 130055   ;;  %vm6176_vm14 = vcmask 1041409   ;;  %vm6179_vm15 = vcmask 1042434   ;;  %s6495_s10 = sshll.u32 %s10569_s19, 3 }
  0x11   : > { %v7295_v4 = vld [vmem:[%s7281_s23 + $0x48] sm:$0xff]  ;;  %v7298_v5 = vld [vmem:[%s7281_s23 + $0x50] sm:$0xff]  ;;  %v6497_v7 = vld [vmem:[%s7281_s23 + $0x20] sm:$0xff]  ;;  %259 = vst.msk [vmem:[#allocation2 + $0x20] sm:$0xff] %vm256_vm0, %v6496_v6  ;;  %7017 = vmatpush3.bf16.msra.mxu0 %v7165_v27 }
  0x12   : > { %1676 = vst.msk [vmem:[#allocation2 + $0x28] sm:$0xff] %vm256_vm0, %v7295_v4  ;;  %1677 = vst.msk [vmem:[#allocation2 + $0x38] sm:$0xff] %vm256_vm0, %v7298_v5  ;;  %v7310_v8 = vld [vmem:[%s7281_s23 + $0x32] sm:$0xff]  ;;  %v7313_v9 = vld [vmem:[%s7281_s23 + $0x3a] sm:$0xff]  ;;  %7018 = vmatprep.subr.bf16.mxu0 %v7166_v28 }
  0x13   : > { %260 = vst.msk [vmem:[#allocation2 + $0x30] sm:$0xff] %vm256_vm0, %v6497_v7  ;;  %v482_v10 = vld [vmem:[%s7281_s23 + $0x2] sm:$0xff]  ;;  %v483_v11 = vld [vmem:[%s7281_s23 + $0xa] sm:$0xff]  ;;  %v7333_v15 = vld [vmem:[%s7281_s23 + $0x38] sm:$0xff] }
  0x14   : > { %1772 = vrot.lane.b32.xlu0 %v7291_v2, %s7228_s24  ;;  %355 = vrot.lane.b32.xlu1 %v290_v3, %s7228_s24  ;;  %v7324_v12 = vld [vmem:[%s7281_s23 + $0x60] sm:$0xff]  ;;  %v7327_v13 = vld [vmem:[%s7281_s23 + $0x68] sm:$0xff]  ;;  %1675 = vst.msk [vmem:[#allocation2 + $0x18] sm:$0xff] %vm256_vm0, %v7333_v15  ;;  %262 = vst.msk [vmem:[#allocation2 + $0x50] sm:$0xff] %vm256_vm0, %v7333_v15 }
  0x15   : > { %v7330_v14 = vld [vmem:[%s7281_s23 + $0x30] sm:$0xff]  ;;  %1678 = vst.msk [vmem:[#allocation2 + $0x48] sm:$0xff] %vm256_vm0, %v7324_v12  ;;  %1679 = vst.msk [vmem:[#allocation2 + $0x58] sm:$0xff] %vm256_vm0, %v7327_v13  ;;  %v7353_v17 = vld [vmem:[%s7281_s23 + $0x3b] sm:$0xff]  ;;  %7019 = vmatpush3.bf16.msra.mxu0 %v7167_v29 }
  0x16   : > { %1674 = vst.msk [vmem:[#allocation2 + $0x8] sm:$0xff] %vm256_vm0, %v7330_v14  ;;  %261 = vst.msk [vmem:[#allocation2 + $0x40] sm:$0xff] %vm256_vm0, %v7330_v14  ;;  %v7350_v16 = vld [vmem:[%s7281_s23 + $0x33] sm:$0xff]  ;;  %v224_v18 = vld [vmem:[%s7281_s23] sm:$0xff]  ;;  %7020 = vmatprep.subr.bf16.mxu0 %v7168_v32 }
  0x17   : > { %v225_v19 = vld [vmem:[%s7281_s23 + $0x8] sm:$0xff]  ;;  %v7358_v20 = vld [vmem:[%s7281_s23 + $0x78] sm:$0xff]  ;;  %257 = vst.msk [vmem:[#allocation2] sm:$0xff] %vm256_vm0, %v224_v18  ;;  %v7363_v21 = vld [vmem:[%s7281_s23 + $0x80] sm:$0xff] }
  0x18   : > { %1962 = vrot.lane.b32.xlu0 %v7310_v8, %s7229_s25  ;;  %1964 = vrot.lane.b32.xlu1 %v7313_v9, %s7229_s25  ;;  %258 = vst.msk [vmem:[#allocation2 + $0x10] sm:$0xff] %vm256_vm0, %v225_v19  ;;  %1680 = vst.msk [vmem:[#allocation2 + $0x68] sm:$0xff] %vm256_vm0, %v7358_v20  ;;  %v675_v22 = vld [vmem:[%s7281_s23 + $0x3] sm:$0xff]  ;;  %v676_v23 = vld [vmem:[%s7281_s23 + $0xb] sm:$0xff] }
  0x19   : > { %1681 = vst.msk [vmem:[#allocation2 + $0x78] sm:$0xff] %vm256_vm0, %v7363_v21  ;;  %v7400_v30 = vld [vmem:[%s7281_s23 + $0x49] sm:$0xff]  ;;  %v7403_v31 = vld [vmem:[%s7281_s23 + $0x51] sm:$0xff]  ;;  %7021 = vmatpush3.bf16.msra.mxu0 %v7169_v33  ;;  %v6528_v34 = vld [vmem:[%s7281_s23 + $0x19] sm:$0xff] }
  0x1a   : > { %v6529_v35 = vld [vmem:[%s7281_s23 + $0x21] sm:$0xff]  ;;  %7022 = vmatprep.subr.bf16.mxu0 %v7170_v36  ;;  %v7426_v38 = vld [vmem:[%s7281_s23 + $0x4a] sm:$0xff]  ;;  %v7429_v39 = vld [vmem:[%s7281_s23 + $0x52] sm:$0xff] }
  0x1b   : > { %v6560_v42 = vld [vmem:[%s7281_s23 + $0x1a] sm:$0xff]  ;;  %v6561_v43 = vld [vmem:[%s7281_s23 + $0x22] sm:$0xff]  ;;  %v7452_v46 = vld [vmem:[%s7281_s23 + $0x4b] sm:$0xff] }
  0x1c   : > { %546 = vrot.lane.b32.xlu0 %v482_v10, %s7229_s25  ;;  %548 = vrot.lane.b32.xlu1 %v483_v11, %s7229_s25  ;;  %v7174_v44 = vld [vmem:[%s10563_s1 + $0x48] sm:$0xff]   ;;  %v7455_v47 = vld [vmem:[%s7281_s23 + $0x53] sm:$0xff] }
  0x1d   : > { %7023 = vmatpush3.bf16.msra.mxu0 %v7171_v37  ;;  %v7175_v45 = vld [vmem:[%s10563_s1 + $0x8] sm:$0xff]   ;;  %v7176_v48 = vld [vmem:[%s10563_s1 + $0x40] sm:$0xff]   ;;  %v7480_v52 = vld [vmem:[%s7281_s23 + $0x90] sm:$0xff] }
  0x1e   : > { %7024 = vmatprep.subr.bf16.mxu0 %v7172_v40  ;;  %v7177_v49 = vld [vmem:[%s10563_s1] sm:$0xff]   ;;  %v7483_v53 = vld [vmem:[%s7281_s23 + $0x98] sm:$0xff]  ;;  %1682 = vst.msk [vmem:[#allocation2 + $0x88] sm:$0xff] %vm256_vm0, %v7480_v52  ;;  %v7513_v55 = vld [vmem:[%s7281_s23 + $0x69] sm:$0xff] }
  0x1f   : > { %v6592_v50 = vld [vmem:[%s7281_s23 + $0x1b] sm:$0xff]  ;;  %v6593_v51 = vld [vmem:[%s7281_s23 + $0x23] sm:$0xff]  ;;  %1683 = vst.msk [vmem:[#allocation2 + $0x98] sm:$0xff] %vm256_vm0, %v7483_v53  ;;  %v7541_v59 = vld [vmem:[%s7281_s23 + $0x6b] sm:$0xff] }
  0x20   : > { %2154 = vrot.lane.b32.xlu0 %v7350_v16, %s7230_s28  ;;  %2156 = vrot.lane.b32.xlu1 %v7353_v17, %s7230_s28  ;;  %v7510_v54 = vld [vmem:[%s7281_s23 + $0x61] sm:$0xff]  ;;  %v7527_v57 = vld [vmem:[%s7281_s23 + $0x6a] sm:$0xff] }
  0x21   : > { %7025 = vmatpush3.bf16.msra.mxu0 %v7173_v41  ;;  %v7524_v56 = vld [vmem:[%s7281_s23 + $0x62] sm:$0xff]  ;;  %v7567_v3 = vld [vmem:[%s7281_s23 + $0xb0] sm:$0xff] }
  0x22   : > { %7026 = vmatprep.subr.bf16.mxu0 %v7174_v44  ;;  %v7538_v58 = vld [vmem:[%s7281_s23 + $0x63] sm:$0xff]  ;;  %1685 = vst.msk [vmem:[#allocation2 + $0xb8] sm:$0xff] %vm256_vm0, %v7567_v3  ;;  %v7644_v28 = vld [vmem:[%s7281_s23 + $0x7b] sm:$0xff]  ;;  %v231_v33 = vld [vmem:[%s7281_s23 + $0x50] sm:$0xff] }
  0x23   : > { %v7564_v1 = vld [vmem:[%s7281_s23 + $0xa8] sm:$0xff]  ;;  %264 = vst.msk [vmem:[#allocation2 + $0x70] sm:$0xff] %vm256_vm0, %v231_v33 }
  0x24   : > { %739 = vrot.lane.b32.xlu0 %v675_v22, %s7230_s28  ;;  %741 = vrot.lane.b32.xlu1 %v676_v23, %s7230_s28  ;;  %1684 = vst.msk [vmem:[#allocation2 + $0xa8] sm:$0xff] %vm256_vm0, %v7564_v1  ;;  %v7626_v22 = vld [vmem:[%s7281_s23 + $0x7a] sm:$0xff]  ;;  %v7629_v23 = vld [vmem:[%s7281_s23 + $0x82] sm:$0xff] }
  0x25   : > { %7027 = vmatpush3.bf16.msra.mxu0 %v7175_v45  ;;  %v7647_v29 = vld [vmem:[%s7281_s23 + $0x83] sm:$0xff] }
  0x26   : > { %7028 = vmatprep.subr.bf16.mxu0 %v7176_v48  ;;  %v230_v32 = vld [vmem:[%s7281_s23 + $0x48] sm:$0xff] }
  0x27   : > { %263 = vst.msk [vmem:[#allocation2 + $0x60] sm:$0xff] %vm256_vm0, %v230_v32 }
  0x28   : > { %2347 = vrot.lane.b32.xlu0 %v7295_v4, %s7231_s12  ;;  %2349 = vrot.lane.b32.xlu1 %v7298_v5, %s7231_s12 }
  0x29   : > { %7029 = vmatpush3.bf16.msra.mxu0 %v7177_v49 }
  0x2c   : > { %933 = vrot.lane.b32.xlu0 %v6496_v6, %s7231_s12  ;;  %935 = vrot.lane.b32.xlu1 %v6497_v7, %s7231_s12 }
  0x30   : > { %2539 = vrot.lane.b32.xlu0 %v7400_v30, %s7232_s26  ;;  %2541 = vrot.lane.b32.xlu1 %v7403_v31, %s7232_s26 }
  0x34   : > { %1126 = vrot.lane.b32.xlu0 %v6528_v34, %s7232_s26  ;;  %1128 = vrot.lane.b32.xlu1 %v6529_v35, %s7232_s26 }
  0x38   : > { %2731 = vrot.lane.b32.xlu0 %v7426_v38, %s7233_s11  ;;  %2733 = vrot.lane.b32.xlu1 %v7429_v39, %s7233_s11 }
  0x3c   : > { %1319 = vrot.lane.b32.xlu0 %v6560_v42, %s7233_s11  ;;  %1321 = vrot.lane.b32.xlu1 %v6561_v43, %s7233_s11 }
  0x40   : > { %2923 = vrot.lane.b32.xlu0 %v7452_v46, %s7234_s21  ;;  %2925 = vrot.lane.b32.xlu1 %v7455_v47, %s7234_s21 }
  0x44   : > { %1512 = vrot.lane.b32.xlu0 %v6592_v50, %s7234_s21  ;;  %1514 = vrot.lane.b32.xlu1 %v6593_v51, %s7234_s21 }
  0x48   : > { %1774 = vrot.lane.b32.xlu0 %v7400_v30, %s7228_s24  ;;  %1776 = vrot.lane.b32.xlu1 %v7403_v31, %s7228_s24 }
  0x4c   : > { %357 = vrot.lane.b32.xlu0 %v6528_v34, %s7228_s24  ;;  %359 = vrot.lane.b32.xlu1 %v6529_v35, %s7228_s24 }
  0x50   : > { %1966 = vrot.lane.b32.xlu0 %v7426_v38, %s7229_s25  ;;  %1968 = vrot.lane.b32.xlu1 %v7429_v39, %s7229_s25 }
  0x54   : > { %550 = vrot.lane.b32.xlu0 %v6560_v42, %s7229_s25  ;;  %552 = vrot.lane.b32.xlu1 %v6561_v43, %s7229_s25 }
  0x58   : > { %2158 = vrot.lane.b32.xlu0 %v7452_v46, %s7230_s28  ;;  %2160 = vrot.lane.b32.xlu1 %v7455_v47, %s7230_s28 }
  0x5c   : > { %743 = vrot.lane.b32.xlu0 %v6592_v50, %s7230_s28  ;;  %745 = vrot.lane.b32.xlu1 %v6593_v51, %s7230_s28 }
  0x60   : > { %2351 = vrot.lane.b32.xlu0 %v7324_v12, %s7231_s12  ;;  %2353 = vrot.lane.b32.xlu1 %v7327_v13, %s7231_s12 }
  0x64   : > { %937 = vrot.lane.b32.xlu0 %v7330_v14, %s7231_s12  ;;  %939 = vrot.lane.b32.xlu1 %v7333_v15, %s7231_s12 }
  0x68   : > { %2543 = vrot.lane.b32.xlu0 %v7510_v54, %s7232_s26  ;;  %2545 = vrot.lane.b32.xlu1 %v7513_v55, %s7232_s26 }
  0x6c   : > { %1130 = vrot.lane.b32.xlu0 %v7284_v0, %s7232_s26  ;;  %1132 = vrot.lane.b32.xlu1 %v7291_v2, %s7232_s26 }
  0x70   : > { %2735 = vrot.lane.b32.xlu0 %v7524_v56, %s7233_s11  ;;  %2737 = vrot.lane.b32.xlu1 %v7527_v57, %s7233_s11 }
  0x74   : > { %1323 = vrot.lane.b32.xlu0 %v7310_v8, %s7233_s11  ;;  %1325 = vrot.lane.b32.xlu1 %v7313_v9, %s7233_s11 }
  0x78   : > { %2927 = vrot.lane.b32.xlu0 %v7538_v58, %s7234_s21  ;;  %2929 = vrot.lane.b32.xlu1 %v7541_v59, %s7234_s21 }
  0x7c   : > { %1516 = vrot.lane.b32.xlu0 %v7350_v16, %s7234_s21  ;;  %1518 = vrot.lane.b32.xlu1 %v7353_v17, %s7234_s21 }
  0x80   : > { %1778 = vrot.lane.b32.xlu0 %v7510_v54, %s7228_s24  ;;  %1780 = vrot.lane.b32.xlu1 %v7513_v55, %s7228_s24 }
  0x82   : > { %v1771_v60 = vpop.permute.xlu0 %1770  ;;  %v354_v61 = vpop.permute.xlu1 %353 }
  0x83   : > { %1866 = vst.msk [vmem:[#allocation2 + $0x8] sm:$0xff] %vm449_vm1, %v1771_v60  ;;  %450 = vst.msk [vmem:[#allocation2] sm:$0xff] %vm449_vm1, %v354_v61 }
  0x84   : > { %361 = vrot.lane.b32.xlu0 %v7284_v0, %s7228_s24  ;;  %363 = vrot.lane.b32.xlu1 %v7291_v2, %s7228_s24 }
  0x86   : > { %v1773_v62 = vpop.permute.xlu0 %1772  ;;  %v356_v63 = vpop.permute.xlu1 %355 }
  0x87   : > { %1867 = vst.msk [vmem:[#allocation2 + $0x18] sm:$0xff] %vm449_vm1, %v1773_v62  ;;  %451 = vst.msk [vmem:[#allocation2 + $0x10] sm:$0xff] %vm449_vm1, %v356_v63  ;;  %v7680_v62 = vld [vmem:[%s7281_s23 + $0xc0] sm:$0xff]  ;;  %v7683_v63 = vld [vmem:[%s7281_s23 + $0xc8] sm:$0xff] }
  0x88   : > { %1970 = vrot.lane.b32.xlu0 %v7524_v56, %s7229_s25  ;;  %1972 = vrot.lane.b32.xlu1 %v7527_v57, %s7229_s25  ;;  %1686 = vst.msk [vmem:[#allocation2 + $0xc8] sm:$0xff] %vm256_vm0, %v7680_v62  ;;  %1687 = vst.msk [vmem:[#allocation2 + $0xd8] sm:$0xff] %vm256_vm0, %v7683_v63 }
  0x8a   : > { %v1963_v0 = vpop.permute.xlu0 %1962  ;;  %v1965_v2 = vpop.permute.xlu1 %1964 }
  0x8b   : > { %2058 = vst.msk [vmem:[#allocation2 + $0x8] sm:$0xff] %vm642_vm2, %v1963_v0  ;;  %2059 = vst.msk [vmem:[#allocation2 + $0x18] sm:$0xff] %vm642_vm2, %v1965_v2 }
  0x8c   : > { %554 = vrot.lane.b32.xlu0 %v7310_v8, %s7229_s25  ;;  %556 = vrot.lane.b32.xlu1 %v7313_v9, %s7229_s25 }
  0x8e   : > { %v547_v6 = vpop.permute.xlu0 %546  ;;  %v549_v7 = vpop.permute.xlu1 %548 }
  0x8f   : > { %643 = vst.msk [vmem:[#allocation2] sm:$0xff] %vm642_vm2, %v547_v6  ;;  %644 = vst.msk [vmem:[#allocation2 + $0x10] sm:$0xff] %vm642_vm2, %v549_v7 }
  0x90   : > { %2162 = vrot.lane.b32.xlu0 %v7538_v58, %s7230_s28  ;;  %2164 = vrot.lane.b32.xlu1 %v7541_v59, %s7230_s28 }
  0x92   : > { %v2155_v10 = vpop.permute.xlu0 %2154  ;;  %v2157_v11 = vpop.permute.xlu1 %2156 }
  0x93   : > { %2250 = vst.msk [vmem:[#allocation2 + $0x8] sm:$0xff] %vm835_vm3, %v2155_v10  ;;  %2251 = vst.msk [vmem:[#allocation2 + $0x18] sm:$0xff] %vm835_vm3, %v2157_v11 }
  0x94   : > { %747 = vrot.lane.b32.xlu0 %v7350_v16, %s7230_s28  ;;  %749 = vrot.lane.b32.xlu1 %v7353_v17, %s7230_s28  ;;  %v7608_v16 = vld [vmem:[%s7281_s23 + $0x79] sm:$0xff]  ;;  %v7611_v17 = vld [vmem:[%s7281_s23 + $0x81] sm:$0xff] }
  0x96   : > { %v740_v8 = vpop.permute.xlu0 %739  ;;  %v742_v9 = vpop.permute.xlu1 %741 }
  0x97   : > { %836 = vst.msk [vmem:[#allocation2] sm:$0xff] %vm835_vm3, %v740_v8  ;;  %837 = vst.msk [vmem:[#allocation2 + $0x10] sm:$0xff] %vm835_vm3, %v742_v9 }
  0x98   : > { %2355 = vrot.lane.b32.xlu0 %v7358_v20, %s7231_s12  ;;  %2357 = vrot.lane.b32.xlu1 %v7363_v21, %s7231_s12 }
  0x9a   : > { %v2348_v14 = vpop.permute.xlu0 %2347  ;;  %v2350_v15 = vpop.permute.xlu1 %2349 }
  0x9b   : > { %2443 = vst.msk [vmem:[#allocation2 + $0x8] sm:$0xff] %vm1029_vm4, %v2348_v14  ;;  %2444 = vst.msk [vmem:[#allocation2 + $0x18] sm:$0xff] %vm1029_vm4, %v2350_v15  ;;  %v7745_v15 = vld [vmem:[%s7281_s23 + $0x9a] sm:$0xff] }
  0x9c   : > { %941 = vrot.lane.b32.xlu0 %v7295_v4, %s7231_s12  ;;  %943 = vrot.lane.b32.xlu1 %v7298_v5, %s7231_s12 }
  0x9e   : > { %v934_v18 = vpop.permute.xlu0 %933  ;;  %v936_v19 = vpop.permute.xlu1 %935 }
  0x9f   : > { %1030 = vst.msk [vmem:[#allocation2] sm:$0xff] %vm1029_vm4, %v934_v18  ;;  %1031 = vst.msk [vmem:[#allocation2 + $0x10] sm:$0xff] %vm1029_vm4, %v936_v19 }
  0xa0   : > { %2547 = vrot.lane.b32.xlu0 %v7608_v16, %s7232_s26  ;;  %2549 = vrot.lane.b32.xlu1 %v7611_v17, %s7232_s26 }
  0xa2   : > { %v2540_v4 = vpop.permute.xlu0 %2539  ;;  %v2542_v5 = vpop.permute.xlu1 %2541 }
  0xa3   : > { %2635 = vst.msk [vmem:[#allocation2 + $0x8] sm:$0xff] %vm1222_vm5, %v2540_v4  ;;  %2636 = vst.msk [vmem:[#allocation2 + $0x18] sm:$0xff] %vm1222_vm5, %v2542_v5 }
  0xa4   : > { %1134 = vrot.lane.b32.xlu0 %v7400_v30, %s7232_s26  ;;  %1136 = vrot.lane.b32.xlu1 %v7403_v31, %s7232_s26 }
  0xa6   : > { %v1127_v24 = vpop.permute.xlu0 %1126  ;;  %v1129_v25 = vpop.permute.xlu1 %1128 }
  0xa7   : > { %1223 = vst.msk [vmem:[#allocation2] sm:$0xff] %vm1222_vm5, %v1127_v24  ;;  %1224 = vst.msk [vmem:[#allocation2 + $0x10] sm:$0xff] %vm1222_vm5, %v1129_v25  ;;  %v7760_v24 = vld [vmem:[%s7281_s23 + $0x93] sm:$0xff]  ;;  %v7763_v25 = vld [vmem:[%s7281_s23 + $0x9b] sm:$0xff] }
  0xa8   : > { %2739 = vrot.lane.b32.xlu0 %v7626_v22, %s7233_s11  ;;  %2741 = vrot.lane.b32.xlu1 %v7629_v23, %s7233_s11 }
  0xaa   : > { %v2732_v26 = vpop.permute.xlu0 %2731  ;;  %v2734_v27 = vpop.permute.xlu1 %2733 }
  0xab   : > { %2827 = vst.msk [vmem:[#allocation2 + $0x8] sm:$0xff] %vm1415_vm6, %v2732_v26  ;;  %2828 = vst.msk [vmem:[#allocation2 + $0x18] sm:$0xff] %vm1415_vm6, %v2734_v27  ;;  %v232_v26 = vld [vmem:[%s7281_s23 + $0x60] sm:$0xff]  ;;  %v233_v27 = vld [vmem:[%s7281_s23 + $0x68] sm:$0xff] }
  0xac   : > { %1327 = vrot.lane.b32.xlu0 %v7426_v38, %s7233_s11  ;;  %1329 = vrot.lane.b32.xlu1 %v7429_v39, %s7233_s11  ;;  %265 = vst.msk [vmem:[#allocation2 + $0x80] sm:$0xff] %vm256_vm0, %v232_v26  ;;  %266 = vst.msk [vmem:[#allocation2 + $0x90] sm:$0xff] %vm256_vm0, %v233_v27 }
  0xae   : > { %v1320_v34 = vpop.permute.xlu0 %1319  ;;  %v1322_v35 = vpop.permute.xlu1 %1321 }
  0xaf   : > { %1416 = vst.msk [vmem:[#allocation2] sm:$0xff] %vm1415_vm6, %v1320_v34  ;;  %1417 = vst.msk [vmem:[#allocation2 + $0x10] sm:$0xff] %vm1415_vm6, %v1322_v35 }
  0xb0   : > { %2931 = vrot.lane.b32.xlu0 %v7644_v28, %s7234_s21  ;;  %2933 = vrot.lane.b32.xlu1 %v7647_v29, %s7234_s21 }
  0xb2   : > { %v2924_v36 = vpop.permute.xlu0 %2923  ;;  %v2926_v37 = vpop.permute.xlu1 %2925 }
  0xb3   : > { %3019 = vst.msk [vmem:[#allocation2 + $0x8] sm:$0xff] %vm1608_vm7, %v2924_v36  ;;  %3020 = vst.msk [vmem:[#allocation2 + $0x18] sm:$0xff] %vm1608_vm7, %v2926_v37 }
  0xb4   : > { %1520 = vrot.lane.b32.xlu0 %v7452_v46, %s7234_s21  ;;  %1522 = vrot.lane.b32.xlu1 %v7455_v47, %s7234_s21 }
  0xb6   : > { %v1513_v40 = vpop.permute.xlu0 %1512  ;;  %v1515_v41 = vpop.permute.xlu1 %1514 }
  0xb7   : > { %1609 = vst.msk [vmem:[#allocation2] sm:$0xff] %vm1608_vm7, %v1513_v40  ;;  %1610 = vst.msk [vmem:[#allocation2 + $0x10] sm:$0xff] %vm1608_vm7, %v1515_v41 }
  0xb8   : > { %1782 = vrot.lane.b32.xlu0 %v7608_v16, %s7228_s24  ;;  %1784 = vrot.lane.b32.xlu1 %v7611_v17, %s7228_s24 }
  0xba   : > { %v1775_v42 = vpop.permute.xlu0 %1774  ;;  %v1777_v43 = vpop.permute.xlu1 %1776  ;;  %v3052_v44 = vld [vmem:[#allocation2 + $0x8] sm:$0xff]  ;;  %v3054_v45 = vld [vmem:[#allocation2 + $0x18] sm:$0xff] }
  0xbb   : > { %1868 = vst.msk [vmem:[#allocation2 + $0x28] sm:$0xff] %vm449_vm1, %v1775_v42  ;;  %1869 = vst.msk [vmem:[#allocation2 + $0x38] sm:$0xff] %vm449_vm1, %v1777_v43  ;;  %v3116_v48 = vpack.c.bf16 %v3054_v45, %v3052_v44 }
  0xbc   : > { %365 = vrot.lane.b32.xlu0 %v7400_v30, %s7228_s24  ;;  %367 = vrot.lane.b32.xlu1 %v7403_v31, %s7228_s24 }
  0xbd   : > { %3307 = vmatprep.mubr.bf16.mxu0 %v3116_v48 }
  0xbe   : > { %v358_v49 = vpop.permute.xlu0 %357  ;;  %v360_v50 = vpop.permute.xlu1 %359  ;;  %v3051_v51 = vld [vmem:[#allocation2] sm:$0xff]  ;;  %v3053_v60 = vld [vmem:[#allocation2 + $0x10] sm:$0xff] }
  0xbf   : > { %452 = vst.msk [vmem:[#allocation2 + $0x20] sm:$0xff] %vm449_vm1, %v358_v49  ;;  %453 = vst.msk [vmem:[#allocation2 + $0x30] sm:$0xff] %vm449_vm1, %v360_v50  ;;  %v3115_v61 = vpack.c.bf16 %v3053_v60, %v3051_v51  ;;  %v7796_v60 = vld [vmem:[%s7281_s23 + $0xd8] sm:$0xff] }
  0xc0   : > { %1974 = vrot.lane.b32.xlu0 %v7626_v22, %s7229_s25  ;;  %1976 = vrot.lane.b32.xlu1 %v7629_v23, %s7229_s25  ;;  %1688 = vst.msk [vmem:[#allocation2 + $0xe8] sm:$0xff] %vm256_vm0, %v7796_v60 }
  0xc1   : > { %3308 = vmatmul.mubr.bf16.vlgmr.msra.gmra.mxu0 %v3115_v61  ;;  %v7799_v61 = vld [vmem:[%s7281_s23 + $0xe0] sm:$0xff] }
  0xc2   : > { %v1967_v30 = vpop.permute.xlu0 %1966  ;;  %v1969_v31 = vpop.permute.xlu1 %1968  ;;  %1689 = vst.msk [vmem:[#allocation2 + $0xf8] sm:$0xff] %vm256_vm0, %v7799_v61 }
  0xc3   : > { %2060 = vst.msk [vmem:[#allocation2 + $0x28] sm:$0xff] %vm642_vm2, %v1967_v30  ;;  %2061 = vst.msk [vmem:[#allocation2 + $0x38] sm:$0xff] %vm642_vm2, %v1969_v31 }
  0xc4   : > { %558 = vrot.lane.b32.xlu0 %v7426_v38, %s7229_s25  ;;  %560 = vrot.lane.b32.xlu1 %v7429_v39, %s7229_s25 }
  0xc6   : > { %v551_v0 = vpop.permute.xlu0 %550  ;;  %v553_v2 = vpop.permute.xlu1 %552 }
  0xc7   : > { %645 = vst.msk [vmem:[#allocation2 + $0x20] sm:$0xff] %vm642_vm2, %v551_v0  ;;  %646 = vst.msk [vmem:[#allocation2 + $0x30] sm:$0xff] %vm642_vm2, %v553_v2 }
  0xc8   : > { %2166 = vrot.lane.b32.xlu0 %v7644_v28, %s7230_s28  ;;  %2168 = vrot.lane.b32.xlu1 %v7647_v29, %s7230_s28 }
  0xca   : > { %v2159_v6 = vpop.permute.xlu0 %2158  ;;  %v2161_v7 = vpop.permute.xlu1 %2160 }
  0xcb   : > { %2252 = vst.msk [vmem:[#allocation2 + $0x28] sm:$0xff] %vm835_vm3, %v2159_v6  ;;  %2253 = vst.msk [vmem:[#allocation2 + $0x38] sm:$0xff] %vm835_vm3, %v2161_v7 }
  0xcc   : > { %751 = vrot.lane.b32.xlu0 %v7452_v46, %s7230_s28  ;;  %753 = vrot.lane.b32.xlu1 %v7455_v47, %s7230_s28  ;;  %v7724_v46 = vld [vmem:[%s7281_s23 + $0x91] sm:$0xff]  ;;  %v7727_v47 = vld [vmem:[%s7281_s23 + $0x99] sm:$0xff] }
  0xce   : > { %v744_v38 = vpop.permute.xlu0 %743  ;;  %v746_v39 = vpop.permute.xlu1 %745 }
  0xcf   : > { %838 = vst.msk [vmem:[#allocation2 + $0x20] sm:$0xff] %vm835_vm3, %v744_v38  ;;  %839 = vst.msk [vmem:[#allocation2 + $0x30] sm:$0xff] %vm835_vm3, %v746_v39 }
  0xd0   : > { %2359 = vrot.lane.b32.xlu0 %v7480_v52, %s7231_s12  ;;  %2361 = vrot.lane.b32.xlu1 %v7483_v53, %s7231_s12 }
  0xd2   : > { %v2352_v10 = vpop.permute.xlu0 %2351  ;;  %v2354_v11 = vpop.permute.xlu1 %2353 }
  0xd3   : > { %2445 = vst.msk [vmem:[#allocation2 + $0x28] sm:$0xff] %vm1029_vm4, %v2352_v10  ;;  %2446 = vst.msk [vmem:[#allocation2 + $0x38] sm:$0xff] %vm1029_vm4, %v2354_v11  ;;  %v7861_v11 = vld [vmem:[%s7281_s23 + $0xb2] sm:$0xff] }
  0xd4   : > { %945 = vrot.lane.b32.xlu0 %v7324_v12, %s7231_s12  ;;  %947 = vrot.lane.b32.xlu1 %v7327_v13, %s7231_s12  ;;  %v7742_v13 = vld [vmem:[%s7281_s23 + $0x92] sm:$0xff] }
  0xd6   : > { %v938_v8 = vpop.permute.xlu0 %937  ;;  %v940_v9 = vpop.permute.xlu1 %939 }
  0xd7   : > { %1032 = vst.msk [vmem:[#allocation2 + $0x20] sm:$0xff] %vm1029_vm4, %v938_v8  ;;  %1033 = vst.msk [vmem:[#allocation2 + $0x30] sm:$0xff] %vm1029_vm4, %v940_v9 }
  0xd8   : > { %2551 = vrot.lane.b32.xlu0 %v7724_v46, %s7232_s26  ;;  %2553 = vrot.lane.b32.xlu1 %v7727_v47, %s7232_s26 }
  0xda   : > { %v2544_v12 = vpop.permute.xlu0 %2543  ;;  %v2546_v14 = vpop.permute.xlu1 %2545 }
  0xdb   : > { %2637 = vst.msk [vmem:[#allocation2 + $0x28] sm:$0xff] %vm1222_vm5, %v2544_v12  ;;  %2638 = vst.msk [vmem:[#allocation2 + $0x38] sm:$0xff] %vm1222_vm5, %v2546_v14 }
  0xdc   : > { %1138 = vrot.lane.b32.xlu0 %v7510_v54, %s7232_s26  ;;  %1140 = vrot.lane.b32.xlu1 %v7513_v55, %s7232_s26 }
  0xde   : > { %v1131_v18 = vpop.permute.xlu0 %1130  ;;  %v1133_v19 = vpop.permute.xlu1 %1132 }
  0xdf   : > { %1225 = vst.msk [vmem:[#allocation2 + $0x20] sm:$0xff] %vm1222_vm5, %v1131_v18  ;;  %1226 = vst.msk [vmem:[#allocation2 + $0x30] sm:$0xff] %vm1222_vm5, %v1133_v19  ;;  %v7876_v18 = vld [vmem:[%s7281_s23 + $0xab] sm:$0xff]  ;;  %v7879_v19 = vld [vmem:[%s7281_s23 + $0xb3] sm:$0xff] }
  0xe0   : > { %2743 = vrot.lane.b32.xlu0 %v7742_v13, %s7233_s11  ;;  %2745 = vrot.lane.b32.xlu1 %v7745_v15, %s7233_s11 }
  0xe2   : > { %v2736_v4 = vpop.permute.xlu0 %2735  ;;  %v2738_v5 = vpop.permute.xlu1 %2737 }
  0xe3   : > { %2829 = vst.msk [vmem:[#allocation2 + $0x28] sm:$0xff] %vm1415_vm6, %v2736_v4  ;;  %2830 = vst.msk [vmem:[#allocation2 + $0x38] sm:$0xff] %vm1415_vm6, %v2738_v5  ;;  %v234_v4 = vld [vmem:[%s7281_s23 + $0x78] sm:$0xff]  ;;  %v235_v5 = vld [vmem:[%s7281_s23 + $0x80] sm:$0xff] }
  0xe4   : > { %1331 = vrot.lane.b32.xlu0 %v7524_v56, %s7233_s11  ;;  %1333 = vrot.lane.b32.xlu1 %v7527_v57, %s7233_s11  ;;  %267 = vst.msk [vmem:[#allocation2 + $0xa0] sm:$0xff] %vm256_vm0, %v234_v4  ;;  %268 = vst.msk [vmem:[#allocation2 + $0xb0] sm:$0xff] %vm256_vm0, %v235_v5  ;;  %v237_v4 = vld [vmem:[%s7281_s23 + $0x98] sm:$0xff] }
  0xe5   : > { %270 = vst.msk [vmem:[#allocation2 + $0xd0] sm:$0xff] %vm256_vm0, %v237_v4 }
  0xe6   : > { %v1324_v32 = vpop.permute.xlu0 %1323  ;;  %v1326_v33 = vpop.permute.xlu1 %1325 }
  0xe7   : > { %1418 = vst.msk [vmem:[#allocation2 + $0x20] sm:$0xff] %vm1415_vm6, %v1324_v32  ;;  %1419 = vst.msk [vmem:[#allocation2 + $0x30] sm:$0xff] %vm1415_vm6, %v1326_v33 }
  0xe8   : > { %2935 = vrot.lane.b32.xlu0 %v7760_v24, %s7234_s21  ;;  %2937 = vrot.lane.b32.xlu1 %v7763_v25, %s7234_s21 }
  0xea   : > { %v2928_v34 = vpop.permute.xlu0 %2927  ;;  %v2930_v35 = vpop.permute.xlu1 %2929 }
  0xeb   : > { %3021 = vst.msk [vmem:[#allocation2 + $0x28] sm:$0xff] %vm1608_vm7, %v2928_v34  ;;  %3022 = vst.msk [vmem:[#allocation2 + $0x38] sm:$0xff] %vm1608_vm7, %v2930_v35 }
  0xec   : > { %1524 = vrot.lane.b32.xlu0 %v7538_v58, %s7234_s21  ;;  %1526 = vrot.lane.b32.xlu1 %v7541_v59, %s7234_s21 }
  0xee   : > { %v1517_v36 = vpop.permute.xlu0 %1516  ;;  %v1519_v37 = vpop.permute.xlu1 %1518 }
  0xef   : > { %1611 = vst.msk [vmem:[#allocation2 + $0x20] sm:$0xff] %vm1608_vm7, %v1517_v36  ;;  %1612 = vst.msk [vmem:[#allocation2 + $0x30] sm:$0xff] %vm1608_vm7, %v1519_v37 }
  0xf0   : > { %1786 = vrot.lane.b32.xlu0 %v7724_v46, %s7228_s24  ;;  %1788 = vrot.lane.b32.xlu1 %v7727_v47, %s7228_s24 }
  0xf2   : > { %v1779_v40 = vpop.permute.xlu0 %1778  ;;  %v1781_v41 = vpop.permute.xlu1 %1780  ;;  %v3056_v42 = vld [vmem:[#allocation2 + $0x28] sm:$0xff]  ;;  %v3058_v43 = vld [vmem:[#allocation2 + $0x38] sm:$0xff] }
  0xf3   : > { %1870 = vst.msk [vmem:[#allocation2 + $0x48] sm:$0xff] %vm449_vm1, %v1779_v40  ;;  %1871 = vst.msk [vmem:[#allocation2 + $0x58] sm:$0xff] %vm449_vm1, %v1781_v41  ;;  %v3118_v44 = vpack.c.bf16 %v3058_v43, %v3056_v42 }
  0xf4   : > { %369 = vrot.lane.b32.xlu0 %v7510_v54, %s7228_s24  ;;  %371 = vrot.lane.b32.xlu1 %v7513_v55, %s7228_s24 }
  0xf5   : > { %3315 = vmatprep.mubr.bf16.mxu0 %v3118_v44 }
  0xf6   : > { %v362_v45 = vpop.permute.xlu0 %361  ;;  %v364_v48 = vpop.permute.xlu1 %363  ;;  %v3055_v49 = vld [vmem:[#allocation2 + $0x20] sm:$0xff]  ;;  %v3057_v50 = vld [vmem:[#allocation2 + $0x30] sm:$0xff] }
  0xf7   : > { %454 = vst.msk [vmem:[#allocation2 + $0x40] sm:$0xff] %vm449_vm1, %v362_v45  ;;  %455 = vst.msk [vmem:[#allocation2 + $0x50] sm:$0xff] %vm449_vm1, %v364_v48  ;;  %v3117_v51 = vpack.c.bf16 %v3057_v50, %v3055_v49  ;;  %v7912_v50 = vld [vmem:[%s7281_s23 + $0xf0] sm:$0xff] }
  0xf8   : > { %1978 = vrot.lane.b32.xlu0 %v7742_v13, %s7229_s25  ;;  %1980 = vrot.lane.b32.xlu1 %v7745_v15, %s7229_s25  ;;  %1690 = vst.msk [vmem:[#allocation2 + $0x108] sm:$0xff] %vm256_vm0, %v7912_v50 }
  0xf9   : > { %3316 = vmatmul.mubr.bf16.gmra.mxu0 %v3117_v51  ;;  %v7915_v51 = vld [vmem:[%s7281_s23 + $0xf8] sm:$0xff] }
  0xfa   : > { %v1971_v54 = vpop.permute.xlu0 %1970  ;;  %v1973_v55 = vpop.permute.xlu1 %1972  ;;  %1691 = vst.msk [vmem:[#allocation2 + $0x118] sm:$0xff] %vm256_vm0, %v7915_v51 }
  0xfb   : > { %2062 = vst.msk [vmem:[#allocation2 + $0x48] sm:$0xff] %vm642_vm2, %v1971_v54  ;;  %2063 = vst.msk [vmem:[#allocation2 + $0x58] sm:$0xff] %vm642_vm2, %v1973_v55 }
  0xfc   : > { %562 = vrot.lane.b32.xlu0 %v7524_v56, %s7229_s25  ;;  %564 = vrot.lane.b32.xlu1 %v7527_v57, %s7229_s25 }
  0xfe   : > { %v555_v30 = vpop.permute.xlu0 %554  ;;  %v557_v31 = vpop.permute.xlu1 %556 }
  0xff   : > { %647 = vst.msk [vmem:[#allocation2 + $0x40] sm:$0xff] %vm642_vm2, %v555_v30  ;;  %648 = vst.msk [vmem:[#allocation2 + $0x50] sm:$0xff] %vm642_vm2, %v557_v31 }
 0x100   : > { %2170 = vrot.lane.b32.xlu0 %v7760_v24, %s7230_s28  ;;  %2172 = vrot.lane.b32.xlu1 %v7763_v25, %s7230_s28 }
 0x102   : > { %v2163_v0 = vpop.permute.xlu0 %2162  ;;  %v2165_v2 = vpop.permute.xlu1 %2164 }
 0x103   : > { %2254 = vst.msk [vmem:[#allocation2 + $0x48] sm:$0xff] %vm835_vm3, %v2163_v0  ;;  %2255 = vst.msk [vmem:[#allocation2 + $0x58] sm:$0xff] %vm835_vm3, %v2165_v2 }
 0x104   : > { %755 = vrot.lane.b32.xlu0 %v7538_v58, %s7230_s28  ;;  %757 = vrot.lane.b32.xlu1 %v7541_v59, %s7230_s28  ;;  %v7840_v58 = vld [vmem:[%s7281_s23 + $0xa9] sm:$0xff]  ;;  %v7843_v59 = vld [vmem:[%s7281_s23 + $0xb1] sm:$0xff] }
 0x106   : > { %v748_v56 = vpop.permute.xlu0 %747  ;;  %v750_v57 = vpop.permute.xlu1 %749 }
 0x107   : > { %840 = vst.msk [vmem:[#allocation2 + $0x40] sm:$0xff] %vm835_vm3, %v748_v56  ;;  %841 = vst.msk [vmem:[#allocation2 + $0x50] sm:$0xff] %vm835_vm3, %v750_v57  ;;  %v7235_v56 = vmov 0.0  }
 0x108   : > { %2363 = vrot.lane.b32.xlu0 %v7564_v1, %s7231_s12  ;;  %2365 = vrot.lane.b32.xlu1 %v7567_v3, %s7231_s12  ;;  %3575 = vst.msk [vmem:[#allocation4 + $0x10] sm:$0xff] %vm256_vm0, %v7235_v56  ;;  %3572 = vst.msk [vmem:[#allocation4] sm:$0xff] %vm256_vm0, %v7235_v56 }
 0x109   : > { %3577 = vst.msk [vmem:[#allocation4 + $0x20] sm:$0xff] %vm256_vm0, %v7235_v56  ;;  %3579 = vst.msk [vmem:[#allocation4 + $0x30] sm:$0xff] %vm256_vm0, %v7235_v56 }
 0x10a   : > { %v2356_v6 = vpop.permute.xlu0 %2355  ;;  %v2358_v7 = vpop.permute.xlu1 %2357  ;;  %3581 = vst.msk [vmem:[#allocation4 + $0x40] sm:$0xff] %vm256_vm0, %v7235_v56  ;;  %3583 = vst.msk [vmem:[#allocation4 + $0x50] sm:$0xff] %vm256_vm0, %v7235_v56 }
 0x10b   : > { %2447 = vst.msk [vmem:[#allocation2 + $0x48] sm:$0xff] %vm1029_vm4, %v2356_v6  ;;  %2448 = vst.msk [vmem:[#allocation2 + $0x58] sm:$0xff] %vm1029_vm4, %v2358_v7  ;;  %v7984_v7 = vld [vmem:[%s7281_s23 + $0xc2] sm:$0xff] }
 0x10c   : > { %949 = vrot.lane.b32.xlu0 %v7358_v20, %s7231_s12  ;;  %951 = vrot.lane.b32.xlu1 %v7363_v21, %s7231_s12  ;;  %v7858_v21 = vld [vmem:[%s7281_s23 + $0xaa] sm:$0xff]  ;;  %3585 = vst.msk [vmem:[#allocation4 + $0x60] sm:$0xff] %vm256_vm0, %v7235_v56  ;;  %3587 = vst.msk [vmem:[#allocation4 + $0x70] sm:$0xff] %vm256_vm0, %v7235_v56 }
 0x10d   : > { %3589 = vst.msk [vmem:[#allocation4 + $0x80] sm:$0xff] %vm256_vm0, %v7235_v56  ;;  %3591 = vst.msk [vmem:[#allocation4 + $0x90] sm:$0xff] %vm256_vm0, %v7235_v56 }
 0x10e   : > { %v942_v38 = vpop.permute.xlu0 %941  ;;  %v944_v39 = vpop.permute.xlu1 %943  ;;  %3576 = vst.msk [vmem:[#allocation4 + $0x18] sm:$0x3] %vm3573_vm8, %v7235_v56  ;;  %3574 = vst.msk [vmem:[#allocation4 + $0x8] sm:$0x3] %vm3573_vm8, %v7235_v56 }
 0x10f   : > { %1034 = vst.msk [vmem:[#allocation2 + $0x40] sm:$0xff] %vm1029_vm4, %v942_v38  ;;  %1035 = vst.msk [vmem:[#allocation2 + $0x50] sm:$0xff] %vm1029_vm4, %v944_v39  ;;  %v7987_v38 = vld [vmem:[%s7281_s23 + $0xca] sm:$0xff] }
 0x110   : > { %2555 = vrot.lane.b32.xlu0 %v7840_v58, %s7232_s26  ;;  %2557 = vrot.lane.b32.xlu1 %v7843_v59, %s7232_s26  ;;  %3578 = vst.msk [vmem:[#allocation4 + $0x28] sm:$0x3] %vm3573_vm8, %v7235_v56  ;;  %3580 = vst.msk [vmem:[#allocation4 + $0x38] sm:$0x3] %vm3573_vm8, %v7235_v56 }
 0x111   : > { %3582 = vst.msk [vmem:[#allocation4 + $0x48] sm:$0x3] %vm3573_vm8, %v7235_v56  ;;  %3584 = vst.msk [vmem:[#allocation4 + $0x58] sm:$0x3] %vm3573_vm8, %v7235_v56 }
 0x112   : > { %v2548_v20 = vpop.permute.xlu0 %2547  ;;  %v2550_v10 = vpop.permute.xlu1 %2549  ;;  %3586 = vst.msk [vmem:[#allocation4 + $0x68] sm:$0x3] %vm3573_vm8, %v7235_v56  ;;  %3588 = vst.msk [vmem:[#allocation4 + $0x78] sm:$0x3] %vm3573_vm8, %v7235_v56 }
 0x113   : > { %2639 = vst.msk [vmem:[#allocation2 + $0x48] sm:$0xff] %vm1222_vm5, %v2548_v20  ;;  %2640 = vst.msk [vmem:[#allocation2 + $0x58] sm:$0xff] %vm1222_vm5, %v2550_v10 }
 0x114   : > { %1142 = vrot.lane.b32.xlu0 %v7608_v16, %s7232_s26  ;;  %1144 = vrot.lane.b32.xlu1 %v7611_v17, %s7232_s26  ;;  %3590 = vst.msk [vmem:[#allocation4 + $0x88] sm:$0x3] %vm3573_vm8, %v7235_v56  ;;  %3592 = vst.msk [vmem:[#allocation4 + $0x98] sm:$0x3] %vm3573_vm8, %v7235_v56  ;;  %v8103_v56 = vld [vmem:[%s7281_s23 + $0xe2] sm:$0xff]  ;;  %vm6182_vm8 = vcmask 1043459  }
 0x116   : > { %v1135_v8 = vpop.permute.xlu0 %1134  ;;  %v1137_v9 = vpop.permute.xlu1 %1136 }
 0x117   : > { %1227 = vst.msk [vmem:[#allocation2 + $0x40] sm:$0xff] %vm1222_vm5, %v1135_v8  ;;  %1228 = vst.msk [vmem:[#allocation2 + $0x50] sm:$0xff] %vm1222_vm5, %v1137_v9  ;;  %v8002_v9 = vld [vmem:[%s7281_s23 + $0xc3] sm:$0xff] }
 0x118   : > { %2747 = vrot.lane.b32.xlu0 %v7858_v21, %s7233_s11  ;;  %2749 = vrot.lane.b32.xlu1 %v7861_v11, %s7233_s11 }
 0x11a   : > { %v2740_v12 = vpop.permute.xlu0 %2739  ;;  %v2742_v14 = vpop.permute.xlu1 %2741 }
 0x11b   : > { %2831 = vst.msk [vmem:[#allocation2 + $0x48] sm:$0xff] %vm1415_vm6, %v2740_v12  ;;  %2832 = vst.msk [vmem:[#allocation2 + $0x58] sm:$0xff] %vm1415_vm6, %v2742_v14  ;;  %v8005_v12 = vld [vmem:[%s7281_s23 + $0xcb] sm:$0xff] }
 0x11c   : > { %1335 = vrot.lane.b32.xlu0 %v7626_v22, %s7233_s11  ;;  %1337 = vrot.lane.b32.xlu1 %v7629_v23, %s7233_s11  ;;  %v236_v14 = vld [vmem:[%s7281_s23 + $0x90] sm:$0xff] }
 0x11d   : > { %269 = vst.msk [vmem:[#allocation2 + $0xc0] sm:$0xff] %vm256_vm0, %v236_v14 }
 0x11e   : > { %v1328_v26 = vpop.permute.xlu0 %1327  ;;  %v1330_v27 = vpop.permute.xlu1 %1329 }
 0x11f   : > { %1420 = vst.msk [vmem:[#allocation2 + $0x40] sm:$0xff] %vm1415_vm6, %v1328_v26  ;;  %1421 = vst.msk [vmem:[#allocation2 + $0x50] sm:$0xff] %vm1415_vm6, %v1330_v27 }
 0x120   : > { %2939 = vrot.lane.b32.xlu0 %v7876_v18, %s7234_s21  ;;  %2941 = vrot.lane.b32.xlu1 %v7879_v19, %s7234_s21 }
 0x122   : > { %v2932_v32 = vpop.permute.xlu0 %2931  ;;  %v2934_v33 = vpop.permute.xlu1 %2933 }
 0x123   : > { %3023 = vst.msk [vmem:[#allocation2 + $0x48] sm:$0xff] %vm1608_vm7, %v2932_v32  ;;  %3024 = vst.msk [vmem:[#allocation2 + $0x58] sm:$0xff] %vm1608_vm7, %v2934_v33 }
 0x124   : > { %1528 = vrot.lane.b32.xlu0 %v7644_v28, %s7234_s21  ;;  %1530 = vrot.lane.b32.xlu1 %v7647_v29, %s7234_s21 }
 0x126   : > { %v1521_v34 = vpop.permute.xlu0 %1520  ;;  %v1523_v35 = vpop.permute.xlu1 %1522 }
 0x127   : > { %1613 = vst.msk [vmem:[#allocation2 + $0x40] sm:$0xff] %vm1608_vm7, %v1521_v34  ;;  %1614 = vst.msk [vmem:[#allocation2 + $0x50] sm:$0xff] %vm1608_vm7, %v1523_v35 }
 0x128   : > { %1790 = vrot.lane.b32.xlu0 %v7840_v58, %s7228_s24  ;;  %1792 = vrot.lane.b32.xlu1 %v7843_v59, %s7228_s24 }
 0x12a   : > { %v1783_v36 = vpop.permute.xlu0 %1782  ;;  %v1785_v37 = vpop.permute.xlu1 %1784  ;;  %v3060_v40 = vld [vmem:[#allocation2 + $0x48] sm:$0xff]  ;;  %v3062_v41 = vld [vmem:[#allocation2 + $0x58] sm:$0xff] }
 0x12b   : > { %1872 = vst.msk [vmem:[#allocation2 + $0x68] sm:$0xff] %vm449_vm1, %v1783_v36  ;;  %1873 = vst.msk [vmem:[#allocation2 + $0x78] sm:$0xff] %vm449_vm1, %v1785_v37  ;;  %v3120_v42 = vpack.c.bf16 %v3062_v41, %v3060_v40 }
 0x12c   : > { %373 = vrot.lane.b32.xlu0 %v7608_v16, %s7228_s24  ;;  %375 = vrot.lane.b32.xlu1 %v7611_v17, %s7228_s24 }
 0x12d   : > { %3323 = vmatprep.mubr.bf16.mxu0 %v3120_v42 }
 0x12e   : > { %v366_v43 = vpop.permute.xlu0 %365  ;;  %v368_v44 = vpop.permute.xlu1 %367  ;;  %v3059_v45 = vld [vmem:[#allocation2 + $0x40] sm:$0xff]  ;;  %v3061_v48 = vld [vmem:[#allocation2 + $0x50] sm:$0xff] }
 0x12f   : > { %456 = vst.msk [vmem:[#allocation2 + $0x60] sm:$0xff] %vm449_vm1, %v366_v43  ;;  %457 = vst.msk [vmem:[#allocation2 + $0x70] sm:$0xff] %vm449_vm1, %v368_v44  ;;  %v3119_v49 = vpack.c.bf16 %v3061_v48, %v3059_v45 }
 0x130   : > { %1982 = vrot.lane.b32.xlu0 %v7858_v21, %s7229_s25  ;;  %1984 = vrot.lane.b32.xlu1 %v7861_v11, %s7229_s25 }
 0x131   : > { %3324 = vmatmul.mubr.bf16.gmra.mxu0 %v3119_v49  ;;  %v8038_v49 = vld [vmem:[%s7281_s23 + $0x108] sm:$0xff] }
 0x132   : > { %v1975_v16 = vpop.permute.xlu0 %1974  ;;  %v1977_v17 = vpop.permute.xlu1 %1976  ;;  %1692 = vst.msk [vmem:[#allocation2 + $0x128] sm:$0xff] %vm256_vm0, %v8038_v49 }
 0x133   : > { %2064 = vst.msk [vmem:[#allocation2 + $0x68] sm:$0xff] %vm642_vm2, %v1975_v16  ;;  %2065 = vst.msk [vmem:[#allocation2 + $0x78] sm:$0xff] %vm642_vm2, %v1977_v17  ;;  %v8041_v16 = vld [vmem:[%s7281_s23 + $0x110] sm:$0xff] }
 0x134   : > { %566 = vrot.lane.b32.xlu0 %v7626_v22, %s7229_s25  ;;  %568 = vrot.lane.b32.xlu1 %v7629_v23, %s7229_s25  ;;  %1693 = vst.msk [vmem:[#allocation2 + $0x138] sm:$0xff] %vm256_vm0, %v8041_v16 }
 0x136   : > { %v559_v54 = vpop.permute.xlu0 %558  ;;  %v561_v55 = vpop.permute.xlu1 %560 }
 0x137   : > { %649 = vst.msk [vmem:[#allocation2 + $0x60] sm:$0xff] %vm642_vm2, %v559_v54  ;;  %650 = vst.msk [vmem:[#allocation2 + $0x70] sm:$0xff] %vm642_vm2, %v561_v55 }
 0x138   : > { %2174 = vrot.lane.b32.xlu0 %v7876_v18, %s7230_s28  ;;  %2176 = vrot.lane.b32.xlu1 %v7879_v19, %s7230_s28 }
 0x13a   : > { %v2167_v30 = vpop.permute.xlu0 %2166  ;;  %v2169_v31 = vpop.permute.xlu1 %2168 }
 0x13b   : > { %2256 = vst.msk [vmem:[#allocation2 + $0x68] sm:$0xff] %vm835_vm3, %v2167_v30  ;;  %2257 = vst.msk [vmem:[#allocation2 + $0x78] sm:$0xff] %vm835_vm3, %v2169_v31 }
 0x13c   : > { %759 = vrot.lane.b32.xlu0 %v7644_v28, %s7230_s28  ;;  %761 = vrot.lane.b32.xlu1 %v7647_v29, %s7230_s28  ;;  %v7956_v28 = vld [vmem:[%s7281_s23 + $0xc1] sm:$0xff]  ;;  %v7959_v29 = vld [vmem:[%s7281_s23 + $0xc9] sm:$0xff] }
 0x13e   : > { %v752_v22 = vpop.permute.xlu0 %751  ;;  %v754_v23 = vpop.permute.xlu1 %753 }
 0x13f   : > { %842 = vst.msk [vmem:[#allocation2 + $0x60] sm:$0xff] %vm835_vm3, %v752_v22  ;;  %843 = vst.msk [vmem:[#allocation2 + $0x70] sm:$0xff] %vm835_vm3, %v754_v23 }
 0x140   : > { %2367 = vrot.lane.b32.xlu0 %v7680_v62, %s7231_s12  ;;  %2369 = vrot.lane.b32.xlu1 %v7683_v63, %s7231_s12 }
 0x142   : > { %v2360_v0 = vpop.permute.xlu0 %2359  ;;  %v2362_v2 = vpop.permute.xlu1 %2361 }
 0x143   : > { %2449 = vst.msk [vmem:[#allocation2 + $0x68] sm:$0xff] %vm1029_vm4, %v2360_v0  ;;  %2450 = vst.msk [vmem:[#allocation2 + $0x78] sm:$0xff] %vm1029_vm4, %v2362_v2 }
 0x144   : > { %953 = vrot.lane.b32.xlu0 %v7480_v52, %s7231_s12  ;;  %955 = vrot.lane.b32.xlu1 %v7483_v53, %s7231_s12 }
 0x146   : > { %v946_v52 = vpop.permute.xlu0 %945  ;;  %v948_v53 = vpop.permute.xlu1 %947 }
 0x147   : > { %1036 = vst.msk [vmem:[#allocation2 + $0x60] sm:$0xff] %vm1029_vm4, %v946_v52  ;;  %1037 = vst.msk [vmem:[#allocation2 + $0x70] sm:$0xff] %vm1029_vm4, %v948_v53 }
 0x148   : > { %2559 = vrot.lane.b32.xlu0 %v7956_v28, %s7232_s26  ;;  %2561 = vrot.lane.b32.xlu1 %v7959_v29, %s7232_s26 }
 0x14a   : > { %v2552_v57 = vpop.permute.xlu0 %2551  ;;  %v2554_v6 = vpop.permute.xlu1 %2553 }
 0x14b   : > { %2641 = vst.msk [vmem:[#allocation2 + $0x68] sm:$0xff] %vm1222_vm5, %v2552_v57  ;;  %2642 = vst.msk [vmem:[#allocation2 + $0x78] sm:$0xff] %vm1222_vm5, %v2554_v6 }
 0x14c   : > { %1146 = vrot.lane.b32.xlu0 %v7724_v46, %s7232_s26  ;;  %1148 = vrot.lane.b32.xlu1 %v7727_v47, %s7232_s26 }
 0x14e   : > { %v1139_v39 = vpop.permute.xlu0 %1138  ;;  %v1141_v20 = vpop.permute.xlu1 %1140 }
 0x14f   : > { %1229 = vst.msk [vmem:[#allocation2 + $0x60] sm:$0xff] %vm1222_vm5, %v1139_v39  ;;  %1230 = vst.msk [vmem:[#allocation2 + $0x70] sm:$0xff] %vm1222_vm5, %v1141_v20  ;;  %v8118_v39 = vld [vmem:[%s7281_s23 + $0xdb] sm:$0xff]  ;;  %v8121_v20 = vld [vmem:[%s7281_s23 + $0xe3] sm:$0xff] }
 0x150   : > { %2751 = vrot.lane.b32.xlu0 %v7984_v7, %s7233_s11  ;;  %2753 = vrot.lane.b32.xlu1 %v7987_v38, %s7233_s11 }
 0x152   : > { %v2744_v10 = vpop.permute.xlu0 %2743  ;;  %v2746_v8 = vpop.permute.xlu1 %2745 }
 0x153   : > { %2833 = vst.msk [vmem:[#allocation2 + $0x68] sm:$0xff] %vm1415_vm6, %v2744_v10  ;;  %2834 = vst.msk [vmem:[#allocation2 + $0x78] sm:$0xff] %vm1415_vm6, %v2746_v8  ;;  %v238_v10 = vld [vmem:[%s7281_s23 + $0xa8] sm:$0xff]  ;;  %v239_v8 = vld [vmem:[%s7281_s23 + $0xb0] sm:$0xff] }
 0x154   : > { %1339 = vrot.lane.b32.xlu0 %v7742_v13, %s7233_s11  ;;  %1341 = vrot.lane.b32.xlu1 %v7745_v15, %s7233_s11  ;;  %271 = vst.msk [vmem:[#allocation2 + $0xe0] sm:$0xff] %vm256_vm0, %v238_v10  ;;  %272 = vst.msk [vmem:[#allocation2 + $0xf0] sm:$0xff] %vm256_vm0, %v239_v8 }
 0x156   : > { %v1332_v5 = vpop.permute.xlu0 %1331  ;;  %v1334_v26 = vpop.permute.xlu1 %1333 }
 0x157   : > { %1422 = vst.msk [vmem:[#allocation2 + $0x60] sm:$0xff] %vm1415_vm6, %v1332_v5  ;;  %1423 = vst.msk [vmem:[#allocation2 + $0x70] sm:$0xff] %vm1415_vm6, %v1334_v26 }
 0x158   : > { %2943 = vrot.lane.b32.xlu0 %v8002_v9, %s7234_s21  ;;  %2945 = vrot.lane.b32.xlu1 %v8005_v12, %s7234_s21 }
 0x15a   : > { %v2936_v27 = vpop.permute.xlu0 %2935  ;;  %v2938_v32 = vpop.permute.xlu1 %2937 }
 0x15b   : > { %3025 = vst.msk [vmem:[#allocation2 + $0x68] sm:$0xff] %vm1608_vm7, %v2936_v27  ;;  %3026 = vst.msk [vmem:[#allocation2 + $0x78] sm:$0xff] %vm1608_vm7, %v2938_v32 }
 0x15c   : > { %1532 = vrot.lane.b32.xlu0 %v7760_v24, %s7234_s21  ;;  %1534 = vrot.lane.b32.xlu1 %v7763_v25, %s7234_s21 }
 0x15e   : > { %v1525_v33 = vpop.permute.xlu0 %1524  ;;  %v1527_v34 = vpop.permute.xlu1 %1526 }
 0x15f   : > { %1615 = vst.msk [vmem:[#allocation2 + $0x60] sm:$0xff] %vm1608_vm7, %v1525_v33  ;;  %1616 = vst.msk [vmem:[#allocation2 + $0x70] sm:$0xff] %vm1608_vm7, %v1527_v34 }
 0x160   : > { %1794 = vrot.lane.b32.xlu0 %v7956_v28, %s7228_s24  ;;  %1796 = vrot.lane.b32.xlu1 %v7959_v29, %s7228_s24 }
 0x162   : > { %v1787_v35 = vpop.permute.xlu0 %1786  ;;  %v1789_v36 = vpop.permute.xlu1 %1788  ;;  %v3064_v37 = vld [vmem:[#allocation2 + $0x68] sm:$0xff]  ;;  %v3066_v40 = vld [vmem:[#allocation2 + $0x78] sm:$0xff] }
 0x163   : > { %1874 = vst.msk [vmem:[#allocation2 + $0x88] sm:$0xff] %vm449_vm1, %v1787_v35  ;;  %1875 = vst.msk [vmem:[#allocation2 + $0x98] sm:$0xff] %vm449_vm1, %v1789_v36  ;;  %v3122_v41 = vpack.c.bf16 %v3066_v40, %v3064_v37 }
 0x164   : > { %377 = vrot.lane.b32.xlu0 %v7724_v46, %s7228_s24  ;;  %379 = vrot.lane.b32.xlu1 %v7727_v47, %s7228_s24 }
 0x165   : > { %3331 = vmatprep.mubr.bf16.mxu0 %v3122_v41 }
 0x166   : > { %v370_v42 = vpop.permute.xlu0 %369  ;;  %v372_v43 = vpop.permute.xlu1 %371  ;;  %v3063_v44 = vld [vmem:[#allocation2 + $0x60] sm:$0xff]  ;;  %v3065_v45 = vld [vmem:[#allocation2 + $0x70] sm:$0xff] }
 0x167   : > { %458 = vst.msk [vmem:[#allocation2 + $0x80] sm:$0xff] %vm449_vm1, %v370_v42  ;;  %459 = vst.msk [vmem:[#allocation2 + $0x90] sm:$0xff] %vm449_vm1, %v372_v43  ;;  %v3121_v48 = vpack.c.bf16 %v3065_v45, %v3063_v44  ;;  %v8154_v45 = vld [vmem:[%s7281_s23 + $0x120] sm:$0xff] }
 0x168   : > { %1986 = vrot.lane.b32.xlu0 %v7984_v7, %s7229_s25  ;;  %1988 = vrot.lane.b32.xlu1 %v7987_v38, %s7229_s25  ;;  %1694 = vst.msk [vmem:[#allocation2 + $0x148] sm:$0xff] %vm256_vm0, %v8154_v45 }
 0x169   : > { %3332 = vmatmul.mubr.bf16.gmra.mxu0 %v3121_v48  ;;  %v8157_v48 = vld [vmem:[%s7281_s23 + $0x128] sm:$0xff] }
 0x16a   : > { %v1979_v46 = vpop.permute.xlu0 %1978  ;;  %v1981_v47 = vpop.permute.xlu1 %1980  ;;  %1695 = vst.msk [vmem:[#allocation2 + $0x158] sm:$0xff] %vm256_vm0, %v8157_v48 }
 0x16b   : > { %2066 = vst.msk [vmem:[#allocation2 + $0x88] sm:$0xff] %vm642_vm2, %v1979_v46  ;;  %2067 = vst.msk [vmem:[#allocation2 + $0x98] sm:$0xff] %vm642_vm2, %v1981_v47 }
 0x16c   : > { %570 = vrot.lane.b32.xlu0 %v7742_v13, %s7229_s25  ;;  %572 = vrot.lane.b32.xlu1 %v7745_v15, %s7229_s25 }
 0x16e   : > { %v563_v17 = vpop.permute.xlu0 %562  ;;  %v565_v54 = vpop.permute.xlu1 %564 }
 0x16f   : > { %651 = vst.msk [vmem:[#allocation2 + $0x80] sm:$0xff] %vm642_vm2, %v563_v17  ;;  %652 = vst.msk [vmem:[#allocation2 + $0x90] sm:$0xff] %vm642_vm2, %v565_v54 }
 0x170   : > { %2178 = vrot.lane.b32.xlu0 %v8002_v9, %s7230_s28  ;;  %2180 = vrot.lane.b32.xlu1 %v8005_v12, %s7230_s28 }
 0x172   : > { %v2171_v55 = vpop.permute.xlu0 %2170  ;;  %v2173_v30 = vpop.permute.xlu1 %2172 }
 0x173   : > { %2258 = vst.msk [vmem:[#allocation2 + $0x88] sm:$0xff] %vm835_vm3, %v2171_v55  ;;  %2259 = vst.msk [vmem:[#allocation2 + $0x98] sm:$0xff] %vm835_vm3, %v2173_v30 }
 0x174   : > { %763 = vrot.lane.b32.xlu0 %v7760_v24, %s7230_s28  ;;  %765 = vrot.lane.b32.xlu1 %v7763_v25, %s7230_s28  ;;  %v8082_v24 = vld [vmem:[%s7281_s23 + $0xd9] sm:$0xff]  ;;  %v8085_v25 = vld [vmem:[%s7281_s23 + $0xe1] sm:$0xff] }
 0x176   : > { %v756_v13 = vpop.permute.xlu0 %755  ;;  %v758_v15 = vpop.permute.xlu1 %757 }
 0x177   : > { %844 = vst.msk [vmem:[#allocation2 + $0x80] sm:$0xff] %vm835_vm3, %v756_v13  ;;  %845 = vst.msk [vmem:[#allocation2 + $0x90] sm:$0xff] %vm835_vm3, %v758_v15 }
 0x178   : > { %2371 = vrot.lane.b32.xlu0 %v7796_v60, %s7231_s12  ;;  %2373 = vrot.lane.b32.xlu1 %v7799_v61, %s7231_s12 }
 0x17a   : > { %v2364_v31 = vpop.permute.xlu0 %2363  ;;  %v2366_v22 = vpop.permute.xlu1 %2365 }
 0x17b   : > { %2451 = vst.msk [vmem:[#allocation2 + $0x88] sm:$0xff] %vm1029_vm4, %v2364_v31  ;;  %2452 = vst.msk [vmem:[#allocation2 + $0x98] sm:$0xff] %vm1029_vm4, %v2366_v22  ;;  %v8201_v31 = vld [vmem:[%s7281_s23 + $0xf9] sm:$0xff] }
 0x17c   : > { %957 = vrot.lane.b32.xlu0 %v7564_v1, %s7231_s12  ;;  %959 = vrot.lane.b32.xlu1 %v7567_v3, %s7231_s12  ;;  %v8100_v3 = vld [vmem:[%s7281_s23 + $0xda] sm:$0xff] }
 0x17e   : > { %v950_v23 = vpop.permute.xlu0 %949  ;;  %v952_v0 = vpop.permute.xlu1 %951 }
 0x17f   : > { %1038 = vst.msk [vmem:[#allocation2 + $0x80] sm:$0xff] %vm1029_vm4, %v950_v23  ;;  %1039 = vst.msk [vmem:[#allocation2 + $0x90] sm:$0xff] %vm1029_vm4, %v952_v0 }
 0x180   : > { %2563 = vrot.lane.b32.xlu0 %v8082_v24, %s7232_s26  ;;  %2565 = vrot.lane.b32.xlu1 %v8085_v25, %s7232_s26 }
 0x181   : > { %v7030_v55 = vpop.f32.mrf.mxu0 }
 0x182   : > { %v2556_v1 = vpop.permute.xlu0 %2555  ;;  %v2558_v2 = vpop.permute.xlu1 %2557 }
 0x183   : > { %2643 = vst.msk [vmem:[#allocation2 + $0x88] sm:$0xff] %vm1222_vm5, %v2556_v1  ;;  %2644 = vst.msk [vmem:[#allocation2 + $0x98] sm:$0xff] %vm1222_vm5, %v2558_v2  ;;  %v7031_v30 = vpop.f32.mrf.mxu0  ;;  %v8206_v1 = vld [vmem:[%s10565_s3] ss:$0 sm:$0xff] }
 0x184   : > { %1150 = vrot.lane.b32.xlu0 %v7840_v58, %s7232_s26  ;;  %1152 = vrot.lane.b32.xlu1 %v7843_v59, %s7232_s26  ;;  %v7032_v22 = vadd.f32 %v7031_v30, %v7030_v55  ;;  %v241_v55 = vld [vmem:[%s7281_s23 + $0xc8] sm:$0xff] }
 0x185   : > { %v7033_v15 = vpop.f32.mrf.mxu0  ;;  %274 = vst.msk [vmem:[#allocation2 + $0x110] sm:$0xff] %vm256_vm0, %v241_v55 }
 0x186   : > { %v1143_v52 = vpop.permute.xlu0 %1142  ;;  %v1145_v53 = vpop.permute.xlu1 %1144 }
 0x187   : > { %1231 = vst.msk [vmem:[#allocation2 + $0x80] sm:$0xff] %vm1222_vm5, %v1143_v52  ;;  %1232 = vst.msk [vmem:[#allocation2 + $0x90] sm:$0xff] %vm1222_vm5, %v1145_v53  ;;  %v7034_v2 = vpop.f32.mrf.mxu0 }
 0x188   : > { %2755 = vrot.lane.b32.xlu0 %v8100_v3, %s7233_s11  ;;  %2757 = vrot.lane.b32.xlu1 %v8103_v56, %s7233_s11  ;;  %v7035_v52 = vadd.f32 %v7034_v2, %v7033_v15 }
 0x18a   : > { %v2748_v57 = vpop.permute.xlu0 %2747  ;;  %v2750_v6 = vpop.permute.xlu1 %2749 }
 0x18b   : > { %2835 = vst.msk [vmem:[#allocation2 + $0x88] sm:$0xff] %vm1415_vm6, %v2748_v57  ;;  %2836 = vst.msk [vmem:[#allocation2 + $0x98] sm:$0xff] %vm1415_vm6, %v2750_v6  ;;  %v8218_v6 = vld [vmem:[%s10566_s4] ss:$0 sm:$0xff] }
 0x18c   : > { %1343 = vrot.lane.b32.xlu0 %v7858_v21, %s7233_s11  ;;  %1345 = vrot.lane.b32.xlu1 %v7861_v11, %s7233_s11 }
 0x18e   : > { %v1336_v14 = vpop.permute.xlu0 %1335  ;;  %v1338_v4 = vpop.permute.xlu1 %1337 }
 0x18f   : > { %1424 = vst.msk [vmem:[#allocation2 + $0x80] sm:$0xff] %vm1415_vm6, %v1336_v14  ;;  %1425 = vst.msk [vmem:[#allocation2 + $0x90] sm:$0xff] %vm1415_vm6, %v1338_v4  ;;  %v8227_v4 = vld [vmem:[%s7281_s23 + $0xf2] sm:$0xff] }
 0x190   : > { %2947 = vrot.lane.b32.xlu0 %v8118_v39, %s7234_s21  ;;  %2949 = vrot.lane.b32.xlu1 %v8121_v20, %s7234_s21 }
 0x192   : > { %v2940_v5 = vpop.permute.xlu0 %2939  ;;  %v2942_v26 = vpop.permute.xlu1 %2941 }
 0x193   : > { %3027 = vst.msk [vmem:[#allocation2 + $0x88] sm:$0xff] %vm1608_vm7, %v2940_v5  ;;  %3028 = vst.msk [vmem:[#allocation2 + $0x98] sm:$0xff] %vm1608_vm7, %v2942_v26  ;;  %v8230_v5 = vld [vmem:[%s7281_s23 + $0xfa] sm:$0xff] }
 0x194   : > { %1536 = vrot.lane.b32.xlu0 %v7876_v18, %s7234_s21  ;;  %1538 = vrot.lane.b32.xlu1 %v7879_v19, %s7234_s21 }
 0x196   : > { %v1529_v27 = vpop.permute.xlu0 %1528  ;;  %v1531_v32 = vpop.permute.xlu1 %1530 }
 0x197   : > { %1617 = vst.msk [vmem:[#allocation2 + $0x80] sm:$0xff] %vm1608_vm7, %v1529_v27  ;;  %1618 = vst.msk [vmem:[#allocation2 + $0x90] sm:$0xff] %vm1608_vm7, %v1531_v32  ;;  %v3442_v27 = vmul.f32 %v7035_v52, %v8206_v1 }
 0x198   : > { %1798 = vrot.lane.b32.xlu0 %v8082_v24, %s7228_s24  ;;  %1800 = vrot.lane.b32.xlu1 %v8085_v25, %s7228_s24 }
 0x19a   : > { %v1791_v33 = vpop.permute.xlu0 %1790  ;;  %v1793_v34 = vpop.permute.xlu1 %1792  ;;  %v3068_v35 = vld [vmem:[#allocation2 + $0x88] sm:$0xff]  ;;  %v3070_v36 = vld [vmem:[#allocation2 + $0x98] sm:$0xff] }
 0x19b   : > { %1876 = vst.msk [vmem:[#allocation2 + $0xa8] sm:$0xff] %vm449_vm1, %v1791_v33  ;;  %1877 = vst.msk [vmem:[#allocation2 + $0xb8] sm:$0xff] %vm449_vm1, %v1793_v34  ;;  %v3124_v37 = vpack.c.bf16 %v3070_v36, %v3068_v35 }
 0x19c   : > { %381 = vrot.lane.b32.xlu0 %v7840_v58, %s7228_s24  ;;  %383 = vrot.lane.b32.xlu1 %v7843_v59, %s7228_s24 }
 0x19d   : > { %3339 = vmatprep.mubr.bf16.mxu0 %v3124_v37 }
 0x19e   : > { %v374_v40 = vpop.permute.xlu0 %373  ;;  %v376_v41 = vpop.permute.xlu1 %375  ;;  %v3067_v42 = vld [vmem:[#allocation2 + $0x80] sm:$0xff]  ;;  %v3069_v43 = vld [vmem:[#allocation2 + $0x90] sm:$0xff] }
 0x19f   : > { %460 = vst.msk [vmem:[#allocation2 + $0xa0] sm:$0xff] %vm449_vm1, %v374_v40  ;;  %461 = vst.msk [vmem:[#allocation2 + $0xb0] sm:$0xff] %vm449_vm1, %v376_v41  ;;  %v3123_v44 = vpack.c.bf16 %v3069_v43, %v3067_v42  ;;  %v3479_v41 = vadd.f32 %v8218_v6, %v3442_v27 }
 0x1a0   : > { %1990 = vrot.lane.b32.xlu0 %v8100_v3, %s7229_s25  ;;  %1992 = vrot.lane.b32.xlu1 %v8103_v56, %s7229_s25 }
 0x1a1   : > { %3340 = vmatmul.mubr.bf16.gmra.mxu0 %v3123_v44 }
 0x1a2   : > { %v1983_v58 = vpop.permute.xlu0 %1982  ;;  %v1985_v59 = vpop.permute.xlu1 %1984 }
 0x1a3   : > { %2068 = vst.msk [vmem:[#allocation2 + $0xa8] sm:$0xff] %vm642_vm2, %v1983_v58  ;;  %2069 = vst.msk [vmem:[#allocation2 + $0xb8] sm:$0xff] %vm642_vm2, %v1985_v59 }
 0x1a4   : > { %574 = vrot.lane.b32.xlu0 %v7858_v21, %s7229_s25  ;;  %576 = vrot.lane.b32.xlu1 %v7861_v11, %s7229_s25 }
 0x1a6   : > { %v567_v46 = vpop.permute.xlu0 %566  ;;  %v569_v47 = vpop.permute.xlu1 %568 }
 0x1a7   : > { %653 = vst.msk [vmem:[#allocation2 + $0xa0] sm:$0xff] %vm642_vm2, %v567_v46  ;;  %654 = vst.msk [vmem:[#allocation2 + $0xb0] sm:$0xff] %vm642_vm2, %v569_v47  ;;  %v8259_v47 = vld [vmem:[%s7281_s23 + $0xf3] sm:$0xff] }
 0x1a8   : > { %2182 = vrot.lane.b32.xlu0 %v8118_v39, %s7230_s28  ;;  %2184 = vrot.lane.b32.xlu1 %v8121_v20, %s7230_s28 }
 0x1aa   : > { %v2175_v17 = vpop.permute.xlu0 %2174  ;;  %v2177_v54 = vpop.permute.xlu1 %2176 }
 0x1ab   : > { %2260 = vst.msk [vmem:[#allocation2 + $0xa8] sm:$0xff] %vm835_vm3, %v2175_v17  ;;  %2261 = vst.msk [vmem:[#allocation2 + $0xb8] sm:$0xff] %vm835_vm3, %v2177_v54  ;;  %v8262_v17 = vld [vmem:[%s7281_s23 + $0xfb] sm:$0xff] }
 0x1ac   : > { %767 = vrot.lane.b32.xlu0 %v7876_v18, %s7230_s28  ;;  %769 = vrot.lane.b32.xlu1 %v7879_v19, %s7230_s28  ;;  %v8198_v19 = vld [vmem:[%s7281_s23 + $0xf1] sm:$0xff]  ;;  %v240_v54 = vld [vmem:[%s7281_s23 + $0xc0] sm:$0xff] }
 0x1ad   : > { %273 = vst.msk [vmem:[#allocation2 + $0x100] sm:$0xff] %vm256_vm0, %v240_v54 }
 0x1ae   : > { %v760_v21 = vpop.permute.xlu0 %759  ;;  %v762_v11 = vpop.permute.xlu1 %761 }
 0x1af   : > { %846 = vst.msk [vmem:[#allocation2 + $0xa0] sm:$0xff] %vm835_vm3, %v760_v21  ;;  %847 = vst.msk [vmem:[#allocation2 + $0xb0] sm:$0xff] %vm835_vm3, %v762_v11  ;;  %v3511_v21 = vmax.f32 %v3479_v41, 0.0 }
 0x1b0   : > { %2375 = vrot.lane.b32.xlu0 %v7912_v50, %s7231_s12  ;;  %2377 = vrot.lane.b32.xlu1 %v7915_v51, %s7231_s12 }
 0x1b2   : > { %v2368_v13 = vpop.permute.xlu0 %2367  ;;  %v2370_v18 = vpop.permute.xlu1 %2369 }
 0x1b3   : > { %2453 = vst.msk [vmem:[#allocation2 + $0xa8] sm:$0xff] %vm1029_vm4, %v2368_v13  ;;  %2454 = vst.msk [vmem:[#allocation2 + $0xb8] sm:$0xff] %vm1029_vm4, %v2370_v18 }
 0x1b4   : > { %961 = vrot.lane.b32.xlu0 %v7680_v62, %s7231_s12  ;;  %963 = vrot.lane.b32.xlu1 %v7683_v63, %s7231_s12  ;;  %v3441_v63 = vmul.f32 %v7032_v22, %v8206_v1 }
 0x1b6   : > { %v954_v23 = vpop.permute.xlu0 %953  ;;  %v956_v0 = vpop.permute.xlu1 %955  ;;  %v3478_v26 = vadd.f32 %v8218_v6, %v3441_v63 }
 0x1b7   : > { %1040 = vst.msk [vmem:[#allocation2 + $0xa0] sm:$0xff] %vm1029_vm4, %v954_v23  ;;  %1041 = vst.msk [vmem:[#allocation2 + $0xb0] sm:$0xff] %vm1029_vm4, %v956_v0 }
 0x1b8   : > { %2567 = vrot.lane.b32.xlu0 %v8198_v19, %s7232_s26  ;;  %2569 = vrot.lane.b32.xlu1 %v8201_v31, %s7232_s26  ;;  %v3510_v40 = vmax.f32 %v3478_v26, 0.0 }
 0x1b9   : > { %v7036_v62 = vpop.f32.mrf.mxu0 }
 0x1ba   : > { %v2560_v53 = vpop.permute.xlu0 %2559  ;;  %v2562_v57 = vpop.permute.xlu1 %2561 }
 0x1bb   : > { %2645 = vst.msk [vmem:[#allocation2 + $0xa8] sm:$0xff] %vm1222_vm5, %v2560_v53  ;;  %2646 = vst.msk [vmem:[#allocation2 + $0xb8] sm:$0xff] %vm1222_vm5, %v2562_v57  ;;  %v7037_v10 = vpop.f32.mrf.mxu0 }
 0x1bc   : > { %v7038_v8 = vadd.f32 %v7037_v10, %v7036_v62  ;;  %1154 = vrot.lane.b32.xlu0 %v7956_v28, %s7232_s26  ;;  %1156 = vrot.lane.b32.xlu1 %v7959_v29, %s7232_s26 }
 0x1bd   : > { %v7039_v14 = vpop.f32.mrf.mxu0 }
 0x1be   : > { %v3443_v32 = vmul.f32 %v7038_v8, %v8206_v1  ;;  %v1147_v33 = vpop.permute.xlu0 %1146  ;;  %v1149_v34 = vpop.permute.xlu1 %1148 }
 0x1bf   : > { %1233 = vst.msk [vmem:[#allocation2 + $0xa0] sm:$0xff] %vm1222_vm5, %v1147_v33  ;;  %1234 = vst.msk [vmem:[#allocation2 + $0xb0] sm:$0xff] %vm1222_vm5, %v1149_v34  ;;  %v7040_v35 = vpop.f32.mrf.mxu0 }
 0x1c0   : > { %v8238_v36 = vadd.f32 %v8218_v6, %v3443_v32  ;;  %v7041_v37 = vadd.f32 %v7040_v35, %v7039_v14  ;;  %2759 = vrot.lane.b32.xlu0 %v8227_v4, %s7233_s11  ;;  %2761 = vrot.lane.b32.xlu1 %v8230_v5, %s7233_s11 }
 0x1c2   : > { %v3512_v42 = vmax.f32 %v8238_v36, 0.0  ;;  %v3444_v43 = vmul.f32 %v7041_v37, %v8206_v1  ;;  %v2752_v44 = vpop.permute.xlu0 %2751  ;;  %v2754_v58 = vpop.permute.xlu1 %2753  ;;  %v8523_v36 = vld [vmem:[%s7281_s23 + $0x123] sm:$0xff] }
 0x1c3   : > { %2837 = vst.msk [vmem:[#allocation2 + $0xa8] sm:$0xff] %vm1415_vm6, %v2752_v44  ;;  %2838 = vst.msk [vmem:[#allocation2 + $0xb8] sm:$0xff] %vm1415_vm6, %v2754_v58  ;;  %v8306_v58 = vld [vmem:[%s7281_s23 + $0x138] sm:$0xff] }
 0x1c4   : > { %v3542_v59 = vmax.f32 %v3510_v40, %v3512_v42  ;;  %v8252_v46 = vadd.f32 %v8218_v6, %v3444_v43  ;;  %1347 = vrot.lane.b32.xlu0 %v7984_v7, %s7233_s11  ;;  %1349 = vrot.lane.b32.xlu1 %v7987_v38, %s7233_s11  ;;  %1696 = vst.msk [vmem:[#allocation2 + $0x168] sm:$0xff] %vm256_vm0, %v8306_v58 }
 0x1c6   : > { %v3601_v11 = vrot.slane %v3542_v59, 1  ;;  %v3513_v30 = vmax.f32 %v8252_v46, 0.0  ;;  %v1340_v13 = vpop.permute.xlu0 %1339  ;;  %v1342_v18 = vpop.permute.xlu1 %1341  ;;  %v3635_v22 = vrot.slane %v3542_v59, 2 }
 0x1c7   : > { %1426 = vst.msk [vmem:[#allocation2 + $0xa0] sm:$0xff] %vm1415_vm6, %v1340_v13  ;;  %1427 = vst.msk [vmem:[#allocation2 + $0xb0] sm:$0xff] %vm1415_vm6, %v1342_v18 }
 0x1c8   : > { %v3617_v15 = vmax.f32 %v3542_v59, %v3601_v11  ;;  %v3543_v23 = vmax.f32 %v3511_v21, %v3513_v30  ;;  %2951 = vrot.lane.b32.xlu0 %v8259_v47, %s7234_s21  ;;  %2953 = vrot.lane.b32.xlu1 %v8262_v17, %s7234_s21 }
 0x1ca   : > { %3627 = vst.msk [vmem:[#allocation4 + $0x11] sm:$0x1] %vm3626_vm9, %v3617_v15  ;;  %v3651_v0 = vmax.f32 %v3617_v15, %v3635_v22  ;;  %v3694_v2 = vrot.slane %v3543_v23, 1  ;;  %v2944_v62 = vpop.permute.xlu0 %2943  ;;  %v2946_v63 = vpop.permute.xlu1 %2945  ;;  %v3718_v53 = vrot.slane %v3543_v23, 2 }
 0x1cb   : > { %3029 = vst.msk [vmem:[#allocation2 + $0xa8] sm:$0xff] %vm1608_vm7, %v2944_v62  ;;  %3030 = vst.msk [vmem:[#allocation2 + $0xb8] sm:$0xff] %vm1608_vm7, %v2946_v63 }
 0x1cc   : > { %3660 = vst.msk [vmem:[#allocation4 + $0x11] sm:$0x2] %vm3659_vm10, %v3651_v0  ;;  %v3710_v52 = vmax.f32 %v3542_v59, %v3694_v2  ;;  %v3751_v57 = vmax.f32 %v3543_v23, %v3694_v2  ;;  %1540 = vrot.lane.b32.xlu0 %v8002_v9, %s7234_s21  ;;  %1542 = vrot.lane.b32.xlu1 %v8005_v12, %s7234_s21  ;;  %v8309_v59 = vld [vmem:[%s7281_s23 + $0x140] sm:$0xff]  ;;  %v8375_v2 = vld [vmem:[%s7281_s23 + $0x112] sm:$0xff] }
 0x1cd   : > { %3669 = vst.msk [vmem:[#allocation4 + $0x10] sm:$0x8] %vm3668_vm11, %v3651_v0 }
 0x1ce   : > { %3678 = vst.msk [vmem:[#allocation4 + $0xf] sm:$0x20] %vm3677_vm12, %v3651_v0  ;;  %v3734_v10 = vmax.f32 %v3710_v52, %v3718_v53  ;;  %v3759_v8 = vmax.f32 %v3751_v57, %v3718_v53  ;;  %v1533_v14 = vpop.permute.xlu0 %1532  ;;  %v1535_v26 = vpop.permute.xlu1 %1534  ;;  %v8390_v57 = vld [vmem:[%s7281_s23 + $0x10b] sm:$0xff] }
 0x1cf   : > { %1619 = vst.msk [vmem:[#allocation2 + $0xa0] sm:$0xff] %vm1608_vm7, %v1533_v14  ;;  %1620 = vst.msk [vmem:[#allocation2 + $0xb0] sm:$0xff] %vm1608_vm7, %v1535_v26  ;;  %v243_v14 = vld [vmem:[%s7281_s23 + $0xe0] sm:$0xff] }
 0x1d0   : > { %3743 = vst.msk [vmem:[#allocation4 + $0xe] sm:$0x80] %vm3742_vm13, %v3734_v10  ;;  %1802 = vrot.lane.b32.xlu0 %v8198_v19, %s7228_s24  ;;  %1804 = vrot.lane.b32.xlu1 %v8201_v31, %s7228_s24  ;;  %v8393_v10 = vld [vmem:[%s7281_s23 + $0x113] sm:$0xff] }
 0x1d1   : > { %3767 = vst.msk [vmem:[#allocation4 + $0x15] sm:$0x2] %vm3659_vm10, %v3759_v8 }
 0x1d2   : > { %3775 = vst.msk [vmem:[#allocation4 + $0x14] sm:$0x8] %vm3668_vm11, %v3759_v8  ;;  %v1795_v27 = vpop.permute.xlu0 %1794  ;;  %v1797_v32 = vpop.permute.xlu1 %1796  ;;  %v3072_v33 = vld [vmem:[#allocation2 + $0xa8] sm:$0xff]  ;;  %v3074_v34 = vld [vmem:[#allocation2 + $0xb8] sm:$0xff] }
 0x1d3   : > { %3783 = vst.msk [vmem:[#allocation4 + $0x13] sm:$0x20] %vm3677_vm12, %v3759_v8  ;;  %v3126_v35 = vpack.c.bf16 %v3074_v34, %v3072_v33  ;;  %v242_v8 = vld [vmem:[%s7281_s23 + $0xd8] sm:$0xff] }
 0x1d4   : > { %1878 = vst.msk [vmem:[#allocation2 + $0xc8] sm:$0xff] %vm449_vm1, %v1795_v27  ;;  %1879 = vst.msk [vmem:[#allocation2 + $0xd8] sm:$0xff] %vm449_vm1, %v1797_v32  ;;  %385 = vrot.lane.b32.xlu0 %v7956_v28, %s7228_s24  ;;  %387 = vrot.lane.b32.xlu1 %v7959_v29, %s7228_s24 }
 0x1d5   : > { %3347 = vmatprep.mubr.bf16.mxu0 %v3126_v35  ;;  %1697 = vst.msk [vmem:[#allocation2 + $0x178] sm:$0xff] %vm256_vm0, %v8309_v59  ;;  %275 = vst.msk [vmem:[#allocation2 + $0x120] sm:$0xff] %vm256_vm0, %v242_v8 }
 0x1d6   : > { %v378_v37 = vpop.permute.xlu0 %377  ;;  %v380_v40 = vpop.permute.xlu1 %379  ;;  %v3071_v41 = vld [vmem:[#allocation2 + $0xa0] sm:$0xff]  ;;  %v3073_v43 = vld [vmem:[#allocation2 + $0xb0] sm:$0xff]  ;;  %276 = vst.msk [vmem:[#allocation2 + $0x130] sm:$0xff] %vm256_vm0, %v243_v14 }
 0x1d7   : > { %462 = vst.msk [vmem:[#allocation2 + $0xc0] sm:$0xff] %vm449_vm1, %v378_v37  ;;  %463 = vst.msk [vmem:[#allocation2 + $0xd0] sm:$0xff] %vm449_vm1, %v380_v40  ;;  %v3125_v44 = vpack.c.bf16 %v3073_v43, %v3071_v41 }
 0x1d8   : > { %1994 = vrot.lane.b32.xlu0 %v8227_v4, %s7229_s25  ;;  %1996 = vrot.lane.b32.xlu1 %v8230_v5, %s7229_s25 }
 0x1d9   : > { %v8319_v28 = vld [vmem:[#allocation4 + $0x10] sm:$0xff]  ;;  %3348 = vmatmul.mubr.bf16.gmra.mxu0 %v3125_v44 }
 0x1da   : > { %3828 = vst.msk [vmem:[#allocation3 + $0x10] sm:$0xff] %vm256_vm0, %v8319_v28  ;;  %v1987_v29 = vpop.permute.xlu0 %1986  ;;  %v1989_v54 = vpop.permute.xlu1 %1988 }
 0x1db   : > { %2070 = vst.msk [vmem:[#allocation2 + $0xc8] sm:$0xff] %vm642_vm2, %v1987_v29  ;;  %2071 = vst.msk [vmem:[#allocation2 + $0xd8] sm:$0xff] %vm642_vm2, %v1989_v54 }
 0x1dc   : > { %578 = vrot.lane.b32.xlu0 %v7984_v7, %s7229_s25  ;;  %580 = vrot.lane.b32.xlu1 %v7987_v38, %s7229_s25 }
 0x1de   : > { %v571_v55 = vpop.permute.xlu0 %570  ;;  %v573_v21 = vpop.permute.xlu1 %572 }
 0x1df   : > { %655 = vst.msk [vmem:[#allocation2 + $0xc0] sm:$0xff] %vm642_vm2, %v571_v55  ;;  %656 = vst.msk [vmem:[#allocation2 + $0xd0] sm:$0xff] %vm642_vm2, %v573_v21 }
 0x1e0   : > { %2186 = vrot.lane.b32.xlu0 %v8259_v47, %s7230_s28  ;;  %2188 = vrot.lane.b32.xlu1 %v8262_v17, %s7230_s28 }
 0x1e2   : > { %v2179_v11 = vpop.permute.xlu0 %2178  ;;  %v2181_v13 = vpop.permute.xlu1 %2180 }
 0x1e3   : > { %2262 = vst.msk [vmem:[#allocation2 + $0xc8] sm:$0xff] %vm835_vm3, %v2179_v11  ;;  %2263 = vst.msk [vmem:[#allocation2 + $0xd8] sm:$0xff] %vm835_vm3, %v2181_v13  ;;  %v8426_v13 = vld [vmem:[%s7281_s23 + $0x150] sm:$0xff] }
 0x1e4   : > { %771 = vrot.lane.b32.xlu0 %v8002_v9, %s7230_s28  ;;  %773 = vrot.lane.b32.xlu1 %v8005_v12, %s7230_s28  ;;  %v8354_v9 = vld [vmem:[%s7281_s23 + $0x109] sm:$0xff]  ;;  %v8357_v12 = vld [vmem:[%s7281_s23 + $0x111] sm:$0xff]  ;;  %1698 = vst.msk [vmem:[#allocation2 + $0x188] sm:$0xff] %vm256_vm0, %v8426_v13 }
 0x1e6   : > { %v764_v7 = vpop.permute.xlu0 %763  ;;  %v766_v38 = vpop.permute.xlu1 %765 }
 0x1e7   : > { %848 = vst.msk [vmem:[#allocation2 + $0xc0] sm:$0xff] %vm835_vm3, %v764_v7  ;;  %849 = vst.msk [vmem:[#allocation2 + $0xd0] sm:$0xff] %vm835_vm3, %v766_v38  ;;  %v8429_v7 = vld [vmem:[%s7281_s23 + $0x158] sm:$0xff] }
 0x1e8   : > { %2379 = vrot.lane.b32.xlu0 %v8038_v49, %s7231_s12  ;;  %2381 = vrot.lane.b32.xlu1 %v8041_v16, %s7231_s12  ;;  %1699 = vst.msk [vmem:[#allocation2 + $0x198] sm:$0xff] %vm256_vm0, %v8429_v7 }
 0x1ea   : > { %v2372_v18 = vpop.permute.xlu0 %2371  ;;  %v2374_v15 = vpop.permute.xlu1 %2373 }
 0x1eb   : > { %2455 = vst.msk [vmem:[#allocation2 + $0xc8] sm:$0xff] %vm1029_vm4, %v2372_v18  ;;  %2456 = vst.msk [vmem:[#allocation2 + $0xd8] sm:$0xff] %vm1029_vm4, %v2374_v15 }
 0x1ec   : > { %965 = vrot.lane.b32.xlu0 %v7796_v60, %s7231_s12  ;;  %967 = vrot.lane.b32.xlu1 %v7799_v61, %s7231_s12  ;;  %v8372_v61 = vld [vmem:[%s7281_s23 + $0x10a] sm:$0xff] }
 0x1ee   : > { %v958_v22 = vpop.permute.xlu0 %957  ;;  %v960_v23 = vpop.permute.xlu1 %959 }
 0x1ef   : > { %1042 = vst.msk [vmem:[#allocation2 + $0xc0] sm:$0xff] %vm1029_vm4, %v958_v22  ;;  %1043 = vst.msk [vmem:[#allocation2 + $0xd0] sm:$0xff] %vm1029_vm4, %v960_v23 }
 0x1f0   : > { %2571 = vrot.lane.b32.xlu0 %v8354_v9, %s7232_s26  ;;  %2573 = vrot.lane.b32.xlu1 %v8357_v12, %s7232_s26 }
 0x1f1   : > { %v7042_v15 = vpop.f32.mrf.mxu0 }
 0x1f2   : > { %v2564_v60 = vpop.permute.xlu0 %2563  ;;  %v2566_v0 = vpop.permute.xlu1 %2565 }
 0x1f3   : > { %2647 = vst.msk [vmem:[#allocation2 + $0xc8] sm:$0xff] %vm1222_vm5, %v2564_v60  ;;  %2648 = vst.msk [vmem:[#allocation2 + $0xd8] sm:$0xff] %vm1222_vm5, %v2566_v0  ;;  %v7043_v60 = vpop.f32.mrf.mxu0 }
 0x1f4   : > { %1158 = vrot.lane.b32.xlu0 %v8082_v24, %s7232_s26  ;;  %1160 = vrot.lane.b32.xlu1 %v8085_v25, %s7232_s26 }
 0x1f5   : > { %v7045_v0 = vpop.f32.mrf.mxu0 }
 0x1f6   : > { %v1151_v62 = vpop.permute.xlu0 %1150  ;;  %v1153_v63 = vpop.permute.xlu1 %1152 }
 0x1f7   : > { %1235 = vst.msk [vmem:[#allocation2 + $0xc0] sm:$0xff] %vm1222_vm5, %v1151_v62  ;;  %1236 = vst.msk [vmem:[#allocation2 + $0xd0] sm:$0xff] %vm1222_vm5, %v1153_v63  ;;  %v7044_v62 = vadd.f32 %v7043_v60, %v7042_v15 }
 0x1f8   : > { %2763 = vrot.lane.b32.xlu0 %v8372_v61, %s7233_s11  ;;  %2765 = vrot.lane.b32.xlu1 %v8375_v2, %s7233_s11 }
 0x1f9   : > { %v3445_v8 = vmul.f32 %v7044_v62, %v8206_v1 }
 0x1fa   : > { %v2756_v52 = vpop.permute.xlu0 %2755  ;;  %v2758_v53 = vpop.permute.xlu1 %2757 }
 0x1fb   : > { %2839 = vst.msk [vmem:[#allocation2 + $0xc8] sm:$0xff] %vm1415_vm6, %v2756_v52  ;;  %2840 = vst.msk [vmem:[#allocation2 + $0xd8] sm:$0xff] %vm1415_vm6, %v2758_v53  ;;  %v7046_v52 = vpop.f32.mrf.mxu0  ;;  %v8473_v53 = vld [vmem:[%s7281_s23 + $0x129] sm:$0xff] }
 0x1fc   : > { %1351 = vrot.lane.b32.xlu0 %v8100_v3, %s7233_s11  ;;  %1353 = vrot.lane.b32.xlu1 %v8103_v56, %s7233_s11  ;;  %v7047_v14 = vadd.f32 %v7046_v52, %v7045_v0  ;;  %v245_v0 = vld [vmem:[%s7281_s23 + $0xf8] sm:$0xff] }
 0x1fd   : > { %278 = vst.msk [vmem:[#allocation2 + $0x150] sm:$0xff] %vm256_vm0, %v245_v0 }
 0x1fe   : > { %v1344_v26 = vpop.permute.xlu0 %1343  ;;  %v1346_v27 = vpop.permute.xlu1 %1345 }
 0x1ff   : > { %1428 = vst.msk [vmem:[#allocation2 + $0xc0] sm:$0xff] %vm1415_vm6, %v1344_v26  ;;  %1429 = vst.msk [vmem:[#allocation2 + $0xd0] sm:$0xff] %vm1415_vm6, %v1346_v27 }
 0x200   : > { %2955 = vrot.lane.b32.xlu0 %v8390_v57, %s7234_s21  ;;  %2957 = vrot.lane.b32.xlu1 %v8393_v10, %s7234_s21 }
 0x202   : > { %v2948_v32 = vpop.permute.xlu0 %2947  ;;  %v2950_v33 = vpop.permute.xlu1 %2949 }
 0x203   : > { %3031 = vst.msk [vmem:[#allocation2 + $0xc8] sm:$0xff] %vm1608_vm7, %v2948_v32  ;;  %3032 = vst.msk [vmem:[#allocation2 + $0xd8] sm:$0xff] %vm1608_vm7, %v2950_v33  ;;  %v3446_v32 = vmul.f32 %v7047_v14, %v8206_v1 }
 0x204   : > { %1544 = vrot.lane.b32.xlu0 %v8118_v39, %s7234_s21  ;;  %1546 = vrot.lane.b32.xlu1 %v8121_v20, %s7234_s21 }
 0x206   : > { %v1537_v34 = vpop.permute.xlu0 %1536  ;;  %v1539_v35 = vpop.permute.xlu1 %1538 }
 0x207   : > { %1621 = vst.msk [vmem:[#allocation2 + $0xc0] sm:$0xff] %vm1608_vm7, %v1537_v34  ;;  %1622 = vst.msk [vmem:[#allocation2 + $0xd0] sm:$0xff] %vm1608_vm7, %v1539_v35 }
 0x208   : > { %1806 = vrot.lane.b32.xlu0 %v8354_v9, %s7228_s24  ;;  %1808 = vrot.lane.b32.xlu1 %v8357_v12, %s7228_s24 }
 0x20a   : > { %v1799_v37 = vpop.permute.xlu0 %1798  ;;  %v1801_v40 = vpop.permute.xlu1 %1800  ;;  %v3076_v41 = vld [vmem:[#allocation2 + $0xc8] sm:$0xff]  ;;  %v3078_v43 = vld [vmem:[#allocation2 + $0xd8] sm:$0xff] }
 0x20b   : > { %1880 = vst.msk [vmem:[#allocation2 + $0xe8] sm:$0xff] %vm449_vm1, %v1799_v37  ;;  %1881 = vst.msk [vmem:[#allocation2 + $0xf8] sm:$0xff] %vm449_vm1, %v1801_v40  ;;  %v3128_v44 = vpack.c.bf16 %v3078_v43, %v3076_v41  ;;  %v8491_v41 = vld [vmem:[%s7281_s23 + $0x122] sm:$0xff]  ;;  %v8494_v43 = vld [vmem:[%s7281_s23 + $0x12a] sm:$0xff] }
 0x20c   : > { %389 = vrot.lane.b32.xlu0 %v8082_v24, %s7228_s24  ;;  %391 = vrot.lane.b32.xlu1 %v8085_v25, %s7228_s24 }
 0x20d   : > { %3355 = vmatprep.mubr.bf16.mxu0 %v3128_v44 }
 0x20e   : > { %v382_v29 = vpop.permute.xlu0 %381  ;;  %v384_v54 = vpop.permute.xlu1 %383  ;;  %v3075_v55 = vld [vmem:[#allocation2 + $0xc0] sm:$0xff]  ;;  %v3077_v21 = vld [vmem:[#allocation2 + $0xd0] sm:$0xff] }
 0x20f   : > { %464 = vst.msk [vmem:[#allocation2 + $0xe0] sm:$0xff] %vm449_vm1, %v382_v29  ;;  %465 = vst.msk [vmem:[#allocation2 + $0xf0] sm:$0xff] %vm449_vm1, %v384_v54  ;;  %v3127_v11 = vpack.c.bf16 %v3077_v21, %v3075_v55  ;;  %v3483_v29 = vadd.f32 %v8218_v6, %v3446_v32 }
 0x210   : > { %1998 = vrot.lane.b32.xlu0 %v8372_v61, %s7229_s25  ;;  %2000 = vrot.lane.b32.xlu1 %v8375_v2, %s7229_s25 }
 0x211   : > { %3356 = vmatmul.mubr.bf16.gmra.mxu0 %v3127_v11 }
 0x212   : > { %v1991_v24 = vpop.permute.xlu0 %1990  ;;  %v1993_v25 = vpop.permute.xlu1 %1992 }
 0x213   : > { %2072 = vst.msk [vmem:[#allocation2 + $0xe8] sm:$0xff] %vm642_vm2, %v1991_v24  ;;  %2073 = vst.msk [vmem:[#allocation2 + $0xf8] sm:$0xff] %vm642_vm2, %v1993_v25 }
 0x214   : > { %582 = vrot.lane.b32.xlu0 %v8100_v3, %s7229_s25  ;;  %584 = vrot.lane.b32.xlu1 %v8103_v56, %s7229_s25 }
 0x216   : > { %v575_v38 = vpop.permute.xlu0 %574  ;;  %v577_v18 = vpop.permute.xlu1 %576 }
 0x217   : > { %657 = vst.msk [vmem:[#allocation2 + $0xe0] sm:$0xff] %vm642_vm2, %v575_v38  ;;  %658 = vst.msk [vmem:[#allocation2 + $0xf0] sm:$0xff] %vm642_vm2, %v577_v18  ;;  %v3515_v18 = vmax.f32 %v3483_v29, 0.0 }
 0x218   : > { %2190 = vrot.lane.b32.xlu0 %v8390_v57, %s7230_s28  ;;  %2192 = vrot.lane.b32.xlu1 %v8393_v10, %s7230_s28 }
 0x219   : > { %v3545_v62 = vmax.f32 %v3513_v30, %v3515_v18 }
 0x21a   : > { %v2183_v22 = vpop.permute.xlu0 %2182  ;;  %v2185_v23 = vpop.permute.xlu1 %2184 }
 0x21b   : > { %2264 = vst.msk [vmem:[#allocation2 + $0xe8] sm:$0xff] %vm835_vm3, %v2183_v22  ;;  %2265 = vst.msk [vmem:[#allocation2 + $0xf8] sm:$0xff] %vm835_vm3, %v2185_v23 }
 0x21c   : > { %775 = vrot.lane.b32.xlu0 %v8118_v39, %s7230_s28  ;;  %777 = vrot.lane.b32.xlu1 %v8121_v20, %s7230_s28  ;;  %v8470_v20 = vld [vmem:[%s7281_s23 + $0x121] sm:$0xff] }
 0x21e   : > { %v768_v3 = vpop.permute.xlu0 %767  ;;  %v770_v56 = vpop.permute.xlu1 %769 }
 0x21f   : > { %850 = vst.msk [vmem:[#allocation2 + $0xe0] sm:$0xff] %vm835_vm3, %v768_v3  ;;  %851 = vst.msk [vmem:[#allocation2 + $0xf0] sm:$0xff] %vm835_vm3, %v770_v56 }
 0x220   : > { %2383 = vrot.lane.b32.xlu0 %v8154_v45, %s7231_s12  ;;  %2385 = vrot.lane.b32.xlu1 %v8157_v48, %s7231_s12 }
 0x222   : > { %v2376_v39 = vpop.permute.xlu0 %2375  ;;  %v2378_v63 = vpop.permute.xlu1 %2377 }
 0x223   : > { %2457 = vst.msk [vmem:[#allocation2 + $0xe8] sm:$0xff] %vm1029_vm4, %v2376_v39  ;;  %2458 = vst.msk [vmem:[#allocation2 + $0xf8] sm:$0xff] %vm1029_vm4, %v2378_v63 }
 0x224   : > { %969 = vrot.lane.b32.xlu0 %v7912_v50, %s7231_s12  ;;  %971 = vrot.lane.b32.xlu1 %v7915_v51, %s7231_s12  ;;  %v3482_v51 = vadd.f32 %v8218_v6, %v3445_v8 }
 0x226   : > { %v962_v26 = vpop.permute.xlu0 %961  ;;  %v964_v27 = vpop.permute.xlu1 %963  ;;  %v3514_v44 = vmax.f32 %v3482_v51, 0.0 }
 0x227   : > { %1044 = vst.msk [vmem:[#allocation2 + $0xe0] sm:$0xff] %vm1029_vm4, %v962_v26  ;;  %1045 = vst.msk [vmem:[#allocation2 + $0xf0] sm:$0xff] %vm1029_vm4, %v964_v27 }
 0x228   : > { %2575 = vrot.lane.b32.xlu0 %v8470_v20, %s7232_s26  ;;  %2577 = vrot.lane.b32.xlu1 %v8473_v53, %s7232_s26  ;;  %v3544_v38 = vmax.f32 %v3512_v42, %v3514_v44  ;;  %v244_v42 = vld [vmem:[%s7281_s23 + $0xf0] sm:$0xff] }
 0x229   : > { %v7048_v50 = vpop.f32.mrf.mxu0  ;;  %277 = vst.msk [vmem:[#allocation2 + $0x140] sm:$0xff] %vm256_vm0, %v244_v42 }
 0x22a   : > { %v2568_v33 = vpop.permute.xlu0 %2567  ;;  %v2570_v34 = vpop.permute.xlu1 %2569 }
 0x22b   : > { %2649 = vst.msk [vmem:[#allocation2 + $0xe8] sm:$0xff] %vm1222_vm5, %v2568_v33  ;;  %2650 = vst.msk [vmem:[#allocation2 + $0xf8] sm:$0xff] %vm1222_vm5, %v2570_v34  ;;  %v7049_v35 = vpop.f32.mrf.mxu0 }
 0x22c   : > { %v7050_v37 = vadd.f32 %v7049_v35, %v7048_v50  ;;  %1162 = vrot.lane.b32.xlu0 %v8198_v19, %s7232_s26  ;;  %1164 = vrot.lane.b32.xlu1 %v8201_v31, %s7232_s26 }
 0x22d   : > { %v7051_v40 = vpop.f32.mrf.mxu0 }
 0x22e   : > { %v3447_v54 = vmul.f32 %v7050_v37, %v8206_v1  ;;  %v1155_v55 = vpop.permute.xlu0 %1154  ;;  %v1157_v21 = vpop.permute.xlu1 %1156 }
 0x22f   : > { %1237 = vst.msk [vmem:[#allocation2 + $0xe0] sm:$0xff] %vm1222_vm5, %v1155_v55  ;;  %1238 = vst.msk [vmem:[#allocation2 + $0xf0] sm:$0xff] %vm1222_vm5, %v1157_v21  ;;  %v7052_v11 = vpop.f32.mrf.mxu0 }
 0x230   : > { %v8501_v24 = vadd.f32 %v8218_v6, %v3447_v54  ;;  %v7053_v25 = vadd.f32 %v7052_v11, %v7051_v40  ;;  %2767 = vrot.lane.b32.xlu0 %v8491_v41, %s7233_s11  ;;  %2769 = vrot.lane.b32.xlu1 %v8494_v43, %s7233_s11 }
 0x232   : > { %v3516_v15 = vmax.f32 %v8501_v24, 0.0  ;;  %v3448_v22 = vmul.f32 %v7053_v25, %v8206_v1  ;;  %v2760_v23 = vpop.permute.xlu0 %2759  ;;  %v2762_v60 = vpop.permute.xlu1 %2761  ;;  %v8526_v1 = vld [vmem:[%s7281_s23 + $0x12b] sm:$0xff]  ;;  %v8800_v24 = vld [vmem:[%s7281_s23 + $0x153] sm:$0xff] }
 0x233   : > { %2841 = vst.msk [vmem:[#allocation2 + $0xe8] sm:$0xff] %vm1415_vm6, %v2760_v23  ;;  %2842 = vst.msk [vmem:[#allocation2 + $0xf8] sm:$0xff] %vm1415_vm6, %v2762_v60  ;;  %v8572_v60 = vld [vmem:[%s7281_s23 + $0x168] sm:$0xff] }
 0x234   : > { %v3546_v3 = vmax.f32 %v3544_v38, %v3516_v15  ;;  %v8516_v56 = vadd.f32 %v8218_v6, %v3448_v22  ;;  %1355 = vrot.lane.b32.xlu0 %v8227_v4, %s7233_s11  ;;  %1357 = vrot.lane.b32.xlu1 %v8230_v5, %s7233_s11  ;;  %1700 = vst.msk [vmem:[#allocation2 + $0x1a8] sm:$0xff] %vm256_vm0, %v8572_v60 }
 0x236   : > { %v3602_v39 = vrot.slane %v3546_v3, 1  ;;  %v3517_v63 = vmax.f32 %v8516_v56, 0.0  ;;  %v1348_v6 = vpop.permute.xlu0 %1347  ;;  %v1350_v52 = vpop.permute.xlu1 %1349  ;;  %v3636_v14 = vrot.slane %v3546_v3, 2 }
 0x237   : > { %1430 = vst.msk [vmem:[#allocation2 + $0xe0] sm:$0xff] %vm1415_vm6, %v1348_v6  ;;  %1431 = vst.msk [vmem:[#allocation2 + $0xf0] sm:$0xff] %vm1415_vm6, %v1350_v52 }
 0x238   : > { %v3618_v8 = vmax.f32 %v3546_v3, %v3602_v39  ;;  %v3547_v26 = vmax.f32 %v3545_v62, %v3517_v63  ;;  %2959 = vrot.lane.b32.xlu0 %v8523_v36, %s7234_s21  ;;  %2961 = vrot.lane.b32.xlu1 %v8526_v1, %s7234_s21 }
 0x23a   : > { %3628 = vst.msk [vmem:[#allocation4 + $0x21] sm:$0x1] %vm3626_vm9, %v3618_v8  ;;  %v3652_v46 = vmax.f32 %v3618_v8, %v3636_v14  ;;  %v3695_v30 = vrot.slane %v3547_v26, 1  ;;  %v2952_v27 = vpop.permute.xlu0 %2951  ;;  %v2954_v50 = vpop.permute.xlu1 %2953  ;;  %v3719_v32 = vrot.slane %v3547_v26, 2 }
 0x23b   : > { %3033 = vst.msk [vmem:[#allocation2 + $0xe8] sm:$0xff] %vm1608_vm7, %v2952_v27  ;;  %3034 = vst.msk [vmem:[#allocation2 + $0xf8] sm:$0xff] %vm1608_vm7, %v2954_v50 }
 0x23c   : > { %3661 = vst.msk [vmem:[#allocation4 + $0x21] sm:$0x2] %vm3659_vm10, %v3652_v46  ;;  %v3711_v51 = vmax.f32 %v3546_v3, %v3695_v30  ;;  %v3752_v33 = vmax.f32 %v3547_v26, %v3695_v30  ;;  %1548 = vrot.lane.b32.xlu0 %v8259_v47, %s7234_s21  ;;  %1550 = vrot.lane.b32.xlu1 %v8262_v17, %s7234_s21  ;;  %v8642_v30 = vld [vmem:[%s7281_s23 + $0x142] sm:$0xff] }
 0x23d   : > { %3670 = vst.msk [vmem:[#allocation4 + $0x20] sm:$0x8] %vm3668_vm11, %v3652_v46 }
 0x23e   : > { %3679 = vst.msk [vmem:[#allocation4 + $0x1f] sm:$0x20] %vm3677_vm12, %v3652_v46  ;;  %v3735_v34 = vmax.f32 %v3711_v51, %v3719_v32  ;;  %v3760_v35 = vmax.f32 %v3752_v33, %v3719_v32  ;;  %v1541_v37 = vpop.permute.xlu0 %1540  ;;  %v1543_v40 = vpop.permute.xlu1 %1542  ;;  %v8657_v33 = vld [vmem:[%s7281_s23 + $0x13b] sm:$0xff] }
 0x23f   : > { %1623 = vst.msk [vmem:[#allocation2 + $0xe0] sm:$0xff] %vm1608_vm7, %v1541_v37  ;;  %1624 = vst.msk [vmem:[#allocation2 + $0xf0] sm:$0xff] %vm1608_vm7, %v1543_v40  ;;  %v247_v37 = vld [vmem:[%s7281_s23 + $0x110] sm:$0xff] }
 0x240   : > { %3744 = vst.msk [vmem:[#allocation4 + $0x1e] sm:$0x80] %vm3742_vm13, %v3735_v34  ;;  %1810 = vrot.lane.b32.xlu0 %v8470_v20, %s7228_s24  ;;  %1812 = vrot.lane.b32.xlu1 %v8473_v53, %s7228_s24  ;;  %v8660_v34 = vld [vmem:[%s7281_s23 + $0x143] sm:$0xff] }
 0x241   : > { %3768 = vst.msk [vmem:[#allocation4 + $0x25] sm:$0x2] %vm3659_vm10, %v3760_v35 }
 0x242   : > { %3776 = vst.msk [vmem:[#allocation4 + $0x24] sm:$0x8] %vm3668_vm11, %v3760_v35  ;;  %v1803_v44 = vpop.permute.xlu0 %1802  ;;  %v1805_v29 = vpop.permute.xlu1 %1804  ;;  %v3080_v54 = vld [vmem:[#allocation2 + $0xe8] sm:$0xff]  ;;  %v3082_v55 = vld [vmem:[#allocation2 + $0xf8] sm:$0xff] }
 0x243   : > { %3784 = vst.msk [vmem:[#allocation4 + $0x23] sm:$0x20] %vm3677_vm12, %v3760_v35  ;;  %v3130_v21 = vpack.c.bf16 %v3082_v55, %v3080_v54  ;;  %v246_v35 = vld [vmem:[%s7281_s23 + $0x108] sm:$0xff] }
 0x244   : > { %1882 = vst.msk [vmem:[#allocation2 + $0x108] sm:$0xff] %vm449_vm1, %v1803_v44  ;;  %1883 = vst.msk [vmem:[#allocation2 + $0x118] sm:$0xff] %vm449_vm1, %v1805_v29  ;;  %393 = vrot.lane.b32.xlu0 %v8198_v19, %s7228_s24  ;;  %395 = vrot.lane.b32.xlu1 %v8201_v31, %s7228_s24  ;;  %v8580_v19 = vld [vmem:[%s7281_s23 + $0x170] sm:$0xff] }
 0x245   : > { %3363 = vmatprep.mubr.bf16.mxu0 %v3130_v21  ;;  %1701 = vst.msk [vmem:[#allocation2 + $0x1b8] sm:$0xff] %vm256_vm0, %v8580_v19  ;;  %279 = vst.msk [vmem:[#allocation2 + $0x160] sm:$0xff] %vm256_vm0, %v246_v35 }
 0x246   : > { %v386_v11 = vpop.permute.xlu0 %385  ;;  %v388_v25 = vpop.permute.xlu1 %387  ;;  %v3079_v38 = vld [vmem:[#allocation2 + $0xe0] sm:$0xff]  ;;  %v3081_v18 = vld [vmem:[#allocation2 + $0xf0] sm:$0xff]  ;;  %280 = vst.msk [vmem:[#allocation2 + $0x170] sm:$0xff] %vm256_vm0, %v247_v37 }
 0x247   : > { %466 = vst.msk [vmem:[#allocation2 + $0x100] sm:$0xff] %vm449_vm1, %v386_v11  ;;  %467 = vst.msk [vmem:[#allocation2 + $0x110] sm:$0xff] %vm449_vm1, %v388_v25  ;;  %v3129_v22 = vpack.c.bf16 %v3081_v18, %v3079_v38 }
 0x248   : > { %2002 = vrot.lane.b32.xlu0 %v8491_v41, %s7229_s25  ;;  %2004 = vrot.lane.b32.xlu1 %v8494_v43, %s7229_s25 }
 0x249   : > { %v8584_v31 = vld [vmem:[#allocation4 + $0x20] sm:$0xff]  ;;  %3364 = vmatmul.mubr.bf16.gmra.mxu0 %v3129_v22 }
 0x24a   : > { %v4172_v23 = vld [vmem:[#allocation4 + $0x22] sm:$0xff]  ;;  %3829 = vst.msk [vmem:[#allocation3 + $0x20] sm:$0xff] %vm256_vm0, %v8584_v31  ;;  %v1995_v3 = vpop.permute.xlu0 %1994  ;;  %v1997_v42 = vpop.permute.xlu1 %1996 }
 0x24b   : > { %4180 = vst.msk [vmem:[#allocation3 + $0x8] sm:$0xff] %vm256_vm0, %v4172_v23 }
 0x24c   : > { %2074 = vst.msk [vmem:[#allocation2 + $0x108] sm:$0xff] %vm642_vm2, %v1995_v3  ;;  %2075 = vst.msk [vmem:[#allocation2 + $0x118] sm:$0xff] %vm642_vm2, %v1997_v42  ;;  %586 = vrot.lane.b32.xlu0 %v8227_v4, %s7229_s25  ;;  %588 = vrot.lane.b32.xlu1 %v8230_v5, %s7229_s25 }
 0x24e   : > { %v579_v0 = vpop.permute.xlu0 %578  ;;  %v581_v62 = vpop.permute.xlu1 %580 }
 0x24f   : > { %659 = vst.msk [vmem:[#allocation2 + $0x100] sm:$0xff] %vm642_vm2, %v579_v0  ;;  %660 = vst.msk [vmem:[#allocation2 + $0x110] sm:$0xff] %vm642_vm2, %v581_v62 }
 0x250   : > { %2194 = vrot.lane.b32.xlu0 %v8523_v36, %s7230_s28  ;;  %2196 = vrot.lane.b32.xlu1 %v8526_v1, %s7230_s28 }
 0x252   : > { %v2187_v39 = vpop.permute.xlu0 %2186  ;;  %v2189_v6 = vpop.permute.xlu1 %2188 }
 0x253   : > { %2266 = vst.msk [vmem:[#allocation2 + $0x108] sm:$0xff] %vm835_vm3, %v2187_v39  ;;  %2267 = vst.msk [vmem:[#allocation2 + $0x118] sm:$0xff] %vm835_vm3, %v2189_v6  ;;  %v8693_v39 = vld [vmem:[%s7281_s23 + $0x180] sm:$0xff]  ;;  %v8696_v6 = vld [vmem:[%s7281_s23 + $0x188] sm:$0xff] }
 0x254   : > { %779 = vrot.lane.b32.xlu0 %v8259_v47, %s7230_s28  ;;  %781 = vrot.lane.b32.xlu1 %v8262_v17, %s7230_s28  ;;  %v8621_v47 = vld [vmem:[%s7281_s23 + $0x139] sm:$0xff]  ;;  %v8624_v17 = vld [vmem:[%s7281_s23 + $0x141] sm:$0xff]  ;;  %1702 = vst.msk [vmem:[#allocation2 + $0x1c8] sm:$0xff] %vm256_vm0, %v8693_v39  ;;  %1703 = vst.msk [vmem:[#allocation2 + $0x1d8] sm:$0xff] %vm256_vm0, %v8696_v6 }
 0x256   : > { %v772_v4 = vpop.permute.xlu0 %771  ;;  %v774_v5 = vpop.permute.xlu1 %773 }
 0x257   : > { %852 = vst.msk [vmem:[#allocation2 + $0x100] sm:$0xff] %vm835_vm3, %v772_v4  ;;  %853 = vst.msk [vmem:[#allocation2 + $0x110] sm:$0xff] %vm835_vm3, %v774_v5 }
 0x258   : > { %2387 = vrot.lane.b32.xlu0 %v8306_v58, %s7231_s12  ;;  %2389 = vrot.lane.b32.xlu1 %v8309_v59, %s7231_s12 }
 0x25a   : > { %v2380_v52 = vpop.permute.xlu0 %2379  ;;  %v2382_v8 = vpop.permute.xlu1 %2381 }
 0x25b   : > { %2459 = vst.msk [vmem:[#allocation2 + $0x108] sm:$0xff] %vm1029_vm4, %v2380_v52  ;;  %2460 = vst.msk [vmem:[#allocation2 + $0x118] sm:$0xff] %vm1029_vm4, %v2382_v8 }
 0x25c   : > { %973 = vrot.lane.b32.xlu0 %v8038_v49, %s7231_s12  ;;  %975 = vrot.lane.b32.xlu1 %v8041_v16, %s7231_s12  ;;  %v8639_v16 = vld [vmem:[%s7281_s23 + $0x13a] sm:$0xff] }
 0x25e   : > { %v966_v14 = vpop.permute.xlu0 %965  ;;  %v968_v26 = vpop.permute.xlu1 %967 }
 0x25f   : > { %1046 = vst.msk [vmem:[#allocation2 + $0x100] sm:$0xff] %vm1029_vm4, %v966_v14  ;;  %1047 = vst.msk [vmem:[#allocation2 + $0x110] sm:$0xff] %vm1029_vm4, %v968_v26 }
 0x260   : > { %2579 = vrot.lane.b32.xlu0 %v8621_v47, %s7232_s26  ;;  %2581 = vrot.lane.b32.xlu1 %v8624_v17, %s7232_s26 }
 0x261   : > { %v7054_v52 = vpop.f32.mrf.mxu0 }
 0x262   : > { %v2572_v49 = vpop.permute.xlu0 %2571  ;;  %v2574_v46 = vpop.permute.xlu1 %2573 }
 0x263   : > { %2651 = vst.msk [vmem:[#allocation2 + $0x108] sm:$0xff] %vm1222_vm5, %v2572_v49  ;;  %2652 = vst.msk [vmem:[#allocation2 + $0x118] sm:$0xff] %vm1222_vm5, %v2574_v46  ;;  %v7055_v26 = vpop.f32.mrf.mxu0 }
 0x264   : > { %1166 = vrot.lane.b32.xlu0 %v8354_v9, %s7232_s26  ;;  %1168 = vrot.lane.b32.xlu1 %v8357_v12, %s7232_s26  ;;  %v7056_v46 = vadd.f32 %v7055_v26, %v7054_v52 }
 0x265   : > { %v7057_v49 = vpop.f32.mrf.mxu0 }
 0x266   : > { %v1159_v27 = vpop.permute.xlu0 %1158  ;;  %v1161_v50 = vpop.permute.xlu1 %1160 }
 0x267   : > { %1239 = vst.msk [vmem:[#allocation2 + $0x100] sm:$0xff] %vm1222_vm5, %v1159_v27  ;;  %1240 = vst.msk [vmem:[#allocation2 + $0x110] sm:$0xff] %vm1222_vm5, %v1161_v50  ;;  %v7058_v50 = vpop.f32.mrf.mxu0 }
 0x268   : > { %2771 = vrot.lane.b32.xlu0 %v8639_v16, %s7233_s11  ;;  %2773 = vrot.lane.b32.xlu1 %v8642_v30, %s7233_s11  ;;  %v7059_v37 = vadd.f32 %v7058_v50, %v7057_v49 }
 0x26a   : > { %v2764_v51 = vpop.permute.xlu0 %2763  ;;  %v2766_v32 = vpop.permute.xlu1 %2765 }
 0x26b   : > { %2843 = vst.msk [vmem:[#allocation2 + $0x108] sm:$0xff] %vm1415_vm6, %v2764_v51  ;;  %2844 = vst.msk [vmem:[#allocation2 + $0x118] sm:$0xff] %vm1415_vm6, %v2766_v32  ;;  %v8740_v51 = vld [vmem:[%s7281_s23 + $0x159] sm:$0xff] }
 0x26c   : > { %1359 = vrot.lane.b32.xlu0 %v8372_v61, %s7233_s11  ;;  %1361 = vrot.lane.b32.xlu1 %v8375_v2, %s7233_s11  ;;  %v8745_v32 = vld [vmem:[%s10565_s3] ss:$0 sm:$0xff] }
 0x26d   : > { %v3449_v35 = vmul.f32 %v8745_v32, %v7056_v46  ;;  %v248_v46 = vld [vmem:[%s7281_s23 + $0x120] sm:$0xff] }
 0x26e   : > { %v1352_v40 = vpop.permute.xlu0 %1351  ;;  %v1354_v44 = vpop.permute.xlu1 %1353  ;;  %281 = vst.msk [vmem:[#allocation2 + $0x180] sm:$0xff] %vm256_vm0, %v248_v46 }
 0x26f   : > { %1432 = vst.msk [vmem:[#allocation2 + $0x100] sm:$0xff] %vm1415_vm6, %v1352_v40  ;;  %1433 = vst.msk [vmem:[#allocation2 + $0x110] sm:$0xff] %vm1415_vm6, %v1354_v44 }
 0x270   : > { %2963 = vrot.lane.b32.xlu0 %v8657_v33, %s7234_s21  ;;  %2965 = vrot.lane.b32.xlu1 %v8660_v34, %s7234_s21 }
 0x272   : > { %v2956_v29 = vpop.permute.xlu0 %2955  ;;  %v2958_v54 = vpop.permute.xlu1 %2957 }
 0x273   : > { %3035 = vst.msk [vmem:[#allocation2 + $0x108] sm:$0xff] %vm1608_vm7, %v2956_v29  ;;  %3036 = vst.msk [vmem:[#allocation2 + $0x118] sm:$0xff] %vm1608_vm7, %v2958_v54  ;;  %v3450_v54 = vmul.f32 %v8745_v32, %v7059_v37 }
 0x274   : > { %1552 = vrot.lane.b32.xlu0 %v8390_v57, %s7234_s21  ;;  %1554 = vrot.lane.b32.xlu1 %v8393_v10, %s7234_s21 }
 0x276   : > { %v1545_v55 = vpop.permute.xlu0 %1544  ;;  %v1547_v21 = vpop.permute.xlu1 %1546 }
 0x277   : > { %1625 = vst.msk [vmem:[#allocation2 + $0x100] sm:$0xff] %vm1608_vm7, %v1545_v55  ;;  %1626 = vst.msk [vmem:[#allocation2 + $0x110] sm:$0xff] %vm1608_vm7, %v1547_v21 }
 0x278   : > { %1814 = vrot.lane.b32.xlu0 %v8621_v47, %s7228_s24  ;;  %1816 = vrot.lane.b32.xlu1 %v8624_v17, %s7228_s24 }
 0x27a   : > { %v1807_v11 = vpop.permute.xlu0 %1806  ;;  %v1809_v25 = vpop.permute.xlu1 %1808  ;;  %v3084_v38 = vld [vmem:[#allocation2 + $0x108] sm:$0xff]  ;;  %v3086_v18 = vld [vmem:[#allocation2 + $0x118] sm:$0xff] }
 0x27b   : > { %1884 = vst.msk [vmem:[#allocation2 + $0x128] sm:$0xff] %vm449_vm1, %v1807_v11  ;;  %1885 = vst.msk [vmem:[#allocation2 + $0x138] sm:$0xff] %vm449_vm1, %v1809_v25  ;;  %v3132_v22 = vpack.c.bf16 %v3086_v18, %v3084_v38  ;;  %v8768_v18 = vld [vmem:[%s7281_s23 + $0x152] sm:$0xff] }
 0x27c   : > { %397 = vrot.lane.b32.xlu0 %v8354_v9, %s7228_s24  ;;  %399 = vrot.lane.b32.xlu1 %v8357_v12, %s7228_s24 }
 0x27d   : > { %3371 = vmatprep.mubr.bf16.mxu0 %v3132_v22  ;;  %v8771_v22 = vld [vmem:[%s7281_s23 + $0x15a] sm:$0xff] }
 0x27e   : > { %v390_v23 = vpop.permute.xlu0 %389  ;;  %v392_v3 = vpop.permute.xlu1 %391  ;;  %v3083_v42 = vld [vmem:[#allocation2 + $0x100] sm:$0xff]  ;;  %v3085_v0 = vld [vmem:[#allocation2 + $0x110] sm:$0xff] }
 0x27f   : > { %468 = vst.msk [vmem:[#allocation2 + $0x120] sm:$0xff] %vm449_vm1, %v390_v23  ;;  %469 = vst.msk [vmem:[#allocation2 + $0x130] sm:$0xff] %vm449_vm1, %v392_v3  ;;  %v3131_v62 = vpack.c.bf16 %v3085_v0, %v3083_v42 }
 0x280   : > { %2006 = vrot.lane.b32.xlu0 %v8639_v16, %s7229_s25  ;;  %2008 = vrot.lane.b32.xlu1 %v8642_v30, %s7229_s25 }
 0x281   : > { %3372 = vmatmul.mubr.bf16.gmra.mxu0 %v3131_v62 }
 0x282   : > { %v1999_v9 = vpop.permute.xlu0 %1998  ;;  %v2001_v12 = vpop.permute.xlu1 %2000 }
 0x283   : > { %2076 = vst.msk [vmem:[#allocation2 + $0x128] sm:$0xff] %vm642_vm2, %v1999_v9  ;;  %2077 = vst.msk [vmem:[#allocation2 + $0x138] sm:$0xff] %vm642_vm2, %v2001_v12 }
 0x284   : > { %590 = vrot.lane.b32.xlu0 %v8372_v61, %s7229_s25  ;;  %592 = vrot.lane.b32.xlu1 %v8375_v2, %s7229_s25 }
 0x286   : > { %v583_v4 = vpop.permute.xlu0 %582  ;;  %v585_v5 = vpop.permute.xlu1 %584 }
 0x287   : > { %661 = vst.msk [vmem:[#allocation2 + $0x120] sm:$0xff] %vm642_vm2, %v583_v4  ;;  %662 = vst.msk [vmem:[#allocation2 + $0x130] sm:$0xff] %vm642_vm2, %v585_v5 }
 0x288   : > { %2198 = vrot.lane.b32.xlu0 %v8657_v33, %s7230_s28  ;;  %2200 = vrot.lane.b32.xlu1 %v8660_v34, %s7230_s28 }
 0x28a   : > { %v2191_v8 = vpop.permute.xlu0 %2190  ;;  %v2193_v14 = vpop.permute.xlu1 %2192 }
 0x28b   : > { %2268 = vst.msk [vmem:[#allocation2 + $0x128] sm:$0xff] %vm835_vm3, %v2191_v8  ;;  %2269 = vst.msk [vmem:[#allocation2 + $0x138] sm:$0xff] %vm835_vm3, %v2193_v14 }
 0x28c   : > { %783 = vrot.lane.b32.xlu0 %v8390_v57, %s7230_s28  ;;  %785 = vrot.lane.b32.xlu1 %v8393_v10, %s7230_s28  ;;  %v8737_v10 = vld [vmem:[%s7281_s23 + $0x151] sm:$0xff] }
 0x28e   : > { %v776_v61 = vpop.permute.xlu0 %775  ;;  %v778_v2 = vpop.permute.xlu1 %777 }
 0x28f   : > { %854 = vst.msk [vmem:[#allocation2 + $0x120] sm:$0xff] %vm835_vm3, %v776_v61  ;;  %855 = vst.msk [vmem:[#allocation2 + $0x130] sm:$0xff] %vm835_vm3, %v778_v2 }
 0x290   : > { %2391 = vrot.lane.b32.xlu0 %v8426_v13, %s7231_s12  ;;  %2393 = vrot.lane.b32.xlu1 %v8429_v7, %s7231_s12 }
 0x292   : > { %v2384_v57 = vpop.permute.xlu0 %2383  ;;  %v2386_v27 = vpop.permute.xlu1 %2385 }
 0x293   : > { %2461 = vst.msk [vmem:[#allocation2 + $0x128] sm:$0xff] %vm1029_vm4, %v2384_v57  ;;  %2462 = vst.msk [vmem:[#allocation2 + $0x138] sm:$0xff] %vm1029_vm4, %v2386_v27  ;;  %v249_v57 = vld [vmem:[%s7281_s23 + $0x128] sm:$0xff] }
 0x294   : > { %977 = vrot.lane.b32.xlu0 %v8154_v45, %s7231_s12  ;;  %979 = vrot.lane.b32.xlu1 %v8157_v48, %s7231_s12  ;;  %v8757_v48 = vld [vmem:[%s10566_s4] ss:$0 sm:$0xff]  ;;  %282 = vst.msk [vmem:[#allocation2 + $0x190] sm:$0xff] %vm256_vm0, %v249_v57  ;;  %v8849_v57 = vld [vmem:[%s7281_s23 + $0x198] sm:$0xff] }
 0x295   : > { %v3486_v29 = vadd.f32 %v8757_v48, %v3449_v35  ;;  %v3487_v3 = vadd.f32 %v8757_v48, %v3450_v54  ;;  %1704 = vst.msk [vmem:[#allocation2 + $0x1e8] sm:$0xff] %vm256_vm0, %v8849_v57 }
 0x296   : > { %v970_v40 = vpop.permute.xlu0 %969  ;;  %v972_v44 = vpop.permute.xlu1 %971 }
 0x297   : > { %1048 = vst.msk [vmem:[#allocation2 + $0x120] sm:$0xff] %vm1029_vm4, %v970_v40  ;;  %1049 = vst.msk [vmem:[#allocation2 + $0x130] sm:$0xff] %vm1029_vm4, %v972_v44  ;;  %v3518_v23 = vmax.f32 %v3486_v29, 0.0  ;;  %v3519_v52 = vmax.f32 %v3487_v3, 0.0 }
 0x298   : > { %2583 = vrot.lane.b32.xlu0 %v8737_v10, %s7232_s26  ;;  %2585 = vrot.lane.b32.xlu1 %v8740_v51, %s7232_s26 }
 0x299   : > { %v7060_v45 = vpop.f32.mrf.mxu0  ;;  %v3548_v5 = vmax.f32 %v3516_v15, %v3518_v23  ;;  %v8803_v15 = vld [vmem:[%s7281_s23 + $0x15b] sm:$0xff]  ;;  %v3549_v27 = vmax.f32 %v3517_v63, %v3519_v52 }
 0x29a   : > { %v2576_v55 = vpop.permute.xlu0 %2575  ;;  %v2578_v21 = vpop.permute.xlu1 %2577 }
 0x29b   : > { %2653 = vst.msk [vmem:[#allocation2 + $0x128] sm:$0xff] %vm1222_vm5, %v2576_v55  ;;  %2654 = vst.msk [vmem:[#allocation2 + $0x138] sm:$0xff] %vm1222_vm5, %v2578_v21  ;;  %v7061_v11 = vpop.f32.mrf.mxu0 }
 0x29c   : > { %v7062_v25 = vadd.f32 %v7061_v11, %v7060_v45  ;;  %1170 = vrot.lane.b32.xlu0 %v8470_v20, %s7232_s26  ;;  %1172 = vrot.lane.b32.xlu1 %v8473_v53, %s7232_s26 }
 0x29d   : > { %v7063_v38 = vpop.f32.mrf.mxu0 }
 0x29e   : > { %v3451_v42 = vmul.f32 %v8745_v32, %v7062_v25  ;;  %v1163_v0 = vpop.permute.xlu0 %1162  ;;  %v1165_v62 = vpop.permute.xlu1 %1164 }
 0x29f   : > { %1241 = vst.msk [vmem:[#allocation2 + $0x120] sm:$0xff] %vm1222_vm5, %v1163_v0  ;;  %1242 = vst.msk [vmem:[#allocation2 + $0x130] sm:$0xff] %vm1222_vm5, %v1165_v62  ;;  %v7064_v9 = vpop.f32.mrf.mxu0 }
 0x2a0   : > { %v8778_v12 = vadd.f32 %v8757_v48, %v3451_v42  ;;  %v7065_v4 = vadd.f32 %v7064_v9, %v7063_v38  ;;  %2775 = vrot.lane.b32.xlu0 %v8768_v18, %s7233_s11  ;;  %2777 = vrot.lane.b32.xlu1 %v8771_v22, %s7233_s11 }
 0x2a2   : > { %v3520_v8 = vmax.f32 %v8778_v12, 0.0  ;;  %v3452_v14 = vmul.f32 %v8745_v32, %v7065_v4  ;;  %v2768_v26 = vpop.permute.xlu0 %2767  ;;  %v2770_v61 = vpop.permute.xlu1 %2769  ;;  %v9061_v12 = vld [vmem:[%s7281_s23 + $0x18b] sm:$0xff] }
 0x2a3   : > { %2845 = vst.msk [vmem:[#allocation2 + $0x128] sm:$0xff] %vm1415_vm6, %v2768_v26  ;;  %2846 = vst.msk [vmem:[#allocation2 + $0x138] sm:$0xff] %vm1415_vm6, %v2770_v61 }
 0x2a4   : > { %v3550_v2 = vmax.f32 %v3548_v5, %v3520_v8  ;;  %v8793_v49 = vadd.f32 %v8757_v48, %v3452_v14  ;;  %1363 = vrot.lane.b32.xlu0 %v8491_v41, %s7233_s11  ;;  %1365 = vrot.lane.b32.xlu1 %v8494_v43, %s7233_s11 }
 0x2a6   : > { %v3603_v50 = vrot.slane %v3550_v2, 1  ;;  %v3521_v35 = vmax.f32 %v8793_v49, 0.0  ;;  %v1356_v37 = vpop.permute.xlu0 %1355  ;;  %v1358_v40 = vpop.permute.xlu1 %1357  ;;  %v3637_v45 = vrot.slane %v3550_v2, 2 }
 0x2a7   : > { %1434 = vst.msk [vmem:[#allocation2 + $0x120] sm:$0xff] %vm1415_vm6, %v1356_v37  ;;  %1435 = vst.msk [vmem:[#allocation2 + $0x130] sm:$0xff] %vm1415_vm6, %v1358_v40 }
 0x2a8   : > { %v3619_v44 = vmax.f32 %v3550_v2, %v3603_v50  ;;  %v3551_v29 = vmax.f32 %v3549_v27, %v3521_v35  ;;  %2967 = vrot.lane.b32.xlu0 %v8800_v24, %s7234_s21  ;;  %2969 = vrot.lane.b32.xlu1 %v8803_v15, %s7234_s21 }
 0x2aa   : > { %3629 = vst.msk [vmem:[#allocation4 + $0x31] sm:$0x1] %vm3626_vm9, %v3619_v44  ;;  %v3653_v56 = vmax.f32 %v3619_v44, %v3637_v45  ;;  %v3696_v63 = vrot.slane %v3551_v29, 1  ;;  %v2960_v54 = vpop.permute.xlu0 %2959  ;;  %v2962_v55 = vpop.permute.xlu1 %2961  ;;  %v3720_v11 = vrot.slane %v3551_v29, 2  ;;  %v4189_v44 = vld [vmem:[#allocation3 + $0x8] sm:$0xff] }
 0x2ab   : > { %3037 = vst.msk [vmem:[#allocation2 + $0x128] sm:$0xff] %vm1608_vm7, %v2960_v54  ;;  %3038 = vst.msk [vmem:[#allocation2 + $0x138] sm:$0xff] %vm1608_vm7, %v2962_v55 }
 0x2ac   : > { %3662 = vst.msk [vmem:[#allocation4 + $0x31] sm:$0x2] %vm3659_vm10, %v3653_v56  ;;  %v3712_v21 = vmax.f32 %v3550_v2, %v3696_v63  ;;  %v3753_v25 = vmax.f32 %v3551_v29, %v3696_v63  ;;  %1556 = vrot.lane.b32.xlu0 %v8523_v36, %s7234_s21  ;;  %1558 = vrot.lane.b32.xlu1 %v8526_v1, %s7234_s21 }
 0x2ad   : > { %3671 = vst.msk [vmem:[#allocation4 + $0x30] sm:$0x8] %vm3668_vm11, %v3653_v56 }
 0x2ae   : > { %3680 = vst.msk [vmem:[#allocation4 + $0x2f] sm:$0x20] %vm3677_vm12, %v3653_v56  ;;  %v3736_v38 = vmax.f32 %v3712_v21, %v3720_v11  ;;  %v3761_v23 = vmax.f32 %v3753_v25, %v3720_v11  ;;  %v1549_v3 = vpop.permute.xlu0 %1548  ;;  %v1551_v42 = vpop.permute.xlu1 %1550 }
 0x2af   : > { %1627 = vst.msk [vmem:[#allocation2 + $0x120] sm:$0xff] %vm1608_vm7, %v1549_v3  ;;  %1628 = vst.msk [vmem:[#allocation2 + $0x130] sm:$0xff] %vm1608_vm7, %v1551_v42 }
 0x2b0   : > { %3745 = vst.msk [vmem:[#allocation4 + $0x2e] sm:$0x80] %vm3742_vm13, %v3736_v38  ;;  %1818 = vrot.lane.b32.xlu0 %v8737_v10, %s7228_s24  ;;  %1820 = vrot.lane.b32.xlu1 %v8740_v51, %s7228_s24  ;;  %v8920_v38 = vld [vmem:[%s7281_s23 + $0x172] sm:$0xff] }
 0x2b1   : > { %3769 = vst.msk [vmem:[#allocation4 + $0x35] sm:$0x2] %vm3659_vm10, %v3761_v23 }
 0x2b2   : > { %3777 = vst.msk [vmem:[#allocation4 + $0x34] sm:$0x8] %vm3668_vm11, %v3761_v23  ;;  %v1811_v0 = vpop.permute.xlu0 %1810  ;;  %v1813_v62 = vpop.permute.xlu1 %1812  ;;  %v3088_v9 = vld [vmem:[#allocation2 + $0x128] sm:$0xff]  ;;  %v3090_v4 = vld [vmem:[#allocation2 + $0x138] sm:$0xff] }
 0x2b3   : > { %3785 = vst.msk [vmem:[#allocation4 + $0x33] sm:$0x20] %vm3677_vm12, %v3761_v23  ;;  %v3134_v5 = vpack.c.bf16 %v3090_v4, %v3088_v9  ;;  %v8938_v9 = vld [vmem:[%s7281_s23 + $0x173] sm:$0xff] }
 0x2b4   : > { %1886 = vst.msk [vmem:[#allocation2 + $0x148] sm:$0xff] %vm449_vm1, %v1811_v0  ;;  %1887 = vst.msk [vmem:[#allocation2 + $0x158] sm:$0xff] %vm449_vm1, %v1813_v62  ;;  %401 = vrot.lane.b32.xlu0 %v8470_v20, %s7228_s24  ;;  %403 = vrot.lane.b32.xlu1 %v8473_v53, %s7228_s24  ;;  %v8857_v20 = vld [vmem:[%s7281_s23 + $0x1a0] sm:$0xff]  ;;  %v8935_v62 = vld [vmem:[%s7281_s23 + $0x16b] sm:$0xff] }
 0x2b5   : > { %3379 = vmatprep.mubr.bf16.mxu0 %v3134_v5  ;;  %1705 = vst.msk [vmem:[#allocation2 + $0x1f8] sm:$0xff] %vm256_vm0, %v8857_v20  ;;  %v250_v4 = vld [vmem:[%s7281_s23 + $0x138] sm:$0xff]  ;;  %v251_v5 = vld [vmem:[%s7281_s23 + $0x140] sm:$0xff] }
 0x2b6   : > { %v394_v52 = vpop.permute.xlu0 %393  ;;  %v396_v14 = vpop.permute.xlu1 %395  ;;  %v3087_v26 = vld [vmem:[#allocation2 + $0x120] sm:$0xff]  ;;  %v3089_v61 = vld [vmem:[#allocation2 + $0x130] sm:$0xff]  ;;  %283 = vst.msk [vmem:[#allocation2 + $0x1a0] sm:$0xff] %vm256_vm0, %v250_v4  ;;  %284 = vst.msk [vmem:[#allocation2 + $0x1b0] sm:$0xff] %vm256_vm0, %v251_v5 }
 0x2b7   : > { %470 = vst.msk [vmem:[#allocation2 + $0x140] sm:$0xff] %vm449_vm1, %v394_v52  ;;  %471 = vst.msk [vmem:[#allocation2 + $0x150] sm:$0xff] %vm449_vm1, %v396_v14  ;;  %v3133_v2 = vpack.c.bf16 %v3089_v61, %v3087_v26 }
 0x2b8   : > { %2010 = vrot.lane.b32.xlu0 %v8768_v18, %s7229_s25  ;;  %2012 = vrot.lane.b32.xlu1 %v8771_v22, %s7229_s25 }
 0x2b9   : > { %v8859_v53 = vld [vmem:[#allocation4 + $0x30] sm:$0xff]  ;;  %3380 = vmatmul.mubr.bf16.gmra.mxu0 %v3133_v2 }
 0x2ba   : > { %v4173_v46 = vld [vmem:[#allocation4 + $0x32] sm:$0xff]  ;;  %3830 = vst.msk [vmem:[#allocation3 + $0x30] sm:$0xff] %vm256_vm0, %v8859_v53  ;;  %v2003_v27 = vpop.permute.xlu0 %2002  ;;  %v2005_v50 = vpop.permute.xlu1 %2004 }
 0x2bb   : > { %4181 = vst.msk [vmem:[#allocation3 + $0x18] sm:$0xff] %vm256_vm0, %v4173_v46 }
 0x2bc   : > { %2078 = vst.msk [vmem:[#allocation2 + $0x148] sm:$0xff] %vm642_vm2, %v2003_v27  ;;  %2079 = vst.msk [vmem:[#allocation2 + $0x158] sm:$0xff] %vm642_vm2, %v2005_v50  ;;  %594 = vrot.lane.b32.xlu0 %v8491_v41, %s7229_s25  ;;  %596 = vrot.lane.b32.xlu1 %v8494_v43, %s7229_s25 }
 0x2be   : > { %v587_v37 = vpop.permute.xlu0 %586  ;;  %v589_v40 = vpop.permute.xlu1 %588 }
 0x2bf   : > { %663 = vst.msk [vmem:[#allocation2 + $0x140] sm:$0xff] %vm642_vm2, %v587_v37  ;;  %664 = vst.msk [vmem:[#allocation2 + $0x150] sm:$0xff] %vm642_vm2, %v589_v40 }
 0x2c0   : > { %2202 = vrot.lane.b32.xlu0 %v8800_v24, %s7230_s28  ;;  %2204 = vrot.lane.b32.xlu1 %v8803_v15, %s7230_s28 }
 0x2c2   : > { %v4191_v45 = vld [vmem:[#allocation3 + $0x18] sm:$0xff]  ;;  %v2195_v56 = vpop.permute.xlu0 %2194  ;;  %v2197_v41 = vpop.permute.xlu1 %2196 }
 0x2c3   : > { %v4205_v29 = vpack.c.bf16 %v4191_v45, %v4189_v44  ;;  %2270 = vst.msk [vmem:[#allocation2 + $0x148] sm:$0xff] %vm835_vm3, %v2195_v56  ;;  %2271 = vst.msk [vmem:[#allocation2 + $0x158] sm:$0xff] %vm835_vm3, %v2197_v41 }
 0x2c4   : > { %787 = vrot.lane.b32.xlu0 %v8523_v36, %s7230_s28  ;;  %789 = vrot.lane.b32.xlu1 %v8526_v1, %s7230_s28  ;;  %v8899_v36 = vld [vmem:[%s7281_s23 + $0x169] sm:$0xff]  ;;  %v8902_v1 = vld [vmem:[%s7281_s23 + $0x171] sm:$0xff] }
 0x2c5   : > { %6907 = vmatprep.mubr.msk.bf16.mxu1 %vm256_vm0, %v4205_v29 }
 0x2c6   : > { %v780_v43 = vpop.permute.xlu0 %779  ;;  %v782_v63 = vpop.permute.xlu1 %781 }
 0x2c7   : > { %856 = vst.msk [vmem:[#allocation2 + $0x140] sm:$0xff] %vm835_vm3, %v780_v43  ;;  %857 = vst.msk [vmem:[#allocation2 + $0x150] sm:$0xff] %vm835_vm3, %v782_v63 }
 0x2c8   : > { %2395 = vrot.lane.b32.xlu0 %v8572_v60, %s7231_s12  ;;  %2397 = vrot.lane.b32.xlu1 %v8580_v19, %s7231_s12 }
 0x2ca   : > { %v2388_v54 = vpop.permute.xlu0 %2387  ;;  %v2390_v55 = vpop.permute.xlu1 %2389 }
 0x2cb   : > { %2463 = vst.msk [vmem:[#allocation2 + $0x148] sm:$0xff] %vm1029_vm4, %v2388_v54  ;;  %2464 = vst.msk [vmem:[#allocation2 + $0x158] sm:$0xff] %vm1029_vm4, %v2390_v55 }
 0x2cc   : > { %981 = vrot.lane.b32.xlu0 %v8306_v58, %s7231_s12  ;;  %983 = vrot.lane.b32.xlu1 %v8309_v59, %s7231_s12  ;;  %v8917_v59 = vld [vmem:[%s7281_s23 + $0x16a] sm:$0xff] }
 0x2ce   : > { %v974_v21 = vpop.permute.xlu0 %973  ;;  %v976_v11 = vpop.permute.xlu1 %975 }
 0x2cf   : > { %1050 = vst.msk [vmem:[#allocation2 + $0x140] sm:$0xff] %vm1029_vm4, %v974_v21  ;;  %1051 = vst.msk [vmem:[#allocation2 + $0x150] sm:$0xff] %vm1029_vm4, %v976_v11 }
 0x2d0   : > { %2587 = vrot.lane.b32.xlu0 %v8899_v36, %s7232_s26  ;;  %2589 = vrot.lane.b32.xlu1 %v8902_v1, %s7232_s26 }
 0x2d1   : > { %v7066_v55 = vpop.f32.mrf.mxu0 }
 0x2d2   : > { %v2580_v58 = vpop.permute.xlu0 %2579  ;;  %v2582_v25 = vpop.permute.xlu1 %2581 }
 0x2d3   : > { %2655 = vst.msk [vmem:[#allocation2 + $0x148] sm:$0xff] %vm1222_vm5, %v2580_v58  ;;  %2656 = vst.msk [vmem:[#allocation2 + $0x158] sm:$0xff] %vm1222_vm5, %v2582_v25  ;;  %v7067_v58 = vpop.f32.mrf.mxu0 }
 0x2d4   : > { %1174 = vrot.lane.b32.xlu0 %v8621_v47, %s7232_s26  ;;  %1176 = vrot.lane.b32.xlu1 %v8624_v17, %s7232_s26 }
 0x2d5   : > { %v7069_v25 = vpop.f32.mrf.mxu0 }
 0x2d6   : > { %v1167_v23 = vpop.permute.xlu0 %1166  ;;  %v1169_v3 = vpop.permute.xlu1 %1168 }
 0x2d7   : > { %1243 = vst.msk [vmem:[#allocation2 + $0x140] sm:$0xff] %vm1222_vm5, %v1167_v23  ;;  %1244 = vst.msk [vmem:[#allocation2 + $0x150] sm:$0xff] %vm1222_vm5, %v1169_v3  ;;  %v7068_v23 = vadd.f32 %v7067_v58, %v7066_v55 }
 0x2d8   : > { %2779 = vrot.lane.b32.xlu0 %v8917_v59, %s7233_s11  ;;  %2781 = vrot.lane.b32.xlu1 %v8920_v38, %s7233_s11 }
 0x2d9   : > { %v3453_v4 = vmul.f32 %v8745_v32, %v7068_v23 }
 0x2da   : > { %v2772_v42 = vpop.permute.xlu0 %2771  ;;  %v2774_v0 = vpop.permute.xlu1 %2773 }
 0x2db   : > { %2847 = vst.msk [vmem:[#allocation2 + $0x148] sm:$0xff] %vm1415_vm6, %v2772_v42  ;;  %2848 = vst.msk [vmem:[#allocation2 + $0x158] sm:$0xff] %vm1415_vm6, %v2774_v0  ;;  %v7070_v42 = vpop.f32.mrf.mxu0  ;;  %v9008_v0 = vld [vmem:[%s7281_s23 + $0x189] sm:$0xff] }
 0x2dc   : > { %1367 = vrot.lane.b32.xlu0 %v8639_v16, %s7233_s11  ;;  %1369 = vrot.lane.b32.xlu1 %v8642_v30, %s7233_s11  ;;  %v7071_v5 = vadd.f32 %v7070_v42, %v7069_v25  ;;  %v253_v42 = vld [vmem:[%s7281_s23 + $0x158] sm:$0xff] }
 0x2dd   : > { %286 = vst.msk [vmem:[#allocation2 + $0x1d0] sm:$0xff] %vm256_vm0, %v253_v42 }
 0x2de   : > { %v1360_v52 = vpop.permute.xlu0 %1359  ;;  %v1362_v14 = vpop.permute.xlu1 %1361 }
 0x2df   : > { %1436 = vst.msk [vmem:[#allocation2 + $0x140] sm:$0xff] %vm1415_vm6, %v1360_v52  ;;  %1437 = vst.msk [vmem:[#allocation2 + $0x150] sm:$0xff] %vm1415_vm6, %v1362_v14 }
 0x2e0   : > { %2971 = vrot.lane.b32.xlu0 %v8935_v62, %s7234_s21  ;;  %2973 = vrot.lane.b32.xlu1 %v8938_v9, %s7234_s21 }
 0x2e2   : > { %v2964_v26 = vpop.permute.xlu0 %2963  ;;  %v2966_v61 = vpop.permute.xlu1 %2965 }
 0x2e3   : > { %3039 = vst.msk [vmem:[#allocation2 + $0x148] sm:$0xff] %vm1608_vm7, %v2964_v26  ;;  %3040 = vst.msk [vmem:[#allocation2 + $0x158] sm:$0xff] %vm1608_vm7, %v2966_v61  ;;  %v3454_v26 = vmul.f32 %v8745_v32, %v7071_v5 }
 0x2e4   : > { %1560 = vrot.lane.b32.xlu0 %v8657_v33, %s7234_s21  ;;  %1562 = vrot.lane.b32.xlu1 %v8660_v34, %s7234_s21 }
 0x2e6   : > { %v1553_v2 = vpop.permute.xlu0 %1552  ;;  %v1555_v46 = vpop.permute.xlu1 %1554 }
 0x2e7   : > { %1629 = vst.msk [vmem:[#allocation2 + $0x140] sm:$0xff] %vm1608_vm7, %v1553_v2  ;;  %1630 = vst.msk [vmem:[#allocation2 + $0x150] sm:$0xff] %vm1608_vm7, %v1555_v46 }
 0x2e8   : > { %1822 = vrot.lane.b32.xlu0 %v8899_v36, %s7228_s24  ;;  %1824 = vrot.lane.b32.xlu1 %v8902_v1, %s7228_s24 }
 0x2ea   : > { %v1815_v27 = vpop.permute.xlu0 %1814  ;;  %v1817_v50 = vpop.permute.xlu1 %1816  ;;  %v3092_v37 = vld [vmem:[#allocation2 + $0x148] sm:$0xff]  ;;  %v3094_v40 = vld [vmem:[#allocation2 + $0x158] sm:$0xff] }
 0x2eb   : > { %1888 = vst.msk [vmem:[#allocation2 + $0x168] sm:$0xff] %vm449_vm1, %v1815_v27  ;;  %1889 = vst.msk [vmem:[#allocation2 + $0x178] sm:$0xff] %vm449_vm1, %v1817_v50  ;;  %v3136_v44 = vpack.c.bf16 %v3094_v40, %v3092_v37  ;;  %v9026_v37 = vld [vmem:[%s7281_s23 + $0x182] sm:$0xff]  ;;  %v9029_v40 = vld [vmem:[%s7281_s23 + $0x18a] sm:$0xff] }
 0x2ec   : > { %405 = vrot.lane.b32.xlu0 %v8621_v47, %s7228_s24  ;;  %407 = vrot.lane.b32.xlu1 %v8624_v17, %s7228_s24 }
 0x2ed   : > { %3387 = vmatprep.mubr.bf16.mxu0 %v3136_v44 }
 0x2ee   : > { %v398_v45 = vpop.permute.xlu0 %397  ;;  %v400_v29 = vpop.permute.xlu1 %399  ;;  %v3091_v56 = vld [vmem:[#allocation2 + $0x140] sm:$0xff]  ;;  %v3093_v41 = vld [vmem:[#allocation2 + $0x150] sm:$0xff] }
 0x2ef   : > { %472 = vst.msk [vmem:[#allocation2 + $0x160] sm:$0xff] %vm449_vm1, %v398_v45  ;;  %473 = vst.msk [vmem:[#allocation2 + $0x170] sm:$0xff] %vm449_vm1, %v400_v29  ;;  %v3135_v43 = vpack.c.bf16 %v3093_v41, %v3091_v56  ;;  %v3491_v45 = vadd.f32 %v8757_v48, %v3454_v26 }
 0x2f0   : > { %2014 = vrot.lane.b32.xlu0 %v8917_v59, %s7229_s25  ;;  %2016 = vrot.lane.b32.xlu1 %v8920_v38, %s7229_s25 }
 0x2f1   : > { %3388 = vmatmul.mubr.bf16.gmra.mxu0 %v3135_v43 }
 0x2f2   : > { %v2007_v47 = vpop.permute.xlu0 %2006  ;;  %v2009_v63 = vpop.permute.xlu1 %2008 }
 0x2f3   : > { %2080 = vst.msk [vmem:[#allocation2 + $0x168] sm:$0xff] %vm642_vm2, %v2007_v47  ;;  %2081 = vst.msk [vmem:[#allocation2 + $0x178] sm:$0xff] %vm642_vm2, %v2009_v63 }
 0x2f4   : > { %598 = vrot.lane.b32.xlu0 %v8639_v16, %s7229_s25  ;;  %600 = vrot.lane.b32.xlu1 %v8642_v30, %s7229_s25 }
 0x2f6   : > { %v591_v17 = vpop.permute.xlu0 %590  ;;  %v593_v54 = vpop.permute.xlu1 %592 }
 0x2f7   : > { %665 = vst.msk [vmem:[#allocation2 + $0x160] sm:$0xff] %vm642_vm2, %v591_v17  ;;  %666 = vst.msk [vmem:[#allocation2 + $0x170] sm:$0xff] %vm642_vm2, %v593_v54  ;;  %v3523_v54 = vmax.f32 %v3491_v45, 0.0 }
 0x2f8   : > { %2206 = vrot.lane.b32.xlu0 %v8935_v62, %s7230_s28  ;;  %2208 = vrot.lane.b32.xlu1 %v8938_v9, %s7230_s28 }
 0x2fa   : > { %v2199_v21 = vpop.permute.xlu0 %2198  ;;  %v2201_v11 = vpop.permute.xlu1 %2200 }
 0x2fb   : > { %2272 = vst.msk [vmem:[#allocation2 + $0x168] sm:$0xff] %vm835_vm3, %v2199_v21  ;;  %2273 = vst.msk [vmem:[#allocation2 + $0x178] sm:$0xff] %vm835_vm3, %v2201_v11 }
 0x2fc   : > { %791 = vrot.lane.b32.xlu0 %v8657_v33, %s7230_s28  ;;  %793 = vrot.lane.b32.xlu1 %v8660_v34, %s7230_s28  ;;  %v9005_v34 = vld [vmem:[%s7281_s23 + $0x181] sm:$0xff] }
 0x2fe   : > { %v784_v16 = vpop.permute.xlu0 %783  ;;  %v786_v30 = vpop.permute.xlu1 %785 }
 0x2ff   : > { %858 = vst.msk [vmem:[#allocation2 + $0x160] sm:$0xff] %vm835_vm3, %v784_v16  ;;  %859 = vst.msk [vmem:[#allocation2 + $0x170] sm:$0xff] %vm835_vm3, %v786_v30 }
 0x300   : > { %2399 = vrot.lane.b32.xlu0 %v8693_v39, %s7231_s12  ;;  %2401 = vrot.lane.b32.xlu1 %v8696_v6, %s7231_s12 }
 0x302   : > { %v2392_v33 = vpop.permute.xlu0 %2391  ;;  %v2394_v3 = vpop.permute.xlu1 %2393 }
 0x303   : > { %2465 = vst.msk [vmem:[#allocation2 + $0x168] sm:$0xff] %vm1029_vm4, %v2392_v33  ;;  %2466 = vst.msk [vmem:[#allocation2 + $0x178] sm:$0xff] %vm1029_vm4, %v2394_v3 }
 0x304   : > { %985 = vrot.lane.b32.xlu0 %v8426_v13, %s7231_s12  ;;  %987 = vrot.lane.b32.xlu1 %v8429_v7, %s7231_s12  ;;  %v3490_v7 = vadd.f32 %v8757_v48, %v3453_v4 }
 0x306   : > { %v978_v52 = vpop.permute.xlu0 %977  ;;  %v980_v14 = vpop.permute.xlu1 %979  ;;  %v3522_v44 = vmax.f32 %v3490_v7, 0.0 }
 0x307   : > { %1052 = vst.msk [vmem:[#allocation2 + $0x160] sm:$0xff] %vm1029_vm4, %v978_v52  ;;  %1053 = vst.msk [vmem:[#allocation2 + $0x170] sm:$0xff] %vm1029_vm4, %v980_v14 }
 0x308   : > { %2591 = vrot.lane.b32.xlu0 %v9005_v34, %s7232_s26  ;;  %2593 = vrot.lane.b32.xlu1 %v9008_v0, %s7232_s26  ;;  %v3552_v17 = vmax.f32 %v3520_v8, %v3522_v44  ;;  %v3553_v8 = vmax.f32 %v3521_v35, %v3523_v54 }
 0x309   : > { %v7072_v13 = vpop.f32.mrf.mxu0 }
 0x30a   : > { %v2584_v61 = vpop.permute.xlu0 %2583  ;;  %v2586_v2 = vpop.permute.xlu1 %2585 }
 0x30b   : > { %2657 = vst.msk [vmem:[#allocation2 + $0x168] sm:$0xff] %vm1222_vm5, %v2584_v61  ;;  %2658 = vst.msk [vmem:[#allocation2 + $0x178] sm:$0xff] %vm1222_vm5, %v2586_v2  ;;  %v7073_v46 = vpop.f32.mrf.mxu0 }
 0x30c   : > { %v7074_v27 = vadd.f32 %v7073_v46, %v7072_v13  ;;  %1178 = vrot.lane.b32.xlu0 %v8737_v10, %s7232_s26  ;;  %1180 = vrot.lane.b32.xlu1 %v8740_v51, %s7232_s26 }
 0x30d   : > { %v7075_v50 = vpop.f32.mrf.mxu0 }
 0x30e   : > { %v3455_v29 = vmul.f32 %v8745_v32, %v7074_v27  ;;  %v1171_v56 = vpop.permute.xlu0 %1170  ;;  %v1173_v41 = vpop.permute.xlu1 %1172 }
 0x30f   : > { %1245 = vst.msk [vmem:[#allocation2 + $0x160] sm:$0xff] %vm1222_vm5, %v1171_v56  ;;  %1246 = vst.msk [vmem:[#allocation2 + $0x170] sm:$0xff] %vm1222_vm5, %v1173_v41  ;;  %v7076_v43 = vpop.f32.mrf.mxu0 }
 0x310   : > { %v9036_v47 = vadd.f32 %v8757_v48, %v3455_v29  ;;  %v7077_v63 = vadd.f32 %v7076_v43, %v7075_v50  ;;  %2783 = vrot.lane.b32.xlu0 %v9026_v37, %s7233_s11  ;;  %2785 = vrot.lane.b32.xlu1 %v9029_v40, %s7233_s11 }
 0x312   : > { %v3524_v55 = vmax.f32 %v9036_v47, 0.0  ;;  %v3456_v21 = vmul.f32 %v8745_v32, %v7077_v63  ;;  %v2776_v11 = vpop.permute.xlu0 %2775  ;;  %v2778_v58 = vpop.permute.xlu1 %2777  ;;  %v9058_v32 = vld [vmem:[%s7281_s23 + $0x183] sm:$0xff] }
 0x313   : > { %2849 = vst.msk [vmem:[#allocation2 + $0x168] sm:$0xff] %vm1415_vm6, %v2776_v11  ;;  %2850 = vst.msk [vmem:[#allocation2 + $0x178] sm:$0xff] %vm1415_vm6, %v2778_v58 }
 0x314   : > { %v3554_v16 = vmax.f32 %v3552_v17, %v3524_v55  ;;  %v9051_v30 = vadd.f32 %v8757_v48, %v3456_v21  ;;  %1371 = vrot.lane.b32.xlu0 %v8768_v18, %s7233_s11  ;;  %1373 = vrot.lane.b32.xlu1 %v8771_v22, %s7233_s11  ;;  %v252_v48 = vld [vmem:[%s7281_s23 + $0x150] sm:$0xff] }
 0x315   : > { %285 = vst.msk [vmem:[#allocation2 + $0x1c0] sm:$0xff] %vm256_vm0, %v252_v48 }
 0x316   : > { %v3604_v25 = vrot.slane %v3554_v16, 1  ;;  %v3525_v23 = vmax.f32 %v9051_v30, 0.0  ;;  %v1364_v33 = vpop.permute.xlu0 %1363  ;;  %v1366_v3 = vpop.permute.xlu1 %1365  ;;  %v3638_v5 = vrot.slane %v3554_v16, 2 }
 0x317   : > { %1438 = vst.msk [vmem:[#allocation2 + $0x160] sm:$0xff] %vm1415_vm6, %v1364_v33  ;;  %1439 = vst.msk [vmem:[#allocation2 + $0x170] sm:$0xff] %vm1415_vm6, %v1366_v3 }
 0x318   : > { %v3620_v4 = vmax.f32 %v3554_v16, %v3604_v25  ;;  %v3555_v49 = vmax.f32 %v3553_v8, %v3525_v23  ;;  %2975 = vrot.lane.b32.xlu0 %v9058_v32, %s7234_s21  ;;  %2977 = vrot.lane.b32.xlu1 %v9061_v12, %s7234_s21 }
 0x31a   : > { %3630 = vst.msk [vmem:[#allocation4 + $0x41] sm:$0x1] %vm3626_vm9, %v3620_v4  ;;  %v3654_v35 = vmax.f32 %v3620_v4, %v3638_v5  ;;  %v3697_v52 = vrot.slane %v3555_v49, 1  ;;  %v2968_v14 = vpop.permute.xlu0 %2967  ;;  %v2970_v13 = vpop.permute.xlu1 %2969  ;;  %v3721_v26 = vrot.slane %v3555_v49, 2 }
 0x31b   : > { %3041 = vst.msk [vmem:[#allocation2 + $0x168] sm:$0xff] %vm1608_vm7, %v2968_v14  ;;  %3042 = vst.msk [vmem:[#allocation2 + $0x178] sm:$0xff] %vm1608_vm7, %v2970_v13  ;;  %v6876_v14 = vld [vmem:[%s7281_s23 + $0x19b] sm:$0xff]  ;;  %v6877_v13 = vld [vmem:[%s7281_s23 + $0x1a3] sm:$0xff] }
 0x31c   : > { %3663 = vst.msk [vmem:[#allocation4 + $0x41] sm:$0x2] %vm3659_vm10, %v3654_v35  ;;  %v3713_v7 = vmax.f32 %v3554_v16, %v3697_v52  ;;  %v3754_v61 = vmax.f32 %v3555_v49, %v3697_v52  ;;  %1564 = vrot.lane.b32.xlu0 %v8800_v24, %s7234_s21  ;;  %1566 = vrot.lane.b32.xlu1 %v8803_v15, %s7234_s21 }
 0x31d   : > { %3672 = vst.msk [vmem:[#allocation4 + $0x40] sm:$0x8] %vm3668_vm11, %v3654_v35 }
 0x31e   : > { %3681 = vst.msk [vmem:[#allocation4 + $0x3f] sm:$0x20] %vm3677_vm12, %v3654_v35  ;;  %v3737_v2 = vmax.f32 %v3713_v7, %v3721_v26  ;;  %v3762_v46 = vmax.f32 %v3754_v61, %v3721_v26  ;;  %v1557_v27 = vpop.permute.xlu0 %1556  ;;  %v1559_v50 = vpop.permute.xlu1 %1558  ;;  %v254_v61 = vld [vmem:[%s7281_s23 + $0x168] sm:$0xff] }
 0x31f   : > { %1631 = vst.msk [vmem:[#allocation2 + $0x160] sm:$0xff] %vm1608_vm7, %v1557_v27  ;;  %1632 = vst.msk [vmem:[#allocation2 + $0x170] sm:$0xff] %vm1608_vm7, %v1559_v50 }
 0x320   : > { %3746 = vst.msk [vmem:[#allocation4 + $0x3e] sm:$0x80] %vm3742_vm13, %v3737_v2  ;;  %1826 = vrot.lane.b32.xlu0 %v9005_v34, %s7228_s24  ;;  %1828 = vrot.lane.b32.xlu1 %v9008_v0, %s7228_s24  ;;  %v255_v2 = vld [vmem:[%s7281_s23 + $0x170] sm:$0xff] }
 0x321   : > { %3770 = vst.msk [vmem:[#allocation4 + $0x45] sm:$0x2] %vm3659_vm10, %v3762_v46 }
 0x322   : > { %3778 = vst.msk [vmem:[#allocation4 + $0x44] sm:$0x8] %vm3668_vm11, %v3762_v46  ;;  %v1819_v44 = vpop.permute.xlu0 %1818  ;;  %v1821_v45 = vpop.permute.xlu1 %1820  ;;  %v3096_v29 = vld [vmem:[#allocation2 + $0x168] sm:$0xff]  ;;  %v3098_v56 = vld [vmem:[#allocation2 + $0x178] sm:$0xff] }
 0x323   : > { %3786 = vst.msk [vmem:[#allocation4 + $0x43] sm:$0x20] %vm3677_vm12, %v3762_v46  ;;  %v3138_v41 = vpack.c.bf16 %v3098_v56, %v3096_v29 }
 0x324   : > { %1890 = vst.msk [vmem:[#allocation2 + $0x188] sm:$0xff] %vm449_vm1, %v1819_v44  ;;  %1891 = vst.msk [vmem:[#allocation2 + $0x198] sm:$0xff] %vm449_vm1, %v1821_v45  ;;  %409 = vrot.lane.b32.xlu0 %v8737_v10, %s7228_s24  ;;  %411 = vrot.lane.b32.xlu1 %v8740_v51, %s7228_s24 }
 0x325   : > { %3395 = vmatprep.mubr.bf16.mxu0 %v3138_v41  ;;  %287 = vst.msk [vmem:[#allocation2 + $0x1e0] sm:$0xff] %vm256_vm0, %v254_v61  ;;  %288 = vst.msk [vmem:[#allocation2 + $0x1f0] sm:$0xff] %vm256_vm0, %v255_v2  ;;  %v6846_v2 = vld [vmem:[%s7281_s23 + $0x1b2] sm:$0xff] }
 0x326   : > { %v402_v43 = vpop.permute.xlu0 %401  ;;  %v404_v63 = vpop.permute.xlu1 %403  ;;  %v3095_v17 = vld [vmem:[#allocation2 + $0x160] sm:$0xff]  ;;  %v3097_v54 = vld [vmem:[#allocation2 + $0x170] sm:$0xff] }
 0x327   : > { %474 = vst.msk [vmem:[#allocation2 + $0x180] sm:$0xff] %vm449_vm1, %v402_v43  ;;  %475 = vst.msk [vmem:[#allocation2 + $0x190] sm:$0xff] %vm449_vm1, %v404_v63  ;;  %v3137_v21 = vpack.c.bf16 %v3097_v54, %v3095_v17 }
 0x328   : > { %2018 = vrot.lane.b32.xlu0 %v9026_v37, %s7229_s25  ;;  %2020 = vrot.lane.b32.xlu1 %v9029_v40, %s7229_s25 }
 0x329   : > { %v9106_v11 = vld [vmem:[#allocation4 + $0x40] sm:$0xff]  ;;  %3396 = vmatmul.mubr.bf16.gmra.mxu0 %v3137_v21 }
 0x32a   : > { %v9108_v58 = vld [vmem:[#allocation4 + $0x42] sm:$0xff]  ;;  %3831 = vst.msk [vmem:[#allocation3 + $0x40] sm:$0xff] %vm256_vm0, %v9106_v11  ;;  %v2011_v10 = vpop.permute.xlu0 %2010  ;;  %v2013_v51 = vpop.permute.xlu1 %2012 }
 0x32b   : > { %4182 = vst.msk [vmem:[#allocation3 + $0x28] sm:$0xff] %vm256_vm0, %v9108_v58 }
 0x32c   : > { %2082 = vst.msk [vmem:[#allocation2 + $0x188] sm:$0xff] %vm642_vm2, %v2011_v10  ;;  %2083 = vst.msk [vmem:[#allocation2 + $0x198] sm:$0xff] %vm642_vm2, %v2013_v51  ;;  %602 = vrot.lane.b32.xlu0 %v8768_v18, %s7229_s25  ;;  %604 = vrot.lane.b32.xlu1 %v8771_v22, %s7229_s25 }
 0x32e   : > { %v595_v16 = vpop.permute.xlu0 %594  ;;  %v597_v8 = vpop.permute.xlu1 %596 }
 0x32f   : > { %667 = vst.msk [vmem:[#allocation2 + $0x180] sm:$0xff] %vm642_vm2, %v595_v16  ;;  %668 = vst.msk [vmem:[#allocation2 + $0x190] sm:$0xff] %vm642_vm2, %v597_v8 }
 0x330   : > { %2210 = vrot.lane.b32.xlu0 %v9058_v32, %s7230_s28  ;;  %2212 = vrot.lane.b32.xlu1 %v9061_v12, %s7230_s28 }
 0x332   : > { %v2203_v25 = vpop.permute.xlu0 %2202  ;;  %v2205_v33 = vpop.permute.xlu1 %2204 }
 0x333   : > { %2274 = vst.msk [vmem:[#allocation2 + $0x188] sm:$0xff] %vm835_vm3, %v2203_v25  ;;  %2275 = vst.msk [vmem:[#allocation2 + $0x198] sm:$0xff] %vm835_vm3, %v2205_v33 }
 0x334   : > { %795 = vrot.lane.b32.xlu0 %v8800_v24, %s7230_s28  ;;  %797 = vrot.lane.b32.xlu1 %v8803_v15, %s7230_s28  ;;  %v6812_v24 = vld [vmem:[%s7281_s23 + $0x199] sm:$0xff]  ;;  %v6813_v15 = vld [vmem:[%s7281_s23 + $0x1a1] sm:$0xff] }
 0x336   : > { %v788_v18 = vpop.permute.xlu0 %787  ;;  %v790_v22 = vpop.permute.xlu1 %789 }
 0x337   : > { %860 = vst.msk [vmem:[#allocation2 + $0x180] sm:$0xff] %vm835_vm3, %v788_v18  ;;  %861 = vst.msk [vmem:[#allocation2 + $0x190] sm:$0xff] %vm835_vm3, %v790_v22 }
 0x338   : > { %2403 = vrot.lane.b32.xlu0 %v8849_v57, %s7231_s12  ;;  %2405 = vrot.lane.b32.xlu1 %v8857_v20, %s7231_s12 }
 0x33a   : > { %v2396_v3 = vpop.permute.xlu0 %2395  ;;  %v2398_v48 = vpop.permute.xlu1 %2397 }
 0x33b   : > { %2467 = vst.msk [vmem:[#allocation2 + $0x188] sm:$0xff] %vm1029_vm4, %v2396_v3  ;;  %2468 = vst.msk [vmem:[#allocation2 + $0x198] sm:$0xff] %vm1029_vm4, %v2398_v48 }
 0x33c   : > { %989 = vrot.lane.b32.xlu0 %v8572_v60, %s7231_s12  ;;  %991 = vrot.lane.b32.xlu1 %v8580_v19, %s7231_s12  ;;  %v6844_v60 = vld [vmem:[%s7281_s23 + $0x19a] sm:$0xff]  ;;  %v6845_v19 = vld [vmem:[%s7281_s23 + $0x1a2] sm:$0xff] }
 0x33e   : > { %v982_v57 = vpop.permute.xlu0 %981  ;;  %v984_v42 = vpop.permute.xlu1 %983 }
 0x33f   : > { %1054 = vst.msk [vmem:[#allocation2 + $0x180] sm:$0xff] %vm1029_vm4, %v982_v57  ;;  %1055 = vst.msk [vmem:[#allocation2 + $0x190] sm:$0xff] %vm1029_vm4, %v984_v42 }
 0x340   : > { %2595 = vrot.lane.b32.xlu0 %v6812_v24, %s7232_s26  ;;  %2597 = vrot.lane.b32.xlu1 %v6813_v15, %s7232_s26 }
 0x341   : > { %v7078_v8 = vpop.f32.mrf.mxu0 }
 0x342   : > { %v2588_v20 = vpop.permute.xlu0 %2587  ;;  %v2590_v4 = vpop.permute.xlu1 %2589 }
 0x343   : > { %2659 = vst.msk [vmem:[#allocation2 + $0x188] sm:$0xff] %vm1222_vm5, %v2588_v20  ;;  %2660 = vst.msk [vmem:[#allocation2 + $0x198] sm:$0xff] %vm1222_vm5, %v2590_v4  ;;  %v7079_v18 = vpop.f32.mrf.mxu0  ;;  %v6814_v20 = vld [vmem:[%s7281_s23 + $0x1b1] sm:$0xff]  ;;  %v6815_v4 = vld [vmem:[%s7281_s23 + $0x1b9] sm:$0xff] }
 0x344   : > { %1182 = vrot.lane.b32.xlu0 %v8899_v36, %s7232_s26  ;;  %1184 = vrot.lane.b32.xlu1 %v8902_v1, %s7232_s26 }
 0x345   : > { %v7081_v48 = vpop.f32.mrf.mxu0 }
 0x346   : > { %v1175_v5 = vpop.permute.xlu0 %1174  ;;  %v1177_v49 = vpop.permute.xlu1 %1176 }
 0x347   : > { %1247 = vst.msk [vmem:[#allocation2 + $0x180] sm:$0xff] %vm1222_vm5, %v1175_v5  ;;  %1248 = vst.msk [vmem:[#allocation2 + $0x190] sm:$0xff] %vm1222_vm5, %v1177_v49  ;;  %v7082_v57 = vpop.f32.mrf.mxu0 }
 0x348   : > { %2787 = vrot.lane.b32.xlu0 %v6844_v60, %s7233_s11  ;;  %2789 = vrot.lane.b32.xlu1 %v6845_v19, %s7233_s11 }
 0x34a   : > { %v2780_v35 = vpop.permute.xlu0 %2779  ;;  %v2782_v52 = vpop.permute.xlu1 %2781 }
 0x34b   : > { %2851 = vst.msk [vmem:[#allocation2 + $0x188] sm:$0xff] %vm1415_vm6, %v2780_v35  ;;  %2852 = vst.msk [vmem:[#allocation2 + $0x198] sm:$0xff] %vm1415_vm6, %v2782_v52 }
 0x34c   : > { %1375 = vrot.lane.b32.xlu0 %v8917_v59, %s7233_s11  ;;  %1377 = vrot.lane.b32.xlu1 %v8920_v38, %s7233_s11 }
 0x34e   : > { %v1368_v7 = vpop.permute.xlu0 %1367  ;;  %v1370_v26 = vpop.permute.xlu1 %1369 }
 0x34f   : > { %1440 = vst.msk [vmem:[#allocation2 + $0x180] sm:$0xff] %vm1415_vm6, %v1368_v7  ;;  %1441 = vst.msk [vmem:[#allocation2 + $0x190] sm:$0xff] %vm1415_vm6, %v1370_v26 }
 0x350   : > { %2979 = vrot.lane.b32.xlu0 %v6876_v14, %s7234_s21  ;;  %2981 = vrot.lane.b32.xlu1 %v6877_v13, %s7234_s21 }
 0x352   : > { %v2972_v46 = vpop.permute.xlu0 %2971  ;;  %v2974_v27 = vpop.permute.xlu1 %2973 }
 0x353   : > { %3043 = vst.msk [vmem:[#allocation2 + $0x188] sm:$0xff] %vm1608_vm7, %v2972_v46  ;;  %3044 = vst.msk [vmem:[#allocation2 + $0x198] sm:$0xff] %vm1608_vm7, %v2974_v27  ;;  %v6847_v46 = vld [vmem:[%s7281_s23 + $0x1ba] sm:$0xff] }
 0x354   : > { %1568 = vrot.lane.b32.xlu0 %v8935_v62, %s7234_s21  ;;  %1570 = vrot.lane.b32.xlu1 %v8938_v9, %s7234_s21 }
 0x356   : > { %v1561_v50 = vpop.permute.xlu0 %1560  ;;  %v1563_v44 = vpop.permute.xlu1 %1562 }
 0x357   : > { %1633 = vst.msk [vmem:[#allocation2 + $0x180] sm:$0xff] %vm1608_vm7, %v1561_v50  ;;  %1634 = vst.msk [vmem:[#allocation2 + $0x190] sm:$0xff] %vm1608_vm7, %v1563_v44 }
 0x358   : > { %1830 = vrot.lane.b32.xlu0 %v6812_v24, %s7228_s24  ;;  %1832 = vrot.lane.b32.xlu1 %v6813_v15, %s7228_s24  ;;  %v7080_v24 = vadd.f32 %v7079_v18, %v7078_v8 }
 0x35a   : > { %v1823_v45 = vpop.permute.xlu0 %1822  ;;  %v1825_v29 = vpop.permute.xlu1 %1824  ;;  %v3100_v56 = vld [vmem:[#allocation2 + $0x188] sm:$0xff]  ;;  %v3102_v41 = vld [vmem:[#allocation2 + $0x198] sm:$0xff] }
 0x35b   : > { %1892 = vst.msk [vmem:[#allocation2 + $0x1a8] sm:$0xff] %vm449_vm1, %v1823_v45  ;;  %1893 = vst.msk [vmem:[#allocation2 + $0x1b8] sm:$0xff] %vm449_vm1, %v1825_v29  ;;  %v3140_v43 = vpack.c.bf16 %v3102_v41, %v3100_v56 }
 0x35c   : > { %413 = vrot.lane.b32.xlu0 %v8899_v36, %s7228_s24  ;;  %415 = vrot.lane.b32.xlu1 %v8902_v1, %s7228_s24 }
 0x35d   : > { %3403 = vmatprep.mubr.bf16.mxu0 %v3140_v43 }
 0x35e   : > { %v406_v63 = vpop.permute.xlu0 %405  ;;  %v408_v17 = vpop.permute.xlu1 %407  ;;  %v3099_v54 = vld [vmem:[#allocation2 + $0x180] sm:$0xff]  ;;  %v3101_v21 = vld [vmem:[#allocation2 + $0x190] sm:$0xff] }
 0x35f   : > { %476 = vst.msk [vmem:[#allocation2 + $0x1a0] sm:$0xff] %vm449_vm1, %v406_v63  ;;  %477 = vst.msk [vmem:[#allocation2 + $0x1b0] sm:$0xff] %vm449_vm1, %v408_v17  ;;  %v3139_v10 = vpack.c.bf16 %v3101_v21, %v3099_v54  ;;  %v7178_v21 = vld [vmem:[%s10564_s2 + $0x38] sm:$0xff]  }
 0x360   : > { %2022 = vrot.lane.b32.xlu0 %v6844_v60, %s7229_s25  ;;  %2024 = vrot.lane.b32.xlu1 %v6845_v19, %s7229_s25  ;;  %v7083_v60 = vadd.f32 %v7082_v57, %v7081_v48  ;;  %v3835_v57 = vld [vmem:[#allocation4 + $0x1] sm:$0xff] }
 0x361   : > { %3404 = vmatmul.mubr.bf16.gmra.mxu0 %v3139_v10  ;;  %v7236_v10 = vmov 0  }
 0x362   : > { %v2015_v51 = vpop.permute.xlu0 %2014  ;;  %v2017_v36 = vpop.permute.xlu1 %2016  ;;  %4278 = vmatprep.subr.bf16.mxu1 %v7236_v10  ;;  %6046 = vmatprep.subr.bf16.mxu0 %v7236_v10 }
 0x363   : > { %2084 = vst.msk [vmem:[#allocation2 + $0x1a8] sm:$0xff] %vm642_vm2, %v2015_v51  ;;  %2085 = vst.msk [vmem:[#allocation2 + $0x1b8] sm:$0xff] %vm642_vm2, %v2017_v36  ;;  %v6878_v51 = vld [vmem:[%s7281_s23 + $0x1b3] sm:$0xff]  ;;  %v6879_v36 = vld [vmem:[%s7281_s23 + $0x1bb] sm:$0xff]  ;;  %4279 = vmatpush1.bf16.msra.mxu1 %v7178_v21 }
 0x364   : > { %606 = vrot.lane.b32.xlu0 %v8917_v59, %s7229_s25  ;;  %608 = vrot.lane.b32.xlu1 %v8920_v38, %s7229_s25  ;;  %v6782_v59 = vld [vmem:[%s7281_s23 + $0x1b0] sm:$0xff]  ;;  %v6783_v38 = vld [vmem:[%s7281_s23 + $0x1b8] sm:$0xff] }
 0x365   : > { %4280 = vmatprep.subr.bf16.mxu1 %v7236_v10 }
 0x366   : > { %v599_v1 = vpop.permute.xlu0 %598  ;;  %v601_v16 = vpop.permute.xlu1 %600 }
 0x367   : > { %669 = vst.msk [vmem:[#allocation2 + $0x1a0] sm:$0xff] %vm642_vm2, %v599_v1  ;;  %670 = vst.msk [vmem:[#allocation2 + $0x1b0] sm:$0xff] %vm642_vm2, %v601_v16 }
 0x368   : > { %2214 = vrot.lane.b32.xlu0 %v6876_v14, %s7230_s28  ;;  %2216 = vrot.lane.b32.xlu1 %v6877_v13, %s7230_s28 }
 0x36a   : > { %v2207_v25 = vpop.permute.xlu0 %2206  ;;  %v2209_v33 = vpop.permute.xlu1 %2208 }
 0x36b   : > { %2276 = vst.msk [vmem:[#allocation2 + $0x1a8] sm:$0xff] %vm835_vm3, %v2207_v25  ;;  %2277 = vst.msk [vmem:[#allocation2 + $0x1b8] sm:$0xff] %vm835_vm3, %v2209_v33 }
 0x36c   : > { %799 = vrot.lane.b32.xlu0 %v8935_v62, %s7230_s28  ;;  %801 = vrot.lane.b32.xlu1 %v8938_v9, %s7230_s28  ;;  %v9233_v9 = vld [vmem:[%s10565_s3] ss:$0 sm:$0xff] }
 0x36d   : > { %v3457_v42 = vmul.f32 %v9233_v9, %v7080_v24  ;;  %v3458_v35 = vmul.f32 %v9233_v9, %v7083_v60 }
 0x36e   : > { %v792_v22 = vpop.permute.xlu0 %791  ;;  %v794_v3 = vpop.permute.xlu1 %793 }
 0x36f   : > { %862 = vst.msk [vmem:[#allocation2 + $0x1a0] sm:$0xff] %vm835_vm3, %v792_v22  ;;  %863 = vst.msk [vmem:[#allocation2 + $0x1b0] sm:$0xff] %vm835_vm3, %v794_v3 }
 0x370   : > { %2407 = vrot.lane.b32.xlu0 %v6782_v59, %s7231_s12  ;;  %2409 = vrot.lane.b32.xlu1 %v6783_v38, %s7231_s12  ;;  %v7180_v59 = vld [vmem:[%s10564_s2 + $0x28] sm:$0xff]  }
 0x372   : > { %v2400_v62 = vpop.permute.xlu0 %2399  ;;  %v2402_v15 = vpop.permute.xlu1 %2401 }
 0x373   : > { %2469 = vst.msk [vmem:[#allocation2 + $0x1a8] sm:$0xff] %vm1029_vm4, %v2400_v62  ;;  %2470 = vst.msk [vmem:[#allocation2 + $0x1b8] sm:$0xff] %vm1029_vm4, %v2402_v15 }
 0x374   : > { %993 = vrot.lane.b32.xlu0 %v8693_v39, %s7231_s12  ;;  %995 = vrot.lane.b32.xlu1 %v8696_v6, %s7231_s12  ;;  %v9245_v39 = vld [vmem:[%s10566_s4] ss:$0 sm:$0xff] }
 0x375   : > { %v3494_v6 = vadd.f32 %v9245_v39, %v3457_v42  ;;  %v3495_v27 = vadd.f32 %v9245_v39, %v3458_v35  ;;  %v7181_v42 = vld [vmem:[%s10564_s2 + $0x20] sm:$0xff]  }
 0x376   : > { %v986_v19 = vpop.permute.xlu0 %985  ;;  %v988_v5 = vpop.permute.xlu1 %987 }
 0x377   : > { %1056 = vst.msk [vmem:[#allocation2 + $0x1a0] sm:$0xff] %vm1029_vm4, %v986_v19  ;;  %1057 = vst.msk [vmem:[#allocation2 + $0x1b0] sm:$0xff] %vm1029_vm4, %v988_v5  ;;  %v3526_v26 = vmax.f32 %v3494_v6, 0.0  ;;  %v3527_v41 = vmax.f32 %v3495_v27, 0.0  ;;  %v7182_v5 = vld [vmem:[%s10564_s2 + $0x18] sm:$0xff]  }
 0x378   : > { %2599 = vrot.lane.b32.xlu0 %v6814_v20, %s7232_s26  ;;  %2601 = vrot.lane.b32.xlu1 %v6815_v4, %s7232_s26 }
 0x379   : > { %v7084_v49 = vpop.f32.mrf.mxu0  ;;  %v3557_v1 = vmax.f32 %v3525_v23, %v3527_v41 }
 0x37a   : > { %v2592_v52 = vpop.permute.xlu0 %2591  ;;  %v2594_v14 = vpop.permute.xlu1 %2593 }
 0x37b   : > { %2661 = vst.msk [vmem:[#allocation2 + $0x1a8] sm:$0xff] %vm1222_vm5, %v2592_v52  ;;  %2662 = vst.msk [vmem:[#allocation2 + $0x1b8] sm:$0xff] %vm1222_vm5, %v2594_v14  ;;  %v7085_v13 = vpop.f32.mrf.mxu0  ;;  %v3884_v14 = vld [vmem:[#allocation4 + $0x12] sm:$0xff] }
 0x37c   : > { %v7086_v7 = vadd.f32 %v7085_v13, %v7084_v49  ;;  %1186 = vrot.lane.b32.xlu0 %v9005_v34, %s7232_s26  ;;  %1188 = vrot.lane.b32.xlu1 %v9008_v0, %s7232_s26  ;;  %v3556_v0 = vmax.f32 %v3524_v55, %v3526_v26 }
 0x37d   : > { %v7087_v61 = vpop.f32.mrf.mxu0 }
 0x37e   : > { %v3459_v50 = vmul.f32 %v9233_v9, %v7086_v7  ;;  %v1179_v44 = vpop.permute.xlu0 %1178  ;;  %v1181_v45 = vpop.permute.xlu1 %1180  ;;  %v7183_v7 = vld [vmem:[%s10564_s2 + $0x10] sm:$0xff]  }
 0x37f   : > { %1249 = vst.msk [vmem:[#allocation2 + $0x1a0] sm:$0xff] %vm1222_vm5, %v1179_v44  ;;  %1250 = vst.msk [vmem:[#allocation2 + $0x1b0] sm:$0xff] %vm1222_vm5, %v1181_v45  ;;  %v7088_v29 = vpop.f32.mrf.mxu0  ;;  %v7184_v45 = vld [vmem:[%s10564_s2 + $0x8] sm:$0xff]  }
 0x380   : > { %v9262_v34 = vadd.f32 %v9245_v39, %v3459_v50  ;;  %v7089_v56 = vadd.f32 %v7088_v29, %v7087_v61  ;;  %2791 = vrot.lane.b32.xlu0 %v6846_v2, %s7233_s11  ;;  %2793 = vrot.lane.b32.xlu1 %v6847_v46, %s7233_s11 }
 0x382   : > { %v3528_v43 = vmax.f32 %v9262_v34, 0.0  ;;  %v3460_v63 = vmul.f32 %v9233_v9, %v7089_v56  ;;  %v2784_v17 = vpop.permute.xlu0 %2783  ;;  %v2786_v54 = vpop.permute.xlu1 %2785 }
 0x383   : > { %2853 = vst.msk [vmem:[#allocation2 + $0x1a8] sm:$0xff] %vm1415_vm6, %v2784_v17  ;;  %2854 = vst.msk [vmem:[#allocation2 + $0x1b8] sm:$0xff] %vm1415_vm6, %v2786_v54  ;;  %v4028_v17 = vld [vmem:[#allocation4 + $0x22] sm:$0xff] }
 0x384   : > { %v3558_v47 = vmax.f32 %v3556_v0, %v3528_v43  ;;  %v9280_v55 = vadd.f32 %v9245_v39, %v3460_v63  ;;  %1379 = vrot.lane.b32.xlu0 %v9026_v37, %s7233_s11  ;;  %1381 = vrot.lane.b32.xlu1 %v9029_v40, %s7233_s11  ;;  %v7179_v37 = vld [vmem:[%s10564_s2 + $0x30] sm:$0xff]   ;;  %v9297_v40 = vld [vmem:[#allocation4] sm:$0xff] }
 0x385   : > { %3827 = vst.msk [vmem:[#allocation3] sm:$0xff] %vm256_vm0, %v9297_v40  ;;  %4281 = vmatpush1.bf16.msra.mxu1 %v7179_v37  ;;  %v7185_v0 = vld [vmem:[%s10564_s2] sm:$0xff]   ;;  %v3886_v37 = vld [vmem:[#allocation4 + $0x32] sm:$0xff] }
 0x386   : > { %v3605_v16 = vrot.slane %v3558_v47, 1  ;;  %v3529_v8 = vmax.f32 %v9280_v55, 0.0  ;;  %v1372_v25 = vpop.permute.xlu0 %1371  ;;  %v1374_v33 = vpop.permute.xlu1 %1373  ;;  %v3639_v30 = vrot.slane %v3558_v47, 2  ;;  %4282 = vmatprep.subr.bf16.mxu1 %v7236_v10  ;;  %v7186_v54 = vld [vmem:[%s10564_s2 + $0x40] sm:$0xff]  }
 0x387   : > { %1442 = vst.msk [vmem:[#allocation2 + $0x1a0] sm:$0xff] %vm1415_vm6, %v1372_v25  ;;  %1443 = vst.msk [vmem:[#allocation2 + $0x1b0] sm:$0xff] %vm1415_vm6, %v1374_v33 }
 0x388   : > { %v3621_v18 = vmax.f32 %v3558_v47, %v3605_v16  ;;  %v3559_v23 = vmax.f32 %v3557_v1, %v3529_v8  ;;  %2983 = vrot.lane.b32.xlu0 %v6878_v51, %s7234_s21  ;;  %2985 = vrot.lane.b32.xlu1 %v6879_v36, %s7234_s21  ;;  %v4125_v1 = vld [vmem:[#allocation4 + $0x31] sm:$0xff] }
 0x389   : > { %4283 = vmatpush1.bf16.msra.mxu1 %v7180_v59 }
 0x38a   : > { %3631 = vst.msk [vmem:[#allocation4 + $0x51] sm:$0x1] %vm3626_vm9, %v3621_v18  ;;  %v3655_v38 = vmax.f32 %v3621_v18, %v3639_v30  ;;  %v3698_v22 = vrot.slane %v3559_v23, 1  ;;  %v2976_v3 = vpop.permute.xlu0 %2975  ;;  %v2978_v48 = vpop.permute.xlu1 %2977  ;;  %v3722_v62 = vrot.slane %v3559_v23, 2  ;;  %4284 = vmatprep.subr.bf16.mxu1 %v7236_v10 }
 0x38b   : > { %3045 = vst.msk [vmem:[#allocation2 + $0x1a8] sm:$0xff] %vm1608_vm7, %v2976_v3  ;;  %3046 = vst.msk [vmem:[#allocation2 + $0x1b8] sm:$0xff] %vm1608_vm7, %v2978_v48 }
 0x38c   : > { %3664 = vst.msk [vmem:[#allocation4 + $0x51] sm:$0x2] %vm3659_vm10, %v3655_v38  ;;  %v3714_v24 = vmax.f32 %v3558_v47, %v3698_v22  ;;  %v3755_v15 = vmax.f32 %v3559_v23, %v3698_v22  ;;  %1572 = vrot.lane.b32.xlu0 %v9058_v32, %s7234_s21  ;;  %1574 = vrot.lane.b32.xlu1 %v9061_v12, %s7234_s21  ;;  %v3836_v32 = vld [vmem:[#allocation4 + $0x11] sm:$0xff]  ;;  %v3883_v12 = vld [vmem:[#allocation4 + $0x2] sm:$0xff] }
 0x38d   : > { %3673 = vst.msk [vmem:[#allocation4 + $0x50] sm:$0x8] %vm3668_vm11, %v3655_v38  ;;  %4285 = vmatpush1.bf16.msra.mxu1 %v7181_v42 }
 0x38e   : > { %3682 = vst.msk [vmem:[#allocation4 + $0x4f] sm:$0x20] %vm3677_vm12, %v3655_v38  ;;  %v3738_v20 = vmax.f32 %v3714_v24, %v3722_v62  ;;  %v3763_v4 = vmax.f32 %v3755_v15, %v3722_v62  ;;  %v1565_v60 = vpop.permute.xlu0 %1564  ;;  %v1567_v19 = vpop.permute.xlu1 %1566  ;;  %4286 = vmatprep.subr.bf16.mxu1 %v7236_v10  ;;  %v9402_v38 = vld [vmem:[#allocation4 + $0x41] sm:$0xff] }
 0x38f   : > { %1635 = vst.msk [vmem:[#allocation2 + $0x1a0] sm:$0xff] %vm1608_vm7, %v1565_v60  ;;  %1636 = vst.msk [vmem:[#allocation2 + $0x1b0] sm:$0xff] %vm1608_vm7, %v1567_v19 }
 0x390   : > { %3747 = vst.msk [vmem:[#allocation4 + $0x4e] sm:$0x80] %vm3742_vm13, %v3738_v20  ;;  %3851 = vrot.lane.b32.xlu0 %v3835_v57, %s7228_s24  ;;  %3853 = vrot.lane.b32.xlu1 %v3836_v32, %s7228_s24 }
 0x391   : > { %3771 = vst.msk [vmem:[#allocation4 + $0x55] sm:$0x2] %vm3659_vm10, %v3763_v4  ;;  %4287 = vmatpush1.bf16.msra.mxu1 %v7182_v5 }
 0x392   : > { %3779 = vst.msk [vmem:[#allocation4 + $0x54] sm:$0x8] %vm3668_vm11, %v3763_v4  ;;  %v1827_v6 = vpop.permute.xlu0 %1826  ;;  %v1829_v49 = vpop.permute.xlu1 %1828  ;;  %v3104_v35 = vld [vmem:[#allocation2 + $0x1a8] sm:$0xff]  ;;  %v3106_v52 = vld [vmem:[#allocation2 + $0x1b8] sm:$0xff]  ;;  %4288 = vmatprep.subr.bf16.mxu1 %v7236_v10 }
 0x393   : > { %3787 = vst.msk [vmem:[#allocation4 + $0x53] sm:$0x20] %vm3677_vm12, %v3763_v4  ;;  %v3142_v13 = vpack.c.bf16 %v3106_v52, %v3104_v35 }
 0x394   : > { %1894 = vst.msk [vmem:[#allocation2 + $0x1c8] sm:$0xff] %vm449_vm1, %v1827_v6  ;;  %1895 = vst.msk [vmem:[#allocation2 + $0x1d8] sm:$0xff] %vm449_vm1, %v1829_v49  ;;  %3899 = vrot.lane.b32.xlu0 %v3883_v12, %s7229_s25  ;;  %3901 = vrot.lane.b32.xlu1 %v3884_v14, %s7229_s25 }
 0x395   : > { %3411 = vmatprep.mubr.bf16.mxu0 %v3142_v13  ;;  %4289 = vmatpush1.bf16.msra.mxu1 %v7183_v7 }
 0x396   : > { %v410_v26 = vpop.permute.xlu0 %409  ;;  %v412_v61 = vpop.permute.xlu1 %411  ;;  %v3103_v2 = vld [vmem:[#allocation2 + $0x1a0] sm:$0xff]  ;;  %v3105_v46 = vld [vmem:[#allocation2 + $0x1b0] sm:$0xff]  ;;  %4290 = vmatprep.subr.bf16.mxu1 %v7236_v10 }
 0x397   : > { %478 = vst.msk [vmem:[#allocation2 + $0x1c0] sm:$0xff] %vm449_vm1, %v410_v26  ;;  %479 = vst.msk [vmem:[#allocation2 + $0x1d0] sm:$0xff] %vm449_vm1, %v412_v61  ;;  %v3141_v27 = vpack.c.bf16 %v3105_v46, %v3103_v2 }
 0x398   : > { %3947 = vrot.lane.b32.xlu0 %v8319_v28, %s7230_s28  ;;  %3949 = vrot.lane.b32.xlu1 %v8584_v31, %s7230_s28  ;;  %v3980_v28 = vld [vmem:[#allocation4 + $0x21] sm:$0xff] }
 0x399   : > { %v9345_v50 = vld [vmem:[#allocation4 + $0x50] sm:$0xff]  ;;  %3412 = vmatmul.mubr.bf16.gmra.mxu0 %v3141_v27  ;;  %4291 = vmatpush1.bf16.msra.mxu1 %v7184_v45 }
 0x39a   : > { %v9347_v44 = vld [vmem:[#allocation4 + $0x52] sm:$0xff]  ;;  %3832 = vst.msk [vmem:[#allocation3 + $0x50] sm:$0xff] %vm256_vm0, %v9345_v50  ;;  %v2019_v29 = vpop.permute.xlu0 %2018  ;;  %v2021_v56 = vpop.permute.xlu1 %2020  ;;  %4292 = vmatprep.subr.bf16.mxu1 %v7236_v10 }
 0x39b   : > { %4183 = vst.msk [vmem:[#allocation3 + $0x38] sm:$0xff] %vm256_vm0, %v9347_v44  ;;  %v9420_v15 = vld [vmem:[#allocation4 + $0x51] sm:$0xff] }
 0x39c   : > { %2086 = vst.msk [vmem:[#allocation2 + $0x1c8] sm:$0xff] %vm642_vm2, %v2019_v29  ;;  %2087 = vst.msk [vmem:[#allocation2 + $0x1d8] sm:$0xff] %vm642_vm2, %v2021_v56  ;;  %3995 = vrot.lane.b32.xlu0 %v3836_v32, %s7231_s12  ;;  %3997 = vrot.lane.b32.xlu1 %v3980_v28, %s7231_s12 }
 0x39d   : > { %4293 = vmatpush1.bf16.msra.mxu1 %v7185_v0 }
 0x39e   : > { %v603_v41 = vpop.permute.xlu0 %602  ;;  %v605_v63 = vpop.permute.xlu1 %604  ;;  %4308 = vmatprep.subr.bf16.mxu1 %v7236_v10 }
 0x39f   : > { %671 = vst.msk [vmem:[#allocation2 + $0x1c0] sm:$0xff] %vm642_vm2, %v603_v41  ;;  %672 = vst.msk [vmem:[#allocation2 + $0x1d0] sm:$0xff] %vm642_vm2, %v605_v63 }
 0x3a0   : > { %4043 = vrot.lane.b32.xlu0 %v3884_v14, %s7232_s26  ;;  %4045 = vrot.lane.b32.xlu1 %v4028_v17, %s7232_s26 }
 0x3a1   : > { %4309 = vmatpush2.bf16.msra.mxu1 %v7186_v54 }
 0x3a2   : > { %v2211_v21 = vpop.permute.xlu0 %2210  ;;  %v2213_v47 = vpop.permute.xlu1 %2212  ;;  %4862 = vmatprep.subr.bf16.mxu1 %v7236_v10 }
 0x3a3   : > { %2278 = vst.msk [vmem:[#allocation2 + $0x1c8] sm:$0xff] %vm835_vm3, %v2211_v21  ;;  %2279 = vst.msk [vmem:[#allocation2 + $0x1d8] sm:$0xff] %vm835_vm3, %v2213_v47 }
 0x3a4   : > { %4092 = vrot.lane.b32.xlu0 %v8584_v31, %s7233_s11  ;;  %4094 = vrot.lane.b32.xlu1 %v8859_v53, %s7233_s11 }
 0x3a6   : > { %v796_v51 = vpop.permute.xlu0 %795  ;;  %v798_v36 = vpop.permute.xlu1 %797 }
 0x3a7   : > { %864 = vst.msk [vmem:[#allocation2 + $0x1c0] sm:$0xff] %vm835_vm3, %v796_v51  ;;  %865 = vst.msk [vmem:[#allocation2 + $0x1d0] sm:$0xff] %vm835_vm3, %v798_v36 }
 0x3a8   : > { %4140 = vrot.lane.b32.xlu0 %v3980_v28, %s7234_s21  ;;  %4142 = vrot.lane.b32.xlu1 %v4125_v1, %s7234_s21 }
 0x3aa   : > { %v2404_v16 = vpop.permute.xlu0 %2403  ;;  %v2406_v25 = vpop.permute.xlu1 %2405 }
 0x3ab   : > { %2471 = vst.msk [vmem:[#allocation2 + $0x1c8] sm:$0xff] %vm1029_vm4, %v2404_v16  ;;  %2472 = vst.msk [vmem:[#allocation2 + $0x1d8] sm:$0xff] %vm1029_vm4, %v2406_v25 }
 0x3ac   : > { %3855 = vrot.lane.b32.xlu0 %v3980_v28, %s7228_s24  ;;  %3857 = vrot.lane.b32.xlu1 %v4125_v1, %s7228_s24 }
 0x3ae   : > { %v990_v31 = vpop.permute.xlu0 %989  ;;  %v992_v33 = vpop.permute.xlu1 %991 }
 0x3af   : > { %1058 = vst.msk [vmem:[#allocation2 + $0x1c0] sm:$0xff] %vm1029_vm4, %v990_v31  ;;  %1059 = vst.msk [vmem:[#allocation2 + $0x1d0] sm:$0xff] %vm1029_vm4, %v992_v33 }
 0x3b0   : > { %3903 = vrot.lane.b32.xlu0 %v4028_v17, %s7229_s25  ;;  %3905 = vrot.lane.b32.xlu1 %v3886_v37, %s7229_s25 }
 0x3b1   : > { %v7090_v13 = vpop.f32.mrf.mxu0 }
 0x3b2   : > { %v2596_v18 = vpop.permute.xlu0 %2595  ;;  %v2598_v30 = vpop.permute.xlu1 %2597 }
 0x3b3   : > { %2663 = vst.msk [vmem:[#allocation2 + $0x1c8] sm:$0xff] %vm1222_vm5, %v2596_v18  ;;  %2664 = vst.msk [vmem:[#allocation2 + $0x1d8] sm:$0xff] %vm1222_vm5, %v2598_v30  ;;  %v7091_v61 = vpop.f32.mrf.mxu0 }
 0x3b4   : > { %3951 = vrot.lane.b32.xlu0 %v8859_v53, %s7230_s28  ;;  %3953 = vrot.lane.b32.xlu1 %v9106_v11, %s7230_s28 }
 0x3b5   : > { %v7093_v27 = vpop.f32.mrf.mxu0 }
 0x3b6   : > { %v1183_v23 = vpop.permute.xlu0 %1182  ;;  %v1185_v59 = vpop.permute.xlu1 %1184 }
 0x3b7   : > { %1251 = vst.msk [vmem:[#allocation2 + $0x1c0] sm:$0xff] %vm1222_vm5, %v1183_v23  ;;  %1252 = vst.msk [vmem:[#allocation2 + $0x1d0] sm:$0xff] %vm1222_vm5, %v1185_v59  ;;  %v7094_v56 = vpop.f32.mrf.mxu0 }
 0x3b8   : > { %3999 = vrot.lane.b32.xlu0 %v4125_v1, %s7231_s12  ;;  %4001 = vrot.lane.b32.xlu1 %v9402_v38, %s7231_s12  ;;  %v7095_v28 = vadd.f32 %v7094_v56, %v7093_v27 }
 0x3ba   : > { %v2788_v22 = vpop.permute.xlu0 %2787  ;;  %v2790_v3 = vpop.permute.xlu1 %2789  ;;  %v3462_v54 = vmul.f32 %v9233_v9, %v7095_v28 }
 0x3bb   : > { %2855 = vst.msk [vmem:[#allocation2 + $0x1c8] sm:$0xff] %vm1415_vm6, %v2788_v22  ;;  %2856 = vst.msk [vmem:[#allocation2 + $0x1d8] sm:$0xff] %vm1415_vm6, %v2790_v3 }
 0x3bc   : > { %4047 = vrot.lane.b32.xlu0 %v3886_v37, %s7232_s26  ;;  %4049 = vrot.lane.b32.xlu1 %v9108_v58, %s7232_s26  ;;  %v3499_v25 = vadd.f32 %v9245_v39, %v3462_v54 }
 0x3be   : > { %v1376_v53 = vpop.permute.xlu0 %1375  ;;  %v1378_v48 = vpop.permute.xlu1 %1377  ;;  %v3531_v22 = vmax.f32 %v3499_v25, 0.0 }
 0x3bf   : > { %1444 = vst.msk [vmem:[#allocation2 + $0x1c0] sm:$0xff] %vm1415_vm6, %v1376_v53  ;;  %1445 = vst.msk [vmem:[#allocation2 + $0x1d0] sm:$0xff] %vm1415_vm6, %v1378_v48 }
 0x3c0   : > { %4096 = vrot.lane.b32.xlu0 %v9106_v11, %s7233_s11  ;;  %4098 = vrot.lane.b32.xlu1 %v9345_v50, %s7233_s11  ;;  %v3561_v34 = vmax.f32 %v3529_v8, %v3531_v22  ;;  %v4193_v22 = vld [vmem:[#allocation3 + $0x28] sm:$0xff] }
 0x3c2   : > { %v2980_v24 = vpop.permute.xlu0 %2979  ;;  %v2982_v62 = vpop.permute.xlu1 %2981 }
 0x3c3   : > { %3047 = vst.msk [vmem:[#allocation2 + $0x1c8] sm:$0xff] %vm1608_vm7, %v2980_v24  ;;  %3048 = vst.msk [vmem:[#allocation2 + $0x1d8] sm:$0xff] %vm1608_vm7, %v2982_v62 }
 0x3c4   : > { %4144 = vrot.lane.b32.xlu0 %v9402_v38, %s7234_s21  ;;  %4146 = vrot.lane.b32.xlu1 %v9420_v15, %s7234_s21 }
 0x3c6   : > { %v1569_v57 = vpop.permute.xlu0 %1568  ;;  %v1571_v42 = vpop.permute.xlu1 %1570 }
 0x3c7   : > { %1637 = vst.msk [vmem:[#allocation2 + $0x1c0] sm:$0xff] %vm1608_vm7, %v1569_v57  ;;  %1638 = vst.msk [vmem:[#allocation2 + $0x1d0] sm:$0xff] %vm1608_vm7, %v1571_v42 }
 0x3c8   : > { %3859 = vrot.lane.b32.xlu0 %v9402_v38, %s7228_s24  ;;  %3861 = vrot.lane.b32.xlu1 %v9420_v15, %s7228_s24 }
 0x3ca   : > { %v1831_v11 = vpop.permute.xlu0 %1830  ;;  %v1833_v20 = vpop.permute.xlu1 %1832  ;;  %v3108_v4 = vld [vmem:[#allocation2 + $0x1c8] sm:$0xff]  ;;  %v3110_v60 = vld [vmem:[#allocation2 + $0x1d8] sm:$0xff] }
 0x3cb   : > { %1896 = vst.msk [vmem:[#allocation2 + $0x1e8] sm:$0xff] %vm449_vm1, %v1831_v11  ;;  %1897 = vst.msk [vmem:[#allocation2 + $0x1f8] sm:$0xff] %vm449_vm1, %v1833_v20  ;;  %v3144_v19 = vpack.c.bf16 %v3110_v60, %v3108_v4 }
 0x3cc   : > { %3907 = vrot.lane.b32.xlu0 %v9108_v58, %s7229_s25  ;;  %3909 = vrot.lane.b32.xlu1 %v9347_v44, %s7229_s25 }
 0x3cd   : > { %3419 = vmatprep.mubr.bf16.mxu0 %v3144_v19 }
 0x3ce   : > { %v414_v32 = vpop.permute.xlu0 %413  ;;  %v416_v12 = vpop.permute.xlu1 %415  ;;  %v3107_v5 = vld [vmem:[#allocation2 + $0x1c0] sm:$0xff]  ;;  %v3109_v6 = vld [vmem:[#allocation2 + $0x1d0] sm:$0xff] }
 0x3cf   : > { %480 = vst.msk [vmem:[#allocation2 + $0x1e0] sm:$0xff] %vm449_vm1, %v414_v32  ;;  %481 = vst.msk [vmem:[#allocation2 + $0x1f0] sm:$0xff] %vm449_vm1, %v416_v12  ;;  %v3143_v49 = vpack.c.bf16 %v3109_v6, %v3107_v5 }
 0x3d0   : > { %3955 = vrot.lane.b32.xlu0 %v9345_v50, %s7230_s28  ;;  %v7092_v50 = vadd.f32 %v7091_v61, %v7090_v13 }
 0x3d1   : > { %3420 = vmatmul.mubr.bf16.gmra.mxu0 %v3143_v49 }
 0x3d2   : > { %v2023_v35 = vpop.permute.xlu0 %2022  ;;  %v2025_v52 = vpop.permute.xlu1 %2024 }
 0x3d3   : > { %2088 = vst.msk [vmem:[#allocation2 + $0x1e8] sm:$0xff] %vm642_vm2, %v2023_v35  ;;  %2089 = vst.msk [vmem:[#allocation2 + $0x1f8] sm:$0xff] %vm642_vm2, %v2025_v52 }
 0x3d4   : > { %4003 = vrot.lane.b32.xlu0 %v9420_v15, %s7231_s12 }
 0x3d6   : > { %v607_v58 = vpop.permute.xlu0 %606  ;;  %v609_v14 = vpop.permute.xlu1 %608 }
 0x3d7   : > { %673 = vst.msk [vmem:[#allocation2 + $0x1e0] sm:$0xff] %vm642_vm2, %v607_v58  ;;  %674 = vst.msk [vmem:[#allocation2 + $0x1f0] sm:$0xff] %vm642_vm2, %v609_v14 }
 0x3d8   : > { %4051 = vrot.lane.b32.xlu0 %v9347_v44, %s7232_s26  ;;  %v3461_v44 = vmul.f32 %v9233_v9, %v7092_v50 }
 0x3da   : > { %v2215_v7 = vpop.permute.xlu0 %2214  ;;  %v2217_v26 = vpop.permute.xlu1 %2216  ;;  %v3498_v17 = vadd.f32 %v9245_v39, %v3461_v44 }
 0x3db   : > { %2280 = vst.msk [vmem:[#allocation2 + $0x1e8] sm:$0xff] %vm835_vm3, %v2215_v7  ;;  %2281 = vst.msk [vmem:[#allocation2 + $0x1f8] sm:$0xff] %vm835_vm3, %v2217_v26 }
 0x3dc   : > { %v3530_v16 = vmax.f32 %v3498_v17, 0.0 }
 0x3de   : > { %v800_v2 = vpop.permute.xlu0 %799  ;;  %v802_v46 = vpop.permute.xlu1 %801  ;;  %v3560_v59 = vmax.f32 %v3528_v43, %v3530_v16 }
 0x3df   : > { %866 = vst.msk [vmem:[#allocation2 + $0x1e0] sm:$0xff] %vm835_vm3, %v800_v2  ;;  %867 = vst.msk [vmem:[#allocation2 + $0x1f0] sm:$0xff] %vm835_vm3, %v802_v46 }
 0x3e2   : > { %v2408_v45 = vpop.permute.xlu0 %2407  ;;  %v2410_v29 = vpop.permute.xlu1 %2409 }
 0x3e3   : > { %2473 = vst.msk [vmem:[#allocation2 + $0x1e8] sm:$0xff] %vm1029_vm4, %v2408_v45  ;;  %2474 = vst.msk [vmem:[#allocation2 + $0x1f8] sm:$0xff] %vm1029_vm4, %v2410_v29 }
 0x3e6   : > { %v994_v0 = vpop.permute.xlu0 %993  ;;  %v996_v41 = vpop.permute.xlu1 %995 }
 0x3e7   : > { %1060 = vst.msk [vmem:[#allocation2 + $0x1e0] sm:$0xff] %vm1029_vm4, %v994_v0  ;;  %1061 = vst.msk [vmem:[#allocation2 + $0x1f0] sm:$0xff] %vm1029_vm4, %v996_v41 }
 0x3e9   : > { %v7096_v63 = vpop.f32.mrf.mxu0 }
 0x3ea   : > { %v2600_v21 = vpop.permute.xlu0 %2599  ;;  %v2602_v47 = vpop.permute.xlu1 %2601 }
 0x3eb   : > { %2665 = vst.msk [vmem:[#allocation2 + $0x1e8] sm:$0xff] %vm1222_vm5, %v2600_v21  ;;  %2666 = vst.msk [vmem:[#allocation2 + $0x1f8] sm:$0xff] %vm1222_vm5, %v2602_v47  ;;  %v7097_v51 = vpop.f32.mrf.mxu0 }
 0x3ec   : > { %v7098_v36 = vadd.f32 %v7097_v51, %v7096_v63 }
 0x3ed   : > { %v7099_v1 = vpop.f32.mrf.mxu0 }
 0x3ee   : > { %v3463_v31 = vmul.f32 %v9233_v9, %v7098_v36  ;;  %v1187_v33 = vpop.permute.xlu0 %1186  ;;  %v1189_v37 = vpop.permute.xlu1 %1188 }
 0x3ef   : > { %1253 = vst.msk [vmem:[#allocation2 + $0x1e0] sm:$0xff] %vm1222_vm5, %v1187_v33  ;;  %1254 = vst.msk [vmem:[#allocation2 + $0x1f0] sm:$0xff] %vm1222_vm5, %v1189_v37  ;;  %v7100_v18 = vpop.f32.mrf.mxu0 }
 0x3f0   : > { %v9470_v30 = vadd.f32 %v9245_v39, %v3463_v31  ;;  %v7101_v23 = vadd.f32 %v7100_v18, %v7099_v1  ;;  %v4195_v31 = vld [vmem:[#allocation3 + $0x38] sm:$0xff] }
 0x3f2   : > { %v3532_v3 = vmax.f32 %v9470_v30, 0.0  ;;  %v3464_v53 = vmul.f32 %v9233_v9, %v7101_v23  ;;  %v2792_v48 = vpop.permute.xlu0 %2791  ;;  %v2794_v24 = vpop.permute.xlu1 %2793 }
 0x3f3   : > { %2857 = vst.msk [vmem:[#allocation2 + $0x1e8] sm:$0xff] %vm1415_vm6, %v2792_v48  ;;  %2858 = vst.msk [vmem:[#allocation2 + $0x1f8] sm:$0xff] %vm1415_vm6, %v2794_v24 }
 0x3f4   : > { %v3562_v62 = vmax.f32 %v3560_v59, %v3532_v3  ;;  %v9481_v57 = vadd.f32 %v9245_v39, %v3464_v53  ;;  %v4207_v53 = vpack.c.bf16 %v4195_v31, %v4193_v22 }
 0x3f6   : > { %v3606_v43 = vrot.slane %v3562_v62, 1  ;;  %v3533_v42 = vmax.f32 %v9481_v57, 0.0  ;;  %v1380_v11 = vpop.permute.xlu0 %1379  ;;  %v1382_v20 = vpop.permute.xlu1 %1381  ;;  %v3640_v60 = vrot.slane %v3562_v62, 2 }
 0x3f7   : > { %1446 = vst.msk [vmem:[#allocation2 + $0x1e0] sm:$0xff] %vm1415_vm6, %v1380_v11  ;;  %1447 = vst.msk [vmem:[#allocation2 + $0x1f0] sm:$0xff] %vm1415_vm6, %v1382_v20 }
 0x3f8   : > { %v3622_v4 = vmax.f32 %v3562_v62, %v3606_v43  ;;  %v3563_v19 = vmax.f32 %v3561_v34, %v3533_v42 }
 0x3fa   : > { %3632 = vst.msk [vmem:[#allocation4 + $0x61] sm:$0x1] %vm3626_vm9, %v3622_v4  ;;  %v3656_v32 = vmax.f32 %v3622_v4, %v3640_v60  ;;  %v3699_v12 = vrot.slane %v3563_v19, 1  ;;  %v2984_v55 = vpop.permute.xlu0 %2983  ;;  %v2986_v8 = vpop.permute.xlu1 %2985  ;;  %v3723_v6 = vrot.slane %v3563_v19, 2 }
 0x3fb   : > { %3049 = vst.msk [vmem:[#allocation2 + $0x1e8] sm:$0xff] %vm1608_vm7, %v2984_v55  ;;  %3050 = vst.msk [vmem:[#allocation2 + $0x1f8] sm:$0xff] %vm1608_vm7, %v2986_v8 }
 0x3fc   : > { %3665 = vst.msk [vmem:[#allocation4 + $0x61] sm:$0x2] %vm3659_vm10, %v3656_v32  ;;  %v3715_v5 = vmax.f32 %v3562_v62, %v3699_v12  ;;  %v3756_v49 = vmax.f32 %v3563_v19, %v3699_v12 }
 0x3fd   : > { %3674 = vst.msk [vmem:[#allocation4 + $0x60] sm:$0x8] %vm3668_vm11, %v3656_v32 }
 0x3fe   : > { %3683 = vst.msk [vmem:[#allocation4 + $0x5f] sm:$0x20] %vm3677_vm12, %v3656_v32  ;;  %v3739_v35 = vmax.f32 %v3715_v5, %v3723_v6  ;;  %v3764_v52 = vmax.f32 %v3756_v49, %v3723_v6  ;;  %v1573_v58 = vpop.permute.xlu0 %1572  ;;  %v1575_v14 = vpop.permute.xlu1 %1574 }
 0x3ff   : > { %1639 = vst.msk [vmem:[#allocation2 + $0x1e0] sm:$0xff] %vm1608_vm7, %v1573_v58  ;;  %1640 = vst.msk [vmem:[#allocation2 + $0x1f0] sm:$0xff] %vm1608_vm7, %v1575_v14 }
 0x400   : > { %3748 = vst.msk [vmem:[#allocation4 + $0x5e] sm:$0x80] %vm3742_vm13, %v3739_v35 }
 0x401   : > { %3772 = vst.msk [vmem:[#allocation4 + $0x65] sm:$0x2] %vm3659_vm10, %v3764_v52 }
 0x402   : > { %3780 = vst.msk [vmem:[#allocation4 + $0x64] sm:$0x8] %vm3668_vm11, %v3764_v52  ;;  %v3852_v13 = vpop.permute.xlu0 %3851  ;;  %v3854_v7 = vpop.permute.xlu1 %3853  ;;  %v3112_v26 = vld [vmem:[#allocation2 + $0x1e8] sm:$0xff]  ;;  %v3114_v61 = vld [vmem:[#allocation2 + $0x1f8] sm:$0xff] }
 0x403   : > { %3788 = vst.msk [vmem:[#allocation4 + $0x63] sm:$0x20] %vm3677_vm12, %v3764_v52  ;;  %v3146_v2 = vpack.c.bf16 %v3114_v61, %v3112_v26 }
 0x404   : > { %3875 = vst.msk [vmem:[#allocation3] sm:$0xff] %vm449_vm1, %v3852_v13  ;;  %3876 = vst.msk [vmem:[#allocation3 + $0x10] sm:$0xff] %vm449_vm1, %v3854_v7 }
 0x405   : > { %3427 = vmatprep.mubr.bf16.mxu0 %v3146_v2 }
 0x406   : > { %v3900_v46 = vpop.permute.xlu0 %3899  ;;  %v3902_v27 = vpop.permute.xlu1 %3901  ;;  %v3111_v50 = vld [vmem:[#allocation2 + $0x1e0] sm:$0xff]  ;;  %v3113_v45 = vld [vmem:[#allocation2 + $0x1f0] sm:$0xff] }
 0x407   : > { %3923 = vst.msk [vmem:[#allocation3] sm:$0xff] %vm642_vm2, %v3900_v46  ;;  %3924 = vst.msk [vmem:[#allocation3 + $0x10] sm:$0xff] %vm642_vm2, %v3902_v27  ;;  %v3145_v56 = vpack.c.bf16 %v3113_v45, %v3111_v50 }
 0x409   : > { %v4080_v29 = vld [vmem:[#allocation4 + $0x60] sm:$0xff]  ;;  %3428 = vmatmul.mubr.bf16.gmra.mxu0 %v3145_v56 }
 0x40a   : > { %v4032_v44 = vld [vmem:[#allocation4 + $0x62] sm:$0xff]  ;;  %4100 = vrot.lane.b32.xlu0 %v4080_v29, %s7233_s11  ;;  %3957 = vrot.lane.b32.xlu1 %v4080_v29, %s7230_s28  ;;  %3833 = vst.msk [vmem:[#allocation3 + $0x60] sm:$0xff] %vm256_vm0, %v4080_v29  ;;  %v3948_v28 = vpop.permute.xlu0 %3947  ;;  %v3950_v0 = vpop.permute.xlu1 %3949 }
 0x40b   : > { %4184 = vst.msk [vmem:[#allocation3 + $0x48] sm:$0xff] %vm256_vm0, %v4032_v44  ;;  %v9510_v41 = vld [vmem:[#allocation4 + $0x61] sm:$0xff] }
 0x40c   : > { %3971 = vst.msk [vmem:[#allocation3] sm:$0xff] %vm835_vm3, %v3948_v28  ;;  %3972 = vst.msk [vmem:[#allocation3 + $0x10] sm:$0xff] %vm835_vm3, %v3950_v0 }
 0x40e   : > { %4148 = vrot.lane.b32.xlu0 %v9510_v41, %s7234_s21  ;;  %4005 = vrot.lane.b32.xlu1 %v9510_v41, %s7231_s12  ;;  %v3996_v63 = vpop.permute.xlu0 %3995  ;;  %v3998_v17 = vpop.permute.xlu1 %3997 }
 0x40f   : > { %4019 = vst.msk [vmem:[#allocation3] sm:$0xff] %vm1029_vm4, %v3996_v63  ;;  %4020 = vst.msk [vmem:[#allocation3 + $0x10] sm:$0xff] %vm1029_vm4, %v3998_v17 }
 0x412   : > { %3863 = vrot.lane.b32.xlu0 %v9510_v41, %s7228_s24  ;;  %4053 = vrot.lane.b32.xlu1 %v4032_v44, %s7232_s26  ;;  %v4044_v54 = vpop.permute.xlu0 %4043  ;;  %v4046_v21 = vpop.permute.xlu1 %4045 }
 0x413   : > { %4067 = vst.msk [vmem:[#allocation3] sm:$0xff] %vm1222_vm5, %v4044_v54  ;;  %4068 = vst.msk [vmem:[#allocation3 + $0x10] sm:$0xff] %vm1222_vm5, %v4046_v21 }
 0x416   : > { %3911 = vrot.lane.b32.xlu0 %v4032_v44, %s7229_s25  ;;  %v4093_v47 = vpop.permute.xlu0 %4092  ;;  %v4095_v51 = vpop.permute.xlu1 %4094 }
 0x417   : > { %4116 = vst.msk [vmem:[#allocation3] sm:$0xff] %vm1415_vm6, %v4093_v47  ;;  %4117 = vst.msk [vmem:[#allocation3 + $0x10] sm:$0xff] %vm1415_vm6, %v4095_v51 }
 0x41a   : > { %v4141_v36 = vpop.permute.xlu0 %4140  ;;  %v4143_v1 = vpop.permute.xlu1 %4142 }
 0x41b   : > { %4164 = vst.msk [vmem:[#allocation3] sm:$0xff] %vm1608_vm7, %v4141_v36  ;;  %4165 = vst.msk [vmem:[#allocation3 + $0x10] sm:$0xff] %vm1608_vm7, %v4143_v1 }
 0x41e   : > { %v3856_v16 = vpop.permute.xlu0 %3855  ;;  %v3858_v25 = vpop.permute.xlu1 %3857 }
 0x41f   : > { %3877 = vst.msk [vmem:[#allocation3 + $0x20] sm:$0xff] %vm449_vm1, %v3856_v16  ;;  %3878 = vst.msk [vmem:[#allocation3 + $0x30] sm:$0xff] %vm449_vm1, %v3858_v25 }
 0x421   : > { %v7102_v52 = vpop.f32.mrf.mxu0 }
 0x422   : > { %v3904_v33 = vpop.permute.xlu0 %3903  ;;  %v3906_v37 = vpop.permute.xlu1 %3905  ;;  %v4188_v18 = vld [vmem:[#allocation3] sm:$0xff]  ;;  %v4190_v23 = vld [vmem:[#allocation3 + $0x10] sm:$0xff] }
 0x423   : > { %3925 = vst.msk [vmem:[#allocation3 + $0x20] sm:$0xff] %vm642_vm2, %v3904_v33  ;;  %3926 = vst.msk [vmem:[#allocation3 + $0x30] sm:$0xff] %vm642_vm2, %v3906_v37  ;;  %v4204_v59 = vpack.c.bf16 %v4190_v23, %v4188_v18  ;;  %v7103_v14 = vpop.f32.mrf.mxu0  ;;  %v9576_v18 = vld [vmem:[#allocation4 + $0x92] sm:$0xff] }
 0x424   : > { %4412 = vst.msk [vmem:[#allocation3] sm:$0xff] %vm256_vm0, %v9297_v40  ;;  %v7104_v7 = vadd.f32 %v7103_v14, %v7102_v52  ;;  %4187 = vst.msk [vmem:[#allocation3 + $0x78] sm:$0xff] %vm256_vm0, %v9576_v18 }
 0x425   : > { %4311 = vmatmul.mubr.bf16.vlgmr.msra.gmra.mxu1 %v4204_v59  ;;  %v7105_v13 = vpop.f32.mrf.mxu0 }
 0x426   : > { %v3952_v48 = vpop.permute.xlu0 %3951  ;;  %v3954_v24 = vpop.permute.xlu1 %3953  ;;  %6908 = vmatprep.mubr.msk.bf16.mxu1 %vm256_vm0, %v4207_v53  ;;  %v3465_v61 = vmul.f32 %v9233_v9, %v7104_v7 }
 0x427   : > { %3973 = vst.msk [vmem:[#allocation3 + $0x20] sm:$0xff] %vm835_vm3, %v3952_v48  ;;  %3974 = vst.msk [vmem:[#allocation3 + $0x30] sm:$0xff] %vm835_vm3, %v3954_v24  ;;  %v7106_v26 = vpop.f32.mrf.mxu0 }
 0x428   : > { %v7107_v2 = vadd.f32 %v7106_v26, %v7105_v13  ;;  %v3502_v27 = vadd.f32 %v9245_v39, %v3465_v61  ;;  %v7219_v13 = vld [vmem:[%s10566_s4] ss:$0 sm:$0xff] }
 0x42a   : > { %v4000_v62 = vpop.permute.xlu0 %3999  ;;  %v4002_v34 = vpop.permute.xlu1 %4001  ;;  %v3466_v50 = vmul.f32 %v9233_v9, %v7107_v2  ;;  %v3534_v44 = vmax.f32 %v3502_v27, 0.0 }
 0x42b   : > { %4021 = vst.msk [vmem:[#allocation3 + $0x20] sm:$0xff] %vm1029_vm4, %v4000_v62  ;;  %4022 = vst.msk [vmem:[#allocation3 + $0x30] sm:$0xff] %vm1029_vm4, %v4002_v34  ;;  %v9588_v53 = vld [vmem:[#allocation3 + $0x78] sm:$0xff] }
 0x42c   : > { %v3503_v28 = vadd.f32 %v9245_v39, %v3466_v50  ;;  %v3564_v21 = vmax.f32 %v3532_v3, %v3534_v44  ;;  %4771 = vst.msk [vmem:[#allocation3 + $0x78] sm:$0xff] %vm256_vm0, %v9576_v18 }
 0x42e   : > { %v4048_v43 = vpop.permute.xlu0 %4047  ;;  %v4050_v11 = vpop.permute.xlu1 %4049  ;;  %v3535_v47 = vmax.f32 %v3503_v28, 0.0 }
 0x42f   : > { %4069 = vst.msk [vmem:[#allocation3 + $0x20] sm:$0xff] %vm1222_vm5, %v4048_v43  ;;  %4070 = vst.msk [vmem:[#allocation3 + $0x30] sm:$0xff] %vm1222_vm5, %v4050_v11 }
 0x430   : > { %v3565_v25 = vmax.f32 %v3533_v42, %v3535_v47 }
 0x432   : > { %v4097_v40 = vpop.permute.xlu0 %4096  ;;  %v4099_v20 = vpop.permute.xlu1 %4098 }
 0x433   : > { %4118 = vst.msk [vmem:[#allocation3 + $0x20] sm:$0xff] %vm1415_vm6, %v4097_v40  ;;  %4119 = vst.msk [vmem:[#allocation3 + $0x30] sm:$0xff] %vm1415_vm6, %v4099_v20  ;;  %v4197_v20 = vld [vmem:[#allocation3 + $0x48] sm:$0xff] }
 0x436   : > { %v4145_v4 = vpop.permute.xlu0 %4144  ;;  %v4147_v60 = vpop.permute.xlu1 %4146 }
 0x437   : > { %4166 = vst.msk [vmem:[#allocation3 + $0x20] sm:$0xff] %vm1608_vm7, %v4145_v4  ;;  %4167 = vst.msk [vmem:[#allocation3 + $0x30] sm:$0xff] %vm1608_vm7, %v4147_v60 }
 0x43a   : > { %v3860_v19 = vpop.permute.xlu0 %3859  ;;  %v3862_v32 = vpop.permute.xlu1 %3861 }
 0x43b   : > { %3879 = vst.msk [vmem:[#allocation3 + $0x40] sm:$0xff] %vm449_vm1, %v3860_v19  ;;  %3880 = vst.msk [vmem:[#allocation3 + $0x50] sm:$0xff] %vm449_vm1, %v3862_v32 }
 0x43e   : > { %v3908_v12 = vpop.permute.xlu0 %3907  ;;  %v3910_v55 = vpop.permute.xlu1 %3909  ;;  %v4192_v8 = vld [vmem:[#allocation3 + $0x20] sm:$0xff]  ;;  %v4194_v5 = vld [vmem:[#allocation3 + $0x30] sm:$0xff] }
 0x43f   : > { %3927 = vst.msk [vmem:[#allocation3 + $0x40] sm:$0xff] %vm642_vm2, %v3908_v12  ;;  %3928 = vst.msk [vmem:[#allocation3 + $0x50] sm:$0xff] %vm642_vm2, %v3910_v55  ;;  %v4206_v6 = vpack.c.bf16 %v4194_v5, %v4192_v8 }
 0x441   : > { %4319 = vmatmul.mubr.bf16.gmra.mxu1 %v4206_v6 }
 0x442   : > { %v3956_v49 = vpop.permute.xlu0 %3955 }
 0x443   : > { %3975 = vst.msk [vmem:[#allocation3 + $0x40] sm:$0xff] %vm835_vm3, %v3956_v49 }
 0x446   : > { %v4004_v35 = vpop.permute.xlu0 %4003 }
 0x447   : > { %4023 = vst.msk [vmem:[#allocation3 + $0x40] sm:$0xff] %vm1029_vm4, %v4004_v35  ;;  %v7218_v35 = vld [vmem:[%s10565_s3] ss:$0 sm:$0xff] }
 0x44a   : > { %v4052_v58 = vpop.permute.xlu0 %4051 }
 0x44b   : > { %4071 = vst.msk [vmem:[#allocation3 + $0x40] sm:$0xff] %vm1222_vm5, %v4052_v58 }
 0x459   : > { %v7108_v46 = vpop.f32.mrf.mxu0 }
 0x45b   : > { %v7109_v45 = vpop.f32.mrf.mxu0 }
 0x45c   : > { %v7110_v29 = vadd.f32 %v7109_v45, %v7108_v46 }
 0x45d   : > { %v7111_v56 = vpop.f32.mrf.mxu0 }
 0x45e   : > { %v3467_v0 = vmul.f32 %v9233_v9, %v7110_v29 }
 0x45f   : > { %v7112_v63 = vpop.f32.mrf.mxu0 }
 0x460   : > { %v9560_v17 = vadd.f32 %v9245_v39, %v3467_v0  ;;  %v7113_v54 = vadd.f32 %v7112_v63, %v7111_v56 }
 0x462   : > { %v3536_v51 = vmax.f32 %v9560_v17, 0.0  ;;  %v3468_v36 = vmul.f32 %v9233_v9, %v7113_v54 }
 0x464   : > { %v3566_v1 = vmax.f32 %v3564_v21, %v3536_v51  ;;  %v9569_v16 = vadd.f32 %v9245_v39, %v3468_v36 }
 0x466   : > { %v3607_v31 = vrot.slane %v3566_v1, 1  ;;  %v3537_v33 = vmax.f32 %v9569_v16, 0.0  ;;  %v3641_v30 = vrot.slane %v3566_v1, 2 }
 0x468   : > { %v3623_v37 = vmax.f32 %v3566_v1, %v3607_v31  ;;  %v3567_v3 = vmax.f32 %v3565_v25, %v3537_v33 }
 0x46a   : > { %3633 = vst.msk [vmem:[#allocation4 + $0x71] sm:$0x1] %vm3626_vm9, %v3623_v37  ;;  %v3657_v9 = vmax.f32 %v3623_v37, %v3641_v30  ;;  %v3700_v23 = vrot.slane %v3567_v3, 1  ;;  %v3724_v57 = vrot.slane %v3567_v3, 2 }
 0x46c   : > { %3666 = vst.msk [vmem:[#allocation4 + $0x71] sm:$0x2] %vm3659_vm10, %v3657_v9  ;;  %v3716_v39 = vmax.f32 %v3566_v1, %v3700_v23  ;;  %v3757_v42 = vmax.f32 %v3567_v3, %v3700_v23 }
 0x46d   : > { %3675 = vst.msk [vmem:[#allocation4 + $0x70] sm:$0x8] %vm3668_vm11, %v3657_v9 }
 0x46e   : > { %3684 = vst.msk [vmem:[#allocation4 + $0x6f] sm:$0x20] %vm3677_vm12, %v3657_v9  ;;  %v3740_v59 = vmax.f32 %v3716_v39, %v3724_v57  ;;  %v3765_v22 = vmax.f32 %v3757_v42, %v3724_v57  ;;  %v9635_v39 = vld [vmem:[%s10565_s3 + $0x1] ss:$0 sm:$0xff] }
 0x46f   : > { %v9640_v57 = vld [vmem:[%s10566_s4 + $0x1] ss:$0 sm:$0xff] }
 0x470   : > { %3749 = vst.msk [vmem:[#allocation4 + $0x6e] sm:$0x80] %vm3742_vm13, %v3740_v59 }
 0x471   : > { %3773 = vst.msk [vmem:[#allocation4 + $0x75] sm:$0x2] %vm3659_vm10, %v3765_v22 }
 0x472   : > { %3781 = vst.msk [vmem:[#allocation4 + $0x74] sm:$0x8] %vm3668_vm11, %v3765_v22 }
 0x473   : > { %3789 = vst.msk [vmem:[#allocation4 + $0x73] sm:$0x20] %vm3677_vm12, %v3765_v22 }
 0x479   : > { %v3937_v48 = vld [vmem:[#allocation4 + $0x70] sm:$0xff] }
 0x47a   : > { %v4033_v24 = vld [vmem:[#allocation4 + $0x72] sm:$0xff]  ;;  %3959 = vrot.lane.b32.xlu0 %v3937_v48, %s7230_s28  ;;  %4102 = vrot.lane.b32.xlu1 %v3937_v48, %s7233_s11  ;;  %3834 = vst.msk [vmem:[#allocation3 + $0x70] sm:$0xff] %vm256_vm0, %v3937_v48 }
 0x47b   : > { %4185 = vst.msk [vmem:[#allocation3 + $0x58] sm:$0xff] %vm256_vm0, %v4033_v24  ;;  %v9596_v43 = vld [vmem:[#allocation4 + $0x71] sm:$0xff] }
 0x47c   : > { %v4101_v62 = vpop.permute.xlu0 %4100  ;;  %v3958_v34 = vpop.permute.xlu1 %3957 }
 0x47d   : > { %4120 = vst.msk [vmem:[#allocation3 + $0x40] sm:$0xff] %vm1415_vm6, %v4101_v62 }
 0x47e   : > { %3976 = vst.msk [vmem:[#allocation3 + $0x50] sm:$0xff] %vm835_vm3, %v3958_v34  ;;  %4007 = vrot.lane.b32.xlu0 %v9596_v43, %s7231_s12  ;;  %4150 = vrot.lane.b32.xlu1 %v9596_v43, %s7234_s21 }
 0x480   : > { %v4149_v11 = vpop.permute.xlu0 %4148  ;;  %v4006_v40 = vpop.permute.xlu1 %4005 }
 0x481   : > { %4168 = vst.msk [vmem:[#allocation3 + $0x40] sm:$0xff] %vm1608_vm7, %v4149_v11 }
 0x482   : > { %4024 = vst.msk [vmem:[#allocation3 + $0x50] sm:$0xff] %vm1029_vm4, %v4006_v40  ;;  %v4199_v4 = vld [vmem:[#allocation3 + $0x58] sm:$0xff]  ;;  %4055 = vrot.lane.b32.xlu0 %v4033_v24, %s7232_s26  ;;  %3865 = vrot.lane.b32.xlu1 %v9596_v43, %s7228_s24 }
 0x483   : > { %v4209_v60 = vpack.c.bf16 %v4199_v4, %v4197_v20 }
 0x484   : > { %v3864_v19 = vpop.permute.xlu0 %3863  ;;  %v4054_v32 = vpop.permute.xlu1 %4053 }
 0x485   : > { %6909 = vmatprep.mubr.msk.bf16.mxu1 %vm256_vm0, %v4209_v60  ;;  %3881 = vst.msk [vmem:[#allocation3 + $0x60] sm:$0xff] %vm449_vm1, %v3864_v19  ;;  %v9648_v60 = vld [vmem:[#allocation4 + $0x11] sm:$0xff] }
 0x486   : > { %4072 = vst.msk [vmem:[#allocation3 + $0x50] sm:$0xff] %vm1222_vm5, %v4054_v32  ;;  %3913 = vrot.lane.b32.xlu1 %v4033_v24, %s7229_s25 }
 0x488   : > { %v3912_v12 = vpop.permute.xlu0 %3911 }
 0x489   : > { %3929 = vst.msk [vmem:[#allocation3 + $0x60] sm:$0xff] %vm642_vm2, %v3912_v12  ;;  %v7187_v12 = vld [vmem:[%s10564_s2 + $0x80] sm:$0xff]  }
 0x48a   : > { %4863 = vmatpush1.bf16.msra.mxu1 %v7187_v12 }
 0x48b   : > { %4864 = vmatprep.subr.bf16.mxu1 %v7236_v10 }
 0x491   : > { %v7114_v55 = vpop.f32.mrf.mxu0 }
 0x493   : > { %v7115_v8 = vpop.f32.mrf.mxu0 }
 0x494   : > { %v7116_v6 = vadd.f32 %v7115_v8, %v7114_v55  ;;  %v9663_v8 = vld [vmem:[#allocation4 + $0x1] sm:$0xff] }
 0x495   : > { %v7117_v5 = vpop.f32.mrf.mxu0 }
 0x496   : > { %v3469_v52 = vmul.f32 %v7218_v35, %v7116_v6 }
 0x497   : > { %v7118_v49 = vpop.f32.mrf.mxu0 }
 0x498   : > { %v7119_v58 = vadd.f32 %v7118_v49, %v7117_v5  ;;  %v3506_v7 = vadd.f32 %v7219_v13, %v3469_v52  ;;  %v7188_v52 = vld [vmem:[%s10564_s2 + $0x78] sm:$0xff]  }
 0x499   : > { %4865 = vmatpush1.bf16.msra.mxu1 %v7188_v52 }
 0x49a   : > { %v3470_v26 = vmul.f32 %v7218_v35, %v7119_v58  ;;  %v3538_v27 = vmax.f32 %v3506_v7, 0.0  ;;  %v9677_v58 = vld [vmem:[#allocation4 + $0x2] sm:$0xff]  ;;  %4866 = vmatprep.subr.bf16.mxu1 %v7236_v10 }
 0x49c   : > { %v3507_v50 = vadd.f32 %v7219_v13, %v3470_v26  ;;  %v3568_v28 = vmax.f32 %v3536_v51, %v3538_v27 }
 0x49e   : > { %v3539_v0 = vmax.f32 %v3507_v50, 0.0  ;;  %v4196_v50 = vld [vmem:[#allocation3 + $0x40] sm:$0xff] }
 0x4a0   : > { %v3569_v36 = vmax.f32 %v3537_v33, %v3539_v0  ;;  %v7190_v0 = vld [vmem:[%s10564_s2 + $0x68] sm:$0xff]  }
 0x4c9   : > { %v7120_v14 = vpop.f32.mrf.mxu0 }
 0x4cb   : > { %v7121_v61 = vpop.f32.mrf.mxu0 }
 0x4cc   : > { %v7122_v2 = vadd.f32 %v7121_v61, %v7120_v14  ;;  %v9679_v14 = vld [vmem:[#allocation4 + $0x90] sm:$0xff] }
 0x4cd   : > { %v7123_v46 = vpop.f32.mrf.mxu0  ;;  %v9689_v61 = vld [vmem:[#allocation4 + $0x91] sm:$0xff] }
 0x4ce   : > { %v3471_v45 = vmul.f32 %v7218_v35, %v7122_v2 }
 0x4cf   : > { %v7124_v29 = vpop.f32.mrf.mxu0 }
 0x4d0   : > { %v3508_v56 = vadd.f32 %v7219_v13, %v3471_v45  ;;  %v7125_v44 = vadd.f32 %v7124_v29, %v7123_v46  ;;  %v7189_v46 = vld [vmem:[%s10564_s2 + $0x70] sm:$0xff]  }
 0x4d1   : > { %4867 = vmatpush1.bf16.msra.mxu1 %v7189_v46 }
 0x4d2   : > { %v3540_v63 = vmax.f32 %v3508_v56, 0.0  ;;  %v3472_v54 = vmul.f32 %v7218_v35, %v7125_v44  ;;  %v9666_v35 = vld [vmem:[#allocation4 + $0x21] sm:$0xff]  ;;  %4868 = vmatprep.subr.bf16.mxu1 %v7236_v10 }
 0x4d4   : > { %v3570_v21 = vmax.f32 %v3568_v28, %v3540_v63  ;;  %v3509_v47 = vadd.f32 %v7219_v13, %v3472_v54  ;;  %v7191_v54 = vld [vmem:[%s10564_s2 + $0x60] sm:$0xff]  }
 0x4d5   : > { %4869 = vmatpush1.bf16.msra.mxu1 %v7190_v0 }
 0x4d6   : > { %v3608_v1 = vrot.slane %v3570_v21, 1  ;;  %v3541_v25 = vmax.f32 %v3509_v47, 0.0  ;;  %v3642_v37 = vrot.slane %v3570_v21, 2  ;;  %4870 = vmatprep.subr.bf16.mxu1 %v7236_v10 }
 0x4d8   : > { %v3624_v31 = vmax.f32 %v3570_v21, %v3608_v1  ;;  %v3571_v30 = vmax.f32 %v3569_v36, %v3541_v25  ;;  %v7193_v25 = vld [vmem:[%s10564_s2 + $0x50] sm:$0xff]  }
 0x4d9   : > { %4871 = vmatpush1.bf16.msra.mxu1 %v7191_v54 }
 0x4da   : > { %3634 = vst.msk [vmem:[#allocation4 + $0x81] sm:$0x1] %vm3626_vm9, %v3624_v31  ;;  %v3658_v3 = vmax.f32 %v3624_v31, %v3642_v37  ;;  %v3701_v9 = vrot.slane %v3571_v30, 1  ;;  %v3725_v51 = vrot.slane %v3571_v30, 2  ;;  %4872 = vmatprep.subr.bf16.mxu1 %v7236_v10  ;;  %vm6185_vm9 = vcmask 1044484  }
 0x4dc   : > { %3667 = vst.msk [vmem:[#allocation4 + $0x81] sm:$0x2] %vm3659_vm10, %v3658_v3  ;;  %v3717_v17 = vmax.f32 %v3570_v21, %v3701_v9  ;;  %v3758_v23 = vmax.f32 %v3571_v30, %v3701_v9  ;;  %v7192_v21 = vld [vmem:[%s10564_s2 + $0x58] sm:$0xff]  }
 0x4dd   : > { %3676 = vst.msk [vmem:[#allocation4 + $0x80] sm:$0x8] %vm3668_vm11, %v3658_v3  ;;  %4873 = vmatpush1.bf16.msra.mxu1 %v7192_v21  ;;  %v9727_v9 = vld [vmem:[#allocation4 + $0x31] sm:$0xff] }
 0x4de   : > { %3685 = vst.msk [vmem:[#allocation4 + $0x7f] sm:$0x20] %vm3677_vm12, %v3658_v3  ;;  %v3741_v16 = vmax.f32 %v3717_v17, %v3725_v51  ;;  %v3766_v33 = vmax.f32 %v3758_v23, %v3725_v51  ;;  %4874 = vmatprep.subr.bf16.mxu1 %v7236_v10  ;;  %v7194_v23 = vld [vmem:[%s10564_s2 + $0x48] sm:$0xff]  }
 0x4e0   : > { %3750 = vst.msk [vmem:[#allocation4 + $0x7e] sm:$0x80] %vm3742_vm13, %v3741_v16 }
 0x4e1   : > { %3774 = vst.msk [vmem:[#allocation4 + $0x85] sm:$0x2] %vm3659_vm10, %v3766_v33  ;;  %4875 = vmatpush1.bf16.msra.mxu1 %v7193_v25  ;;  %vm6188_vm10 = vcmask 1045509  }
 0x4e2   : > { %3782 = vst.msk [vmem:[#allocation4 + $0x84] sm:$0x8] %vm3668_vm11, %v3766_v33  ;;  %4876 = vmatprep.subr.bf16.mxu1 %v7236_v10  ;;  %vm6191_vm11 = vcmask 1046534  }
 0x4e3   : > { %3790 = vst.msk [vmem:[#allocation4 + $0x83] sm:$0x20] %vm3677_vm12, %v3766_v33  ;;  %vm6194_vm12 = vcmask 1047559  }
 0x4e5   : > { %v4312_v42 = vpop.f32.mrf.mxu1  ;;  %4877 = vmatpush1.bf16.msra.mxu1 %v7194_v23 }
 0x4e6   : > { %v4347_v59 = vmul.f32 %v9635_v39, %v4312_v42  ;;  %v7195_v42 = vld [vmem:[%s10564_s2 + $0x88] sm:$0xff]   ;;  %4892 = vmatprep.subr.bf16.mxu1 %v7236_v10 }
 0x4e7   : > { %v4314_v22 = vpop.f32.mrf.mxu1 }
 0x4e8   : > { %v4359_v62 = vadd.f32 %v9640_v57, %v4347_v59 }
 0x4e9   : > { %v4082_v48 = vld [vmem:[#allocation4 + $0x80] sm:$0xff]  ;;  %v4315_v34 = vpop.f32.mrf.mxu1  ;;  %4893 = vmatpush2.bf16.msra.mxu1 %v7195_v42 }
 0x4ea   : > { %v4034_v24 = vld [vmem:[#allocation4 + $0x82] sm:$0xff]  ;;  %4104 = vrot.lane.b32.xlu0 %v4082_v48, %s7233_s11  ;;  %3961 = vrot.lane.b32.xlu1 %v4082_v48, %s7230_s28  ;;  %v4367_v11 = vmax.f32 %v4359_v62, 0.0  ;;  %v4348_v40 = vmul.f32 %v9635_v39, %v4315_v34 }
 0x4eb   : > { %4186 = vst.msk [vmem:[#allocation3 + $0x68] sm:$0xff] %vm256_vm0, %v4034_v24  ;;  %v9650_v19 = vld [vmem:[#allocation4 + $0x81] sm:$0xff]  ;;  %v4317_v32 = vpop.f32.mrf.mxu1  ;;  %5462 = vmatprep.subr.bf16.mxu1 %v7236_v10 }
 0x4ec   : > { %v3960_v20 = vpop.permute.xlu0 %3959  ;;  %v4103_v4 = vpop.permute.xlu1 %4102  ;;  %4375 = vst.msk [vmem:[#allocation4 + $0x11] sm:$0xff] %vm256_vm0, %v4367_v11  ;;  %v4360_v55 = vadd.f32 %v9640_v57, %v4348_v40 }
 0x4ed   : > { %3977 = vst.msk [vmem:[#allocation3 + $0x60] sm:$0xff] %vm835_vm3, %v3960_v20 }
 0x4ee   : > { %4121 = vst.msk [vmem:[#allocation3 + $0x50] sm:$0xff] %vm1415_vm6, %v4103_v4  ;;  %4152 = vrot.lane.b32.xlu0 %v9650_v19, %s7234_s21  ;;  %4009 = vrot.lane.b32.xlu1 %v9650_v19, %s7231_s12  ;;  %v4368_v5 = vmax.f32 %v4360_v55, 0.0 }
 0x4f0   : > { %v4008_v6 = vpop.permute.xlu0 %4007  ;;  %v4151_v49 = vpop.permute.xlu1 %4150  ;;  %4376 = vst.msk [vmem:[#allocation4 + $0x21] sm:$0xff] %vm256_vm0, %v4368_v5 }
 0x4f1   : > { %4025 = vst.msk [vmem:[#allocation3 + $0x60] sm:$0xff] %vm1029_vm4, %v4008_v6 }
 0x4f2   : > { %4169 = vst.msk [vmem:[#allocation3 + $0x50] sm:$0xff] %vm1608_vm7, %v4151_v49  ;;  %4436 = vrot.lane.b32.xlu0 %v9663_v8, %s7228_s24  ;;  %4057 = vrot.lane.b32.xlu1 %v4034_v24, %s7232_s26  ;;  %v4201_v2 = vld [vmem:[#allocation3 + $0x68] sm:$0xff] }
 0x4f3   : > { %v4516_v26 = vld [vmem:[#allocation4 + $0x10] sm:$0xff]  ;;  %v4211_v28 = vpack.c.bf16 %v9588_v53, %v4201_v2 }
 0x4f4   : > { %v4056_v13 = vpop.permute.xlu0 %4055  ;;  %v3866_v7 = vpop.permute.xlu1 %3865  ;;  %4413 = vst.msk [vmem:[#allocation3 + $0x10] sm:$0xff] %vm256_vm0, %v4516_v26  ;;  %v4564_v63 = vld [vmem:[#allocation4 + $0x11] sm:$0xff] }
 0x4f5   : > { %4073 = vst.msk [vmem:[#allocation3 + $0x60] sm:$0xff] %vm1222_vm5, %v4056_v13  ;;  %v4612_v53 = vld [vmem:[#allocation4 + $0x12] sm:$0xff] }
 0x4f6   : > { %3882 = vst.msk [vmem:[#allocation3 + $0x70] sm:$0xff] %vm449_vm1, %v3866_v7  ;;  %4484 = vrot.lane.b32.xlu0 %v9677_v58, %s7229_s25  ;;  %4106 = vrot.lane.b32.xlu1 %v9679_v14, %s7233_s11 }
 0x4f7   : > { %v4660_v56 = vld [vmem:[#allocation4 + $0x20] sm:$0xff] }
 0x4f8   : > { %v3914_v27 = vpop.permute.xlu1 %3913  ;;  %v4613_v44 = vld [vmem:[#allocation4 + $0x22] sm:$0xff]  ;;  %4414 = vst.msk [vmem:[#allocation3 + $0x20] sm:$0xff] %vm256_vm0, %v4660_v56 }
 0x4f9   : > { %v4198_v45 = vld [vmem:[#allocation3 + $0x50] sm:$0xff]  ;;  %3930 = vst.msk [vmem:[#allocation3 + $0x70] sm:$0xff] %vm642_vm2, %v3914_v27  ;;  %v4708_v51 = vld [vmem:[#allocation4 + $0x21] sm:$0xff] }
 0x4fa   : > { %v4208_v29 = vpack.c.bf16 %v4198_v45, %v4196_v50  ;;  %4154 = vrot.lane.b32.xlu1 %v9689_v61, %s7234_s21  ;;  %4532 = vrot.lane.b32.xlu0 %v4516_v26, %s7230_s28  ;;  %4764 = vst.msk [vmem:[#allocation3 + $0x8] sm:$0xff] %vm256_vm0, %v4613_v44 }
 0x4fc   : > { %4327 = vmatmul.mubr.bf16.gmra.mxu1 %v4208_v29 }
 0x4fd   : > { %6910 = vmatprep.mubr.msk.bf16.mxu1 %vm256_vm0, %v4211_v28 }
 0x4fe   : > { %4580 = vrot.lane.b32.xlu0 %v4564_v63, %s7231_s12  ;;  %4438 = vrot.lane.b32.xlu1 %v4564_v63, %s7228_s24 }
 0x501   : > { %v4320_v47 = vpop.f32.mrf.mxu1  ;;  %v4773_v45 = vld [vmem:[#allocation3 + $0x8] sm:$0xff] }
 0x502   : > { %4628 = vrot.lane.b32.xlu0 %v4612_v53, %s7232_s26  ;;  %4486 = vrot.lane.b32.xlu1 %v4612_v53, %s7229_s25  ;;  %v4349_v36 = vmul.f32 %v9635_v39, %v4320_v47 }
 0x503   : > { %v4322_v1 = vpop.f32.mrf.mxu1 }
 0x504   : > { %v4361_v31 = vadd.f32 %v9640_v57, %v4349_v36 }
 0x505   : > { %v4323_v37 = vpop.f32.mrf.mxu1 }
 0x506   : > { %4676 = vrot.lane.b32.xlu0 %v4660_v56, %s7233_s11  ;;  %4534 = vrot.lane.b32.xlu1 %v4660_v56, %s7230_s28  ;;  %v4369_v30 = vmax.f32 %v4361_v31, 0.0  ;;  %v4350_v3 = vmul.f32 %v9635_v39, %v4323_v37 }
 0x507   : > { %v4325_v17 = vpop.f32.mrf.mxu1 }
 0x508   : > { %4377 = vst.msk [vmem:[#allocation4 + $0x31] sm:$0xff] %vm256_vm0, %v4369_v30  ;;  %v4362_v16 = vadd.f32 %v9640_v57, %v4350_v3 }
 0x50a   : > { %4724 = vrot.lane.b32.xlu0 %v4708_v51, %s7234_s21  ;;  %4582 = vrot.lane.b32.xlu1 %v4708_v51, %s7231_s12  ;;  %v4370_v33 = vmax.f32 %v4362_v16, 0.0 }
 0x50c   : > { %4378 = vst.msk [vmem:[#allocation4 + $0x41] sm:$0xff] %vm256_vm0, %v4370_v33 }
 0x50e   : > { %4440 = vrot.lane.b32.xlu0 %v4708_v51, %s7228_s24  ;;  %4630 = vrot.lane.b32.xlu1 %v4613_v44, %s7232_s26 }
 0x50f   : > { %v4661_v59 = vld [vmem:[#allocation4 + $0x30] sm:$0xff] }
 0x510   : > { %v4614_v22 = vld [vmem:[#allocation4 + $0x32] sm:$0xff]  ;;  %4415 = vst.msk [vmem:[#allocation3 + $0x30] sm:$0xff] %vm256_vm0, %v4661_v59 }
 0x511   : > { %4765 = vst.msk [vmem:[#allocation3 + $0x18] sm:$0xff] %vm256_vm0, %v4614_v22  ;;  %v4709_v48 = vld [vmem:[#allocation4 + $0x31] sm:$0xff] }
 0x512   : > { %4488 = vrot.lane.b32.xlu0 %v4613_v44, %s7229_s25  ;;  %4678 = vrot.lane.b32.xlu1 %v4661_v59, %s7233_s11 }
 0x513   : > { %v4662_v24 = vld [vmem:[#allocation4 + $0x40] sm:$0xff] }
 0x514   : > { %v4615_v62 = vld [vmem:[#allocation4 + $0x42] sm:$0xff]  ;;  %4416 = vst.msk [vmem:[#allocation3 + $0x40] sm:$0xff] %vm256_vm0, %v4662_v24 }
 0x515   : > { %4766 = vst.msk [vmem:[#allocation3 + $0x28] sm:$0xff] %vm256_vm0, %v4615_v62  ;;  %v4710_v34 = vld [vmem:[#allocation4 + $0x41] sm:$0xff] }
 0x516   : > { %4536 = vrot.lane.b32.xlu0 %v4661_v59, %s7230_s28  ;;  %4726 = vrot.lane.b32.xlu1 %v4709_v48, %s7234_s21 }
 0x518   : > { %v4775_v7 = vld [vmem:[#allocation3 + $0x18] sm:$0xff] }
 0x519   : > { %v4789_v29 = vpack.c.bf16 %v4775_v7, %v4773_v45 }
 0x51a   : > { %4584 = vrot.lane.b32.xlu0 %v4709_v48, %s7231_s12  ;;  %4442 = vrot.lane.b32.xlu1 %v4709_v48, %s7228_s24 }
 0x51e   : > { %4632 = vrot.lane.b32.xlu0 %v4614_v22, %s7232_s26  ;;  %4490 = vrot.lane.b32.xlu1 %v4614_v22, %s7229_s25 }
 0x522   : > { %4680 = vrot.lane.b32.xlu0 %v4662_v24, %s7233_s11  ;;  %4538 = vrot.lane.b32.xlu1 %v4662_v24, %s7230_s28 }
 0x526   : > { %4728 = vrot.lane.b32.xlu0 %v4710_v34, %s7234_s21  ;;  %4586 = vrot.lane.b32.xlu1 %v4710_v34, %s7231_s12 }
 0x52a   : > { %4444 = vrot.lane.b32.xlu0 %v4710_v34, %s7228_s24  ;;  %4634 = vrot.lane.b32.xlu1 %v4615_v62, %s7232_s26 }
 0x52e   : > { %4492 = vrot.lane.b32.xlu0 %v4615_v62, %s7229_s25 }
 0x55c   : > { %v4105_v11 = vpop.permute.xlu0 %4104  ;;  %v3962_v40 = vpop.permute.xlu1 %3961 }
 0x55d   : > { %4122 = vst.msk [vmem:[#allocation3 + $0x60] sm:$0xff] %vm1415_vm6, %v4105_v11 }
 0x55e   : > { %3978 = vst.msk [vmem:[#allocation3 + $0x70] sm:$0xff] %vm835_vm3, %v3962_v40 }
 0x560   : > { %v4153_v20 = vpop.permute.xlu0 %4152  ;;  %v4010_v4 = vpop.permute.xlu1 %4009 }
 0x561   : > { %4170 = vst.msk [vmem:[#allocation3 + $0x60] sm:$0xff] %vm1608_vm7, %v4153_v20 }
 0x562   : > { %4026 = vst.msk [vmem:[#allocation3 + $0x70] sm:$0xff] %vm1029_vm4, %v4010_v4 }
 0x564   : > { %v4437_v32 = vpop.permute.xlu0 %4436  ;;  %v4058_v12 = vpop.permute.xlu1 %4057 }
 0x565   : > { %4460 = vst.msk [vmem:[#allocation3] sm:$0xff] %vm449_vm1, %v4437_v32 }
 0x566   : > { %4074 = vst.msk [vmem:[#allocation3 + $0x70] sm:$0xff] %vm1222_vm5, %v4058_v12 }
 0x568   : > { %v4485_v55 = vpop.permute.xlu0 %4484  ;;  %v4107_v5 = vpop.permute.xlu1 %4106  ;;  %v4200_v46 = vld [vmem:[#allocation3 + $0x60] sm:$0xff] }
 0x569   : > { %4508 = vst.msk [vmem:[#allocation3] sm:$0xff] %vm642_vm2, %v4485_v55 }
 0x56a   : > { %4123 = vst.msk [vmem:[#allocation3 + $0x70] sm:$0xff] %vm1415_vm6, %v4107_v5 }
 0x56c   : > { %v4155_v6 = vpop.permute.xlu1 %4154  ;;  %v4533_v49 = vpop.permute.xlu0 %4532 }
 0x56d   : > { %4171 = vst.msk [vmem:[#allocation3 + $0x70] sm:$0xff] %vm1608_vm7, %v4155_v6 }
 0x56e   : > { %4556 = vst.msk [vmem:[#allocation3] sm:$0xff] %vm835_vm3, %v4533_v49 }
 0x570   : > { %v4581_v52 = vpop.permute.xlu0 %4580  ;;  %v4439_v13 = vpop.permute.xlu1 %4438 }
 0x571   : > { %4604 = vst.msk [vmem:[#allocation3] sm:$0xff] %vm1029_vm4, %v4581_v52 }
 0x572   : > { %4461 = vst.msk [vmem:[#allocation3 + $0x10] sm:$0xff] %vm449_vm1, %v4439_v13  ;;  %v4777_v13 = vld [vmem:[#allocation3 + $0x28] sm:$0xff] }
 0x574   : > { %v4629_v26 = vpop.permute.xlu0 %4628  ;;  %v4487_v2 = vpop.permute.xlu1 %4486  ;;  %v4202_v27 = vld [vmem:[#allocation3 + $0x70] sm:$0xff] }
 0x575   : > { %4652 = vst.msk [vmem:[#allocation3] sm:$0xff] %vm1222_vm5, %v4629_v26  ;;  %v4210_v50 = vpack.c.bf16 %v4202_v27, %v4200_v46 }
 0x576   : > { %4509 = vst.msk [vmem:[#allocation3 + $0x10] sm:$0xff] %vm642_vm2, %v4487_v2  ;;  %v9816_v2 = vld [vmem:[#allocation3 + $0x78] sm:$0xff] }
 0x577   : > { %4335 = vmatmul.mubr.bf16.gmra.mxu1 %v4210_v50  ;;  %5371 = vst.msk [vmem:[#allocation3 + $0x78] sm:$0xff] %vm256_vm0, %v9576_v18 }
 0x578   : > { %6940 = vmatprep.mubr.msk.bf16.mxu1 %vm256_vm0, %v4789_v29  ;;  %v4677_v56 = vpop.permute.xlu0 %4676  ;;  %v4535_v44 = vpop.permute.xlu1 %4534 }
 0x579   : > { %4700 = vst.msk [vmem:[#allocation3] sm:$0xff] %vm1415_vm6, %v4677_v56 }
 0x57a   : > { %4557 = vst.msk [vmem:[#allocation3 + $0x10] sm:$0xff] %vm835_vm3, %v4535_v44 }
 0x57c   : > { %v4725_v28 = vpop.permute.xlu0 %4724  ;;  %v4583_v0 = vpop.permute.xlu1 %4582 }
 0x57d   : > { %4748 = vst.msk [vmem:[#allocation3] sm:$0xff] %vm1608_vm7, %v4725_v28 }
 0x57e   : > { %4605 = vst.msk [vmem:[#allocation3 + $0x10] sm:$0xff] %vm1029_vm4, %v4583_v0 }
 0x580   : > { %v4441_v63 = vpop.permute.xlu0 %4440  ;;  %v4631_v54 = vpop.permute.xlu1 %4630 }
 0x581   : > { %4462 = vst.msk [vmem:[#allocation3 + $0x20] sm:$0xff] %vm449_vm1, %v4441_v63 }
 0x582   : > { %4653 = vst.msk [vmem:[#allocation3 + $0x10] sm:$0xff] %vm1222_vm5, %v4631_v54 }
 0x584   : > { %v4489_v53 = vpop.permute.xlu0 %4488  ;;  %v4679_v21 = vpop.permute.xlu1 %4678  ;;  %v4772_v30 = vld [vmem:[#allocation3] sm:$0xff] }
 0x585   : > { %4510 = vst.msk [vmem:[#allocation3 + $0x20] sm:$0xff] %vm642_vm2, %v4489_v53 }
 0x586   : > { %4701 = vst.msk [vmem:[#allocation3 + $0x10] sm:$0xff] %vm1415_vm6, %v4679_v21 }
 0x588   : > { %v4537_v47 = vpop.permute.xlu0 %4536  ;;  %v4727_v36 = vpop.permute.xlu1 %4726 }
 0x589   : > { %4558 = vst.msk [vmem:[#allocation3 + $0x20] sm:$0xff] %vm835_vm3, %v4537_v47 }
 0x58a   : > { %4749 = vst.msk [vmem:[#allocation3 + $0x10] sm:$0xff] %vm1608_vm7, %v4727_v36 }
 0x58c   : > { %v4585_v1 = vpop.permute.xlu0 %4584  ;;  %v4443_v25 = vpop.permute.xlu1 %4442 }
 0x58d   : > { %4606 = vst.msk [vmem:[#allocation3 + $0x20] sm:$0xff] %vm1029_vm4, %v4585_v1 }
 0x58e   : > { %4463 = vst.msk [vmem:[#allocation3 + $0x30] sm:$0xff] %vm449_vm1, %v4443_v25 }
 0x590   : > { %v4633_v31 = vpop.permute.xlu0 %4632  ;;  %v4491_v37 = vpop.permute.xlu1 %4490 }
 0x591   : > { %v4774_v3 = vld [vmem:[#allocation3 + $0x10] sm:$0xff]  ;;  %4654 = vst.msk [vmem:[#allocation3 + $0x20] sm:$0xff] %vm1222_vm5, %v4633_v31 }
 0x592   : > { %4511 = vst.msk [vmem:[#allocation3 + $0x30] sm:$0xff] %vm642_vm2, %v4491_v37  ;;  %v4788_v17 = vpack.c.bf16 %v4774_v3, %v4772_v30 }
 0x594   : > { %4895 = vmatmul.mubr.bf16.vlgmr.msra.gmra.mxu1 %v4788_v17  ;;  %v4681_v51 = vpop.permute.xlu0 %4680  ;;  %v4539_v23 = vpop.permute.xlu1 %4538 }
 0x595   : > { %4702 = vst.msk [vmem:[#allocation3 + $0x20] sm:$0xff] %vm1415_vm6, %v4681_v51 }
 0x596   : > { %4559 = vst.msk [vmem:[#allocation3 + $0x30] sm:$0xff] %vm835_vm3, %v4539_v23 }
 0x598   : > { %v4729_v16 = vpop.permute.xlu0 %4728  ;;  %v4587_v33 = vpop.permute.xlu1 %4586 }
 0x599   : > { %4750 = vst.msk [vmem:[#allocation3 + $0x20] sm:$0xff] %vm1608_vm7, %v4729_v16 }
 0x59a   : > { %4607 = vst.msk [vmem:[#allocation3 + $0x30] sm:$0xff] %vm1029_vm4, %v4587_v33 }
 0x59c   : > { %v4445_v42 = vpop.permute.xlu0 %4444  ;;  %v4635_v59 = vpop.permute.xlu1 %4634 }
 0x59d   : > { %4464 = vst.msk [vmem:[#allocation3 + $0x40] sm:$0xff] %vm449_vm1, %v4445_v42 }
 0x59e   : > { %4655 = vst.msk [vmem:[#allocation3 + $0x30] sm:$0xff] %vm1222_vm5, %v4635_v59  ;;  %v9852_v59 = vld [vmem:[#allocation4] sm:$0xff] }
 0x59f   : > { %5012 = vst.msk [vmem:[#allocation3] sm:$0xff] %vm256_vm0, %v9852_v59 }
 0x5a0   : > { %v4493_v22 = vpop.permute.xlu0 %4492  ;;  %v4776_v37 = vld [vmem:[#allocation3 + $0x20] sm:$0xff] }
 0x5a1   : > { %4512 = vst.msk [vmem:[#allocation3 + $0x40] sm:$0xff] %vm642_vm2, %v4493_v22 }
 0x5bc   : > { %v4328_v48 = vpop.f32.mrf.mxu1 }
 0x5bd   : > { %v4351_v24 = vmul.f32 %v9635_v39, %v4328_v48 }
 0x5be   : > { %v4330_v62 = vpop.f32.mrf.mxu1 }
 0x5bf   : > { %v4363_v34 = vadd.f32 %v9640_v57, %v4351_v24 }
 0x5c0   : > { %v4331_v11 = vpop.f32.mrf.mxu1 }
 0x5c1   : > { %v4371_v40 = vmax.f32 %v4363_v34, 0.0  ;;  %v4352_v20 = vmul.f32 %v9635_v39, %v4331_v11  ;;  %v9864_v34 = vld [vmem:[%s10565_s3 + $0x2] ss:$0 sm:$0xff] }
 0x5c2   : > { %v4333_v4 = vpop.f32.mrf.mxu1  ;;  %v9871_v11 = vld [vmem:[%s10566_s4 + $0x2] ss:$0 sm:$0xff] }
 0x5c3   : > { %4379 = vst.msk [vmem:[#allocation4 + $0x51] sm:$0xff] %vm256_vm0, %v4371_v40  ;;  %v4364_v32 = vadd.f32 %v9640_v57, %v4352_v20 }
 0x5c5   : > { %v4372_v12 = vmax.f32 %v4364_v32, 0.0 }
 0x5c7   : > { %4380 = vst.msk [vmem:[#allocation4 + $0x61] sm:$0xff] %vm256_vm0, %v4372_v12 }
 0x5ca   : > { %v4520_v55 = vld [vmem:[#allocation4 + $0x50] sm:$0xff] }
 0x5cb   : > { %v4616_v5 = vld [vmem:[#allocation4 + $0x52] sm:$0xff]  ;;  %4540 = vrot.lane.b32.xlu0 %v4520_v55, %s7230_s28  ;;  %4682 = vrot.lane.b32.xlu1 %v4520_v55, %s7233_s11  ;;  %4417 = vst.msk [vmem:[#allocation3 + $0x50] sm:$0xff] %vm256_vm0, %v4520_v55 }
 0x5cc   : > { %4767 = vst.msk [vmem:[#allocation3 + $0x38] sm:$0xff] %vm256_vm0, %v4616_v5  ;;  %v4568_v6 = vld [vmem:[#allocation4 + $0x51] sm:$0xff] }
 0x5ce   : > { %v4664_v49 = vld [vmem:[#allocation4 + $0x60] sm:$0xff] }
 0x5cf   : > { %v4474_v52 = vld [vmem:[#allocation4 + $0x62] sm:$0xff]  ;;  %4588 = vrot.lane.b32.xlu0 %v4568_v6, %s7231_s12  ;;  %4730 = vrot.lane.b32.xlu1 %v4568_v6, %s7234_s21  ;;  %4418 = vst.msk [vmem:[#allocation3 + $0x60] sm:$0xff] %vm256_vm0, %v4664_v49 }
 0x5d0   : > { %4768 = vst.msk [vmem:[#allocation3 + $0x48] sm:$0xff] %vm256_vm0, %v4474_v52  ;;  %v4712_v46 = vld [vmem:[#allocation4 + $0x61] sm:$0xff] }
 0x5d3   : > { %v4779_v7 = vld [vmem:[#allocation3 + $0x38] sm:$0xff]  ;;  %4636 = vrot.lane.b32.xlu0 %v4616_v5, %s7232_s26  ;;  %4446 = vrot.lane.b32.xlu1 %v4568_v6, %s7228_s24 }
 0x5d4   : > { %v4791_v26 = vpack.c.bf16 %v4779_v7, %v4777_v13 }
 0x5d6   : > { %6941 = vmatprep.mubr.msk.bf16.mxu1 %vm256_vm0, %v4791_v26 }
 0x5d7   : > { %4684 = vrot.lane.b32.xlu0 %v4664_v49, %s7233_s11  ;;  %4494 = vrot.lane.b32.xlu1 %v4616_v5, %s7229_s25  ;;  %v4781_v33 = vld [vmem:[#allocation3 + $0x48] sm:$0xff] }
 0x5db   : > { %4732 = vrot.lane.b32.xlu0 %v4712_v46, %s7234_s21  ;;  %4542 = vrot.lane.b32.xlu1 %v4664_v49, %s7230_s28 }
 0x5df   : > { %4448 = vrot.lane.b32.xlu0 %v4712_v46, %s7228_s24  ;;  %4590 = vrot.lane.b32.xlu1 %v4712_v46, %s7231_s12 }
 0x5e3   : > { %4496 = vrot.lane.b32.xlu0 %v4474_v52, %s7229_s25  ;;  %4638 = vrot.lane.b32.xlu1 %v4474_v52, %s7232_s26 }
 0x637   : > { %v4336_v27 = vpop.f32.mrf.mxu1 }
 0x638   : > { %v4353_v18 = vmul.f32 %v9635_v39, %v4336_v27 }
 0x639   : > { %v4338_v50 = vpop.f32.mrf.mxu1 }
 0x63a   : > { %v4365_v45 = vadd.f32 %v9640_v57, %v4353_v18  ;;  %v7197_v50 = vld [vmem:[%s10564_s2 + $0xc0] sm:$0xff]  }
 0x63b   : > { %v4339_v29 = vpop.f32.mrf.mxu1 }
 0x63c   : > { %v4373_v56 = vmax.f32 %v4365_v45, 0.0  ;;  %v4354_v44 = vmul.f32 %v9635_v39, %v4339_v29 }
 0x63d   : > { %v4541_v28 = vpop.permute.xlu0 %4540  ;;  %v4683_v0 = vpop.permute.xlu1 %4682 }
 0x63e   : > { %4560 = vst.msk [vmem:[#allocation3 + $0x40] sm:$0xff] %vm835_vm3, %v4541_v28  ;;  %v4341_v63 = vpop.f32.mrf.mxu1  ;;  %v4366_v54 = vadd.f32 %v9640_v57, %v4354_v44 }
 0x63f   : > { %4703 = vst.msk [vmem:[#allocation3 + $0x30] sm:$0xff] %vm1415_vm6, %v4683_v0  ;;  %v7199_v0 = vld [vmem:[%s10564_s2 + $0xb0] sm:$0xff]  }
 0x640   : > { %4381 = vst.msk [vmem:[#allocation4 + $0x71] sm:$0xff] %vm256_vm0, %v4373_v56  ;;  %v4374_v53 = vmax.f32 %v4366_v54, 0.0  ;;  %v7198_v56 = vld [vmem:[%s10564_s2 + $0xb8] sm:$0xff]  }
 0x641   : > { %v4589_v21 = vpop.permute.xlu0 %4588  ;;  %v4731_v47 = vpop.permute.xlu1 %4730 }
 0x642   : > { %4608 = vst.msk [vmem:[#allocation3 + $0x40] sm:$0xff] %vm1029_vm4, %v4589_v21 }
 0x643   : > { %4751 = vst.msk [vmem:[#allocation3 + $0x30] sm:$0xff] %vm1608_vm7, %v4731_v47 }
 0x644   : > { %4382 = vst.msk [vmem:[#allocation4 + $0x81] sm:$0xff] %vm256_vm0, %v4374_v53 }
 0x645   : > { %v4637_v39 = vpop.permute.xlu0 %4636  ;;  %v4447_v36 = vpop.permute.xlu1 %4446 }
 0x646   : > { %4656 = vst.msk [vmem:[#allocation3 + $0x40] sm:$0xff] %vm1222_vm5, %v4637_v39 }
 0x647   : > { %4465 = vst.msk [vmem:[#allocation3 + $0x50] sm:$0xff] %vm449_vm1, %v4447_v36  ;;  %v4522_v1 = vld [vmem:[#allocation4 + $0x70] sm:$0xff] }
 0x648   : > { %v4618_v25 = vld [vmem:[#allocation4 + $0x72] sm:$0xff]  ;;  %4544 = vrot.lane.b32.xlu0 %v4522_v1, %s7230_s28  ;;  %4686 = vrot.lane.b32.xlu1 %v4522_v1, %s7233_s11  ;;  %4419 = vst.msk [vmem:[#allocation3 + $0x70] sm:$0xff] %vm256_vm0, %v4522_v1 }
 0x649   : > { %4769 = vst.msk [vmem:[#allocation3 + $0x58] sm:$0xff] %vm256_vm0, %v4618_v25  ;;  %v4685_v57 = vpop.permute.xlu0 %4684  ;;  %v4495_v31 = vpop.permute.xlu1 %4494  ;;  %v4570_v3 = vld [vmem:[#allocation4 + $0x71] sm:$0xff] }
 0x64a   : > { %v4778_v30 = vld [vmem:[#allocation3 + $0x30] sm:$0xff]  ;;  %4704 = vst.msk [vmem:[#allocation3 + $0x40] sm:$0xff] %vm1415_vm6, %v4685_v57 }
 0x64b   : > { %4513 = vst.msk [vmem:[#allocation3 + $0x50] sm:$0xff] %vm642_vm2, %v4495_v31  ;;  %v4790_v17 = vpack.c.bf16 %v4778_v30, %v4776_v37  ;;  %v4619_v51 = vld [vmem:[#allocation4 + $0x82] sm:$0xff] }
 0x64c   : > { %4592 = vrot.lane.b32.xlu0 %v4570_v3, %s7231_s12  ;;  %4734 = vrot.lane.b32.xlu1 %v4570_v3, %s7234_s21  ;;  %4770 = vst.msk [vmem:[#allocation3 + $0x68] sm:$0xff] %vm256_vm0, %v4619_v51  ;;  %v4666_v62 = vld [vmem:[#allocation4 + $0x80] sm:$0xff] }
 0x64d   : > { %4903 = vmatmul.mubr.bf16.gmra.mxu1 %v4790_v17  ;;  %v4733_v23 = vpop.permute.xlu0 %4732  ;;  %v4543_v16 = vpop.permute.xlu1 %4542  ;;  %v4714_v55 = vld [vmem:[#allocation4 + $0x81] sm:$0xff] }
 0x64e   : > { %4752 = vst.msk [vmem:[#allocation3 + $0x40] sm:$0xff] %vm1608_vm7, %v4733_v23 }
 0x64f   : > { %4561 = vst.msk [vmem:[#allocation3 + $0x50] sm:$0xff] %vm835_vm3, %v4543_v16 }
 0x650   : > { %v4783_v42 = vld [vmem:[#allocation3 + $0x58] sm:$0xff]  ;;  %4640 = vrot.lane.b32.xlu0 %v4618_v25, %s7232_s26  ;;  %4450 = vrot.lane.b32.xlu1 %v4570_v3, %s7228_s24 }
 0x651   : > { %v4793_v22 = vpack.c.bf16 %v4783_v42, %v4781_v33  ;;  %v4449_v48 = vpop.permute.xlu0 %4448  ;;  %v4591_v24 = vpop.permute.xlu1 %4590 }
 0x652   : > { %4466 = vst.msk [vmem:[#allocation3 + $0x60] sm:$0xff] %vm449_vm1, %v4449_v48 }
 0x653   : > { %6942 = vmatprep.mubr.msk.bf16.mxu1 %vm256_vm0, %v4793_v22  ;;  %4609 = vst.msk [vmem:[#allocation3 + $0x50] sm:$0xff] %vm1029_vm4, %v4591_v24  ;;  %v4785_v53 = vld [vmem:[#allocation3 + $0x68] sm:$0xff] }
 0x654   : > { %4688 = vrot.lane.b32.xlu0 %v4666_v62, %s7233_s11  ;;  %4498 = vrot.lane.b32.xlu1 %v4618_v25, %s7229_s25  ;;  %v4896_v40 = vpop.f32.mrf.mxu1  ;;  %v4795_v25 = vpack.c.bf16 %v9816_v2, %v4785_v53 }
 0x655   : > { %v4931_v20 = vmul.f32 %v9864_v34, %v4896_v40  ;;  %v4497_v4 = vpop.permute.xlu0 %4496  ;;  %v4639_v32 = vpop.permute.xlu1 %4638  ;;  %v4780_v39 = vld [vmem:[#allocation3 + $0x40] sm:$0xff] }
 0x656   : > { %4514 = vst.msk [vmem:[#allocation3 + $0x60] sm:$0xff] %vm642_vm2, %v4497_v4  ;;  %v4898_v12 = vpop.f32.mrf.mxu1 }
 0x657   : > { %4657 = vst.msk [vmem:[#allocation3 + $0x50] sm:$0xff] %vm1222_vm5, %v4639_v32  ;;  %v4943_v5 = vadd.f32 %v9871_v11, %v4931_v20 }
 0x658   : > { %4736 = vrot.lane.b32.xlu0 %v4714_v55, %s7234_s21  ;;  %4546 = vrot.lane.b32.xlu1 %v4666_v62, %s7230_s28  ;;  %v4899_v6 = vpop.f32.mrf.mxu1 }
 0x659   : > { %v4951_v49 = vadd.f32 %v4943_v5, %v9648_v60  ;;  %v4932_v52 = vmul.f32 %v9864_v34, %v4899_v6 }
 0x65a   : > { %v4901_v13 = vpop.f32.mrf.mxu1 }
 0x65b   : > { %v4959_v7 = vmax.f32 %v4951_v49, 0.0  ;;  %v4944_v26 = vadd.f32 %v9871_v11, %v4932_v52  ;;  %v7200_v49 = vld [vmem:[%s10564_s2 + $0xa8] sm:$0xff]  }
 0x65c   : > { %4594 = vrot.lane.b32.xlu1 %v4714_v55, %s7231_s12  ;;  %5036 = vrot.lane.b32.xlu0 %v9663_v8, %s7228_s24 }
 0x65d   : > { %4967 = vst.msk [vmem:[#allocation4 + $0x11] sm:$0xff] %vm256_vm0, %v4959_v7  ;;  %v4952_v46 = vadd.f32 %v4944_v26, %v9666_v35 }
 0x65f   : > { %v4960_v27 = vmax.f32 %v4952_v46, 0.0  ;;  %v7201_v46 = vld [vmem:[%s10564_s2 + $0xa0] sm:$0xff]  }
 0x660   : > { %4642 = vrot.lane.b32.xlu1 %v4619_v51, %s7232_s26  ;;  %5084 = vrot.lane.b32.xlu0 %v9677_v58, %s7229_s25 }
 0x661   : > { %4968 = vst.msk [vmem:[#allocation4 + $0x21] sm:$0xff] %vm256_vm0, %v4960_v27 }
 0x664   : > { %4690 = vrot.lane.b32.xlu1 %v9679_v14, %s7233_s11  ;;  %v5116_v60 = vld [vmem:[#allocation4 + $0x10] sm:$0xff] }
 0x665   : > { %5132 = vrot.lane.b32.xlu0 %v5116_v60, %s7230_s28  ;;  %5013 = vst.msk [vmem:[#allocation3 + $0x10] sm:$0xff] %vm256_vm0, %v5116_v60  ;;  %v9897_v8 = vld [vmem:[#allocation4 + $0x11] sm:$0xff] }
 0x666   : > { %v5212_v58 = vld [vmem:[#allocation4 + $0x12] sm:$0xff] }
 0x668   : > { %4738 = vrot.lane.b32.xlu1 %v9689_v61, %s7234_s21  ;;  %v5260_v35 = vld [vmem:[#allocation4 + $0x20] sm:$0xff]  ;;  %v7196_v61 = vld [vmem:[%s10564_s2 + $0xc8] sm:$0xff]  }
 0x669   : > { %v5213_v18 = vld [vmem:[#allocation4 + $0x22] sm:$0xff]  ;;  %5180 = vrot.lane.b32.xlu0 %v9897_v8, %s7231_s12  ;;  %5014 = vst.msk [vmem:[#allocation3 + $0x20] sm:$0xff] %vm256_vm0, %v5260_v35  ;;  %5463 = vmatpush1.bf16.msra.mxu1 %v7196_v61  ;;  %v7202_v61 = vld [vmem:[%s10564_s2 + $0x98] sm:$0xff]  }
 0x66a   : > { %5364 = vst.msk [vmem:[#allocation3 + $0x8] sm:$0xff] %vm256_vm0, %v5213_v18  ;;  %v9909_v14 = vld [vmem:[#allocation4 + $0x21] sm:$0xff]  ;;  %5464 = vmatprep.subr.bf16.mxu1 %v7236_v10 }
 0x66c   : > { %5038 = vrot.lane.b32.xlu1 %v9897_v8, %s7228_s24 }
 0x66d   : > { %5228 = vrot.lane.b32.xlu0 %v5212_v58, %s7232_s26  ;;  %5465 = vmatpush1.bf16.msra.mxu1 %v7197_v50 }
 0x66e   : > { %5466 = vmatprep.subr.bf16.mxu1 %v7236_v10 }
 0x670   : > { %5086 = vrot.lane.b32.xlu1 %v5212_v58, %s7229_s25 }
 0x671   : > { %5276 = vrot.lane.b32.xlu0 %v5260_v35, %s7233_s11  ;;  %5467 = vmatpush1.bf16.msra.mxu1 %v7198_v56 }
 0x672   : > { %5468 = vmatprep.subr.bf16.mxu1 %v7236_v10 }
 0x674   : > { %5134 = vrot.lane.b32.xlu1 %v5260_v35, %s7230_s28 }
 0x675   : > { %5324 = vrot.lane.b32.xlu0 %v9909_v14, %s7234_s21  ;;  %5469 = vmatpush1.bf16.msra.mxu1 %v7199_v0 }
 0x676   : > { %5470 = vmatprep.subr.bf16.mxu1 %v7236_v10 }
 0x678   : > { %5182 = vrot.lane.b32.xlu1 %v9909_v14, %s7231_s12 }
 0x679   : > { %5040 = vrot.lane.b32.xlu0 %v9909_v14, %s7228_s24  ;;  %5471 = vmatpush1.bf16.msra.mxu1 %v7200_v49 }
 0x67a   : > { %5472 = vmatprep.subr.bf16.mxu1 %v7236_v10 }
 0x67c   : > { %5230 = vrot.lane.b32.xlu1 %v5213_v18, %s7232_s26 }
 0x67d   : > { %5088 = vrot.lane.b32.xlu0 %v5213_v18, %s7229_s25  ;;  %5473 = vmatpush1.bf16.msra.mxu1 %v7201_v46 }
 0x67e   : > { %5474 = vmatprep.subr.bf16.mxu1 %v7236_v10 }
 0x681   : > { %5475 = vmatpush1.bf16.msra.mxu1 %v7202_v61 }
 0x682   : > { %5476 = vmatprep.subr.bf16.mxu1 %v7236_v10 }
 0x6ba   : > { %v4545_v45 = vpop.permute.xlu0 %4544  ;;  %v4687_v29 = vpop.permute.xlu1 %4686 }
 0x6bb   : > { %4562 = vst.msk [vmem:[#allocation3 + $0x60] sm:$0xff] %vm835_vm3, %v4545_v45 }
 0x6bc   : > { %4705 = vst.msk [vmem:[#allocation3 + $0x50] sm:$0xff] %vm1415_vm6, %v4687_v29  ;;  %v7204_v29 = vld [vmem:[%s10564_s2 + $0xd0] sm:$0xff]  }
 0x6be   : > { %v4593_v44 = vpop.permute.xlu0 %4592  ;;  %v4735_v28 = vpop.permute.xlu1 %4734 }
 0x6bf   : > { %4610 = vst.msk [vmem:[#allocation3 + $0x60] sm:$0xff] %vm1029_vm4, %v4593_v44 }
 0x6c0   : > { %4753 = vst.msk [vmem:[#allocation3 + $0x50] sm:$0xff] %vm1608_vm7, %v4735_v28 }
 0x6c2   : > { %v4641_v63 = vpop.permute.xlu0 %4640  ;;  %v4451_v54 = vpop.permute.xlu1 %4450 }
 0x6c3   : > { %4658 = vst.msk [vmem:[#allocation3 + $0x60] sm:$0xff] %vm1222_vm5, %v4641_v63  ;;  %v5373_v63 = vld [vmem:[#allocation3 + $0x8] sm:$0xff] }
 0x6c4   : > { %4467 = vst.msk [vmem:[#allocation3 + $0x70] sm:$0xff] %vm449_vm1, %v4451_v54 }
 0x6c6   : > { %v4689_v21 = vpop.permute.xlu0 %4688  ;;  %v4499_v47 = vpop.permute.xlu1 %4498 }
 0x6c7   : > { %v4782_v36 = vld [vmem:[#allocation3 + $0x50] sm:$0xff]  ;;  %4706 = vst.msk [vmem:[#allocation3 + $0x60] sm:$0xff] %vm1415_vm6, %v4689_v21 }
 0x6c8   : > { %4515 = vst.msk [vmem:[#allocation3 + $0x70] sm:$0xff] %vm642_vm2, %v4499_v47  ;;  %v4792_v1 = vpack.c.bf16 %v4782_v36, %v4780_v39 }
 0x6ca   : > { %4911 = vmatmul.mubr.bf16.gmra.mxu1 %v4792_v1  ;;  %v4737_v57 = vpop.permute.xlu0 %4736  ;;  %v4547_v31 = vpop.permute.xlu1 %4546 }
 0x6cb   : > { %6943 = vmatprep.mubr.msk.bf16.mxu1 %vm256_vm0, %v4795_v25  ;;  %4754 = vst.msk [vmem:[#allocation3 + $0x60] sm:$0xff] %vm1608_vm7, %v4737_v57 }
 0x6cc   : > { %4563 = vst.msk [vmem:[#allocation3 + $0x70] sm:$0xff] %vm835_vm3, %v4547_v31 }
 0x6ce   : > { %v4595_v37 = vpop.permute.xlu1 %4594  ;;  %v5037_v30 = vpop.permute.xlu0 %5036 }
 0x6cf   : > { %4611 = vst.msk [vmem:[#allocation3 + $0x70] sm:$0xff] %vm1029_vm4, %v4595_v37 }
 0x6d0   : > { %5060 = vst.msk [vmem:[#allocation3] sm:$0xff] %vm449_vm1, %v5037_v30 }
 0x6d2   : > { %v4643_v3 = vpop.permute.xlu1 %4642  ;;  %v5085_v17 = vpop.permute.xlu0 %5084  ;;  %v4784_v48 = vld [vmem:[#allocation3 + $0x60] sm:$0xff] }
 0x6d3   : > { %4659 = vst.msk [vmem:[#allocation3 + $0x70] sm:$0xff] %vm1222_vm5, %v4643_v3 }
 0x6d4   : > { %5108 = vst.msk [vmem:[#allocation3] sm:$0xff] %vm642_vm2, %v5085_v17 }
 0x6d6   : > { %v4691_v2 = vpop.permute.xlu1 %4690 }
 0x6d7   : > { %4707 = vst.msk [vmem:[#allocation3 + $0x70] sm:$0xff] %vm1415_vm6, %v4691_v2  ;;  %v5133_v51 = vpop.permute.xlu0 %5132 }
 0x6d8   : > { %5156 = vst.msk [vmem:[#allocation3] sm:$0xff] %vm835_vm3, %v5133_v51 }
 0x6da   : > { %v4739_v23 = vpop.permute.xlu1 %4738 }
 0x6db   : > { %4755 = vst.msk [vmem:[#allocation3 + $0x70] sm:$0xff] %vm1608_vm7, %v4739_v23  ;;  %v5181_v16 = vpop.permute.xlu0 %5180 }
 0x6dc   : > { %5204 = vst.msk [vmem:[#allocation3] sm:$0xff] %vm1029_vm4, %v5181_v16 }
 0x6de   : > { %v5039_v33 = vpop.permute.xlu1 %5038 }
 0x6df   : > { %5061 = vst.msk [vmem:[#allocation3 + $0x10] sm:$0xff] %vm449_vm1, %v5039_v33  ;;  %v5229_v42 = vpop.permute.xlu0 %5228 }
 0x6e0   : > { %5252 = vst.msk [vmem:[#allocation3] sm:$0xff] %vm1222_vm5, %v5229_v42 }
 0x6e2   : > { %v5087_v22 = vpop.permute.xlu1 %5086  ;;  %v4786_v24 = vld [vmem:[#allocation3 + $0x70] sm:$0xff] }
 0x6e3   : > { %5109 = vst.msk [vmem:[#allocation3 + $0x10] sm:$0xff] %vm642_vm2, %v5087_v22  ;;  %v4794_v62 = vpack.c.bf16 %v4786_v24, %v4784_v48  ;;  %v5277_v40 = vpop.permute.xlu0 %5276 }
 0x6e4   : > { %5300 = vst.msk [vmem:[#allocation3] sm:$0xff] %vm1415_vm6, %v5277_v40 }
 0x6e5   : > { %4919 = vmatmul.mubr.bf16.gmra.mxu1 %v4794_v62 }
 0x6e6   : > { %v5135_v20 = vpop.permute.xlu1 %5134 }
 0x6e7   : > { %5157 = vst.msk [vmem:[#allocation3 + $0x10] sm:$0xff] %vm835_vm3, %v5135_v20  ;;  %v5325_v4 = vpop.permute.xlu0 %5324 }
 0x6e8   : > { %5348 = vst.msk [vmem:[#allocation3] sm:$0xff] %vm1608_vm7, %v5325_v4 }
 0x6ea   : > { %v5183_v32 = vpop.permute.xlu1 %5182 }
 0x6eb   : > { %5205 = vst.msk [vmem:[#allocation3 + $0x10] sm:$0xff] %vm1029_vm4, %v5183_v32  ;;  %v5041_v12 = vpop.permute.xlu0 %5040 }
 0x6ec   : > { %5062 = vst.msk [vmem:[#allocation3 + $0x20] sm:$0xff] %vm449_vm1, %v5041_v12 }
 0x6ee   : > { %v5231_v55 = vpop.permute.xlu1 %5230 }
 0x6ef   : > { %5253 = vst.msk [vmem:[#allocation3 + $0x10] sm:$0xff] %vm1222_vm5, %v5231_v55  ;;  %v5089_v5 = vpop.permute.xlu0 %5088  ;;  %v9964_v6 = vld [vmem:[#allocation3] sm:$0xff] }
 0x6f0   : > { %5110 = vst.msk [vmem:[#allocation3 + $0x20] sm:$0xff] %vm642_vm2, %v5089_v5 }
 0x6f1   : > { %5596 = vst.msk [vmem:[#allocation3] sm:$0xff] %vm256_vm0, %v9852_v59 }
 0x70d   : > { %v4904_v52 = vpop.f32.mrf.mxu1 }
 0x70e   : > { %v4933_v13 = vmul.f32 %v9864_v34, %v4904_v52 }
 0x70f   : > { %v4906_v7 = vpop.f32.mrf.mxu1 }
 0x710   : > { %v4945_v26 = vadd.f32 %v9871_v11, %v4933_v13 }
 0x711   : > { %v4907_v27 = vpop.f32.mrf.mxu1 }
 0x712   : > { %v4953_v59 = vadd.f32 %v4945_v26, %v9727_v9  ;;  %v4934_v60 = vmul.f32 %v9864_v34, %v4907_v27  ;;  %v7203_v9 = vld [vmem:[%s10564_s2 + $0x90] sm:$0xff]  }
 0x713   : > { %v4909_v35 = vpop.f32.mrf.mxu1  ;;  %5477 = vmatpush1.bf16.msra.mxu1 %v7203_v9 }
 0x714   : > { %v4961_v18 = vmax.f32 %v4953_v59, 0.0  ;;  %v4946_v58 = vadd.f32 %v9871_v11, %v4934_v60  ;;  %5492 = vmatprep.subr.bf16.mxu1 %v7236_v10 }
 0x716   : > { %4969 = vst.msk [vmem:[#allocation4 + $0x31] sm:$0xff] %vm256_vm0, %v4961_v18  ;;  %v4954_v50 = vadd.f32 %v4946_v58, %v9402_v38 }
 0x717   : > { %5493 = vmatpush2.bf16.msra.mxu1 %v7204_v29 }
 0x718   : > { %v4962_v45 = vmax.f32 %v4954_v50, 0.0  ;;  %7126 = vmatprep.subr.bf16.mxu1 %v7236_v10 }
 0x71a   : > { %4970 = vst.msk [vmem:[#allocation4 + $0x41] sm:$0xff] %vm256_vm0, %v4962_v45 }
 0x71d   : > { %v5261_v56 = vld [vmem:[#allocation4 + $0x30] sm:$0xff] }
 0x71e   : > { %v5214_v44 = vld [vmem:[#allocation4 + $0x32] sm:$0xff]  ;;  %5278 = vrot.lane.b32.xlu1 %v5261_v56, %s7233_s11  ;;  %5136 = vrot.lane.b32.xlu0 %v5261_v56, %s7230_s28  ;;  %5015 = vst.msk [vmem:[#allocation3 + $0x30] sm:$0xff] %vm256_vm0, %v5261_v56 }
 0x71f   : > { %5365 = vst.msk [vmem:[#allocation3 + $0x18] sm:$0xff] %vm256_vm0, %v5214_v44  ;;  %v10001_v38 = vld [vmem:[#allocation4 + $0x31] sm:$0xff] }
 0x721   : > { %v5262_v28 = vld [vmem:[#allocation4 + $0x40] sm:$0xff] }
 0x722   : > { %v5215_v0 = vld [vmem:[#allocation4 + $0x42] sm:$0xff]  ;;  %5326 = vrot.lane.b32.xlu1 %v10001_v38, %s7234_s21  ;;  %5184 = vrot.lane.b32.xlu0 %v10001_v38, %s7231_s12  ;;  %5016 = vst.msk [vmem:[#allocation3 + $0x40] sm:$0xff] %vm256_vm0, %v5262_v28 }
 0x723   : > { %5366 = vst.msk [vmem:[#allocation3 + $0x28] sm:$0xff] %vm256_vm0, %v5215_v0  ;;  %v10015_v21 = vld [vmem:[#allocation4 + $0x41] sm:$0xff] }
 0x726   : > { %v5375_v54 = vld [vmem:[#allocation3 + $0x18] sm:$0xff]  ;;  %5232 = vrot.lane.b32.xlu0 %v5214_v44, %s7232_s26  ;;  %5042 = vrot.lane.b32.xlu1 %v10001_v38, %s7228_s24 }
 0x727   : > { %v5389_v53 = vpack.c.bf16 %v5375_v54, %v5373_v63  ;;  %v5267_v54 = vld [vmem:[#allocation4 + $0x90] sm:$0xff] }
 0x729   : > { %6973 = vmatprep.mubr.msk.bf16.mxu1 %vm256_vm0, %v5389_v53  ;;  %v10114_v53 = vld [vmem:[#allocation4 + $0x91] sm:$0xff] }
 0x72a   : > { %5090 = vrot.lane.b32.xlu1 %v5214_v44, %s7229_s25  ;;  %5280 = vrot.lane.b32.xlu0 %v5262_v28, %s7233_s11  ;;  %v5377_v5 = vld [vmem:[#allocation3 + $0x28] sm:$0xff] }
 0x72e   : > { %5328 = vrot.lane.b32.xlu0 %v10015_v21, %s7234_s21  ;;  %5138 = vrot.lane.b32.xlu1 %v5262_v28, %s7230_s28 }
 0x732   : > { %5186 = vrot.lane.b32.xlu1 %v10015_v21, %s7231_s12  ;;  %5044 = vrot.lane.b32.xlu0 %v10015_v21, %s7228_s24 }
 0x736   : > { %5234 = vrot.lane.b32.xlu1 %v5215_v0, %s7232_s26  ;;  %5092 = vrot.lane.b32.xlu0 %v5215_v0, %s7229_s25 }
 0x78a   : > { %v4912_v47 = vpop.f32.mrf.mxu1 }
 0x78b   : > { %v4935_v39 = vmul.f32 %v9864_v34, %v4912_v47  ;;  %v5604_v47 = vld [vmem:[#allocation4 + $0x1] sm:$0xff] }
 0x78c   : > { %v4914_v36 = vpop.f32.mrf.mxu1 }
 0x78d   : > { %v4947_v1 = vadd.f32 %v9871_v11, %v4935_v39  ;;  %v5652_v39 = vld [vmem:[#allocation4 + $0x2] sm:$0xff] }
 0x78e   : > { %v4915_v25 = vpop.f32.mrf.mxu1 }
 0x78f   : > { %v4955_v57 = vadd.f32 %v4947_v1, %v9420_v15  ;;  %v4936_v31 = vmul.f32 %v9864_v34, %v4915_v25 }
 0x790   : > { %v4917_v37 = vpop.f32.mrf.mxu1  ;;  %v5279_v17 = vpop.permute.xlu1 %5278 }
 0x791   : > { %v4963_v30 = vmax.f32 %v4955_v57, 0.0  ;;  %v4948_v3 = vadd.f32 %v9871_v11, %v4936_v31  ;;  %v5137_v2 = vpop.permute.xlu0 %5136  ;;  %5301 = vst.msk [vmem:[#allocation3 + $0x10] sm:$0xff] %vm1415_vm6, %v5279_v17 }
 0x792   : > { %5158 = vst.msk [vmem:[#allocation3 + $0x20] sm:$0xff] %vm835_vm3, %v5137_v2 }
 0x793   : > { %4971 = vst.msk [vmem:[#allocation4 + $0x51] sm:$0xff] %vm256_vm0, %v4963_v30  ;;  %v4956_v51 = vadd.f32 %v4948_v3, %v9510_v41 }
 0x794   : > { %v5327_v16 = vpop.permute.xlu1 %5326 }
 0x795   : > { %v4964_v23 = vmax.f32 %v4956_v51, 0.0  ;;  %v5185_v33 = vpop.permute.xlu0 %5184  ;;  %5349 = vst.msk [vmem:[#allocation3 + $0x10] sm:$0xff] %vm1608_vm7, %v5327_v16 }
 0x796   : > { %5206 = vst.msk [vmem:[#allocation3 + $0x20] sm:$0xff] %vm1029_vm4, %v5185_v33 }
 0x797   : > { %4972 = vst.msk [vmem:[#allocation4 + $0x61] sm:$0xff] %vm256_vm0, %v4964_v23 }
 0x798   : > { %v5043_v42 = vpop.permute.xlu1 %5042 }
 0x799   : > { %v5233_v15 = vpop.permute.xlu0 %5232  ;;  %5063 = vst.msk [vmem:[#allocation3 + $0x30] sm:$0xff] %vm449_vm1, %v5043_v42 }
 0x79a   : > { %5254 = vst.msk [vmem:[#allocation3 + $0x20] sm:$0xff] %vm1222_vm5, %v5233_v15  ;;  %v5263_v22 = vld [vmem:[#allocation4 + $0x50] sm:$0xff] }
 0x79b   : > { %v5216_v48 = vld [vmem:[#allocation4 + $0x52] sm:$0xff]  ;;  %5282 = vrot.lane.b32.xlu1 %v5263_v22, %s7233_s11  ;;  %5140 = vrot.lane.b32.xlu0 %v5263_v22, %s7230_s28  ;;  %5017 = vst.msk [vmem:[#allocation3 + $0x50] sm:$0xff] %vm256_vm0, %v5263_v22 }
 0x79c   : > { %5367 = vst.msk [vmem:[#allocation3 + $0x38] sm:$0xff] %vm256_vm0, %v5216_v48  ;;  %v5091_v41 = vpop.permute.xlu1 %5090  ;;  %v5374_v62 = vld [vmem:[#allocation3 + $0x10] sm:$0xff] }
 0x79d   : > { %v5281_v24 = vpop.permute.xlu0 %5280  ;;  %5111 = vst.msk [vmem:[#allocation3 + $0x30] sm:$0xff] %vm642_vm2, %v5091_v41  ;;  %v10046_v40 = vld [vmem:[#allocation4 + $0x51] sm:$0xff]  ;;  %v5388_v20 = vpack.c.bf16 %v5374_v62, %v9964_v6 }
 0x79e   : > { %5302 = vst.msk [vmem:[#allocation3 + $0x20] sm:$0xff] %vm1415_vm6, %v5281_v24  ;;  %v5264_v4 = vld [vmem:[#allocation4 + $0x60] sm:$0xff] }
 0x79f   : > { %v5217_v32 = vld [vmem:[#allocation4 + $0x62] sm:$0xff]  ;;  %5330 = vrot.lane.b32.xlu1 %v10046_v40, %s7234_s21  ;;  %5188 = vrot.lane.b32.xlu0 %v10046_v40, %s7231_s12  ;;  %5018 = vst.msk [vmem:[#allocation3 + $0x60] sm:$0xff] %vm256_vm0, %v5264_v4 }
 0x7a0   : > { %5368 = vst.msk [vmem:[#allocation3 + $0x48] sm:$0xff] %vm256_vm0, %v5217_v32  ;;  %5495 = vmatmul.mubr.bf16.vlgmr.msra.gmra.mxu1 %v5388_v20  ;;  %v5139_v55 = vpop.permute.xlu1 %5138  ;;  %v10069_v18 = vld [vmem:[#allocation4 + $0x61] sm:$0xff] }
 0x7a1   : > { %v5329_v12 = vpop.permute.xlu0 %5328  ;;  %5159 = vst.msk [vmem:[#allocation3 + $0x30] sm:$0xff] %vm835_vm3, %v5139_v55 }
 0x7a2   : > { %5350 = vst.msk [vmem:[#allocation3 + $0x20] sm:$0xff] %vm1608_vm7, %v5329_v12 }
 0x7a3   : > { %v5379_v6 = vld [vmem:[#allocation3 + $0x38] sm:$0xff]  ;;  %5236 = vrot.lane.b32.xlu0 %v5216_v48, %s7232_s26  ;;  %5046 = vrot.lane.b32.xlu1 %v10046_v40, %s7228_s24 }
 0x7a4   : > { %v5391_v49 = vpack.c.bf16 %v5379_v6, %v5377_v5  ;;  %v5187_v52 = vpop.permute.xlu1 %5186 }
 0x7a5   : > { %v5045_v13 = vpop.permute.xlu0 %5044  ;;  %5207 = vst.msk [vmem:[#allocation3 + $0x30] sm:$0xff] %vm1029_vm4, %v5187_v52  ;;  %v4920_v7 = vpop.f32.mrf.mxu1 }
 0x7a6   : > { %6974 = vmatprep.mubr.msk.bf16.mxu1 %vm256_vm0, %v5391_v49  ;;  %5064 = vst.msk [vmem:[#allocation3 + $0x40] sm:$0xff] %vm449_vm1, %v5045_v13  ;;  %v4937_v26 = vmul.f32 %v9864_v34, %v4920_v7 }
 0x7a7   : > { %5094 = vrot.lane.b32.xlu1 %v5216_v48, %s7229_s25  ;;  %5284 = vrot.lane.b32.xlu0 %v5264_v4, %s7233_s11  ;;  %v4922_v46 = vpop.f32.mrf.mxu1  ;;  %v5381_v16 = vld [vmem:[#allocation3 + $0x48] sm:$0xff] }
 0x7a8   : > { %v4949_v27 = vadd.f32 %v9871_v11, %v4937_v26  ;;  %v5235_v59 = vpop.permute.xlu1 %5234 }
 0x7a9   : > { %v5093_v60 = vpop.permute.xlu0 %5092  ;;  %5255 = vst.msk [vmem:[#allocation3 + $0x30] sm:$0xff] %vm1222_vm5, %v5235_v59  ;;  %v4923_v35 = vpop.f32.mrf.mxu1  ;;  %v5376_v2 = vld [vmem:[#allocation3 + $0x20] sm:$0xff] }
 0x7aa   : > { %5112 = vst.msk [vmem:[#allocation3 + $0x40] sm:$0xff] %vm642_vm2, %v5093_v60  ;;  %v4957_v58 = vadd.f32 %v4949_v27, %v9596_v43  ;;  %v4938_v61 = vmul.f32 %v9864_v34, %v4923_v35 }
 0x7ab   : > { %5332 = vrot.lane.b32.xlu0 %v10069_v18, %s7234_s21  ;;  %5142 = vrot.lane.b32.xlu1 %v5264_v4, %s7230_s28  ;;  %v4925_v50 = vpop.f32.mrf.mxu1 }
 0x7ac   : > { %v4965_v9 = vmax.f32 %v4957_v58, 0.0  ;;  %v4950_v45 = vadd.f32 %v9871_v11, %v4938_v61  ;;  %v5947_v11 = vld [vmem:[#allocation4 + $0x92] sm:$0xff] }
 0x7ae   : > { %4973 = vst.msk [vmem:[#allocation4 + $0x71] sm:$0xff] %vm256_vm0, %v4965_v9  ;;  %v4958_v29 = vadd.f32 %v4950_v45, %v9650_v19  ;;  %v10090_v19 = vld [vmem:[#allocation3 + $0x78] sm:$0xff] }
 0x7af   : > { %5190 = vrot.lane.b32.xlu1 %v10069_v18, %s7231_s12  ;;  %5048 = vrot.lane.b32.xlu0 %v10069_v18, %s7228_s24  ;;  %5955 = vst.msk [vmem:[#allocation3 + $0x78] sm:$0xff] %vm256_vm0, %v5947_v11 }
 0x7b0   : > { %v4966_v43 = vmax.f32 %v4958_v29, 0.0  ;;  %v10156_v29 = vld [vmem:[%s10565_s3 + $0x3] ss:$0 sm:$0xff] }
 0x7b2   : > { %4974 = vst.msk [vmem:[#allocation4 + $0x81] sm:$0xff] %vm256_vm0, %v4966_v43 }
 0x7b3   : > { %5238 = vrot.lane.b32.xlu1 %v5217_v32, %s7232_s26  ;;  %5096 = vrot.lane.b32.xlu0 %v5217_v32, %s7229_s25 }
 0x7b5   : > { %v5265_v34 = vld [vmem:[#allocation4 + $0x70] sm:$0xff] }
 0x7b6   : > { %v5218_v56 = vld [vmem:[#allocation4 + $0x72] sm:$0xff]  ;;  %5019 = vst.msk [vmem:[#allocation3 + $0x70] sm:$0xff] %vm256_vm0, %v5265_v34 }
 0x7b7   : > { %5286 = vrot.lane.b32.xlu1 %v5265_v34, %s7233_s11  ;;  %5144 = vrot.lane.b32.xlu0 %v5265_v34, %s7230_s28  ;;  %5369 = vst.msk [vmem:[#allocation3 + $0x58] sm:$0xff] %vm256_vm0, %v5218_v56  ;;  %v10092_v44 = vld [vmem:[#allocation4 + $0x71] sm:$0xff]  ;;  %v10161_v34 = vld [vmem:[%s10566_s4 + $0x3] ss:$0 sm:$0xff] }
 0x7b9   : > { %v5219_v28 = vld [vmem:[#allocation4 + $0x82] sm:$0xff] }
 0x7ba   : > { %5370 = vst.msk [vmem:[#allocation3 + $0x68] sm:$0xff] %vm256_vm0, %v5219_v28  ;;  %v5266_v0 = vld [vmem:[#allocation4 + $0x80] sm:$0xff] }
 0x7bb   : > { %5334 = vrot.lane.b32.xlu1 %v10092_v44, %s7234_s21  ;;  %5192 = vrot.lane.b32.xlu0 %v10092_v44, %s7231_s12  ;;  %v10105_v63 = vld [vmem:[#allocation4 + $0x81] sm:$0xff] }
 0x7be   : > { %v5383_v30 = vld [vmem:[#allocation3 + $0x58] sm:$0xff] }
 0x7bf   : > { %5240 = vrot.lane.b32.xlu0 %v5218_v56, %s7232_s26  ;;  %5050 = vrot.lane.b32.xlu1 %v10092_v44, %s7228_s24  ;;  %v5393_v33 = vpack.c.bf16 %v5383_v30, %v5381_v16 }
 0x7c1   : > { %v5385_v5 = vld [vmem:[#allocation3 + $0x68] sm:$0xff] }
 0x7c2   : > { %v5395_v26 = vpack.c.bf16 %v10090_v19, %v5385_v5 }
 0x7c3   : > { %5098 = vrot.lane.b32.xlu1 %v5218_v56, %s7229_s25  ;;  %5288 = vrot.lane.b32.xlu0 %v5266_v0, %s7233_s11 }
 0x7c7   : > { %5336 = vrot.lane.b32.xlu0 %v10105_v63, %s7234_s21  ;;  %5146 = vrot.lane.b32.xlu1 %v5266_v0, %s7230_s28 }
 0x7cb   : > { %5194 = vrot.lane.b32.xlu1 %v10105_v63, %s7231_s12  ;;  %5620 = vrot.lane.b32.xlu0 %v5604_v47, %s7228_s24 }
 0x7cf   : > { %5242 = vrot.lane.b32.xlu1 %v5219_v28, %s7232_s26  ;;  %5668 = vrot.lane.b32.xlu0 %v5652_v39, %s7229_s25 }
 0x7d3   : > { %5290 = vrot.lane.b32.xlu1 %v5267_v54, %s7233_s11 }
 0x7d7   : > { %5338 = vrot.lane.b32.xlu1 %v10114_v53, %s7234_s21 }
 0x7db   : > { %5874 = vrot.lane.b32.xlu1 %v5267_v54, %s7233_s11 }
 0x80d   : > { %v5283_v36 = vpop.permute.xlu1 %5282  ;;  %v5141_v1 = vpop.permute.xlu0 %5140 }
 0x80e   : > { %5303 = vst.msk [vmem:[#allocation3 + $0x30] sm:$0xff] %vm1415_vm6, %v5283_v36 }
 0x80f   : > { %5160 = vst.msk [vmem:[#allocation3 + $0x40] sm:$0xff] %vm835_vm3, %v5141_v1 }
 0x811   : > { %v5331_v25 = vpop.permute.xlu1 %5330  ;;  %v5189_v57 = vpop.permute.xlu0 %5188 }
 0x812   : > { %5351 = vst.msk [vmem:[#allocation3 + $0x30] sm:$0xff] %vm1608_vm7, %v5331_v25 }
 0x813   : > { %5208 = vst.msk [vmem:[#allocation3 + $0x40] sm:$0xff] %vm1029_vm4, %v5189_v57 }
 0x815   : > { %v5237_v31 = vpop.permute.xlu0 %5236  ;;  %v5047_v37 = vpop.permute.xlu1 %5046 }
 0x816   : > { %5256 = vst.msk [vmem:[#allocation3 + $0x40] sm:$0xff] %vm1222_vm5, %v5237_v31 }
 0x817   : > { %5065 = vst.msk [vmem:[#allocation3 + $0x50] sm:$0xff] %vm449_vm1, %v5047_v37 }
 0x819   : > { %v5095_v3 = vpop.permute.xlu1 %5094  ;;  %v5285_v17 = vpop.permute.xlu0 %5284  ;;  %v5378_v51 = vld [vmem:[#allocation3 + $0x30] sm:$0xff] }
 0x81a   : > { %5113 = vst.msk [vmem:[#allocation3 + $0x50] sm:$0xff] %vm642_vm2, %v5095_v3  ;;  %v5390_v23 = vpack.c.bf16 %v5378_v51, %v5376_v2  ;;  %v7206_v2 = vld [vmem:[%s10564_s2 + $0x108] sm:$0xff]   ;;  %v7207_v51 = vld [vmem:[%s10564_s2 + $0x100] sm:$0xff]  }
 0x81b   : > { %5304 = vst.msk [vmem:[#allocation3 + $0x40] sm:$0xff] %vm1415_vm6, %v5285_v17  ;;  %v7205_v17 = vld [vmem:[%s10564_s2 + $0x110] sm:$0xff]  }
 0x81c   : > { %5503 = vmatmul.mubr.bf16.gmra.mxu1 %v5390_v23  ;;  %6047 = vmatpush1.bf16.msra.mxu0 %v7205_v17  ;;  %v7208_v23 = vld [vmem:[%s10564_s2 + $0xf8] sm:$0xff]  }
 0x81d   : > { %v5333_v15 = vpop.permute.xlu0 %5332  ;;  %v5143_v42 = vpop.permute.xlu1 %5142  ;;  %6975 = vmatprep.mubr.msk.bf16.mxu1 %vm256_vm0, %v5393_v33  ;;  %7135 = vmatpush1.bf16.msra.mxu1 %v7205_v17 }
 0x81e   : > { %5352 = vst.msk [vmem:[#allocation3 + $0x40] sm:$0xff] %vm1608_vm7, %v5333_v15  ;;  %6048 = vmatprep.subr.bf16.mxu0 %v7236_v10  ;;  %7127 = vmatprep.subr.bf16.mxu1 %v7236_v10 }
 0x81f   : > { %5161 = vst.msk [vmem:[#allocation3 + $0x50] sm:$0xff] %vm835_vm3, %v5143_v42 }
 0x820   : > { %6049 = vmatpush1.bf16.msra.mxu0 %v7206_v2 }
 0x821   : > { %v5191_v22 = vpop.permute.xlu1 %5190  ;;  %v5049_v48 = vpop.permute.xlu0 %5048  ;;  %7136 = vmatpush1.bf16.msra.mxu1 %v7206_v2  ;;  %6050 = vmatprep.subr.bf16.mxu0 %v7236_v10 }
 0x822   : > { %5209 = vst.msk [vmem:[#allocation3 + $0x50] sm:$0xff] %vm1029_vm4, %v5191_v22  ;;  %7128 = vmatprep.subr.bf16.mxu1 %v7236_v10  ;;  %v7209_v22 = vld [vmem:[%s10564_s2 + $0xf0] sm:$0xff]  }
 0x823   : > { %5066 = vst.msk [vmem:[#allocation3 + $0x60] sm:$0xff] %vm449_vm1, %v5049_v48 }
 0x824   : > { %6051 = vmatpush1.bf16.msra.mxu0 %v7207_v51 }
 0x825   : > { %v5239_v41 = vpop.permute.xlu1 %5238  ;;  %v5097_v24 = vpop.permute.xlu0 %5096  ;;  %v5380_v52 = vld [vmem:[#allocation3 + $0x40] sm:$0xff]  ;;  %7137 = vmatpush1.bf16.msra.mxu1 %v7207_v51  ;;  %6052 = vmatprep.subr.bf16.mxu0 %v7236_v10 }
 0x826   : > { %5257 = vst.msk [vmem:[#allocation3 + $0x50] sm:$0xff] %vm1222_vm5, %v5239_v41  ;;  %7129 = vmatprep.subr.bf16.mxu1 %v7236_v10 }
 0x827   : > { %5114 = vst.msk [vmem:[#allocation3 + $0x60] sm:$0xff] %vm642_vm2, %v5097_v24 }
 0x828   : > { %6053 = vmatpush1.bf16.msra.mxu0 %v7208_v23 }
 0x829   : > { %v5287_v62 = vpop.permute.xlu1 %5286  ;;  %v5145_v20 = vpop.permute.xlu0 %5144  ;;  %7138 = vmatpush1.bf16.msra.mxu1 %v7208_v23  ;;  %6054 = vmatprep.subr.bf16.mxu0 %v7236_v10 }
 0x82a   : > { %5305 = vst.msk [vmem:[#allocation3 + $0x50] sm:$0xff] %vm1415_vm6, %v5287_v62  ;;  %7130 = vmatprep.subr.bf16.mxu1 %v7236_v10 }
 0x82b   : > { %5162 = vst.msk [vmem:[#allocation3 + $0x60] sm:$0xff] %vm835_vm3, %v5145_v20 }
 0x82c   : > { %6055 = vmatpush1.bf16.msra.mxu0 %v7209_v22 }
 0x82d   : > { %v5335_v4 = vpop.permute.xlu1 %5334  ;;  %v5193_v32 = vpop.permute.xlu0 %5192  ;;  %7139 = vmatpush1.bf16.msra.mxu1 %v7209_v22  ;;  %6056 = vmatprep.subr.bf16.mxu0 %v7236_v10 }
 0x82e   : > { %5353 = vst.msk [vmem:[#allocation3 + $0x50] sm:$0xff] %vm1608_vm7, %v5335_v4  ;;  %7131 = vmatprep.subr.bf16.mxu1 %v7236_v10 }
 0x82f   : > { %5210 = vst.msk [vmem:[#allocation3 + $0x60] sm:$0xff] %vm1029_vm4, %v5193_v32 }
 0x831   : > { %v5241_v12 = vpop.permute.xlu0 %5240  ;;  %v5051_v55 = vpop.permute.xlu1 %5050 }
 0x832   : > { %5258 = vst.msk [vmem:[#allocation3 + $0x60] sm:$0xff] %vm1222_vm5, %v5241_v12  ;;  %v7210_v12 = vld [vmem:[%s10564_s2 + $0xe8] sm:$0xff]  }
 0x833   : > { %5067 = vst.msk [vmem:[#allocation3 + $0x70] sm:$0xff] %vm449_vm1, %v5051_v55  ;;  %6057 = vmatpush1.bf16.msra.mxu0 %v7210_v12  ;;  %7140 = vmatpush1.bf16.msra.mxu1 %v7210_v12 }
 0x834   : > { %6058 = vmatprep.subr.bf16.mxu0 %v7236_v10  ;;  %7132 = vmatprep.subr.bf16.mxu1 %v7236_v10 }
 0x835   : > { %v5099_v6 = vpop.permute.xlu1 %5098  ;;  %v5289_v49 = vpop.permute.xlu0 %5288  ;;  %v5382_v13 = vld [vmem:[#allocation3 + $0x50] sm:$0xff] }
 0x836   : > { %5115 = vst.msk [vmem:[#allocation3 + $0x70] sm:$0xff] %vm642_vm2, %v5099_v6  ;;  %v5392_v7 = vpack.c.bf16 %v5382_v13, %v5380_v52  ;;  %v7211_v52 = vld [vmem:[%s10564_s2 + $0xe0] sm:$0xff]  }
 0x837   : > { %5306 = vst.msk [vmem:[#allocation3 + $0x60] sm:$0xff] %vm1415_vm6, %v5289_v49  ;;  %6059 = vmatpush1.bf16.msra.mxu0 %v7211_v52  ;;  %7141 = vmatpush1.bf16.msra.mxu1 %v7211_v52 }
 0x838   : > { %5511 = vmatmul.mubr.bf16.gmra.mxu1 %v5392_v7  ;;  %6060 = vmatprep.subr.bf16.mxu0 %v7236_v10 }
 0x839   : > { %6976 = vmatprep.mubr.msk.bf16.mxu1 %vm256_vm0, %v5395_v26  ;;  %v5337_v46 = vpop.permute.xlu0 %5336  ;;  %v5147_v27 = vpop.permute.xlu1 %5146  ;;  %7133 = vmatprep.subr.bf16.mxu1 %v7236_v10 }
 0x83a   : > { %5354 = vst.msk [vmem:[#allocation3 + $0x60] sm:$0xff] %vm1608_vm7, %v5337_v46 }
 0x83b   : > { %5163 = vst.msk [vmem:[#allocation3 + $0x70] sm:$0xff] %vm835_vm3, %v5147_v27 }
 0x83d   : > { %v5195_v59 = vpop.permute.xlu1 %5194  ;;  %v5621_v45 = vpop.permute.xlu0 %5620 }
 0x83e   : > { %5211 = vst.msk [vmem:[#allocation3 + $0x70] sm:$0xff] %vm1029_vm4, %v5195_v59  ;;  %v7212_v59 = vld [vmem:[%s10564_s2 + $0xd8] sm:$0xff]  }
 0x83f   : > { %5644 = vst.msk [vmem:[#allocation3] sm:$0xff] %vm449_vm1, %v5621_v45  ;;  %6061 = vmatpush1.bf16.msra.mxu0 %v7212_v59  ;;  %7142 = vmatpush1.bf16.msra.mxu1 %v7212_v59 }
 0x840   : > { %6076 = vmatprep.subr.bf16.mxu0 %v7236_v10  ;;  %7134 = vmatprep.subr.bf16.mxu1 %v7236_v10 }
 0x841   : > { %v5243_v60 = vpop.permute.xlu1 %5242  ;;  %v5384_v61 = vld [vmem:[#allocation3 + $0x60] sm:$0xff]  ;;  %v5669_v43 = vpop.permute.xlu0 %5668 }
 0x842   : > { %5259 = vst.msk [vmem:[#allocation3 + $0x70] sm:$0xff] %vm1222_vm5, %v5243_v60 }
 0x843   : > { %5692 = vst.msk [vmem:[#allocation3] sm:$0xff] %vm642_vm2, %v5669_v43 }
 0x845   : > { %v5291_v35 = vpop.permute.xlu1 %5290 }
 0x846   : > { %5307 = vst.msk [vmem:[#allocation3 + $0x70] sm:$0xff] %vm1415_vm6, %v5291_v35 }
 0x849   : > { %v5339_v58 = vpop.permute.xlu1 %5338 }
 0x84a   : > { %5355 = vst.msk [vmem:[#allocation3 + $0x70] sm:$0xff] %vm1608_vm7, %v5339_v58 }
 0x84d   : > { %v10205_v16 = vpop.permute.xlu1 %5874 }
 0x851   : > { %v5386_v50 = vld [vmem:[#allocation3 + $0x70] sm:$0xff] }
 0x852   : > { %v5394_v9 = vpack.c.bf16 %v5386_v50, %v5384_v61  ;;  %v7213_v50 = vld [vmem:[%s10564_s2 + $0x118] sm:$0xff]  }
 0x853   : > { %6077 = vmatpush2.bf16.msra.mxu0 %v7213_v50  ;;  %7143 = vmatpush2.bf16.msra.mxu1 %v7213_v50 }
 0x854   : > { %5519 = vmatmul.mubr.bf16.gmra.mxu1 %v5394_v9 }
 0x860   : > { %v5496_v56 = vpop.f32.mrf.mxu1 }
 0x861   : > { %v5531_v19 = vmul.f32 %v10156_v29, %v5496_v56 }
 0x862   : > { %v5498_v11 = vpop.f32.mrf.mxu1 }
 0x863   : > { %v5543_v28 = vadd.f32 %v10161_v34, %v5531_v19 }
 0x864   : > { %v5499_v0 = vpop.f32.mrf.mxu1 }
 0x865   : > { %v5551_v54 = vmax.f32 %v5543_v28, 0.0  ;;  %v5532_v47 = vmul.f32 %v10156_v29, %v5499_v0 }
 0x866   : > { %v5501_v39 = vpop.f32.mrf.mxu1 }
 0x867   : > { %v5544_v36 = vadd.f32 %v10161_v34, %v5532_v47  ;;  %5559 = vst.msk [vmem:[#allocation4 + $0x11] sm:$0xff] %vm256_vm0, %v5551_v54 }
 0x869   : > { %v5552_v1 = vmax.f32 %v5544_v36, 0.0 }
 0x86b   : > { %5560 = vst.msk [vmem:[#allocation4 + $0x21] sm:$0xff] %vm256_vm0, %v5552_v1 }
 0x86e   : > { %v5700_v25 = vld [vmem:[#allocation4 + $0x10] sm:$0xff] }
 0x86f   : > { %v5605_v57 = vld [vmem:[#allocation4 + $0x11] sm:$0xff]  ;;  %5716 = vrot.lane.b32.xlu0 %v5700_v25, %s7230_s28  ;;  %5597 = vst.msk [vmem:[#allocation3 + $0x10] sm:$0xff] %vm256_vm0, %v5700_v25 }
 0x870   : > { %5622 = vrot.lane.b32.xlu1 %v5605_v57, %s7228_s24  ;;  %v5653_v31 = vld [vmem:[#allocation4 + $0x12] sm:$0xff] }
 0x872   : > { %v5701_v37 = vld [vmem:[#allocation4 + $0x20] sm:$0xff] }
 0x873   : > { %v5797_v30 = vld [vmem:[#allocation4 + $0x22] sm:$0xff]  ;;  %5764 = vrot.lane.b32.xlu0 %v5605_v57, %s7231_s12  ;;  %5598 = vst.msk [vmem:[#allocation3 + $0x20] sm:$0xff] %vm256_vm0, %v5701_v37 }
 0x874   : > { %5670 = vrot.lane.b32.xlu1 %v5653_v31, %s7229_s25  ;;  %5948 = vst.msk [vmem:[#allocation3 + $0x8] sm:$0xff] %vm256_vm0, %v5797_v30  ;;  %v5749_v3 = vld [vmem:[#allocation4 + $0x21] sm:$0xff] }
 0x877   : > { %5812 = vrot.lane.b32.xlu0 %v5653_v31, %s7232_s26 }
 0x878   : > { %5718 = vrot.lane.b32.xlu1 %v5701_v37, %s7230_s28 }
 0x87b   : > { %5624 = vrot.lane.b32.xlu0 %v5749_v3, %s7228_s24  ;;  %v5957_v10 = vld [vmem:[#allocation3 + $0x8] sm:$0xff] }
 0x87c   : > { %5766 = vrot.lane.b32.xlu1 %v5749_v3, %s7231_s12 }
 0x87f   : > { %5672 = vrot.lane.b32.xlu0 %v5797_v30, %s7229_s25 }
 0x880   : > { %5814 = vrot.lane.b32.xlu1 %v5797_v30, %s7232_s26 }
 0x883   : > { %5860 = vrot.lane.b32.xlu0 %v5701_v37, %s7233_s11 }
 0x887   : > { %5908 = vrot.lane.b32.xlu0 %v5749_v3, %s7234_s21 }
 0x8dc   : > { %v5504_v33 = vpop.f32.mrf.mxu1 }
 0x8dd   : > { %v5533_v15 = vmul.f32 %v10156_v29, %v5504_v33 }
 0x8de   : > { %v5506_v42 = vpop.f32.mrf.mxu1 }
 0x8df   : > { %v5545_v48 = vadd.f32 %v10161_v34, %v5533_v15 }
 0x8e0   : > { %v5507_v41 = vpop.f32.mrf.mxu1 }
 0x8e1   : > { %v5553_v24 = vmax.f32 %v5545_v48, 0.0  ;;  %v5534_v62 = vmul.f32 %v10156_v29, %v5507_v41  ;;  %v5717_v20 = vpop.permute.xlu0 %5716 }
 0x8e2   : > { %v5623_v4 = vpop.permute.xlu1 %5622  ;;  %5740 = vst.msk [vmem:[#allocation3] sm:$0xff] %vm835_vm3, %v5717_v20  ;;  %v5509_v32 = vpop.f32.mrf.mxu1 }
 0x8e3   : > { %5645 = vst.msk [vmem:[#allocation3 + $0x10] sm:$0xff] %vm449_vm1, %v5623_v4  ;;  %v5546_v55 = vadd.f32 %v10161_v34, %v5534_v62 }
 0x8e4   : > { %5561 = vst.msk [vmem:[#allocation4 + $0x31] sm:$0xff] %vm256_vm0, %v5553_v24 }
 0x8e5   : > { %v5554_v5 = vmax.f32 %v5546_v55, 0.0  ;;  %v5765_v6 = vpop.permute.xlu0 %5764 }
 0x8e6   : > { %v5671_v49 = vpop.permute.xlu1 %5670  ;;  %5788 = vst.msk [vmem:[#allocation3] sm:$0xff] %vm1029_vm4, %v5765_v6 }
 0x8e7   : > { %5693 = vst.msk [vmem:[#allocation3 + $0x10] sm:$0xff] %vm642_vm2, %v5671_v49 }
 0x8e8   : > { %5562 = vst.msk [vmem:[#allocation4 + $0x41] sm:$0xff] %vm256_vm0, %v5554_v5 }
 0x8e9   : > { %v5813_v13 = vpop.permute.xlu0 %5812 }
 0x8ea   : > { %v5719_v7 = vpop.permute.xlu1 %5718  ;;  %5836 = vst.msk [vmem:[#allocation3] sm:$0xff] %vm1222_vm5, %v5813_v13 }
 0x8eb   : > { %5741 = vst.msk [vmem:[#allocation3 + $0x10] sm:$0xff] %vm835_vm3, %v5719_v7  ;;  %v5702_v26 = vld [vmem:[#allocation4 + $0x30] sm:$0xff] }
 0x8ec   : > { %v5607_v46 = vld [vmem:[#allocation4 + $0x31] sm:$0xff]  ;;  %5720 = vrot.lane.b32.xlu0 %v5702_v26, %s7230_s28  ;;  %5599 = vst.msk [vmem:[#allocation3 + $0x30] sm:$0xff] %vm256_vm0, %v5702_v26 }
 0x8ed   : > { %v5655_v27 = vld [vmem:[#allocation4 + $0x32] sm:$0xff]  ;;  %5626 = vrot.lane.b32.xlu1 %v5607_v46, %s7228_s24  ;;  %v5625_v35 = vpop.permute.xlu0 %5624 }
 0x8ee   : > { %5949 = vst.msk [vmem:[#allocation3 + $0x18] sm:$0xff] %vm256_vm0, %v5655_v27  ;;  %v5767_v60 = vpop.permute.xlu1 %5766 }
 0x8ef   : > { %5789 = vst.msk [vmem:[#allocation3 + $0x10] sm:$0xff] %vm1029_vm4, %v5767_v60  ;;  %v5846_v58 = vld [vmem:[#allocation4 + $0x40] sm:$0xff] }
 0x8f0   : > { %5646 = vst.msk [vmem:[#allocation3 + $0x20] sm:$0xff] %vm449_vm1, %v5625_v35  ;;  %v5799_v61 = vld [vmem:[#allocation4 + $0x42] sm:$0xff]  ;;  %5768 = vrot.lane.b32.xlu0 %v5607_v46, %s7231_s12 }
 0x8f1   : > { %5674 = vrot.lane.b32.xlu1 %v5655_v27, %s7229_s25  ;;  %5950 = vst.msk [vmem:[#allocation3 + $0x28] sm:$0xff] %vm256_vm0, %v5799_v61  ;;  %5600 = vst.msk [vmem:[#allocation3 + $0x40] sm:$0xff] %vm256_vm0, %v5846_v58  ;;  %v5673_v45 = vpop.permute.xlu0 %5672  ;;  %v5894_v47 = vld [vmem:[#allocation4 + $0x41] sm:$0xff] }
 0x8f2   : > { %v5815_v9 = vpop.permute.xlu1 %5814  ;;  %5694 = vst.msk [vmem:[#allocation3 + $0x20] sm:$0xff] %vm642_vm2, %v5673_v45 }
 0x8f3   : > { %5837 = vst.msk [vmem:[#allocation3 + $0x10] sm:$0xff] %vm1222_vm5, %v5815_v9 }
 0x8f4   : > { %5816 = vrot.lane.b32.xlu0 %v5655_v27, %s7232_s26 }
 0x8f5   : > { %v5959_v43 = vld [vmem:[#allocation3 + $0x18] sm:$0xff]  ;;  %5862 = vrot.lane.b32.xlu1 %v5702_v26, %s7233_s11  ;;  %v5861_v19 = vpop.permute.xlu0 %5860 }
 0x8f6   : > { %v5973_v56 = vpack.c.bf16 %v5959_v43, %v5957_v10  ;;  %5884 = vst.msk [vmem:[#allocation3] sm:$0xff] %vm1415_vm6, %v5861_v19 }
 0x8f8   : > { %7006 = vmatprep.mubr.msk.bf16.mxu0 %vm256_vm0, %v5973_v56  ;;  %5864 = vrot.lane.b32.xlu0 %v5846_v58, %s7233_s11  ;;  %v5512_v11 = vpop.f32.mrf.mxu1  ;;  %v5961_v23 = vld [vmem:[#allocation3 + $0x28] sm:$0xff] }
 0x8f9   : > { %5910 = vrot.lane.b32.xlu1 %v5607_v46, %s7234_s21  ;;  %v5535_v28 = vmul.f32 %v10156_v29, %v5512_v11  ;;  %v5909_v0 = vpop.permute.xlu0 %5908 }
 0x8fa   : > { %5932 = vst.msk [vmem:[#allocation3] sm:$0xff] %vm1608_vm7, %v5909_v0  ;;  %v5514_v54 = vpop.f32.mrf.mxu1 }
 0x8fb   : > { %v5547_v39 = vadd.f32 %v10161_v34, %v5535_v28 }
 0x8fc   : > { %5912 = vrot.lane.b32.xlu0 %v5894_v47, %s7234_s21  ;;  %v5515_v36 = vpop.f32.mrf.mxu1 }
 0x8fd   : > { %5722 = vrot.lane.b32.xlu1 %v5846_v58, %s7230_s28  ;;  %v5555_v1 = vmax.f32 %v5547_v39, 0.0  ;;  %v5536_v25 = vmul.f32 %v10156_v29, %v5515_v36 }
 0x8fe   : > { %v5517_v57 = vpop.f32.mrf.mxu1 }
 0x8ff   : > { %v5548_v31 = vadd.f32 %v10161_v34, %v5536_v25  ;;  %5563 = vst.msk [vmem:[#allocation4 + $0x51] sm:$0xff] %vm256_vm0, %v5555_v1 }
 0x900   : > { %5628 = vrot.lane.b32.xlu0 %v5894_v47, %s7228_s24 }
 0x901   : > { %5770 = vrot.lane.b32.xlu1 %v5894_v47, %s7231_s12  ;;  %v5556_v37 = vmax.f32 %v5548_v31, 0.0  ;;  %v5956_v9 = vld [vmem:[#allocation3] sm:$0xff] }
 0x903   : > { %5564 = vst.msk [vmem:[#allocation4 + $0x61] sm:$0xff] %vm256_vm0, %v5556_v37 }
 0x904   : > { %5676 = vrot.lane.b32.xlu0 %v5799_v61, %s7229_s25 }
 0x905   : > { %5818 = vrot.lane.b32.xlu1 %v5799_v61, %s7232_s26 }
 0x906   : > { %v5847_v30 = vld [vmem:[#allocation4 + $0x50] sm:$0xff] }
 0x907   : > { %v5800_v3 = vld [vmem:[#allocation4 + $0x52] sm:$0xff]  ;;  %5601 = vst.msk [vmem:[#allocation3 + $0x50] sm:$0xff] %vm256_vm0, %v5847_v30 }
 0x908   : > { %5724 = vrot.lane.b32.xlu0 %v5847_v30, %s7230_s28  ;;  %5951 = vst.msk [vmem:[#allocation3 + $0x38] sm:$0xff] %vm256_vm0, %v5800_v3  ;;  %v5895_v17 = vld [vmem:[#allocation4 + $0x51] sm:$0xff] }
 0x909   : > { %5866 = vrot.lane.b32.xlu1 %v5847_v30, %s7233_s11 }
 0x90a   : > { %v5848_v2 = vld [vmem:[#allocation4 + $0x60] sm:$0xff] }
 0x90b   : > { %v5801_v51 = vld [vmem:[#allocation4 + $0x62] sm:$0xff]  ;;  %5602 = vst.msk [vmem:[#allocation3 + $0x60] sm:$0xff] %vm256_vm0, %v5848_v2 }
 0x90c   : > { %5772 = vrot.lane.b32.xlu0 %v5895_v17, %s7231_s12  ;;  %5952 = vst.msk [vmem:[#allocation3 + $0x48] sm:$0xff] %vm256_vm0, %v5801_v51  ;;  %v5896_v41 = vld [vmem:[#allocation4 + $0x61] sm:$0xff] }
 0x90d   : > { %5914 = vrot.lane.b32.xlu1 %v5895_v17, %s7234_s21 }
 0x90f   : > { %v5963_v33 = vld [vmem:[#allocation3 + $0x38] sm:$0xff] }
 0x910   : > { %5820 = vrot.lane.b32.xlu0 %v5800_v3, %s7232_s26  ;;  %v5975_v15 = vpack.c.bf16 %v5963_v33, %v5961_v23 }
 0x911   : > { %5630 = vrot.lane.b32.xlu1 %v5895_v17, %s7228_s24 }
 0x912   : > { %7007 = vmatprep.mubr.msk.bf16.mxu1 %vm256_vm0, %v5975_v15 }
 0x913   : > { %v5965_v37 = vld [vmem:[#allocation3 + $0x48] sm:$0xff] }
 0x914   : > { %5868 = vrot.lane.b32.xlu0 %v5848_v2, %s7233_s11  ;;  %v5520_v42 = vpop.f32.mrf.mxu1 }
 0x915   : > { %5678 = vrot.lane.b32.xlu1 %v5800_v3, %s7229_s25  ;;  %v5537_v22 = vmul.f32 %v10156_v29, %v5520_v42 }
 0x916   : > { %v5522_v48 = vpop.f32.mrf.mxu1 }
 0x917   : > { %v5549_v24 = vadd.f32 %v10161_v34, %v5537_v22 }
 0x918   : > { %5916 = vrot.lane.b32.xlu0 %v5896_v41, %s7234_s21  ;;  %v5523_v62 = vpop.f32.mrf.mxu1 }
 0x919   : > { %5726 = vrot.lane.b32.xlu1 %v5848_v2, %s7230_s28  ;;  %v5557_v20 = vmax.f32 %v5549_v24, 0.0  ;;  %v5538_v4 = vmul.f32 %v10156_v29, %v5523_v62 }
 0x91a   : > { %v5525_v32 = vpop.f32.mrf.mxu1 }
 0x91b   : > { %v5550_v12 = vadd.f32 %v10161_v34, %v5538_v4  ;;  %5565 = vst.msk [vmem:[#allocation4 + $0x71] sm:$0xff] %vm256_vm0, %v5557_v20  ;;  %v5971_v20 = vld [vmem:[#allocation3 + $0x78] sm:$0xff] }
 0x91c   : > { %5632 = vrot.lane.b32.xlu0 %v5896_v41, %s7228_s24 }
 0x91d   : > { %5774 = vrot.lane.b32.xlu1 %v5896_v41, %s7231_s12  ;;  %v5558_v55 = vmax.f32 %v5550_v12, 0.0 }
 0x91f   : > { %5566 = vst.msk [vmem:[#allocation4 + $0x81] sm:$0xff] %vm256_vm0, %v5558_v55 }
 0x920   : > { %5680 = vrot.lane.b32.xlu0 %v5801_v51, %s7229_s25 }
 0x921   : > { %5822 = vrot.lane.b32.xlu1 %v5801_v51, %s7232_s26 }
 0x922   : > { %v5849_v5 = vld [vmem:[#allocation4 + $0x70] sm:$0xff] }
 0x923   : > { %v5802_v6 = vld [vmem:[#allocation4 + $0x72] sm:$0xff]  ;;  %5603 = vst.msk [vmem:[#allocation3 + $0x70] sm:$0xff] %vm256_vm0, %v5849_v5 }
 0x924   : > { %5728 = vrot.lane.b32.xlu0 %v5849_v5, %s7230_s28  ;;  %5953 = vst.msk [vmem:[#allocation3 + $0x58] sm:$0xff] %vm256_vm0, %v5802_v6  ;;  %v5897_v29 = vld [vmem:[#allocation4 + $0x71] sm:$0xff] }
 0x925   : > { %5870 = vrot.lane.b32.xlu1 %v5849_v5, %s7233_s11 }
 0x926   : > { %v5803_v34 = vld [vmem:[#allocation4 + $0x82] sm:$0xff] }
 0x927   : > { %5954 = vst.msk [vmem:[#allocation3 + $0x68] sm:$0xff] %vm256_vm0, %v5803_v34  ;;  %v5850_v49 = vld [vmem:[#allocation4 + $0x80] sm:$0xff] }
 0x928   : > { %5776 = vrot.lane.b32.xlu0 %v5897_v29, %s7231_s12  ;;  %v5898_v52 = vld [vmem:[#allocation4 + $0x81] sm:$0xff] }
 0x929   : > { %5918 = vrot.lane.b32.xlu1 %v5897_v29, %s7234_s21 }
 0x92b   : > { %v5967_v39 = vld [vmem:[#allocation3 + $0x58] sm:$0xff] }
 0x92c   : > { %5824 = vrot.lane.b32.xlu0 %v5802_v6, %s7232_s26  ;;  %v5977_v30 = vpack.c.bf16 %v5967_v39, %v5965_v37 }
 0x92d   : > { %5634 = vrot.lane.b32.xlu1 %v5897_v29, %s7228_s24 }
 0x92e   : > { %v5969_v62 = vld [vmem:[#allocation3 + $0x68] sm:$0xff] }
 0x930   : > { %5872 = vrot.lane.b32.xlu0 %v5850_v49, %s7233_s11 }
 0x931   : > { %5682 = vrot.lane.b32.xlu1 %v5802_v6, %s7229_s25  ;;  %v5979_v6 = vpack.c.bf16 %v5971_v20, %v5969_v62 }
 0x934   : > { %5920 = vrot.lane.b32.xlu0 %v5898_v52, %s7234_s21 }
 0x935   : > { %5730 = vrot.lane.b32.xlu1 %v5850_v49, %s7230_s28 }
 0x939   : > { %5778 = vrot.lane.b32.xlu1 %v5898_v52, %s7231_s12 }
 0x93d   : > { %5826 = vrot.lane.b32.xlu1 %v5803_v34, %s7232_s26 }
 0x941   : > { %5922 = vrot.lane.b32.xlu1 %v10114_v53, %s7234_s21 }
 0x95e   : > { %v5721_v13 = vpop.permute.xlu0 %5720 }
 0x95f   : > { %v5627_v7 = vpop.permute.xlu1 %5626  ;;  %5742 = vst.msk [vmem:[#allocation3 + $0x20] sm:$0xff] %vm835_vm3, %v5721_v13 }
 0x960   : > { %5647 = vst.msk [vmem:[#allocation3 + $0x30] sm:$0xff] %vm449_vm1, %v5627_v7 }
 0x962   : > { %v5769_v26 = vpop.permute.xlu0 %5768 }
 0x963   : > { %v5675_v46 = vpop.permute.xlu1 %5674  ;;  %5790 = vst.msk [vmem:[#allocation3 + $0x20] sm:$0xff] %vm1029_vm4, %v5769_v26 }
 0x964   : > { %5695 = vst.msk [vmem:[#allocation3 + $0x30] sm:$0xff] %vm642_vm2, %v5675_v46 }
 0x966   : > { %v5817_v27 = vpop.permute.xlu0 %5816 }
 0x967   : > { %v5863_v59 = vpop.permute.xlu1 %5862  ;;  %5838 = vst.msk [vmem:[#allocation3 + $0x20] sm:$0xff] %vm1222_vm5, %v5817_v27  ;;  %v10363_v27 = vld [vmem:[%s10565_s3 + $0x4] ss:$0 sm:$0xff] }
 0x968   : > { %5885 = vst.msk [vmem:[#allocation3 + $0x10] sm:$0xff] %vm1415_vm6, %v5863_v59  ;;  %v10368_v59 = vld [vmem:[%s10566_s4 + $0x4] ss:$0 sm:$0xff] }
 0x96a   : > { %v5865_v53 = vpop.permute.xlu0 %5864 }
 0x96b   : > { %v5911_v60 = vpop.permute.xlu1 %5910  ;;  %5886 = vst.msk [vmem:[#allocation3 + $0x20] sm:$0xff] %vm1415_vm6, %v5865_v53 }
 0x96c   : > { %5933 = vst.msk [vmem:[#allocation3 + $0x10] sm:$0xff] %vm1608_vm7, %v5911_v60 }
 0x96e   : > { %v5913_v35 = vpop.permute.xlu0 %5912 }
 0x96f   : > { %v5723_v58 = vpop.permute.xlu1 %5722  ;;  %5934 = vst.msk [vmem:[#allocation3 + $0x20] sm:$0xff] %vm1608_vm7, %v5913_v35 }
 0x970   : > { %5743 = vst.msk [vmem:[#allocation3 + $0x30] sm:$0xff] %vm835_vm3, %v5723_v58 }
 0x972   : > { %v5629_v50 = vpop.permute.xlu0 %5628 }
 0x973   : > { %v5771_v61 = vpop.permute.xlu1 %5770  ;;  %v5958_v45 = vld [vmem:[#allocation3 + $0x10] sm:$0xff]  ;;  %5648 = vst.msk [vmem:[#allocation3 + $0x40] sm:$0xff] %vm449_vm1, %v5629_v50 }
 0x974   : > { %5791 = vst.msk [vmem:[#allocation3 + $0x30] sm:$0xff] %vm1029_vm4, %v5771_v61  ;;  %v5972_v10 = vpack.c.bf16 %v5958_v45, %v5956_v9 }
 0x976   : > { %6079 = vmatmul.mubr.bf16.vlgmr.msra.gmra.mxu0 %v5972_v10  ;;  %v5677_v56 = vpop.permute.xlu0 %5676  ;;  %v5960_v25 = vld [vmem:[#allocation3 + $0x20] sm:$0xff] }
 0x977   : > { %v5819_v43 = vpop.permute.xlu1 %5818  ;;  %5696 = vst.msk [vmem:[#allocation3 + $0x40] sm:$0xff] %vm642_vm2, %v5677_v56 }
 0x978   : > { %5839 = vst.msk [vmem:[#allocation3 + $0x30] sm:$0xff] %vm1222_vm5, %v5819_v43 }
 0x97a   : > { %v5725_v11 = vpop.permute.xlu0 %5724 }
 0x97b   : > { %v5867_v19 = vpop.permute.xlu1 %5866  ;;  %5744 = vst.msk [vmem:[#allocation3 + $0x40] sm:$0xff] %vm835_vm3, %v5725_v11 }
 0x97c   : > { %5887 = vst.msk [vmem:[#allocation3 + $0x30] sm:$0xff] %vm1415_vm6, %v5867_v19 }
 0x97e   : > { %v5773_v0 = vpop.permute.xlu0 %5772 }
 0x97f   : > { %v5915_v28 = vpop.permute.xlu1 %5914  ;;  %5792 = vst.msk [vmem:[#allocation3 + $0x40] sm:$0xff] %vm1029_vm4, %v5773_v0 }
 0x980   : > { %5935 = vst.msk [vmem:[#allocation3 + $0x30] sm:$0xff] %vm1608_vm7, %v5915_v28 }
 0x982   : > { %v5821_v54 = vpop.permute.xlu0 %5820 }
 0x983   : > { %v5631_v47 = vpop.permute.xlu1 %5630  ;;  %5840 = vst.msk [vmem:[#allocation3 + $0x40] sm:$0xff] %vm1222_vm5, %v5821_v54 }
 0x984   : > { %5649 = vst.msk [vmem:[#allocation3 + $0x50] sm:$0xff] %vm449_vm1, %v5631_v47 }
 0x986   : > { %v5869_v1 = vpop.permute.xlu0 %5868 }
 0x987   : > { %v5679_v36 = vpop.permute.xlu1 %5678  ;;  %v5962_v57 = vld [vmem:[#allocation3 + $0x30] sm:$0xff]  ;;  %5888 = vst.msk [vmem:[#allocation3 + $0x40] sm:$0xff] %vm1415_vm6, %v5869_v1 }
 0x988   : > { %5697 = vst.msk [vmem:[#allocation3 + $0x50] sm:$0xff] %vm642_vm2, %v5679_v36  ;;  %v5974_v31 = vpack.c.bf16 %v5962_v57, %v5960_v25 }
 0x98a   : > { %6087 = vmatmul.mubr.bf16.vlgmr.msra.gmra.mxu1 %v5974_v31  ;;  %v5917_v3 = vpop.permute.xlu0 %5916 }
 0x98b   : > { %v5727_v17 = vpop.permute.xlu1 %5726  ;;  %7008 = vmatprep.mubr.msk.bf16.mxu1 %vm256_vm0, %v5977_v30  ;;  %5936 = vst.msk [vmem:[#allocation3 + $0x40] sm:$0xff] %vm1608_vm7, %v5917_v3 }
 0x98c   : > { %5745 = vst.msk [vmem:[#allocation3 + $0x50] sm:$0xff] %vm835_vm3, %v5727_v17 }
 0x98e   : > { %v5633_v51 = vpop.permute.xlu0 %5632 }
 0x98f   : > { %v5775_v2 = vpop.permute.xlu1 %5774  ;;  %5650 = vst.msk [vmem:[#allocation3 + $0x60] sm:$0xff] %vm449_vm1, %v5633_v51 }
 0x990   : > { %5793 = vst.msk [vmem:[#allocation3 + $0x50] sm:$0xff] %vm1029_vm4, %v5775_v2 }
 0x992   : > { %v5681_v33 = vpop.permute.xlu0 %5680  ;;  %v5964_v12 = vld [vmem:[#allocation3 + $0x40] sm:$0xff] }
 0x993   : > { %v5823_v23 = vpop.permute.xlu1 %5822  ;;  %5698 = vst.msk [vmem:[#allocation3 + $0x60] sm:$0xff] %vm642_vm2, %v5681_v33 }
 0x994   : > { %5841 = vst.msk [vmem:[#allocation3 + $0x50] sm:$0xff] %vm1222_vm5, %v5823_v23 }
 0x996   : > { %v5729_v42 = vpop.permute.xlu0 %5728 }
 0x997   : > { %v5871_v15 = vpop.permute.xlu1 %5870  ;;  %5746 = vst.msk [vmem:[#allocation3 + $0x60] sm:$0xff] %vm835_vm3, %v5729_v42 }
 0x998   : > { %5889 = vst.msk [vmem:[#allocation3 + $0x50] sm:$0xff] %vm1415_vm6, %v5871_v15 }
 0x99a   : > { %v5777_v48 = vpop.permute.xlu0 %5776 }
 0x99b   : > { %v5919_v22 = vpop.permute.xlu1 %5918  ;;  %5794 = vst.msk [vmem:[#allocation3 + $0x60] sm:$0xff] %vm1029_vm4, %v5777_v48 }
 0x99c   : > { %5937 = vst.msk [vmem:[#allocation3 + $0x50] sm:$0xff] %vm1608_vm7, %v5919_v22 }
 0x99e   : > { %v5825_v41 = vpop.permute.xlu0 %5824 }
 0x99f   : > { %v5635_v24 = vpop.permute.xlu1 %5634  ;;  %5842 = vst.msk [vmem:[#allocation3 + $0x60] sm:$0xff] %vm1222_vm5, %v5825_v41 }
 0x9a0   : > { %5651 = vst.msk [vmem:[#allocation3 + $0x70] sm:$0xff] %vm449_vm1, %v5635_v24 }
 0x9a2   : > { %v5873_v32 = vpop.permute.xlu0 %5872 }
 0x9a3   : > { %v5683_v4 = vpop.permute.xlu1 %5682  ;;  %v5966_v55 = vld [vmem:[#allocation3 + $0x50] sm:$0xff]  ;;  %5890 = vst.msk [vmem:[#allocation3 + $0x60] sm:$0xff] %vm1415_vm6, %v5873_v32 }
 0x9a4   : > { %5699 = vst.msk [vmem:[#allocation3 + $0x70] sm:$0xff] %vm642_vm2, %v5683_v4  ;;  %v5976_v5 = vpack.c.bf16 %v5966_v55, %v5964_v12 }
 0x9a6   : > { %6095 = vmatmul.mubr.bf16.gmra.mxu1 %v5976_v5  ;;  %v5921_v29 = vpop.permute.xlu0 %5920 }
 0x9a7   : > { %7009 = vmatprep.mubr.msk.bf16.mxu1 %vm256_vm0, %v5979_v6  ;;  %v5731_v34 = vpop.permute.xlu1 %5730  ;;  %5938 = vst.msk [vmem:[#allocation3 + $0x60] sm:$0xff] %vm1608_vm7, %v5921_v29 }
 0x9a8   : > { %5747 = vst.msk [vmem:[#allocation3 + $0x70] sm:$0xff] %vm835_vm3, %v5731_v34 }
 0x9ab   : > { %v5779_v49 = vpop.permute.xlu1 %5778 }
 0x9ac   : > { %5795 = vst.msk [vmem:[#allocation3 + $0x70] sm:$0xff] %vm1029_vm4, %v5779_v49 }
 0x9ae   : > { %v5968_v7 = vld [vmem:[#allocation3 + $0x60] sm:$0xff] }
 0x9af   : > { %v5827_v52 = vpop.permute.xlu1 %5826 }
 0x9b0   : > { %5843 = vst.msk [vmem:[#allocation3 + $0x70] sm:$0xff] %vm1222_vm5, %v5827_v52 }
 0x9b1   : > { %5891 = vst.msk [vmem:[#allocation3 + $0x70] sm:$0xff] %vm1415_vm6, %v10205_v16 }
 0x9b3   : > { %v5923_v13 = vpop.permute.xlu1 %5922 }
 0x9b4   : > { %5939 = vst.msk [vmem:[#allocation3 + $0x70] sm:$0xff] %vm1608_vm7, %v5923_v13 }
 0x9bb   : > { %v5970_v26 = vld [vmem:[#allocation3 + $0x70] sm:$0xff] }
 0x9bc   : > { %v5978_v46 = vpack.c.bf16 %v5970_v26, %v5968_v7 }
 0x9be   : > { %6103 = vmatmul.mubr.bf16.gmra.mxu1 %v5978_v46 }
 0xa36   : > { %v6080_v60 = vpop.f32.mrf.mxu0 }
 0xa37   : > { %v6115_v16 = vmul.f32 %v10363_v27, %v6080_v60 }
 0xa38   : > { %v6082_v53 = vpop.f32.mrf.mxu0 }
 0xa39   : > { %v6127_v35 = vadd.f32 %v10368_v59, %v6115_v16 }
 0xa3a   : > { %v6083_v58 = vpop.f32.mrf.mxu0 }
 0xa3b   : > { %v6135_v61 = vadd.f32 %v6127_v35, %v9897_v8  ;;  %v6116_v50 = vmul.f32 %v10363_v27, %v6083_v58 }
 0xa3c   : > { %v6085_v9 = vpop.f32.mrf.mxu0 }
 0xa3d   : > { %v6143_v45 = vmax.f32 %v6135_v61, 0.0  ;;  %v6128_v10 = vadd.f32 %v10368_v59, %v6116_v50 }
 0xa3f   : > { %6151 = vst.msk [vmem:[#allocation4 + $0x11] sm:$0xff] %vm256_vm0, %v6143_v45  ;;  %v6136_v43 = vadd.f32 %v6128_v10, %v9909_v14 }
 0xa41   : > { %v6144_v56 = vmax.f32 %v6136_v43, 0.0 }
 0xa43   : > { %6152 = vst.msk [vmem:[#allocation4 + $0x21] sm:$0xff] %vm256_vm0, %v6144_v56 }
 0xa46   : > { %v6232_v52 = vld [vmem:[#allocation4 + $0x13] sm:$0x1]  ;;  %v6198_v16 = vld [vmem:[#allocation4 + $0x12] sm:$0x1]  ;;  %v6300_v10 = vld [vmem:[#allocation4 + $0x15] sm:$0x1] }
 0xa47   : > { %v6266_v43 = vld [vmem:[#allocation4 + $0x14] sm:$0x1] }
 0xa4a   : > { %v6088_v19 = vpop.f32.mrf.mxu1  ;;  %v6233_v15 = vld [vmem:[#allocation4 + $0x23] sm:$0x1]  ;;  %v6199_v42 = vld [vmem:[#allocation4 + $0x22] sm:$0x1]  ;;  %v6301_v22 = vld [vmem:[#allocation4 + $0x25] sm:$0x1] }
 0xa4b   : > { %v6117_v11 = vmul.f32 %v10363_v27, %v6088_v19  ;;  %v6267_v48 = vld [vmem:[#allocation4 + $0x24] sm:$0x1]  ;;  %v10394_v41 = vld [vmem:[#allocation4 + $0x27] sm:$0x1]  ;;  %v10396_v24 = vld [vmem:[#allocation4 + $0x26] sm:$0x1] }
 0xa4c   : > { %v6090_v28 = vpop.f32.mrf.mxu1  ;;  %v10398_v62 = vld [vmem:[#allocation4 + $0x28] sm:$0x1]  ;;  %v10400_v20 = vld [vmem:[#allocation4 + $0x21] sm:$0x1]  ;;  %v6248_v5 = vrot.slane %v6233_v15, 7  ;;  %v6214_v6 = vrot.slane %v6199_v42, 7 }
 0xa4d   : > { %v6129_v0 = vadd.f32 %v10368_v59, %v6117_v11  ;;  %v6316_v29 = vrot.slane %v6301_v22, 7  ;;  %v6282_v34 = vrot.slane %v6267_v48, 7  ;;  %v6384_v13 = vrot.slane %v10394_v41, 7 }
 0xa4e   : > { %v6091_v8 = vpop.f32.mrf.mxu1  ;;  %v6350_v7 = vrot.slane %v10396_v24, 7  ;;  %v6418_v26 = vrot.slane %v10398_v62, 7  ;;  %v6175_v61 = vrot.slane %v10400_v20, 7  ;;  %v6249_v28 = vsel %vm6176_vm14, %v6248_v5, %v6232_v52 }
 0xa4f   : > { %v6137_v54 = vadd.f32 %v6129_v0, %v10001_v38  ;;  %v6118_v47 = vmul.f32 %v10363_v27, %v6091_v8 }
 0xa50   : > { %v6093_v39 = vpop.f32.mrf.mxu1 }
 0xa51   : > { %v6145_v36 = vmax.f32 %v6137_v54, 0.0  ;;  %v6130_v1 = vadd.f32 %v10368_v59, %v6118_v47 }
 0xa53   : > { %6153 = vst.msk [vmem:[#allocation4 + $0x31] sm:$0xff] %vm256_vm0, %v6145_v36  ;;  %v6138_v14 = vadd.f32 %v6130_v1, %v10015_v21  ;;  %v6368_v1 = vld [vmem:[#allocation4 + $0x17] sm:$0x1] }
 0xa54   : > { %v6385_v42 = vsel %vm6176_vm14, %v6384_v13, %v6368_v1 }
 0xa55   : > { %v6146_v25 = vmax.f32 %v6138_v14, 0.0 }
 0xa57   : > { %6154 = vst.msk [vmem:[#allocation4 + $0x41] sm:$0xff] %vm256_vm0, %v6146_v25  ;;  %v6334_v25 = vld [vmem:[#allocation4 + $0x16] sm:$0x1] }
 0xa58   : > { %v6351_v48 = vsel %vm6176_vm14, %v6350_v7, %v6334_v25 }
 0xa5a   : > { %v10405_v32 = vld [vmem:[#allocation4 + $0x32] sm:$0x1]  ;;  %v10407_v12 = vld [vmem:[#allocation4 + $0x35] sm:$0x1]  ;;  %v10416_v58 = vld [vmem:[#allocation4 + $0x34] sm:$0x1] }
 0xa5b   : > { %v6216_v53 = vrot.slane %v10405_v32, 6  ;;  %v6318_v35 = vrot.slane %v10407_v12, 6  ;;  %v10421_v56 = vld [vmem:[#allocation4 + $0x37] sm:$0x1]  ;;  %v10423_v19 = vld [vmem:[#allocation4 + $0x36] sm:$0x1] }
 0xa5c   : > { %v10426_v47 = vld [vmem:[#allocation4 + $0x38] sm:$0x1]  ;;  %v6284_v36 = vrot.slane %v10416_v58, 6  ;;  %v6352_v41 = vrot.slane %v10423_v19, 6 }
 0xa5e   : > { %v6235_v45 = vld [vmem:[#allocation4 + $0x43] sm:$0x1]  ;;  %v6201_v0 = vld [vmem:[#allocation4 + $0x42] sm:$0x1]  ;;  %v6303_v8 = vld [vmem:[#allocation4 + $0x45] sm:$0x1] }
 0xa5f   : > { %v6269_v54 = vld [vmem:[#allocation4 + $0x44] sm:$0x1]  ;;  %v6371_v14 = vld [vmem:[#allocation4 + $0x47] sm:$0x1] }
 0xa60   : > { %v6388_v22 = vrot.slane %v6371_v14, 5 }
 0xa66   : > { %v6096_v57 = vpop.f32.mrf.mxu1 }
 0xa67   : > { %v6119_v31 = vmul.f32 %v10363_v27, %v6096_v57  ;;  %v10431_v57 = vld [vmem:[#allocation4 + $0x31] sm:$0x1] }
 0xa68   : > { %v6098_v37 = vpop.f32.mrf.mxu1 }
 0xa69   : > { %v6131_v30 = vadd.f32 %v10368_v59, %v6119_v31  ;;  %v6252_v31 = vrot.slane %v6235_v45, 5  ;;  %v6317_v37 = vsel %vm6176_vm14, %v6316_v29, %v6300_v10  ;;  %v6178_v29 = vrot.slane %v10431_v57, 6 }
 0xa6a   : > { %v6099_v38 = vpop.f32.mrf.mxu1 }
 0xa6b   : > { %v6139_v3 = vadd.f32 %v6131_v30, %v10046_v40  ;;  %v6120_v17 = vmul.f32 %v10363_v27, %v6099_v38  ;;  %v6283_v30 = vsel %vm6176_vm14, %v6282_v34, %v6266_v43  ;;  %v6386_v38 = vrot.slane %v10421_v56, 6 }
 0xa6c   : > { %v6101_v2 = vpop.f32.mrf.mxu1 }
 0xa6d   : > { %v6147_v51 = vmax.f32 %v6139_v3, 0.0  ;;  %v6132_v23 = vadd.f32 %v10368_v59, %v6120_v17  ;;  %v10436_v3 = vld [vmem:[#allocation4 + $0x46] sm:$0x1]  ;;  %v6218_v2 = vrot.slane %v6201_v0, 5  ;;  %v6387_v10 = vsel %vm6179_vm15, %v6386_v38, %v6385_v42 }
 0xa6e   : > { %v6354_v24 = vrot.slane %v10436_v3, 5 }
 0xa6f   : > { %6155 = vst.msk [vmem:[#allocation4 + $0x51] sm:$0xff] %vm256_vm0, %v6147_v51  ;;  %v6140_v21 = vadd.f32 %v6132_v23, %v10069_v18  ;;  %v10403_v18 = vld [vmem:[#allocation4 + $0x33] sm:$0x1]  ;;  %v6320_v51 = vrot.slane %v6303_v8, 5  ;;  %v6286_v23 = vrot.slane %v6269_v54, 5  ;;  %v10469_v8 = vsel %vm6182_vm8, %v6388_v22, %v6387_v10 }
 0xa70   : > { %v6250_v60 = vrot.slane %v10403_v18, 6  ;;  %v6353_v54 = vsel %vm6179_vm15, %v6352_v41, %v6351_v48 }
 0xa71   : > { %v6148_v33 = vmax.f32 %v6140_v21, 0.0  ;;  %v6162_v21 = vld [vmem:[#allocation4 + $0x41] sm:$0x1]  ;;  %v10475_v57 = vsel %vm6182_vm8, %v6354_v24, %v6353_v54 }
 0xa72   : > { %v6251_v18 = vsel %vm6179_vm15, %v6250_v60, %v6249_v28  ;;  %v6181_v34 = vrot.slane %v6162_v21, 5  ;;  %v6319_v60 = vsel %vm6179_vm15, %v6318_v35, %v6317_v37 }
 0xa73   : > { %6156 = vst.msk [vmem:[#allocation4 + $0x61] sm:$0xff] %vm256_vm0, %v6148_v33  ;;  %v6321_v32 = vsel %vm6182_vm8, %v6320_v51, %v6319_v60 }
 0xa76   : > { %v6236_v33 = vld [vmem:[#allocation4 + $0x53] sm:$0x1]  ;;  %v6202_v15 = vld [vmem:[#allocation4 + $0x52] sm:$0x1]  ;;  %v6270_v5 = vld [vmem:[#allocation4 + $0x54] sm:$0x1] }
 0xa77   : > { %v6254_v52 = vrot.slane %v6236_v33, 4  ;;  %v10461_v45 = vld [vmem:[#allocation4 + $0x57] sm:$0x1]  ;;  %v6288_v12 = vrot.slane %v6270_v5, 4  ;;  %v10466_v56 = vld [vmem:[#allocation4 + $0x56] sm:$0x1] }
 0xa78   : > { %v6163_v35 = vld [vmem:[#allocation4 + $0x51] sm:$0x1]  ;;  %v6356_v51 = vrot.slane %v10466_v56, 4 }
 0xa7a   : > { %v6203_v13 = vld [vmem:[#allocation4 + $0x62] sm:$0x1] }
 0xa7b   : > { %v6222_v0 = vrot.slane %v6203_v13, 3 }
 0xa7e   : > { %v6104_v40 = vpop.f32.mrf.mxu1 }
 0xa7f   : > { %v6121_v4 = vmul.f32 %v10363_v27, %v6104_v40 }
 0xa80   : > { %v6106_v55 = vpop.f32.mrf.mxu1 }
 0xa81   : > { %v6133_v49 = vadd.f32 %v10368_v59, %v6121_v4  ;;  %v6159_v4 = vld [vmem:[#allocation4 + $0x11] sm:$0x1]  ;;  %v6304_v55 = vld [vmem:[#allocation4 + $0x55] sm:$0x1] }
 0xa82   : > { %v6107_v46 = vpop.f32.mrf.mxu1 }
 0xa83   : > { %v6141_v50 = vadd.f32 %v6133_v49, %v10092_v44  ;;  %v6122_v9 = vmul.f32 %v10363_v27, %v6107_v46  ;;  %v6215_v27 = vsel %vm6176_vm14, %v6214_v6, %v6198_v16  ;;  %v6177_v6 = vsel %vm6176_vm14, %v6175_v61, %v6159_v4  ;;  %v6237_v49 = vld [vmem:[#allocation4 + $0x63] sm:$0x1]  ;;  %v6305_v61 = vld [vmem:[#allocation4 + $0x65] sm:$0x1] }
 0xa84   : > { %v6109_v11 = vpop.f32.mrf.mxu1  ;;  %v6217_v7 = vsel %vm6179_vm15, %v6216_v53, %v6215_v27  ;;  %v6220_v46 = vrot.slane %v6202_v15, 4  ;;  %v6253_v16 = vsel %vm6182_vm8, %v6252_v31, %v6251_v18  ;;  %v6322_v53 = vrot.slane %v6304_v55, 4  ;;  %v6164_v31 = vld [vmem:[#allocation4 + $0x61] sm:$0x1] }
 0xa85   : > { %v6149_v39 = vmax.f32 %v6141_v50, 0.0  ;;  %v6134_v44 = vadd.f32 %v10368_v59, %v6122_v9  ;;  %v10438_v59 = vld [vmem:[#allocation4 + $0x48] sm:$0x1]  ;;  %v6219_v58 = vsel %vm6182_vm8, %v6218_v2, %v6217_v7  ;;  %v6271_v50 = vld [vmem:[#allocation4 + $0x64] sm:$0x1]  ;;  %v6285_v9 = vsel %vm6179_vm15, %v6284_v36, %v6283_v30 }
 0xa86   : > { %v6422_v20 = vrot.slane %v10438_v59, 5  ;;  %v6287_v43 = vsel %vm6182_vm8, %v6286_v23, %v6285_v9  ;;  %v6256_v11 = vrot.slane %v6237_v49, 3  ;;  %v6390_v27 = vrot.slane %v10461_v45, 4  ;;  %v10482_v2 = vld [vmem:[#allocation4 + $0x66] sm:$0x1] }
 0xa87   : > { %6157 = vst.msk [vmem:[#allocation4 + $0x71] sm:$0xff] %vm256_vm0, %v6149_v39  ;;  %v6142_v17 = vadd.f32 %v6134_v44, %v10105_v63  ;;  %v6420_v63 = vrot.slane %v10426_v47, 6  ;;  %v6324_v39 = vrot.slane %v6305_v61, 3  ;;  %v6290_v44 = vrot.slane %v6271_v50, 3 }
 0xa88   : > { %v6180_v36 = vsel %vm6179_vm15, %v6178_v29, %v6177_v6  ;;  %v6255_v30 = vsel %vm6185_vm9, %v6254_v52, %v6253_v16  ;;  %v6221_v38 = vsel %vm6185_vm9, %v6220_v46, %v6219_v58  ;;  %v6184_v23 = vrot.slane %v6163_v35, 4 }
 0xa89   : > { %v6150_v40 = vmax.f32 %v6142_v17, 0.0  ;;  %v6183_v37 = vsel %vm6182_vm8, %v6181_v34, %v6180_v36  ;;  %v10480_v17 = vld [vmem:[#allocation4 + $0x67] sm:$0x1]  ;;  %v6257_v33 = vsel %vm6188_vm10, %v6256_v11, %v6255_v30  ;;  %v6223_v42 = vsel %vm6188_vm10, %v6222_v0, %v6221_v38  ;;  %v6402_v30 = vld [vmem:[#allocation4 + $0x18] sm:$0x1] }
 0xa8a   : > { %v6323_v48 = vsel %vm6185_vm9, %v6322_v53, %v6321_v32  ;;  %v6289_v41 = vsel %vm6185_vm9, %v6288_v12, %v6287_v43  ;;  %v6187_v55 = vrot.slane %v6164_v31, 3  ;;  %v6392_v9 = vrot.slane %v10480_v17, 3  ;;  %v6406_v12 = vld [vmem:[#allocation4 + $0x58] sm:$0x1] }
 0xa8b   : > { %6158 = vst.msk [vmem:[#allocation4 + $0x81] sm:$0xff] %vm256_vm0, %v6150_v40  ;;  %v6325_v46 = vsel %vm6188_vm10, %v6324_v39, %v6323_v48  ;;  %v6291_v61 = vsel %vm6188_vm10, %v6290_v44, %v6289_v41  ;;  %v6358_v32 = vrot.slane %v10482_v2, 3  ;;  %v6186_v53 = vsel %vm6185_vm9, %v6184_v23, %v6183_v37  ;;  %v6407_v39 = vld [vmem:[#allocation4 + $0x68] sm:$0x1] }
 0xa8c   : > { %v6189_v56 = vsel %vm6188_vm10, %v6187_v55, %v6186_v53  ;;  %v6391_v31 = vsel %vm6185_vm9, %v6390_v27, %v10469_v8  ;;  %v6357_v37 = vsel %vm6185_vm9, %v6356_v51, %v10475_v57 }
 0xa8d   : > { %v6393_v2 = vsel %vm6188_vm10, %v6392_v9, %v6391_v31  ;;  %v6359_v23 = vsel %vm6188_vm10, %v6358_v32, %v6357_v37 }
 0xa8e   : > { %v6238_v19 = vld [vmem:[#allocation4 + $0x73] sm:$0x1]  ;;  %v6204_v28 = vld [vmem:[#allocation4 + $0x72] sm:$0x1]  ;;  %v6306_v25 = vld [vmem:[#allocation4 + $0x75] sm:$0x1] }
 0xa8f   : > { %v6258_v1 = vrot.slane %v6238_v19, 2  ;;  %v6224_v14 = vrot.slane %v6204_v28, 2  ;;  %v6272_v3 = vld [vmem:[#allocation4 + $0x74] sm:$0x1]  ;;  %v6326_v4 = vrot.slane %v6306_v25, 2 }
 0xa90   : > { %v6292_v34 = vrot.slane %v6272_v3, 2  ;;  %v6374_v49 = vld [vmem:[#allocation4 + $0x77] sm:$0x1]  ;;  %v6165_v52 = vld [vmem:[#allocation4 + $0x71] sm:$0x1]  ;;  %v6424_v3 = vrot.slane %v6406_v12, 4 }
 0xa91   : > { %v6259_v5 = vsel %vm6191_vm11, %v6258_v1, %v6257_v33  ;;  %v6225_v6 = vsel %vm6191_vm11, %v6224_v14, %v6223_v42  ;;  %v6340_v16 = vld [vmem:[#allocation4 + $0x76] sm:$0x1]  ;;  %v6327_v43 = vsel %vm6191_vm11, %v6326_v4, %v6325_v46  ;;  %v6190_v35 = vrot.slane %v6165_v52, 2  ;;  %v6408_v14 = vld [vmem:[#allocation4 + $0x78] sm:$0x1] }
 0xa92   : > { %v6239_v21 = vld [vmem:[#allocation4 + $0x83] sm:$0x1]  ;;  %v6205_v15 = vld [vmem:[#allocation4 + $0x82] sm:$0x1]  ;;  %v6307_v22 = vld [vmem:[#allocation4 + $0x85] sm:$0x1]  ;;  %v6293_v28 = vsel %vm6191_vm11, %v6292_v34, %v6291_v61 }
 0xa93   : > { %v6260_v40 = vrot.slane %v6239_v21, 1  ;;  %v6226_v24 = vrot.slane %v6205_v15, 1  ;;  %v6273_v18 = vld [vmem:[#allocation4 + $0x84] sm:$0x1]  ;;  %v6328_v29 = vrot.slane %v6307_v22, 1  ;;  %v6394_v0 = vrot.slane %v6374_v49, 2 }
 0xa94   : > { %v6294_v60 = vrot.slane %v6273_v18, 1  ;;  %v6166_v58 = vld [vmem:[#allocation4 + $0x81] sm:$0x1]  ;;  %v6375_v50 = vld [vmem:[#allocation4 + $0x87] sm:$0x1]  ;;  %v6360_v54 = vrot.slane %v6340_v16, 2  ;;  %v6192_v25 = vsel %vm6191_vm11, %v6190_v35, %v6189_v56  ;;  %v6419_v21 = vsel %vm6176_vm14, %v6418_v26, %v6402_v30 }
 0xa95   : > { %v6261_v13 = vsel %vm6194_vm12, %v6260_v40, %v6259_v5  ;;  %v6227_v7 = vsel %vm6194_vm12, %v6226_v24, %v6225_v6  ;;  %v6341_v10 = vld [vmem:[#allocation4 + $0x86] sm:$0x1]  ;;  %v6193_v19 = vrot.slane %v6166_v58, 1  ;;  %v6329_v11 = vsel %vm6194_vm12, %v6328_v29, %v6327_v43  ;;  %v6409_v38 = vld [vmem:[#allocation4 + $0x88] sm:$0x1] }
 0xa96   : > { %6262 = vrot.lane.b32.xlu1 %v6261_v13, %s7229_s25  ;;  %6228 = vrot.lane.b32.xlu0 %v6227_v7, %s7228_s24  ;;  %s10508_s25 = scalar_lea.vmem %s10567_s5, %s6495_s10  ;;  %v6295_v44 = vsel %vm6194_vm12, %v6294_v60, %v6293_v28  ;;  %v6396_v36 = vrot.slane %v6375_v50, 1  ;;  %v6362_v1 = vrot.slane %v6341_v10, 1  ;;  %v6426_v33 = vrot.slane %v6407_v39, 3 }
 0xa97   : > { %v6195_v17 = vsel %vm6194_vm12, %v6193_v19, %v6192_v25  ;;  %v6395_v45 = vsel %vm6191_vm11, %v6394_v0, %v6393_v2  ;;  %v6361_v8 = vsel %vm6191_vm11, %v6360_v54, %v6359_v23  ;;  %v6421_v27 = vsel %vm6179_vm15, %v6420_v63, %v6419_v21 }
 0xa98   : > { %6197 = vst.msk [vmem:[%s10508_s25] sm:$0xff] %vm256_vm0, %v6195_v17  ;;  %v6428_v57 = vrot.slane %v6408_v14, 2  ;;  %v6397_v51 = vsel %vm6194_vm12, %v6396_v36, %v6395_v45  ;;  %v6363_v62 = vsel %vm6194_vm12, %v6362_v1, %v6361_v8  ;;  %v6423_v26 = vsel %vm6182_vm8, %v6422_v20, %v6421_v27 }
 0xa99   : > { %v6430_v15 = vrot.slane %v6409_v38, 1  ;;  %v6425_v47 = vsel %vm6185_vm9, %v6424_v3, %v6423_v26 }
 0xa9a   : > { %6330 = vrot.lane.b32.xlu1 %v6329_v11, %s7231_s12  ;;  %6296 = vrot.lane.b32.xlu0 %v6295_v44, %s7230_s28  ;;  %v6427_v63 = vsel %vm6188_vm10, %v6426_v33, %v6425_v47 }
 0xa9b   : > { %v6429_v42 = vsel %vm6191_vm11, %v6428_v57, %v6427_v63 }
 0xa9c   : > { %v6431_v59 = vsel %vm6194_vm12, %v6430_v15, %v6429_v42 }
 0xa9e   : > { %6398 = vrot.lane.b32.xlu1 %v6397_v51, %s7233_s11  ;;  %6364 = vrot.lane.b32.xlu0 %v6363_v62, %s7232_s26 }
 0xaa2   : > { %6432 = vrot.lane.b32.xlu0 %v6431_v59, %s7234_s21 }
 0xb08   : > { %v6263_v20 = vpop.permute.xlu1 %6262  ;;  %v6229_v22 = vpop.permute.xlu0 %6228 }
 0xb09   : > { %6231 = vst.msk [vmem:[%s10508_s25] sm:$0xff] %vm449_vm1, %v6229_v22 }
 0xb0a   : > { %6265 = vst.msk [vmem:[%s10508_s25] sm:$0xff] %vm642_vm2, %v6263_v20 }
 0xb0c   : > { %v6331_v48 = vpop.permute.xlu1 %6330  ;;  %v6297_v41 = vpop.permute.xlu0 %6296 }
 0xb0d   : > { %6299 = vst.msk [vmem:[%s10508_s25] sm:$0xff] %vm835_vm3, %v6297_v41 }
 0xb0e   : > { %6333 = vst.msk [vmem:[%s10508_s25] sm:$0xff] %vm1029_vm4, %v6331_v48 }
 0xb10   : > { %v6399_v40 = vpop.permute.xlu1 %6398  ;;  %v6365_v24 = vpop.permute.xlu0 %6364 }
 0xb11   : > { %6367 = vst.msk [vmem:[%s10508_s25] sm:$0xff] %vm1222_vm5, %v6365_v24 }
 0xb12   : > { %6401 = vst.msk [vmem:[%s10508_s25] sm:$0xff] %vm1415_vm6, %v6399_v40 }
 0xb14   : > { %v6433_v4 = vpop.permute.xlu0 %6432 }
 0xb15   : > { %6435 = vst.msk [vmem:[%s10508_s25] sm:$0xff] %vm1608_vm7, %v6433_v4 }
 0xb16 PF: > { %s15_s18 = sadd.s32 1, %s7226_s18  }
 0xb17   : > { %p12_p4 = scmp.ge.s32.totalorder %s15_s18, 4  }
 0xb19   :  { %14 = sbr.rel (!%p12_p4) target bundleno = 1 (0x1), region = 78 }

</bundles_post_ra>
